<compile_context>
chip_gen: v7x
topology: tpu7x:2x2x1
jax: 0.10.0
libtpu: 0.0.40
codegen_flags: <defaults>
</compile_context>

<pallas_src>
import functools

import jax
import jax.numpy as jnp
import numpy as np
from jax.experimental import pallas as pl
from jax.experimental.pallas import tpu as pltpu


# ----------------------------------------------------------------------------
# Kernel
# ----------------------------------------------------------------------------
def _dgcn_cell_kernel(
    # per-block data (leading batch-block dim squeezed)
    inp_lane_ref,    # (Np, TB*2)   input, lane-stacked (lane = b*2 + ch)
    inp0_ref,        # (TB, Np)     input[..., 0]
    inp1_ref,        # (TB, Np)     input[..., 1]
    state_ref,       # (Np, TB*Fh)  state, lane-stacked (lane = b*Fh + f)
    # batch-invariant params
    win_ref,         # (TB*2, TB*Fh)  blockdiag(lin_in_w.T)        bf16
    bin_ref,         # (1, TB*Fh)                                   f32
    cwx_ref,         # (TB*Fh, TB*2)  blockdiag(conv_w.T[:Fh])      bf16
    cws_ref,         # (TB*Fh, TB*2)  blockdiag(conv_w.T[Fh:])      bf16
    cb_ref,          # (1, TB*2)                                    f32
    mt1_ref,         # (Np, Np)       (A*w2[0]).T                   bf16
    mt2_ref,         # (Np, Np)       (B*w2[1]).T                   bf16
    am1_ref,         # (Np, Np)       -1e16*(1-A) + bias[0]         f32
    am2_ref,         # (Np, Np)       -1e16*(1-B) + bias[1]         f32
    w1x1_ref,        # (Fh, Np)       core_w1[0][:Fh]               bf16
    w1s1_ref,        # (Fh, Np)       core_w1[0][Fh:]               bf16
    w1x2_ref,        # (Fh, Np)       core_w1[1][:Fh]               bf16
    w1s2_ref,        # (Fh, Np)       core_w1[1][Fh:]               bf16
    grt_ref,         # (Np, Np)       (A*dgcr_w).T                  bf16
    rbp_ref,         # (1, TB*2)                                    f32
    rbs_ref,         # (1, TB*Fh)                                   f32
    lrp_ref,         # (TB*2, TB*Fh)  blockdiag(linr_w.T[:2])       bf16
    lrs_ref,         # (TB*Fh, TB*Fh) blockdiag(linr_w.T[2:])       bf16
    lrb_ref,         # (1, TB*Fh)                                   f32
    gut_ref,         # (Np, Np)                                     bf16
    ubp_ref,         # (1, TB*2)                                    f32
    ubs_ref,         # (1, TB*Fh)                                   f32
    lup_ref,         # (TB*2, TB*Fh)                                bf16
    lus_ref,         # (TB*Fh, TB*Fh)                               bf16
    lub_ref,         # (1, TB*Fh)                                   f32
    gct_ref,         # (Np, Np)                                     bf16
    cbx_ref,         # (1, TB*Fh)                                   f32
    cbs_ref,         # (1, TB*Fh)                                   f32
    lcx_ref,         # (TB*Fh, TB*Fh)                               bf16
    lcs_ref,         # (TB*Fh, TB*Fh)                               bf16
    lcb_ref,         # (1, TB*Fh)                                   f32
    # outputs
    p_ref,           # (Np, TB*2)   f32
    H_ref,           # (Np, TB*Fh)  f32
    *, N, TB, Fh,
):
    del N  # only static shape bookkeeping is needed
    f32 = jnp.float32
    bf16 = jnp.bfloat16
    dot = functools.partial(jnp.dot, preferred_element_type=f32)

    Xl = inp_lane_ref[...]                       # (Np, TB*2)  f32
    Sl = state_ref[...]                          # (Np, TB*Fh) f32
    Xl_b = Xl.astype(bf16)
    Sl_b = Sl.astype(bf16)

    # lin_in: x_b = input_b @ W^T + b  (lane-stacked over the batch block)
    xl = dot(Xl_b, win_ref[...]) + bin_ref[...]                      # (Np, TB*Fh) f32
    xl_b = xl.astype(bf16)

    # demand = tanh(gru @ conv_w.T + conv_b) * 0.5 with gru = [x, state] split
    dem = jnp.tanh(dot(xl_b, cwx_ref[...]) + dot(Sl_b, cws_ref[...])
                   + cb_ref[...]) * 0.5                              # (Np, TB*2) f32

    # ---------------- DoubleDGC masked softmaxes --------------------------
    # Shared (N, N) graph matmuls once per slab (bf16 MXU, f32 accumulation).
    g1x = dot(mt1_ref[...], xl_b)                # (Np, TB*Fh)
    g1s = dot(mt1_ref[...], Sl_b)
    g2x = dot(mt2_ref[...], xl_b)
    g2s = dot(mt2_ref[...], Sl_b)

    am1 = am1_ref[...]                           # (Np, Np) f32 (kept in f32)
    am2 = am2_ref[...]
    w1x1 = w1x1_ref[...]
    w1s1 = w1s1_ref[...]
    w1x2 = w1x2_ref[...]
    w1s2 = w1s2_ref[...]

    # Per-batch unrolled logits/softmax/v,q: only (Np, Np) 2-D temporaries,
    # no TB-expanded weights/masks, no normalized mask materialization.
    for b in range(TB):
        fs = slice(b * Fh, (b + 1) * Fh)
        l1 = (dot(g1x[:, fs].astype(bf16), w1x1)
              + dot(g1s[:, fs].astype(bf16), w1s1) + am1)            # (Np, Np) f32
        l2 = (dot(g2x[:, fs].astype(bf16), w1x2)
              + dot(g2s[:, fs].astype(bf16), w1s2) + am2)

        e1 = jnp.exp(l1 - jnp.max(l1, axis=-1, keepdims=True))
        s1 = jnp.sum(e1, axis=-1, keepdims=True)
        e2 = jnp.exp(l2 - jnp.max(l2, axis=-1, keepdims=True))
        s2 = jnp.sum(e2, axis=-1, keepdims=True)

        in0 = inp0_ref[b:b + 1, :]               # (1, Np)
        in1 = inp1_ref[b:b + 1, :]
        v = (jnp.sum(e1 * in0, axis=-1, keepdims=True)
             * pl.reciprocal(s1, approx=True))                       # (Np, 1)
        q = (jnp.sum(e2 * in1, axis=-1, keepdims=True)
             * pl.reciprocal(s2, approx=True))

        # p = [v, q] + demand, written column-wise into the output block.
        p_ref[:, 2 * b:2 * b + 1] = v + dem[:, 2 * b:2 * b + 1]
        p_ref[:, 2 * b + 1:2 * b + 2] = q + dem[:, 2 * b + 1:2 * b + 2]

    p = p_ref[...]                               # (Np, TB*2) f32
    p_b = p.astype(bf16)

    # ---------------- GRU gates (feature_ru / feature_c never built) ------
    grt = grt_ref[...]
    rgc_p = (dot(grt, p_b) + rbp_ref[...]).astype(bf16)              # (Np, TB*2)
    rgc_s = (dot(grt, Sl_b) + rbs_ref[...]).astype(bf16)             # (Np, TB*Fh)
    r = jax.nn.sigmoid(dot(rgc_p, lrp_ref[...])
                       + dot(rgc_s, lrs_ref[...]) + lrb_ref[...])

    gut = gut_ref[...]
    ugc_p = (dot(gut, p_b) + ubp_ref[...]).astype(bf16)
    ugc_s = (dot(gut, Sl_b) + ubs_ref[...]).astype(bf16)
    u = jax.nn.sigmoid(dot(ugc_p, lup_ref[...])
                       + dot(ugc_s, lus_ref[...]) + lub_ref[...])

    gct = gct_ref[...]
    sg = (r * Sl).astype(bf16)
    cgc_x = (dot(gct, xl_b) + cbx_ref[...]).astype(bf16)
    cgc_s = (dot(gct, sg) + cbs_ref[...]).astype(bf16)
    c = jnp.tanh(dot(cgc_x, lcx_ref[...])
                 + dot(cgc_s, lcs_ref[...]) + lcb_ref[...])

    H_ref[...] = u * Sl + (1.0 - u) * c


# ----------------------------------------------------------------------------
# Wrapper helpers
# ----------------------------------------------------------------------------
def _round_up(x, m):
    return ((x + m - 1) // m) * m


def _vmem_capacity_bytes():
    """Physical per-core VMEM (generation-aware), with a safe fallback."""
    try:
        info = pltpu.get_tpu_info()
        cap = getattr(info, "vmem_capacity_bytes", None)
        if cap:
            return int(cap)
    except Exception:
        pass
    return 128 << 20


def _working_set_bytes(Np, TB, Fh):
    """Rough per-step VMEM working-set estimate (bytes)."""
    TBF, W2 = TB * Fh, TB * 2
    nn = Np * Np
    p_graph = 5 * nn * 2 + 2 * nn * 4 + 4 * Fh * Np * 2          # graph mats + masks + w1
    p_dense = (W2 * TBF + 2 * TBF * W2 + 2 * W2 * TBF + 4 * TBF * TBF) * 2
    p_bias = (3 * W2 + 8 * TBF) * 4
    io = (Np * W2 + 2 * TB * Np + Np * TBF) * 4
    out = (Np * W2 + Np * TBF) * 4
    inter = (6 * nn + 16 * Np * TBF) * 4
    return p_graph + p_dense + p_bias + 2 * (io + out) + inter


def _pick_tb(B, Fh, Np, budget_bytes, cap=32):
    """Pick batches-per-step: fit VMEM, prefer lane-dense TB*Fh, prefer G>=2."""
    best, best_key = 1, None
    for t in range(1, min(B, cap) + 1):
        if B % t:
            continue
        if _working_set_bytes(Np, t, Fh) > 0.8 * budget_bytes:
            continue
        g = B // t
        key = ((t * Fh) % 128 == 0, g >= 2, t)
        if best_key is None or key > best_key:
            best, best_key = t, key
    return best


# ----------------------------------------------------------------------------
# Wrapper
# ----------------------------------------------------------------------------
def dgcn_cell_uq(inp, state, params, tb=None):
    """inp: (B, N, 2) f32, state: (B, N, F//2) f32 -> (p, H)."""
    B, N, _ = inp.shape
    Fh = state.shape[-1]
    f32, bf16 = jnp.float32, jnp.bfloat16

    # Pad the node dimension so graph matmuls and softmax rows are tile-dense.
    Np = _round_up(N, 128)
    pad_n = Np - N

    cap_bytes = _vmem_capacity_bytes()
    budget = (cap_bytes * 3) // 4                # ~48 MiB on v7x, ~96 MiB on v5e/v6e

    TB = tb if tb is not None else _pick_tb(B, Fh, Np, budget)
    assert B % TB == 0
    G = B // TB

    # ---- batch-invariant precompute (hoisted, host-side / static) ---------
    P = {k: np.asarray(v, np.float32) for k, v in params.items()}

    def pad_nn(M):
        return np.pad(M, ((0, pad_n), (0, pad_n)))

    def pad_cols(M):
        return np.pad(M, ((0, 0), (0, pad_n)))

    A = pad_nn(P["A"])
    Bm = pad_nn(P["B"])
    w2_1 = pad_nn(P["core_w2"][0])
    w2_2 = pad_nn(P["core_w2"][1])
    cbias1 = np.pad(P["core_bias"][0], ((0, pad_n), (0, 0)))
    cbias2 = np.pad(P["core_bias"][1], ((0, pad_n), (0, 0)))
    w1_1 = pad_cols(P["core_w1"][0])
    w1_2 = pad_cols(P["core_w1"][1])
    dgcr_w = pad_nn(P["dgcr_w"])
    dgcu_w = pad_nn(P["dgcu_w"])
    dgcc_w = pad_nn(P["dgcc_w"])

    WinT = P["lin_in_w"].T                       # (2, Fh)
    convT = P["conv_w"].T                        # (F, 2)
    lrT = P["linr_w"].T                          # (Fh+2, Fh)
    luT = P["linu_w"].T
    lcT = P["linc_w"].T                          # (F, Fh)

    eye = np.eye(TB, dtype=np.float32)
    kron = lambda W: np.kron(eye, W)             # block-diag over the batch block
    tile = lambda v: np.tile(np.reshape(v, (1, -1)), (1, TB))

    mt1 = (A * w2_1).T
    mt2 = (Bm * w2_2).T
    # additive mask with per-row (softmax-invariant) bias folded in; f32.
    am1 = (-1e16) * (1.0 - A) + cbias1
    am2 = (-1e16) * (1.0 - Bm) + cbias2
    grt = (A * dgcr_w).T
    gut = (A * dgcu_w).T
    gct = (A * dgcc_w).T

    b16 = lambda x: jnp.asarray(x, bf16)
    f32a = lambda x: jnp.asarray(x, f32)

    prm = [
        b16(kron(WinT)), f32a(tile(P["lin_in_b"])),
        b16(kron(convT[:Fh])), b16(kron(convT[Fh:])), f32a(tile(P["conv_b"])),
        b16(mt1), b16(mt2), f32a(am1), f32a(am2),
        b16(w1_1[:Fh]), b16(w1_1[Fh:]), b16(w1_2[:Fh]), b16(w1_2[Fh:]),
        b16(grt), f32a(tile(P["dgcr_b"][:, :2])), f32a(tile(P["dgcr_b"][:, 2:])),
        b16(kron(lrT[:2])), b16(kron(lrT[2:])), f32a(tile(P["linr_b"])),
        b16(gut), f32a(tile(P["dgcu_b"][:, :2])), f32a(tile(P["dgcu_b"][:, 2:])),
        b16(kron(luT[:2])), b16(kron(luT[2:])), f32a(tile(P["linu_b"])),
        b16(gct), f32a(tile(P["dgcc_b"][:, :Fh])), f32a(tile(P["dgcc_b"][:, Fh:])),
        b16(kron(lcT[:Fh])), b16(kron(lcT[Fh:])), f32a(tile(P["linc_b"])),
    ]

    # ---- lane-stacked (batch-major) per-block data layout ------------------
    inp = jnp.asarray(inp, f32)
    state = jnp.asarray(state, f32)
    inp_p = jnp.pad(inp, ((0, 0), (0, pad_n), (0, 0)))
    st_p = jnp.pad(state, ((0, 0), (0, pad_n), (0, 0)))
    inp_g = inp_p.reshape(G, TB, Np, 2)
    st_g = st_p.reshape(G, TB, Np, Fh)
    inp_lane = inp_g.transpose(0, 2, 1, 3).reshape(G, Np, TB * 2)
    state_lane = st_g.transpose(0, 2, 1, 3).reshape(G, Np, TB * Fh)
    inp0 = inp_g[..., 0]                         # (G, TB, Np)
    inp1 = inp_g[..., 1]

    kernel = functools.partial(_dgcn_cell_kernel, N=Np, TB=TB, Fh=Fh)

    wss = _working_set_bytes(Np, TB, Fh)
    vmem_limit = int(min(budget, max(32 << 20, 2 * wss)))

    data_specs = [
        pl.BlockSpec((None, Np, TB * 2), lambda g: (g, 0, 0)),
        pl.BlockSpec((None, TB, Np), lambda g: (g, 0, 0)),
        pl.BlockSpec((None, TB, Np), lambda g: (g, 0, 0)),
        pl.BlockSpec((None, Np, TB * Fh), lambda g: (g, 0, 0)),
    ]
    out_specs = [
        pl.BlockSpec((None, Np, TB * 2), lambda g: (g, 0, 0)),
        pl.BlockSpec((None, Np, TB * Fh), lambda g: (g, 0, 0)),
    ]
    out_shape = [
        jax.ShapeDtypeStruct((G, Np, TB * 2), f32),
        jax.ShapeDtypeStruct((G, Np, TB * Fh), f32),
    ]

    def build(single_buffer_params):
        if single_buffer_params:
            # Constant-index params: request 1 buffer instead of the default 2.
            pspec = lambda a: pl.BlockSpec(a.shape, lambda g: (0, 0),
                                           pipeline_mode=pl.Buffered(1))
        else:
            pspec = lambda a: pl.BlockSpec(a.shape, lambda g: (0, 0))
        return pl.pallas_call(
            kernel,
            grid=(G,),
            in_specs=data_specs + [pspec(a) for a in prm],
            out_specs=out_specs,
            out_shape=out_shape,
            compiler_params=pltpu.CompilerParams(
                dimension_semantics=("parallel",),
                vmem_limit_bytes=vmem_limit,
            ),
        )

    args = (inp_lane, inp0, inp1, state_lane, *prm)
    try:
        p_lane, H_lane = jax.block_until_ready(build(True)(*args))
    except Exception:
        # Fallback: default double-buffered constant params.
        p_lane, H_lane = jax.block_until_ready(build(False)(*args))

    p = (p_lane.reshape(G, Np, TB, 2).transpose(0, 2, 1, 3)[:, :, :N, :]
         .reshape(B, N, 2))
    H = (H_lane.reshape(G, Np, TB, Fh).transpose(0, 2, 1, 3)[:, :, :N, :]
         .reshape(B, N, Fh))
    return p, H


# ----------------------------------------------------------------------------
# Pure-JAX reference (mirrors the PyTorch forward exactly)
# ----------------------------------------------------------------------------
def reference(inp, state, P):
    A, Bm = P["A"], P["B"]
    x = inp @ P["lin_in_w"].T + P["lin_in_b"]
    gru = jnp.concatenate([x, state], -1)
    demand = jnp.tanh(gru @ P["conv_w"].T + P["conv_b"]) * 0.5

    def mask_fn(adj, w2i, w1i, bi):
        x1 = jnp.swapaxes(gru, -1, -2) @ (adj * w2i)
        logits = jnp.swapaxes(x1, -1, -2) @ w1i + bi
        logits = logits + (-1e16) * (1.0 - adj)
        return jax.nn.softmax(logits, axis=-1)

    mask1 = mask_fn(A, P["core_w2"][0], P["core_w1"][0], P["core_bias"][0])
    mask2 = mask_fn(Bm, P["core_w2"][1], P["core_w1"][1], P["core_bias"][1])
    v = mask1 @ inp[..., :1]
    q = mask2 @ inp[..., 1:]
    p = jnp.concatenate([v, q], -1) + demand

    feature_ru = jnp.concatenate([p, state], -1)

    def localgc(w, b, feat):
        W = A * w
        out = jnp.swapaxes(jnp.swapaxes(feat, -1, -2) @ W, -1, -2)
        return out + b

    r = jax.nn.sigmoid(localgc(P["dgcr_w"], P["dgcr_b"], feature_ru)
                       @ P["linr_w"].T + P["linr_b"])
    u = jax.nn.sigmoid(localgc(P["dgcu_w"], P["dgcu_b"], feature_ru)
                       @ P["linu_w"].T + P["linu_b"])
    s = r * state
    feature_c = jnp.concatenate([x, s], -1)
    c = jnp.tanh(localgc(P["dgcc_w"], P["dgcc_b"], feature_c)
                 @ P["linc_w"].T + P["linc_b"])
    H = u * state + (1.0 - u) * c
    return p, H


# ----------------------------------------------------------------------------
# Deterministic parameter construction
# ----------------------------------------------------------------------------
def make_params(key, N, F):
    Fh = F // 2
    dim = Fh + 2
    ks = jax.random.split(key, 24)

    def nrm(k, shape, scale=0.1):
        return (scale * jax.random.normal(k, shape)).astype(jnp.float32)

    A = (jax.random.uniform(ks[0], (N, N)) < 0.3).astype(jnp.float32)
    A = jnp.clip(A + jnp.eye(N, dtype=jnp.float32), 0.0, 1.0)
    Bm = (jax.random.uniform(ks[1], (N, N)) < 0.3).astype(jnp.float32)
    Bm = jnp.clip(Bm + jnp.eye(N, dtype=jnp.float32), 0.0, 1.0)

    return {
        "lin_in_w": nrm(ks[2], (Fh, 2)),
        "lin_in_b": nrm(ks[3], (1, Fh)),
        "conv_w": nrm(ks[4], (2, F)),
        "conv_b": nrm(ks[5], (1, 2)),
        "core_w1": nrm(ks[6], (2, F, N)),
        "core_w2": nrm(ks[7], (2, N, N)),
        "core_bias": jnp.zeros((2, N, 1), jnp.float32),
        "A": A,
        "B": Bm,
        "dgcr_w": nrm(ks[8], (N, N)),
        "dgcr_b": jnp.zeros((1, dim), jnp.float32),
        "linr_w": nrm(ks[9], (Fh, dim)),
        "linr_b": nrm(ks[10], (1, Fh)),
        "dgcu_w": nrm(ks[11], (N, N)),
        "dgcu_b": jnp.zeros((1, dim), jnp.float32),
        "linu_w": nrm(ks[12], (Fh, dim)),
        "linu_b": nrm(ks[13], (1, Fh)),
        "dgcc_w": nrm(ks[14], (N, N)),
        "dgcc_b": jnp.zeros((1, F), jnp.float32),
        "linc_w": nrm(ks[15], (Fh, F)),
        "linc_b": nrm(ks[16], (1, Fh)),
    }


if __name__ == "__main__":
    B, N, F = 4, 16, 8            # batch, nodes, feature dim (Fh = 4, dim = 6)
    Fh = F // 2

    key = jax.random.PRNGKey(0)
    k_in, k_st, k_par = jax.random.split(key, 3)
    inp = jax.random.normal(k_in, (B, N, 2), dtype=jnp.float32)
    state = jax.random.normal(k_st, (B, N, Fh), dtype=jnp.float32)
    params = make_params(k_par, N, F)

    p, H = dgcn_cell_uq(inp, state, params)
    jax.block_until_ready((p, H))

    p_ref, H_ref = reference(inp, state, params)
    np.testing.assert_allclose(np.asarray(p), np.asarray(p_ref),
                               rtol=1e-2, atol=1e-2)
    np.testing.assert_allclose(np.asarray(H), np.asarray(H_ref),
                               rtol=1e-2, atol=1e-2)

    print("KERNEL_OK")
</pallas_src>

<mosaic_0001>
module attributes {stable_mosaic.version = 11 : i64} {
  func.func @_dgcn_cell_kernel(%arg0: i32, %arg1: memref<1x128x4xf32, #tpu.memory_space<vmem>>, %arg2: memref<1x2x128xf32, #tpu.memory_space<vmem>>, %arg3: memref<1x2x128xf32, #tpu.memory_space<vmem>>, %arg4: memref<1x128x8xf32, #tpu.memory_space<vmem>>, %arg5: memref<4x8xbf16, #tpu.memory_space<vmem>>, %arg6: memref<1x8xf32, #tpu.memory_space<vmem>>, %arg7: memref<8x4xbf16, #tpu.memory_space<vmem>>, %arg8: memref<8x4xbf16, #tpu.memory_space<vmem>>, %arg9: memref<1x4xf32, #tpu.memory_space<vmem>>, %arg10: memref<128x128xbf16, #tpu.memory_space<vmem>>, %arg11: memref<128x128xbf16, #tpu.memory_space<vmem>>, %arg12: memref<128x128xf32, #tpu.memory_space<vmem>>, %arg13: memref<128x128xf32, #tpu.memory_space<vmem>>, %arg14: memref<4x128xbf16, #tpu.memory_space<vmem>>, %arg15: memref<4x128xbf16, #tpu.memory_space<vmem>>, %arg16: memref<4x128xbf16, #tpu.memory_space<vmem>>, %arg17: memref<4x128xbf16, #tpu.memory_space<vmem>>, %arg18: memref<128x128xbf16, #tpu.memory_space<vmem>>, %arg19: memref<1x4xf32, #tpu.memory_space<vmem>>, %arg20: memref<1x8xf32, #tpu.memory_space<vmem>>, %arg21: memref<4x8xbf16, #tpu.memory_space<vmem>>, %arg22: memref<8x8xbf16, #tpu.memory_space<vmem>>, %arg23: memref<1x8xf32, #tpu.memory_space<vmem>>, %arg24: memref<128x128xbf16, #tpu.memory_space<vmem>>, %arg25: memref<1x4xf32, #tpu.memory_space<vmem>>, %arg26: memref<1x8xf32, #tpu.memory_space<vmem>>, %arg27: memref<4x8xbf16, #tpu.memory_space<vmem>>, %arg28: memref<8x8xbf16, #tpu.memory_space<vmem>>, %arg29: memref<1x8xf32, #tpu.memory_space<vmem>>, %arg30: memref<128x128xbf16, #tpu.memory_space<vmem>>, %arg31: memref<1x8xf32, #tpu.memory_space<vmem>>, %arg32: memref<1x8xf32, #tpu.memory_space<vmem>>, %arg33: memref<8x8xbf16, #tpu.memory_space<vmem>>, %arg34: memref<8x8xbf16, #tpu.memory_space<vmem>>, %arg35: memref<1x8xf32, #tpu.memory_space<vmem>>, %arg36: memref<1x128x4xf32, #tpu.memory_space<vmem>>, %arg37: memref<1x128x8xf32, #tpu.memory_space<vmem>>) attributes {dimension_semantics = [#tpu.dimension_semantics<parallel>], iteration_bounds = array<i64: 2>, scalar_prefetch = 0 : i64, scratch_operands = 0 : i64, tpu.core_type = #tpu.core_type<tc>, window_params = [{transform_indices = @transform_0, window_bounds = array<i64: 1, 128, 4>}, {transform_indices = @transform_1, window_bounds = array<i64: 1, 2, 128>}, {transform_indices = @transform_2, window_bounds = array<i64: 1, 2, 128>}, {transform_indices = @transform_3, window_bounds = array<i64: 1, 128, 8>}, {pipeline_mode = #tpu.pipeline_mode<synchronous>, transform_indices = @transform_4, window_bounds = array<i64: 4, 8>}, {pipeline_mode = #tpu.pipeline_mode<synchronous>, transform_indices = @transform_5, window_bounds = array<i64: 1, 8>}, {pipeline_mode = #tpu.pipeline_mode<synchronous>, transform_indices = @transform_6, window_bounds = array<i64: 8, 4>}, {pipeline_mode = #tpu.pipeline_mode<synchronous>, transform_indices = @transform_7, window_bounds = array<i64: 8, 4>}, {pipeline_mode = #tpu.pipeline_mode<synchronous>, transform_indices = @transform_8, window_bounds = array<i64: 1, 4>}, {pipeline_mode = #tpu.pipeline_mode<synchronous>, transform_indices = @transform_9, window_bounds = array<i64: 128, 128>}, {pipeline_mode = #tpu.pipeline_mode<synchronous>, transform_indices = @transform_10, window_bounds = array<i64: 128, 128>}, {pipeline_mode = #tpu.pipeline_mode<synchronous>, transform_indices = @transform_11, window_bounds = array<i64: 128, 128>}, {pipeline_mode = #tpu.pipeline_mode<synchronous>, transform_indices = @transform_12, window_bounds = array<i64: 128, 128>}, {pipeline_mode = #tpu.pipeline_mode<synchronous>, transform_indices = @transform_13, window_bounds = array<i64: 4, 128>}, {pipeline_mode = #tpu.pipeline_mode<synchronous>, transform_indices = @transform_14, window_bounds = array<i64: 4, 128>}, {pipeline_mode = #tpu.pipeline_mode<synchronous>, transform_indices = @transform_15, window_bounds = array<i64: 4, 128>}, {pipeline_mode = #tpu.pipeline_mode<synchronous>, transform_indices = @transform_16, window_bounds = array<i64: 4, 128>}, {pipeline_mode = #tpu.pipeline_mode<synchronous>, transform_indices = @transform_17, window_bounds = array<i64: 128, 128>}, {pipeline_mode = #tpu.pipeline_mode<synchronous>, transform_indices = @transform_18, window_bounds = array<i64: 1, 4>}, {pipeline_mode = #tpu.pipeline_mode<synchronous>, transform_indices = @transform_19, window_bounds = array<i64: 1, 8>}, {pipeline_mode = #tpu.pipeline_mode<synchronous>, transform_indices = @transform_20, window_bounds = array<i64: 4, 8>}, {pipeline_mode = #tpu.pipeline_mode<synchronous>, transform_indices = @transform_21, window_bounds = array<i64: 8, 8>}, {pipeline_mode = #tpu.pipeline_mode<synchronous>, transform_indices = @transform_22, window_bounds = array<i64: 1, 8>}, {pipeline_mode = #tpu.pipeline_mode<synchronous>, transform_indices = @transform_23, window_bounds = array<i64: 128, 128>}, {pipeline_mode = #tpu.pipeline_mode<synchronous>, transform_indices = @transform_24, window_bounds = array<i64: 1, 4>}, {pipeline_mode = #tpu.pipeline_mode<synchronous>, transform_indices = @transform_25, window_bounds = array<i64: 1, 8>}, {pipeline_mode = #tpu.pipeline_mode<synchronous>, transform_indices = @transform_26, window_bounds = array<i64: 4, 8>}, {pipeline_mode = #tpu.pipeline_mode<synchronous>, transform_indices = @transform_27, window_bounds = array<i64: 8, 8>}, {pipeline_mode = #tpu.pipeline_mode<synchronous>, transform_indices = @transform_28, window_bounds = array<i64: 1, 8>}, {pipeline_mode = #tpu.pipeline_mode<synchronous>, transform_indices = @transform_29, window_bounds = array<i64: 128, 128>}, {pipeline_mode = #tpu.pipeline_mode<synchronous>, transform_indices = @transform_30, window_bounds = array<i64: 1, 8>}, {pipeline_mode = #tpu.pipeline_mode<synchronous>, transform_indices = @transform_31, window_bounds = array<i64: 1, 8>}, {pipeline_mode = #tpu.pipeline_mode<synchronous>, transform_indices = @transform_32, window_bounds = array<i64: 8, 8>}, {pipeline_mode = #tpu.pipeline_mode<synchronous>, transform_indices = @transform_33, window_bounds = array<i64: 8, 8>}, {pipeline_mode = #tpu.pipeline_mode<synchronous>, transform_indices = @transform_34, window_bounds = array<i64: 1, 8>}, {transform_indices = @transform_35, window_bounds = array<i64: 1, 128, 4>}, {transform_indices = @transform_36, window_bounds = array<i64: 1, 128, 8>}]} {
    %c0 = arith.constant 0 : index
    %c0_0 = arith.constant 0 : index
    %c0_1 = arith.constant 0 : index
    %0 = vector.load %arg1[%c0, %c0_0, %c0_1] : memref<1x128x4xf32, #tpu.memory_space<vmem>>, vector<1x128x4xf32>
    %1 = vector.shape_cast %0 : vector<1x128x4xf32> to vector<128x4xf32>
    %c0_2 = arith.constant 0 : index
    %c0_3 = arith.constant 0 : index
    %c0_4 = arith.constant 0 : index
    %2 = vector.load %arg4[%c0_2, %c0_3, %c0_4] : memref<1x128x8xf32, #tpu.memory_space<vmem>>, vector<1x128x8xf32>
    %3 = vector.shape_cast %2 : vector<1x128x8xf32> to vector<128x8xf32>
    %4 = arith.truncf %1 : vector<128x4xf32> to vector<128x4xbf16>
    %5 = arith.truncf %3 : vector<128x8xf32> to vector<128x8xbf16>
    %c0_5 = arith.constant 0 : index
    %c0_6 = arith.constant 0 : index
    %6 = vector.load %arg5[%c0_5, %c0_6] : memref<4x8xbf16, #tpu.memory_space<vmem>>, vector<4x8xbf16>
    %cst = arith.constant dense<0.000000e+00> : vector<128x8xf32>
    %7 = tpu.matmul %4, %6, %cst {dimension_numbers = #tpu.dot_dimension_numbers<[1], [0], [0], [1], [0, 0, 1, 1], [], []>} : vector<128x4xbf16>, vector<4x8xbf16>, vector<128x8xf32> -> vector<128x8xf32>
    %c0_7 = arith.constant 0 : index
    %c0_8 = arith.constant 0 : index
    %8 = vector.load %arg6[%c0_7, %c0_8] : memref<1x8xf32, #tpu.memory_space<vmem>>, vector<1x8xf32>
    %9 = vector.broadcast %8 : vector<1x8xf32> to vector<128x8xf32>
    %10 = arith.addf %7, %9 : vector<128x8xf32>
    %11 = arith.truncf %10 : vector<128x8xf32> to vector<128x8xbf16>
    %c0_9 = arith.constant 0 : index
    %c0_10 = arith.constant 0 : index
    %12 = vector.load %arg7[%c0_9, %c0_10] : memref<8x4xbf16, #tpu.memory_space<vmem>>, vector<8x4xbf16>
    %cst_11 = arith.constant dense<0.000000e+00> : vector<128x4xf32>
    %13 = tpu.matmul %11, %12, %cst_11 {dimension_numbers = #tpu.dot_dimension_numbers<[1], [0], [0], [1], [0, 0, 1, 1], [], []>} : vector<128x8xbf16>, vector<8x4xbf16>, vector<128x4xf32> -> vector<128x4xf32>
    %c0_12 = arith.constant 0 : index
    %c0_13 = arith.constant 0 : index
    %14 = vector.load %arg8[%c0_12, %c0_13] : memref<8x4xbf16, #tpu.memory_space<vmem>>, vector<8x4xbf16>
    %cst_14 = arith.constant dense<0.000000e+00> : vector<128x4xf32>
    %15 = tpu.matmul %5, %14, %cst_14 {dimension_numbers = #tpu.dot_dimension_numbers<[1], [0], [0], [1], [0, 0, 1, 1], [], []>} : vector<128x8xbf16>, vector<8x4xbf16>, vector<128x4xf32> -> vector<128x4xf32>
    %16 = arith.addf %13, %15 : vector<128x4xf32>
    %c0_15 = arith.constant 0 : index
    %c0_16 = arith.constant 0 : index
    %17 = vector.load %arg9[%c0_15, %c0_16] : memref<1x4xf32, #tpu.memory_space<vmem>>, vector<1x4xf32>
    %18 = vector.broadcast %17 : vector<1x4xf32> to vector<128x4xf32>
    %19 = arith.addf %16, %18 : vector<128x4xf32>
    %20 = math.tanh %19 : vector<128x4xf32>
    %cst_17 = arith.constant 5.000000e-01 : f32
    %21 = vector.broadcast %cst_17 : f32 to vector<128x4xf32>
    %22 = arith.mulf %20, %21 : vector<128x4xf32>
    %c0_18 = arith.constant 0 : index
    %c0_19 = arith.constant 0 : index
    %23 = vector.load %arg10[%c0_18, %c0_19] : memref<128x128xbf16, #tpu.memory_space<vmem>>, vector<128x128xbf16>
    %cst_20 = arith.constant dense<0.000000e+00> : vector<128x8xf32>
    %24 = tpu.matmul %23, %11, %cst_20 {dimension_numbers = #tpu.dot_dimension_numbers<[1], [0], [0], [1], [0, 0, 1, 1], [], []>} : vector<128x128xbf16>, vector<128x8xbf16>, vector<128x8xf32> -> vector<128x8xf32>
    %c0_21 = arith.constant 0 : index
    %c0_22 = arith.constant 0 : index
    %25 = vector.load %arg10[%c0_21, %c0_22] : memref<128x128xbf16, #tpu.memory_space<vmem>>, vector<128x128xbf16>
    %cst_23 = arith.constant dense<0.000000e+00> : vector<128x8xf32>
    %26 = tpu.matmul %25, %5, %cst_23 {dimension_numbers = #tpu.dot_dimension_numbers<[1], [0], [0], [1], [0, 0, 1, 1], [], []>} : vector<128x128xbf16>, vector<128x8xbf16>, vector<128x8xf32> -> vector<128x8xf32>
    %c0_24 = arith.constant 0 : index
    %c0_25 = arith.constant 0 : index
    %27 = vector.load %arg11[%c0_24, %c0_25] : memref<128x128xbf16, #tpu.memory_space<vmem>>, vector<128x128xbf16>
    %cst_26 = arith.constant dense<0.000000e+00> : vector<128x8xf32>
    %28 = tpu.matmul %27, %11, %cst_26 {dimension_numbers = #tpu.dot_dimension_numbers<[1], [0], [0], [1], [0, 0, 1, 1], [], []>} : vector<128x128xbf16>, vector<128x8xbf16>, vector<128x8xf32> -> vector<128x8xf32>
    %c0_27 = arith.constant 0 : index
    %c0_28 = arith.constant 0 : index
    %29 = vector.load %arg11[%c0_27, %c0_28] : memref<128x128xbf16, #tpu.memory_space<vmem>>, vector<128x128xbf16>
    %cst_29 = arith.constant dense<0.000000e+00> : vector<128x8xf32>
    %30 = tpu.matmul %29, %5, %cst_29 {dimension_numbers = #tpu.dot_dimension_numbers<[1], [0], [0], [1], [0, 0, 1, 1], [], []>} : vector<128x128xbf16>, vector<128x8xbf16>, vector<128x8xf32> -> vector<128x8xf32>
    %c0_30 = arith.constant 0 : index
    %c0_31 = arith.constant 0 : index
    %31 = vector.load %arg12[%c0_30, %c0_31] : memref<128x128xf32, #tpu.memory_space<vmem>>, vector<128x128xf32>
    %c0_32 = arith.constant 0 : index
    %c0_33 = arith.constant 0 : index
    %32 = vector.load %arg13[%c0_32, %c0_33] : memref<128x128xf32, #tpu.memory_space<vmem>>, vector<128x128xf32>
    %c0_34 = arith.constant 0 : index
    %c0_35 = arith.constant 0 : index
    %33 = vector.load %arg14[%c0_34, %c0_35] : memref<4x128xbf16, #tpu.memory_space<vmem>>, vector<4x128xbf16>
    %c0_36 = arith.constant 0 : index
    %c0_37 = arith.constant 0 : index
    %34 = vector.load %arg15[%c0_36, %c0_37] : memref<4x128xbf16, #tpu.memory_space<vmem>>, vector<4x128xbf16>
    %c0_38 = arith.constant 0 : index
    %c0_39 = arith.constant 0 : index
    %35 = vector.load %arg16[%c0_38, %c0_39] : memref<4x128xbf16, #tpu.memory_space<vmem>>, vector<4x128xbf16>
    %c0_40 = arith.constant 0 : index
    %c0_41 = arith.constant 0 : index
    %36 = vector.load %arg17[%c0_40, %c0_41] : memref<4x128xbf16, #tpu.memory_space<vmem>>, vector<4x128xbf16>
    %37 = vector.extract_strided_slice %24 {offsets = [0, 0], sizes = [128, 4], strides = [1, 1]} : vector<128x8xf32> to vector<128x4xf32>
    %38 = arith.truncf %37 : vector<128x4xf32> to vector<128x4xbf16>
    %cst_42 = arith.constant dense<0.000000e+00> : vector<128x128xf32>
    %39 = tpu.matmul %38, %33, %cst_42 {dimension_numbers = #tpu.dot_dimension_numbers<[1], [0], [0], [1], [0, 0, 1, 1], [], []>} : vector<128x4xbf16>, vector<4x128xbf16>, vector<128x128xf32> -> vector<128x128xf32>
    %40 = vector.extract_strided_slice %26 {offsets = [0, 0], sizes = [128, 4], strides = [1, 1]} : vector<128x8xf32> to vector<128x4xf32>
    %41 = arith.truncf %40 : vector<128x4xf32> to vector<128x4xbf16>
    %cst_43 = arith.constant dense<0.000000e+00> : vector<128x128xf32>
    %42 = tpu.matmul %41, %34, %cst_43 {dimension_numbers = #tpu.dot_dimension_numbers<[1], [0], [0], [1], [0, 0, 1, 1], [], []>} : vector<128x4xbf16>, vector<4x128xbf16>, vector<128x128xf32> -> vector<128x128xf32>
    %43 = arith.addf %39, %42 : vector<128x128xf32>
    %44 = arith.addf %43, %31 : vector<128x128xf32>
    %45 = vector.extract_strided_slice %28 {offsets = [0, 0], sizes = [128, 4], strides = [1, 1]} : vector<128x8xf32> to vector<128x4xf32>
    %46 = arith.truncf %45 : vector<128x4xf32> to vector<128x4xbf16>
    %cst_44 = arith.constant dense<0.000000e+00> : vector<128x128xf32>
    %47 = tpu.matmul %46, %35, %cst_44 {dimension_numbers = #tpu.dot_dimension_numbers<[1], [0], [0], [1], [0, 0, 1, 1], [], []>} : vector<128x4xbf16>, vector<4x128xbf16>, vector<128x128xf32> -> vector<128x128xf32>
    %48 = vector.extract_strided_slice %30 {offsets = [0, 0], sizes = [128, 4], strides = [1, 1]} : vector<128x8xf32> to vector<128x4xf32>
    %49 = arith.truncf %48 : vector<128x4xf32> to vector<128x4xbf16>
    %cst_45 = arith.constant dense<0.000000e+00> : vector<128x128xf32>
    %50 = tpu.matmul %49, %36, %cst_45 {dimension_numbers = #tpu.dot_dimension_numbers<[1], [0], [0], [1], [0, 0, 1, 1], [], []>} : vector<128x4xbf16>, vector<4x128xbf16>, vector<128x128xf32> -> vector<128x128xf32>
    %51 = arith.addf %47, %50 : vector<128x128xf32>
    %52 = arith.addf %51, %32 : vector<128x128xf32>
    %cst_46 = arith.constant dense<0xFF800000> : vector<128xf32>
    %53 = vector.multi_reduction <maximumf>, %44, %cst_46 [1] : vector<128x128xf32> to vector<128xf32>
    %54 = vector.shape_cast %53 : vector<128xf32> to vector<128x1xf32>
    %55 = vector.broadcast %54 : vector<128x1xf32> to vector<128x128xf32>
    %56 = arith.subf %44, %55 : vector<128x128xf32>
    %57 = math.exp %56 : vector<128x128xf32>
    %cst_47 = arith.constant dense<0.000000e+00> : vector<128xf32>
    %58 = vector.multi_reduction <add>, %57, %cst_47 [1] : vector<128x128xf32> to vector<128xf32>
    %59 = vector.shape_cast %58 : vector<128xf32> to vector<128x1xf32>
    %cst_48 = arith.constant dense<0xFF800000> : vector<128xf32>
    %60 = vector.multi_reduction <maximumf>, %52, %cst_48 [1] : vector<128x128xf32> to vector<128xf32>
    %61 = vector.shape_cast %60 : vector<128xf32> to vector<128x1xf32>
    %62 = vector.broadcast %61 : vector<128x1xf32> to vector<128x128xf32>
    %63 = arith.subf %52, %62 : vector<128x128xf32>
    %64 = math.exp %63 : vector<128x128xf32>
    %cst_49 = arith.constant dense<0.000000e+00> : vector<128xf32>
    %65 = vector.multi_reduction <add>, %64, %cst_49 [1] : vector<128x128xf32> to vector<128xf32>
    %66 = vector.shape_cast %65 : vector<128xf32> to vector<128x1xf32>
    %c0_50 = arith.constant 0 : index
    %c0_51 = arith.constant 0 : index
    %c0_52 = arith.constant 0 : index
    %67 = vector.load %arg2[%c0_50, %c0_51, %c0_52] : memref<1x2x128xf32, #tpu.memory_space<vmem>>, vector<1x1x128xf32>
    %68 = vector.shape_cast %67 : vector<1x1x128xf32> to vector<1x128xf32>
    %c0_53 = arith.constant 0 : index
    %c0_54 = arith.constant 0 : index
    %c0_55 = arith.constant 0 : index
    %69 = vector.load %arg3[%c0_53, %c0_54, %c0_55] : memref<1x2x128xf32, #tpu.memory_space<vmem>>, vector<1x1x128xf32>
    %70 = vector.shape_cast %69 : vector<1x1x128xf32> to vector<1x128xf32>
    %71 = vector.broadcast %68 : vector<1x128xf32> to vector<128x128xf32>
    %72 = arith.mulf %57, %71 : vector<128x128xf32>
    %cst_56 = arith.constant dense<0.000000e+00> : vector<128xf32>
    %73 = vector.multi_reduction <add>, %72, %cst_56 [1] : vector<128x128xf32> to vector<128xf32>
    %74 = vector.shape_cast %73 : vector<128xf32> to vector<128x1xf32>
    %75 = tpu.reciprocal %59 {approx = true} : vector<128x1xf32> -> vector<128x1xf32>
    %76 = arith.mulf %74, %75 : vector<128x1xf32>
    %77 = vector.broadcast %70 : vector<1x128xf32> to vector<128x128xf32>
    %78 = arith.mulf %64, %77 : vector<128x128xf32>
    %cst_57 = arith.constant dense<0.000000e+00> : vector<128xf32>
    %79 = vector.multi_reduction <add>, %78, %cst_57 [1] : vector<128x128xf32> to vector<128xf32>
    %80 = vector.shape_cast %79 : vector<128xf32> to vector<128x1xf32>
    %81 = tpu.reciprocal %66 {approx = true} : vector<128x1xf32> -> vector<128x1xf32>
    %82 = arith.mulf %80, %81 : vector<128x1xf32>
    %83 = vector.extract_strided_slice %22 {offsets = [0, 0], sizes = [128, 1], strides = [1, 1]} : vector<128x4xf32> to vector<128x1xf32>
    %84 = arith.addf %76, %83 : vector<128x1xf32>
    %c0_58 = arith.constant 0 : index
    %c0_59 = arith.constant 0 : index
    %c0_60 = arith.constant 0 : index
    %85 = vector.load %arg36[%c0_58, %c0_59, %c0_60] : memref<1x128x4xf32, #tpu.memory_space<vmem>>, vector<1x128x1xf32>
    %86 = vector.shape_cast %85 : vector<1x128x1xf32> to vector<128x1xf32>
    %87 = vector.shape_cast %84 : vector<128x1xf32> to vector<1x128x1xf32>
    tpu.vector_store %arg36[%c0_58, %c0_59, %c0_60], %87 {strides = array<i32>} : memref<1x128x4xf32, #tpu.memory_space<vmem>>, vector<1x128x1xf32>,
    %88 = vector.extract_strided_slice %22 {offsets = [0, 1], sizes = [128, 1], strides = [1, 1]} : vector<128x4xf32> to vector<128x1xf32>
    %89 = arith.addf %82, %88 : vector<128x1xf32>
    %c0_61 = arith.constant 0 : index
    %c0_62 = arith.constant 0 : index
    %c1 = arith.constant 1 : index
    %90 = vector.load %arg36[%c0_61, %c0_62, %c1] : memref<1x128x4xf32, #tpu.memory_space<vmem>>, vector<1x128x1xf32>
    %91 = vector.shape_cast %90 : vector<1x128x1xf32> to vector<128x1xf32>
    %92 = vector.shape_cast %89 : vector<128x1xf32> to vector<1x128x1xf32>
    tpu.vector_store %arg36[%c0_61, %c0_62, %c1], %92 {strides = array<i32>} : memref<1x128x4xf32, #tpu.memory_space<vmem>>, vector<1x128x1xf32>,
    %93 = vector.extract_strided_slice %24 {offsets = [0, 4], sizes = [128, 4], strides = [1, 1]} : vector<128x8xf32> to vector<128x4xf32>
    %94 = arith.truncf %93 : vector<128x4xf32> to vector<128x4xbf16>
    %cst_63 = arith.constant dense<0.000000e+00> : vector<128x128xf32>
    %95 = tpu.matmul %94, %33, %cst_63 {dimension_numbers = #tpu.dot_dimension_numbers<[1], [0], [0], [1], [0, 0, 1, 1], [], []>} : vector<128x4xbf16>, vector<4x128xbf16>, vector<128x128xf32> -> vector<128x128xf32>
    %96 = vector.extract_strided_slice %26 {offsets = [0, 4], sizes = [128, 4], strides = [1, 1]} : vector<128x8xf32> to vector<128x4xf32>
    %97 = arith.truncf %96 : vector<128x4xf32> to vector<128x4xbf16>
    %cst_64 = arith.constant dense<0.000000e+00> : vector<128x128xf32>
    %98 = tpu.matmul %97, %34, %cst_64 {dimension_numbers = #tpu.dot_dimension_numbers<[1], [0], [0], [1], [0, 0, 1, 1], [], []>} : vector<128x4xbf16>, vector<4x128xbf16>, vector<128x128xf32> -> vector<128x128xf32>
    %99 = arith.addf %95, %98 : vector<128x128xf32>
    %100 = arith.addf %99, %31 : vector<128x128xf32>
    %101 = vector.extract_strided_slice %28 {offsets = [0, 4], sizes = [128, 4], strides = [1, 1]} : vector<128x8xf32> to vector<128x4xf32>
    %102 = arith.truncf %101 : vector<128x4xf32> to vector<128x4xbf16>
    %cst_65 = arith.constant dense<0.000000e+00> : vector<128x128xf32>
    %103 = tpu.matmul %102, %35, %cst_65 {dimension_numbers = #tpu.dot_dimension_numbers<[1], [0], [0], [1], [0, 0, 1, 1], [], []>} : vector<128x4xbf16>, vector<4x128xbf16>, vector<128x128xf32> -> vector<128x128xf32>
    %104 = vector.extract_strided_slice %30 {offsets = [0, 4], sizes = [128, 4], strides = [1, 1]} : vector<128x8xf32> to vector<128x4xf32>
    %105 = arith.truncf %104 : vector<128x4xf32> to vector<128x4xbf16>
    %cst_66 = arith.constant dense<0.000000e+00> : vector<128x128xf32>
    %106 = tpu.matmul %105, %36, %cst_66 {dimension_numbers = #tpu.dot_dimension_numbers<[1], [0], [0], [1], [0, 0, 1, 1], [], []>} : vector<128x4xbf16>, vector<4x128xbf16>, vector<128x128xf32> -> vector<128x128xf32>
    %107 = arith.addf %103, %106 : vector<128x128xf32>
    %108 = arith.addf %107, %32 : vector<128x128xf32>
    %cst_67 = arith.constant dense<0xFF800000> : vector<128xf32>
    %109 = vector.multi_reduction <maximumf>, %100, %cst_67 [1] : vector<128x128xf32> to vector<128xf32>
    %110 = vector.shape_cast %109 : vector<128xf32> to vector<128x1xf32>
    %111 = vector.broadcast %110 : vector<128x1xf32> to vector<128x128xf32>
    %112 = arith.subf %100, %111 : vector<128x128xf32>
    %113 = math.exp %112 : vector<128x128xf32>
    %cst_68 = arith.constant dense<0.000000e+00> : vector<128xf32>
    %114 = vector.multi_reduction <add>, %113, %cst_68 [1] : vector<128x128xf32> to vector<128xf32>
    %115 = vector.shape_cast %114 : vector<128xf32> to vector<128x1xf32>
    %cst_69 = arith.constant dense<0xFF800000> : vector<128xf32>
    %116 = vector.multi_reduction <maximumf>, %108, %cst_69 [1] : vector<128x128xf32> to vector<128xf32>
    %117 = vector.shape_cast %116 : vector<128xf32> to vector<128x1xf32>
    %118 = vector.broadcast %117 : vector<128x1xf32> to vector<128x128xf32>
    %119 = arith.subf %108, %118 : vector<128x128xf32>
    %120 = math.exp %119 : vector<128x128xf32>
    %cst_70 = arith.constant dense<0.000000e+00> : vector<128xf32>
    %121 = vector.multi_reduction <add>, %120, %cst_70 [1] : vector<128x128xf32> to vector<128xf32>
    %122 = vector.shape_cast %121 : vector<128xf32> to vector<128x1xf32>
    %c0_71 = arith.constant 0 : index
    %c1_72 = arith.constant 1 : index
    %c0_73 = arith.constant 0 : index
    %123 = vector.load %arg2[%c0_71, %c1_72, %c0_73] : memref<1x2x128xf32, #tpu.memory_space<vmem>>, vector<1x1x128xf32>
    %124 = vector.shape_cast %123 : vector<1x1x128xf32> to vector<1x128xf32>
    %c0_74 = arith.constant 0 : index
    %c1_75 = arith.constant 1 : index
    %c0_76 = arith.constant 0 : index
    %125 = vector.load %arg3[%c0_74, %c1_75, %c0_76] : memref<1x2x128xf32, #tpu.memory_space<vmem>>, vector<1x1x128xf32>
    %126 = vector.shape_cast %125 : vector<1x1x128xf32> to vector<1x128xf32>
    %127 = vector.broadcast %124 : vector<1x128xf32> to vector<128x128xf32>
    %128 = arith.mulf %113, %127 : vector<128x128xf32>
    %cst_77 = arith.constant dense<0.000000e+00> : vector<128xf32>
    %129 = vector.multi_reduction <add>, %128, %cst_77 [1] : vector<128x128xf32> to vector<128xf32>
    %130 = vector.shape_cast %129 : vector<128xf32> to vector<128x1xf32>
    %131 = tpu.reciprocal %115 {approx = true} : vector<128x1xf32> -> vector<128x1xf32>
    %132 = arith.mulf %130, %131 : vector<128x1xf32>
    %133 = vector.broadcast %126 : vector<1x128xf32> to vector<128x128xf32>
    %134 = arith.mulf %120, %133 : vector<128x128xf32>
    %cst_78 = arith.constant dense<0.000000e+00> : vector<128xf32>
    %135 = vector.multi_reduction <add>, %134, %cst_78 [1] : vector<128x128xf32> to vector<128xf32>
    %136 = vector.shape_cast %135 : vector<128xf32> to vector<128x1xf32>
    %137 = tpu.reciprocal %122 {approx = true} : vector<128x1xf32> -> vector<128x1xf32>
    %138 = arith.mulf %136, %137 : vector<128x1xf32>
    %139 = vector.extract_strided_slice %22 {offsets = [0, 2], sizes = [128, 1], strides = [1, 1]} : vector<128x4xf32> to vector<128x1xf32>
    %140 = arith.addf %132, %139 : vector<128x1xf32>
    %c0_79 = arith.constant 0 : index
    %c0_80 = arith.constant 0 : index
    %c2 = arith.constant 2 : index
    %141 = vector.load %arg36[%c0_79, %c0_80, %c2] : memref<1x128x4xf32, #tpu.memory_space<vmem>>, vector<1x128x1xf32>
    %142 = vector.shape_cast %141 : vector<1x128x1xf32> to vector<128x1xf32>
    %143 = vector.shape_cast %140 : vector<128x1xf32> to vector<1x128x1xf32>
    tpu.vector_store %arg36[%c0_79, %c0_80, %c2], %143 {strides = array<i32>} : memref<1x128x4xf32, #tpu.memory_space<vmem>>, vector<1x128x1xf32>,
    %144 = vector.extract_strided_slice %22 {offsets = [0, 3], sizes = [128, 1], strides = [1, 1]} : vector<128x4xf32> to vector<128x1xf32>
    %145 = arith.addf %138, %144 : vector<128x1xf32>
    %c0_81 = arith.constant 0 : index
    %c0_82 = arith.constant 0 : index
    %c3 = arith.constant 3 : index
    %146 = vector.load %arg36[%c0_81, %c0_82, %c3] : memref<1x128x4xf32, #tpu.memory_space<vmem>>, vector<1x128x1xf32>
    %147 = vector.shape_cast %146 : vector<1x128x1xf32> to vector<128x1xf32>
    %148 = vector.shape_cast %145 : vector<128x1xf32> to vector<1x128x1xf32>
    tpu.vector_store %arg36[%c0_81, %c0_82, %c3], %148 {strides = array<i32>} : memref<1x128x4xf32, #tpu.memory_space<vmem>>, vector<1x128x1xf32>,
    %c0_83 = arith.constant 0 : index
    %c0_84 = arith.constant 0 : index
    %c0_85 = arith.constant 0 : index
    %149 = vector.load %arg36[%c0_83, %c0_84, %c0_85] : memref<1x128x4xf32, #tpu.memory_space<vmem>>, vector<1x128x4xf32>
    %150 = vector.shape_cast %149 : vector<1x128x4xf32> to vector<128x4xf32>
    %151 = arith.truncf %150 : vector<128x4xf32> to vector<128x4xbf16>
    %c0_86 = arith.constant 0 : index
    %c0_87 = arith.constant 0 : index
    %152 = vector.load %arg18[%c0_86, %c0_87] : memref<128x128xbf16, #tpu.memory_space<vmem>>, vector<128x128xbf16>
    %cst_88 = arith.constant dense<0.000000e+00> : vector<128x4xf32>
    %153 = tpu.matmul %152, %151, %cst_88 {dimension_numbers = #tpu.dot_dimension_numbers<[1], [0], [0], [1], [0, 0, 1, 1], [], []>} : vector<128x128xbf16>, vector<128x4xbf16>, vector<128x4xf32> -> vector<128x4xf32>
    %c0_89 = arith.constant 0 : index
    %c0_90 = arith.constant 0 : index
    %154 = vector.load %arg19[%c0_89, %c0_90] : memref<1x4xf32, #tpu.memory_space<vmem>>, vector<1x4xf32>
    %155 = vector.broadcast %154 : vector<1x4xf32> to vector<128x4xf32>
    %156 = arith.addf %153, %155 : vector<128x4xf32>
    %157 = arith.truncf %156 : vector<128x4xf32> to vector<128x4xbf16>
    %cst_91 = arith.constant dense<0.000000e+00> : vector<128x8xf32>
    %158 = tpu.matmul %152, %5, %cst_91 {dimension_numbers = #tpu.dot_dimension_numbers<[1], [0], [0], [1], [0, 0, 1, 1], [], []>} : vector<128x128xbf16>, vector<128x8xbf16>, vector<128x8xf32> -> vector<128x8xf32>
    %c0_92 = arith.constant 0 : index
    %c0_93 = arith.constant 0 : index
    %159 = vector.load %arg20[%c0_92, %c0_93] : memref<1x8xf32, #tpu.memory_space<vmem>>, vector<1x8xf32>
    %160 = vector.broadcast %159 : vector<1x8xf32> to vector<128x8xf32>
    %161 = arith.addf %158, %160 : vector<128x8xf32>
    %162 = arith.truncf %161 : vector<128x8xf32> to vector<128x8xbf16>
    %c0_94 = arith.constant 0 : index
    %c0_95 = arith.constant 0 : index
    %163 = vector.load %arg21[%c0_94, %c0_95] : memref<4x8xbf16, #tpu.memory_space<vmem>>, vector<4x8xbf16>
    %cst_96 = arith.constant dense<0.000000e+00> : vector<128x8xf32>
    %164 = tpu.matmul %157, %163, %cst_96 {dimension_numbers = #tpu.dot_dimension_numbers<[1], [0], [0], [1], [0, 0, 1, 1], [], []>} : vector<128x4xbf16>, vector<4x8xbf16>, vector<128x8xf32> -> vector<128x8xf32>
    %c0_97 = arith.constant 0 : index
    %c0_98 = arith.constant 0 : index
    %165 = vector.load %arg22[%c0_97, %c0_98] : memref<8x8xbf16, #tpu.memory_space<vmem>>, vector<8x8xbf16>
    %cst_99 = arith.constant dense<0.000000e+00> : vector<128x8xf32>
    %166 = tpu.matmul %162, %165, %cst_99 {dimension_numbers = #tpu.dot_dimension_numbers<[1], [0], [0], [1], [0, 0, 1, 1], [], []>} : vector<128x8xbf16>, vector<8x8xbf16>, vector<128x8xf32> -> vector<128x8xf32>
    %167 = arith.addf %164, %166 : vector<128x8xf32>
    %c0_100 = arith.constant 0 : index
    %c0_101 = arith.constant 0 : index
    %168 = vector.load %arg23[%c0_100, %c0_101] : memref<1x8xf32, #tpu.memory_space<vmem>>, vector<1x8xf32>
    %169 = vector.broadcast %168 : vector<1x8xf32> to vector<128x8xf32>
    %170 = arith.addf %167, %169 : vector<128x8xf32>
    %171 = arith.negf %170 : vector<128x8xf32>
    %172 = math.exp %171 : vector<128x8xf32>
    %cst_102 = arith.constant 1.000000e+00 : f32
    %173 = vector.broadcast %cst_102 : f32 to vector<128x8xf32>
    %174 = arith.addf %173, %172 : vector<128x8xf32>
    %175 = arith.divf %173, %174 : vector<128x8xf32>
    %c0_103 = arith.constant 0 : index
    %c0_104 = arith.constant 0 : index
    %176 = vector.load %arg24[%c0_103, %c0_104] : memref<128x128xbf16, #tpu.memory_space<vmem>>, vector<128x128xbf16>
    %cst_105 = arith.constant dense<0.000000e+00> : vector<128x4xf32>
    %177 = tpu.matmul %176, %151, %cst_105 {dimension_numbers = #tpu.dot_dimension_numbers<[1], [0], [0], [1], [0, 0, 1, 1], [], []>} : vector<128x128xbf16>, vector<128x4xbf16>, vector<128x4xf32> -> vector<128x4xf32>
    %c0_106 = arith.constant 0 : index
    %c0_107 = arith.constant 0 : index
    %178 = vector.load %arg25[%c0_106, %c0_107] : memref<1x4xf32, #tpu.memory_space<vmem>>, vector<1x4xf32>
    %179 = vector.broadcast %178 : vector<1x4xf32> to vector<128x4xf32>
    %180 = arith.addf %177, %179 : vector<128x4xf32>
    %181 = arith.truncf %180 : vector<128x4xf32> to vector<128x4xbf16>
    %cst_108 = arith.constant dense<0.000000e+00> : vector<128x8xf32>
    %182 = tpu.matmul %176, %5, %cst_108 {dimension_numbers = #tpu.dot_dimension_numbers<[1], [0], [0], [1], [0, 0, 1, 1], [], []>} : vector<128x128xbf16>, vector<128x8xbf16>, vector<128x8xf32> -> vector<128x8xf32>
    %c0_109 = arith.constant 0 : index
    %c0_110 = arith.constant 0 : index
    %183 = vector.load %arg26[%c0_109, %c0_110] : memref<1x8xf32, #tpu.memory_space<vmem>>, vector<1x8xf32>
    %184 = vector.broadcast %183 : vector<1x8xf32> to vector<128x8xf32>
    %185 = arith.addf %182, %184 : vector<128x8xf32>
    %186 = arith.truncf %185 : vector<128x8xf32> to vector<128x8xbf16>
    %c0_111 = arith.constant 0 : index
    %c0_112 = arith.constant 0 : index
    %187 = vector.load %arg27[%c0_111, %c0_112] : memref<4x8xbf16, #tpu.memory_space<vmem>>, vector<4x8xbf16>
    %cst_113 = arith.constant dense<0.000000e+00> : vector<128x8xf32>
    %188 = tpu.matmul %181, %187, %cst_113 {dimension_numbers = #tpu.dot_dimension_numbers<[1], [0], [0], [1], [0, 0, 1, 1], [], []>} : vector<128x4xbf16>, vector<4x8xbf16>, vector<128x8xf32> -> vector<128x8xf32>
    %c0_114 = arith.constant 0 : index
    %c0_115 = arith.constant 0 : index
    %189 = vector.load %arg28[%c0_114, %c0_115] : memref<8x8xbf16, #tpu.memory_space<vmem>>, vector<8x8xbf16>
    %cst_116 = arith.constant dense<0.000000e+00> : vector<128x8xf32>
    %190 = tpu.matmul %186, %189, %cst_116 {dimension_numbers = #tpu.dot_dimension_numbers<[1], [0], [0], [1], [0, 0, 1, 1], [], []>} : vector<128x8xbf16>, vector<8x8xbf16>, vector<128x8xf32> -> vector<128x8xf32>
    %191 = arith.addf %188, %190 : vector<128x8xf32>
    %c0_117 = arith.constant 0 : index
    %c0_118 = arith.constant 0 : index
    %192 = vector.load %arg29[%c0_117, %c0_118] : memref<1x8xf32, #tpu.memory_space<vmem>>, vector<1x8xf32>
    %193 = vector.broadcast %192 : vector<1x8xf32> to vector<128x8xf32>
    %194 = arith.addf %191, %193 : vector<128x8xf32>
    %195 = arith.negf %194 : vector<128x8xf32>
    %196 = math.exp %195 : vector<128x8xf32>
    %cst_119 = arith.constant 1.000000e+00 : f32
    %197 = vector.broadcast %cst_119 : f32 to vector<128x8xf32>
    %198 = arith.addf %197, %196 : vector<128x8xf32>
    %199 = arith.divf %197, %198 : vector<128x8xf32>
    %c0_120 = arith.constant 0 : index
    %c0_121 = arith.constant 0 : index
    %200 = vector.load %arg30[%c0_120, %c0_121] : memref<128x128xbf16, #tpu.memory_space<vmem>>, vector<128x128xbf16>
    %201 = arith.mulf %175, %3 : vector<128x8xf32>
    %202 = arith.truncf %201 : vector<128x8xf32> to vector<128x8xbf16>
    %cst_122 = arith.constant dense<0.000000e+00> : vector<128x8xf32>
    %203 = tpu.matmul %200, %11, %cst_122 {dimension_numbers = #tpu.dot_dimension_numbers<[1], [0], [0], [1], [0, 0, 1, 1], [], []>} : vector<128x128xbf16>, vector<128x8xbf16>, vector<128x8xf32> -> vector<128x8xf32>
    %c0_123 = arith.constant 0 : index
    %c0_124 = arith.constant 0 : index
    %204 = vector.load %arg31[%c0_123, %c0_124] : memref<1x8xf32, #tpu.memory_space<vmem>>, vector<1x8xf32>
    %205 = vector.broadcast %204 : vector<1x8xf32> to vector<128x8xf32>
    %206 = arith.addf %203, %205 : vector<128x8xf32>
    %207 = arith.truncf %206 : vector<128x8xf32> to vector<128x8xbf16>
    %cst_125 = arith.constant dense<0.000000e+00> : vector<128x8xf32>
    %208 = tpu.matmul %200, %202, %cst_125 {dimension_numbers = #tpu.dot_dimension_numbers<[1], [0], [0], [1], [0, 0, 1, 1], [], []>} : vector<128x128xbf16>, vector<128x8xbf16>, vector<128x8xf32> -> vector<128x8xf32>
    %c0_126 = arith.constant 0 : index
    %c0_127 = arith.constant 0 : index
    %209 = vector.load %arg32[%c0_126, %c0_127] : memref<1x8xf32, #tpu.memory_space<vmem>>, vector<1x8xf32>
    %210 = vector.broadcast %209 : vector<1x8xf32> to vector<128x8xf32>
    %211 = arith.addf %208, %210 : vector<128x8xf32>
    %212 = arith.truncf %211 : vector<128x8xf32> to vector<128x8xbf16>
    %c0_128 = arith.constant 0 : index
    %c0_129 = arith.constant 0 : index
    %213 = vector.load %arg33[%c0_128, %c0_129] : memref<8x8xbf16, #tpu.memory_space<vmem>>, vector<8x8xbf16>
    %cst_130 = arith.constant dense<0.000000e+00> : vector<128x8xf32>
    %214 = tpu.matmul %207, %213, %cst_130 {dimension_numbers = #tpu.dot_dimension_numbers<[1], [0], [0], [1], [0, 0, 1, 1], [], []>} : vector<128x8xbf16>, vector<8x8xbf16>, vector<128x8xf32> -> vector<128x8xf32>
    %c0_131 = arith.constant 0 : index
    %c0_132 = arith.constant 0 : index
    %215 = vector.load %arg34[%c0_131, %c0_132] : memref<8x8xbf16, #tpu.memory_space<vmem>>, vector<8x8xbf16>
    %cst_133 = arith.constant dense<0.000000e+00> : vector<128x8xf32>
    %216 = tpu.matmul %212, %215, %cst_133 {dimension_numbers = #tpu.dot_dimension_numbers<[1], [0], [0], [1], [0, 0, 1, 1], [], []>} : vector<128x8xbf16>, vector<8x8xbf16>, vector<128x8xf32> -> vector<128x8xf32>
    %217 = arith.addf %214, %216 : vector<128x8xf32>
    %c0_134 = arith.constant 0 : index
    %c0_135 = arith.constant 0 : index
    %218 = vector.load %arg35[%c0_134, %c0_135] : memref<1x8xf32, #tpu.memory_space<vmem>>, vector<1x8xf32>
    %219 = vector.broadcast %218 : vector<1x8xf32> to vector<128x8xf32>
    %220 = arith.addf %217, %219 : vector<128x8xf32>
    %221 = math.tanh %220 : vector<128x8xf32>
    %222 = arith.mulf %199, %3 : vector<128x8xf32>
    %cst_136 = arith.constant 1.000000e+00 : f32
    %223 = vector.broadcast %cst_136 : f32 to vector<128x8xf32>
    %224 = arith.subf %223, %199 : vector<128x8xf32>
    %225 = arith.mulf %224, %221 : vector<128x8xf32>
    %226 = arith.addf %222, %225 : vector<128x8xf32>
    %c0_137 = arith.constant 0 : index
    %c0_138 = arith.constant 0 : index
    %c0_139 = arith.constant 0 : index
    %227 = vector.load %arg37[%c0_137, %c0_138, %c0_139] : memref<1x128x8xf32, #tpu.memory_space<vmem>>, vector<1x128x8xf32>
    %228 = vector.shape_cast %227 : vector<1x128x8xf32> to vector<128x8xf32>
    %229 = vector.shape_cast %226 : vector<128x8xf32> to vector<1x128x8xf32>
    tpu.vector_store %arg37[%c0_137, %c0_138, %c0_139], %229 {strides = array<i32>} : memref<1x128x8xf32, #tpu.memory_space<vmem>>, vector<1x128x8xf32>,
    return
  }
  func.func @transform_0(%arg0: i32) -> (i32, i32, i32) {
    %c0_i32 = arith.constant 0 : i32
    %c0_i32_0 = arith.constant 0 : i32
    %c0_i32_1 = arith.constant 0 : i32
    return %arg0, %c0_i32, %c0_i32_0 : i32, i32, i32
  }
  func.func @transform_1(%arg0: i32) -> (i32, i32, i32) {
    %c0_i32 = arith.constant 0 : i32
    %c0_i32_0 = arith.constant 0 : i32
    %c0_i32_1 = arith.constant 0 : i32
    return %arg0, %c0_i32, %c0_i32_0 : i32, i32, i32
  }
  func.func @transform_2(%arg0: i32) -> (i32, i32, i32) {
    %c0_i32 = arith.constant 0 : i32
    %c0_i32_0 = arith.constant 0 : i32
    %c0_i32_1 = arith.constant 0 : i32
    return %arg0, %c0_i32, %c0_i32_0 : i32, i32, i32
  }
  func.func @transform_3(%arg0: i32) -> (i32, i32, i32) {
    %c0_i32 = arith.constant 0 : i32
    %c0_i32_0 = arith.constant 0 : i32
    %c0_i32_1 = arith.constant 0 : i32
    return %arg0, %c0_i32, %c0_i32_0 : i32, i32, i32
  }
  func.func @transform_4(%arg0: i32) -> (i32, i32) {
    %c0_i32 = arith.constant 0 : i32
    %c0_i32_0 = arith.constant 0 : i32
    %c0_i32_1 = arith.constant 0 : i32
    return %c0_i32, %c0_i32_0 : i32, i32
  }
  func.func @transform_5(%arg0: i32) -> (i32, i32) {
    %c0_i32 = arith.constant 0 : i32
    %c0_i32_0 = arith.constant 0 : i32
    %c0_i32_1 = arith.constant 0 : i32
    return %c0_i32, %c0_i32_0 : i32, i32
  }
  func.func @transform_6(%arg0: i32) -> (i32, i32) {
    %c0_i32 = arith.constant 0 : i32
    %c0_i32_0 = arith.constant 0 : i32
    %c0_i32_1 = arith.constant 0 : i32
    return %c0_i32, %c0_i32_0 : i32, i32
  }
  func.func @transform_7(%arg0: i32) -> (i32, i32) {
    %c0_i32 = arith.constant 0 : i32
    %c0_i32_0 = arith.constant 0 : i32
    %c0_i32_1 = arith.constant 0 : i32
    return %c0_i32, %c0_i32_0 : i32, i32
  }
  func.func @transform_8(%arg0: i32) -> (i32, i32) {
    %c0_i32 = arith.constant 0 : i32
    %c0_i32_0 = arith.constant 0 : i32
    %c0_i32_1 = arith.constant 0 : i32
    return %c0_i32, %c0_i32_0 : i32, i32
  }
  func.func @transform_9(%arg0: i32) -> (i32, i32) {
    %c0_i32 = arith.constant 0 : i32
    %c0_i32_0 = arith.constant 0 : i32
    %c0_i32_1 = arith.constant 0 : i32
    return %c0_i32, %c0_i32_0 : i32, i32
  }
  func.func @transform_10(%arg0: i32) -> (i32, i32) {
    %c0_i32 = arith.constant 0 : i32
    %c0_i32_0 = arith.constant 0 : i32
    %c0_i32_1 = arith.constant 0 : i32
    return %c0_i32, %c0_i32_0 : i32, i32
  }
  func.func @transform_11(%arg0: i32) -> (i32, i32) {
    %c0_i32 = arith.constant 0 : i32
    %c0_i32_0 = arith.constant 0 : i32
    %c0_i32_1 = arith.constant 0 : i32
    return %c0_i32, %c0_i32_0 : i32, i32
  }
  func.func @transform_12(%arg0: i32) -> (i32, i32) {
    %c0_i32 = arith.constant 0 : i32
    %c0_i32_0 = arith.constant 0 : i32
    %c0_i32_1 = arith.constant 0 : i32
    return %c0_i32, %c0_i32_0 : i32, i32
  }
  func.func @transform_13(%arg0: i32) -> (i32, i32) {
    %c0_i32 = arith.constant 0 : i32
    %c0_i32_0 = arith.constant 0 : i32
    %c0_i32_1 = arith.constant 0 : i32
    return %c0_i32, %c0_i32_0 : i32, i32
  }
  func.func @transform_14(%arg0: i32) -> (i32, i32) {
    %c0_i32 = arith.constant 0 : i32
    %c0_i32_0 = arith.constant 0 : i32
    %c0_i32_1 = arith.constant 0 : i32
    return %c0_i32, %c0_i32_0 : i32, i32
  }
  func.func @transform_15(%arg0: i32) -> (i32, i32) {
    %c0_i32 = arith.constant 0 : i32
    %c0_i32_0 = arith.constant 0 : i32
    %c0_i32_1 = arith.constant 0 : i32
    return %c0_i32, %c0_i32_0 : i32, i32
  }
  func.func @transform_16(%arg0: i32) -> (i32, i32) {
    %c0_i32 = arith.constant 0 : i32
    %c0_i32_0 = arith.constant 0 : i32
    %c0_i32_1 = arith.constant 0 : i32
    return %c0_i32, %c0_i32_0 : i32, i32
  }
  func.func @transform_17(%arg0: i32) -> (i32, i32) {
    %c0_i32 = arith.constant 0 : i32
    %c0_i32_0 = arith.constant 0 : i32
    %c0_i32_1 = arith.constant 0 : i32
    return %c0_i32, %c0_i32_0 : i32, i32
  }
  func.func @transform_18(%arg0: i32) -> (i32, i32) {
    %c0_i32 = arith.constant 0 : i32
    %c0_i32_0 = arith.constant 0 : i32
    %c0_i32_1 = arith.constant 0 : i32
    return %c0_i32, %c0_i32_0 : i32, i32
  }
  func.func @transform_19(%arg0: i32) -> (i32, i32) {
    %c0_i32 = arith.constant 0 : i32
    %c0_i32_0 = arith.constant 0 : i32
    %c0_i32_1 = arith.constant 0 : i32
    return %c0_i32, %c0_i32_0 : i32, i32
  }
  func.func @transform_20(%arg0: i32) -> (i32, i32) {
    %c0_i32 = arith.constant 0 : i32
    %c0_i32_0 = arith.constant 0 : i32
    %c0_i32_1 = arith.constant 0 : i32
    return %c0_i32, %c0_i32_0 : i32, i32
  }
  func.func @transform_21(%arg0: i32) -> (i32, i32) {
    %c0_i32 = arith.constant 0 : i32
    %c0_i32_0 = arith.constant 0 : i32
    %c0_i32_1 = arith.constant 0 : i32
    return %c0_i32, %c0_i32_0 : i32, i32
  }
  func.func @transform_22(%arg0: i32) -> (i32, i32) {
    %c0_i32 = arith.constant 0 : i32
    %c0_i32_0 = arith.constant 0 : i32
    %c0_i32_1 = arith.constant 0 : i32
    return %c0_i32, %c0_i32_0 : i32, i32
  }
  func.func @transform_23(%arg0: i32) -> (i32, i32) {
    %c0_i32 = arith.constant 0 : i32
    %c0_i32_0 = arith.constant 0 : i32
    %c0_i32_1 = arith.constant 0 : i32
    return %c0_i32, %c0_i32_0 : i32, i32
  }
  func.func @transform_24(%arg0: i32) -> (i32, i32) {
    %c0_i32 = arith.constant 0 : i32
    %c0_i32_0 = arith.constant 0 : i32
    %c0_i32_1 = arith.constant 0 : i32
    return %c0_i32, %c0_i32_0 : i32, i32
  }
  func.func @transform_25(%arg0: i32) -> (i32, i32) {
    %c0_i32 = arith.constant 0 : i32
    %c0_i32_0 = arith.constant 0 : i32
    %c0_i32_1 = arith.constant 0 : i32
    return %c0_i32, %c0_i32_0 : i32, i32
  }
  func.func @transform_26(%arg0: i32) -> (i32, i32) {
    %c0_i32 = arith.constant 0 : i32
    %c0_i32_0 = arith.constant 0 : i32
    %c0_i32_1 = arith.constant 0 : i32
    return %c0_i32, %c0_i32_0 : i32, i32
  }
  func.func @transform_27(%arg0: i32) -> (i32, i32) {
    %c0_i32 = arith.constant 0 : i32
    %c0_i32_0 = arith.constant 0 : i32
    %c0_i32_1 = arith.constant 0 : i32
    return %c0_i32, %c0_i32_0 : i32, i32
  }
  func.func @transform_28(%arg0: i32) -> (i32, i32) {
    %c0_i32 = arith.constant 0 : i32
    %c0_i32_0 = arith.constant 0 : i32
    %c0_i32_1 = arith.constant 0 : i32
    return %c0_i32, %c0_i32_0 : i32, i32
  }
  func.func @transform_29(%arg0: i32) -> (i32, i32) {
    %c0_i32 = arith.constant 0 : i32
    %c0_i32_0 = arith.constant 0 : i32
    %c0_i32_1 = arith.constant 0 : i32
    return %c0_i32, %c0_i32_0 : i32, i32
  }
  func.func @transform_30(%arg0: i32) -> (i32, i32) {
    %c0_i32 = arith.constant 0 : i32
    %c0_i32_0 = arith.constant 0 : i32
    %c0_i32_1 = arith.constant 0 : i32
    return %c0_i32, %c0_i32_0 : i32, i32
  }
  func.func @transform_31(%arg0: i32) -> (i32, i32) {
    %c0_i32 = arith.constant 0 : i32
    %c0_i32_0 = arith.constant 0 : i32
    %c0_i32_1 = arith.constant 0 : i32
    return %c0_i32, %c0_i32_0 : i32, i32
  }
  func.func @transform_32(%arg0: i32) -> (i32, i32) {
    %c0_i32 = arith.constant 0 : i32
    %c0_i32_0 = arith.constant 0 : i32
    %c0_i32_1 = arith.constant 0 : i32
    return %c0_i32, %c0_i32_0 : i32, i32
  }
  func.func @transform_33(%arg0: i32) -> (i32, i32) {
    %c0_i32 = arith.constant 0 : i32
    %c0_i32_0 = arith.constant 0 : i32
    %c0_i32_1 = arith.constant 0 : i32
    return %c0_i32, %c0_i32_0 : i32, i32
  }
  func.func @transform_34(%arg0: i32) -> (i32, i32) {
    %c0_i32 = arith.constant 0 : i32
    %c0_i32_0 = arith.constant 0 : i32
    %c0_i32_1 = arith.constant 0 : i32
    return %c0_i32, %c0_i32_0 : i32, i32
  }
  func.func @transform_35(%arg0: i32) -> (i32, i32, i32) {
    %c0_i32 = arith.constant 0 : i32
    %c0_i32_0 = arith.constant 0 : i32
    %c0_i32_1 = arith.constant 0 : i32
    return %arg0, %c0_i32, %c0_i32_0 : i32, i32, i32
  }
  func.func @transform_36(%arg0: i32) -> (i32, i32, i32) {
    %c0_i32 = arith.constant 0 : i32
    %c0_i32_0 = arith.constant 0 : i32
    %c0_i32_1 = arith.constant 0 : i32
    return %arg0, %c0_i32, %c0_i32_0 : i32, i32, i32
  }
}

module attributes {stable_mosaic.version = 11 : i64} {
  func.func @_dgcn_cell_kernel(%arg0: i32, %arg1: memref<1x128x4xf32, #tpu.memory_space<vmem>>, %arg2: memref<1x2x128xf32, #tpu.memory_space<vmem>>, %arg3: memref<1x2x128xf32, #tpu.memory_space<vmem>>, %arg4: memref<1x128x8xf32, #tpu.memory_space<vmem>>, %arg5: memref<4x8xbf16, #tpu.memory_space<vmem>>, %arg6: memref<1x8xf32, #tpu.memory_space<vmem>>, %arg7: memref<8x4xbf16, #tpu.memory_space<vmem>>, %arg8: memref<8x4xbf16, #tpu.memory_space<vmem>>, %arg9: memref<1x4xf32, #tpu.memory_space<vmem>>, %arg10: memref<128x128xbf16, #tpu.memory_space<vmem>>, %arg11: memref<128x128xbf16, #tpu.memory_space<vmem>>, %arg12: memref<128x128xf32, #tpu.memory_space<vmem>>, %arg13: memref<128x128xf32, #tpu.memory_space<vmem>>, %arg14: memref<4x128xbf16, #tpu.memory_space<vmem>>, %arg15: memref<4x128xbf16, #tpu.memory_space<vmem>>, %arg16: memref<4x128xbf16, #tpu.memory_space<vmem>>, %arg17: memref<4x128xbf16, #tpu.memory_space<vmem>>, %arg18: memref<128x128xbf16, #tpu.memory_space<vmem>>, %arg19: memref<1x4xf32, #tpu.memory_space<vmem>>, %arg20: memref<1x8xf32, #tpu.memory_space<vmem>>, %arg21: memref<4x8xbf16, #tpu.memory_space<vmem>>, %arg22: memref<8x8xbf16, #tpu.memory_space<vmem>>, %arg23: memref<1x8xf32, #tpu.memory_space<vmem>>, %arg24: memref<128x128xbf16, #tpu.memory_space<vmem>>, %arg25: memref<1x4xf32, #tpu.memory_space<vmem>>, %arg26: memref<1x8xf32, #tpu.memory_space<vmem>>, %arg27: memref<4x8xbf16, #tpu.memory_space<vmem>>, %arg28: memref<8x8xbf16, #tpu.memory_space<vmem>>, %arg29: memref<1x8xf32, #tpu.memory_space<vmem>>, %arg30: memref<128x128xbf16, #tpu.memory_space<vmem>>, %arg31: memref<1x8xf32, #tpu.memory_space<vmem>>, %arg32: memref<1x8xf32, #tpu.memory_space<vmem>>, %arg33: memref<8x8xbf16, #tpu.memory_space<vmem>>, %arg34: memref<8x8xbf16, #tpu.memory_space<vmem>>, %arg35: memref<1x8xf32, #tpu.memory_space<vmem>>, %arg36: memref<1x128x4xf32, #tpu.memory_space<vmem>>, %arg37: memref<1x128x8xf32, #tpu.memory_space<vmem>>) attributes {dimension_semantics = [#tpu.dimension_semantics<parallel>], iteration_bounds = array<i64: 2>, scalar_prefetch = 0 : i64, scratch_operands = 0 : i64, tpu.core_type = #tpu.core_type<tc>, window_params = [{transform_indices = @transform_0, window_bounds = array<i64: 1, 128, 4>}, {transform_indices = @transform_1, window_bounds = array<i64: 1, 2, 128>}, {transform_indices = @transform_2, window_bounds = array<i64: 1, 2, 128>}, {transform_indices = @transform_3, window_bounds = array<i64: 1, 128, 8>}, {pipeline_mode = #tpu.pipeline_mode<synchronous>, transform_indices = @transform_4, window_bounds = array<i64: 4, 8>}, {pipeline_mode = #tpu.pipeline_mode<synchronous>, transform_indices = @transform_5, window_bounds = array<i64: 1, 8>}, {pipeline_mode = #tpu.pipeline_mode<synchronous>, transform_indices = @transform_6, window_bounds = array<i64: 8, 4>}, {pipeline_mode = #tpu.pipeline_mode<synchronous>, transform_indices = @transform_7, window_bounds = array<i64: 8, 4>}, {pipeline_mode = #tpu.pipeline_mode<synchronous>, transform_indices = @transform_8, window_bounds = array<i64: 1, 4>}, {pipeline_mode = #tpu.pipeline_mode<synchronous>, transform_indices = @transform_9, window_bounds = array<i64: 128, 128>}, {pipeline_mode = #tpu.pipeline_mode<synchronous>, transform_indices = @transform_10, window_bounds = array<i64: 128, 128>}, {pipeline_mode = #tpu.pipeline_mode<synchronous>, transform_indices = @transform_11, window_bounds = array<i64: 128, 128>}, {pipeline_mode = #tpu.pipeline_mode<synchronous>, transform_indices = @transform_12, window_bounds = array<i64: 128, 128>}, {pipeline_mode = #tpu.pipeline_mode<synchronous>, transform_indices = @transform_13, window_bounds = array<i64: 4, 128>}, {pipeline_mode = #tpu.pipeline_mode<synchronous>, transform_indices = @transform_14, window_bounds = array<i64: 4, 128>}, {pipeline_mode = #tpu.pipeline_mode<synchronous>, transform_indices = @transform_15, window_bounds = array<i64: 4, 128>}, {pipeline_mode = #tpu.pipeline_mode<synchronous>, transform_indices = @transform_16, window_bounds = array<i64: 4, 128>}, {pipeline_mode = #tpu.pipeline_mode<synchronous>, transform_indices = @transform_17, window_bounds = array<i64: 128, 128>}, {pipeline_mode = #tpu.pipeline_mode<synchronous>, transform_indices = @transform_18, window_bounds = array<i64: 1, 4>}, {pipeline_mode = #tpu.pipeline_mode<synchronous>, transform_indices = @transform_19, window_bounds = array<i64: 1, 8>}, {pipeline_mode = #tpu.pipeline_mode<synchronous>, transform_indices = @transform_20, window_bounds = array<i64: 4, 8>}, {pipeline_mode = #tpu.pipeline_mode<synchronous>, transform_indices = @transform_21, window_bounds = array<i64: 8, 8>}, {pipeline_mode = #tpu.pipeline_mode<synchronous>, transform_indices = @transform_22, window_bounds = array<i64: 1, 8>}, {pipeline_mode = #tpu.pipeline_mode<synchronous>, transform_indices = @transform_23, window_bounds = array<i64: 128, 128>}, {pipeline_mode = #tpu.pipeline_mode<synchronous>, transform_indices = @transform_24, window_bounds = array<i64: 1, 4>}, {pipeline_mode = #tpu.pipeline_mode<synchronous>, transform_indices = @transform_25, window_bounds = array<i64: 1, 8>}, {pipeline_mode = #tpu.pipeline_mode<synchronous>, transform_indices = @transform_26, window_bounds = array<i64: 4, 8>}, {pipeline_mode = #tpu.pipeline_mode<synchronous>, transform_indices = @transform_27, window_bounds = array<i64: 8, 8>}, {pipeline_mode = #tpu.pipeline_mode<synchronous>, transform_indices = @transform_28, window_bounds = array<i64: 1, 8>}, {pipeline_mode = #tpu.pipeline_mode<synchronous>, transform_indices = @transform_29, window_bounds = array<i64: 128, 128>}, {pipeline_mode = #tpu.pipeline_mode<synchronous>, transform_indices = @transform_30, window_bounds = array<i64: 1, 8>}, {pipeline_mode = #tpu.pipeline_mode<synchronous>, transform_indices = @transform_31, window_bounds = array<i64: 1, 8>}, {pipeline_mode = #tpu.pipeline_mode<synchronous>, transform_indices = @transform_32, window_bounds = array<i64: 8, 8>}, {pipeline_mode = #tpu.pipeline_mode<synchronous>, transform_indices = @transform_33, window_bounds = array<i64: 8, 8>}, {pipeline_mode = #tpu.pipeline_mode<synchronous>, transform_indices = @transform_34, window_bounds = array<i64: 1, 8>}, {transform_indices = @transform_35, window_bounds = array<i64: 1, 128, 4>}, {transform_indices = @transform_36, window_bounds = array<i64: 1, 128, 8>}]} {
    %c0 = arith.constant 0 : index
    %c0_0 = arith.constant 0 : index
    %c0_1 = arith.constant 0 : index
    %0 = vector.load %arg1[%c0, %c0_0, %c0_1] : memref<1x128x4xf32, #tpu.memory_space<vmem>>, vector<1x128x4xf32>
    %1 = vector.shape_cast %0 : vector<1x128x4xf32> to vector<128x4xf32>
    %c0_2 = arith.constant 0 : index
    %c0_3 = arith.constant 0 : index
    %c0_4 = arith.constant 0 : index
    %2 = vector.load %arg4[%c0_2, %c0_3, %c0_4] : memref<1x128x8xf32, #tpu.memory_space<vmem>>, vector<1x128x8xf32>
    %3 = vector.shape_cast %2 : vector<1x128x8xf32> to vector<128x8xf32>
    %4 = arith.truncf %1 : vector<128x4xf32> to vector<128x4xbf16>
    %5 = arith.truncf %3 : vector<128x8xf32> to vector<128x8xbf16>
    %c0_5 = arith.constant 0 : index
    %c0_6 = arith.constant 0 : index
    %6 = vector.load %arg5[%c0_5, %c0_6] : memref<4x8xbf16, #tpu.memory_space<vmem>>, vector<4x8xbf16>
    %cst = arith.constant dense<0.000000e+00> : vector<128x8xf32>
    %7 = tpu.matmul %4, %6, %cst {dimension_numbers = #tpu.dot_dimension_numbers<[1], [0], [0], [1], [0, 0, 1, 1], [], []>} : vector<128x4xbf16>, vector<4x8xbf16>, vector<128x8xf32> -> vector<128x8xf32>
    %c0_7 = arith.constant 0 : index
    %c0_8 = arith.constant 0 : index
    %8 = vector.load %arg6[%c0_7, %c0_8] : memref<1x8xf32, #tpu.memory_space<vmem>>, vector<1x8xf32>
    %9 = vector.broadcast %8 : vector<1x8xf32> to vector<128x8xf32>
    %10 = arith.addf %7, %9 : vector<128x8xf32>
    %11 = arith.truncf %10 : vector<128x8xf32> to vector<128x8xbf16>
    %c0_9 = arith.constant 0 : index
    %c0_10 = arith.constant 0 : index
    %12 = vector.load %arg7[%c0_9, %c0_10] : memref<8x4xbf16, #tpu.memory_space<vmem>>, vector<8x4xbf16>
    %cst_11 = arith.constant dense<0.000000e+00> : vector<128x4xf32>
    %13 = tpu.matmul %11, %12, %cst_11 {dimension_numbers = #tpu.dot_dimension_numbers<[1], [0], [0], [1], [0, 0, 1, 1], [], []>} : vector<128x8xbf16>, vector<8x4xbf16>, vector<128x4xf32> -> vector<128x4xf32>
    %c0_12 = arith.constant 0 : index
    %c0_13 = arith.constant 0 : index
    %14 = vector.load %arg8[%c0_12, %c0_13] : memref<8x4xbf16, #tpu.memory_space<vmem>>, vector<8x4xbf16>
    %cst_14 = arith.constant dense<0.000000e+00> : vector<128x4xf32>
    %15 = tpu.matmul %5, %14, %cst_14 {dimension_numbers = #tpu.dot_dimension_numbers<[1], [0], [0], [1], [0, 0, 1, 1], [], []>} : vector<128x8xbf16>, vector<8x4xbf16>, vector<128x4xf32> -> vector<128x4xf32>
    %16 = arith.addf %13, %15 : vector<128x4xf32>
    %c0_15 = arith.constant 0 : index
    %c0_16 = arith.constant 0 : index
    %17 = vector.load %arg9[%c0_15, %c0_16] : memref<1x4xf32, #tpu.memory_space<vmem>>, vector<1x4xf32>
    %18 = vector.broadcast %17 : vector<1x4xf32> to vector<128x4xf32>
    %19 = arith.addf %16, %18 : vector<128x4xf32>
    %20 = math.tanh %19 : vector<128x4xf32>
    %cst_17 = arith.constant 5.000000e-01 : f32
    %21 = vector.broadcast %cst_17 : f32 to vector<128x4xf32>
    %22 = arith.mulf %20, %21 : vector<128x4xf32>
    %c0_18 = arith.constant 0 : index
    %c0_19 = arith.constant 0 : index
    %23 = vector.load %arg10[%c0_18, %c0_19] : memref<128x128xbf16, #tpu.memory_space<vmem>>, vector<128x128xbf16>
    %cst_20 = arith.constant dense<0.000000e+00> : vector<128x8xf32>
    %24 = tpu.matmul %23, %11, %cst_20 {dimension_numbers = #tpu.dot_dimension_numbers<[1], [0], [0], [1], [0, 0, 1, 1], [], []>} : vector<128x128xbf16>, vector<128x8xbf16>, vector<128x8xf32> -> vector<128x8xf32>
    %c0_21 = arith.constant 0 : index
    %c0_22 = arith.constant 0 : index
    %25 = vector.load %arg10[%c0_21, %c0_22] : memref<128x128xbf16, #tpu.memory_space<vmem>>, vector<128x128xbf16>
    %cst_23 = arith.constant dense<0.000000e+00> : vector<128x8xf32>
    %26 = tpu.matmul %25, %5, %cst_23 {dimension_numbers = #tpu.dot_dimension_numbers<[1], [0], [0], [1], [0, 0, 1, 1], [], []>} : vector<128x128xbf16>, vector<128x8xbf16>, vector<128x8xf32> -> vector<128x8xf32>
    %c0_24 = arith.constant 0 : index
    %c0_25 = arith.constant 0 : index
    %27 = vector.load %arg11[%c0_24, %c0_25] : memref<128x128xbf16, #tpu.memory_space<vmem>>, vector<128x128xbf16>
    %cst_26 = arith.constant dense<0.000000e+00> : vector<128x8xf32>
    %28 = tpu.matmul %27, %11, %cst_26 {dimension_numbers = #tpu.dot_dimension_numbers<[1], [0], [0], [1], [0, 0, 1, 1], [], []>} : vector<128x128xbf16>, vector<128x8xbf16>, vector<128x8xf32> -> vector<128x8xf32>
    %c0_27 = arith.constant 0 : index
    %c0_28 = arith.constant 0 : index
    %29 = vector.load %arg11[%c0_27, %c0_28] : memref<128x128xbf16, #tpu.memory_space<vmem>>, vector<128x128xbf16>
    %cst_29 = arith.constant dense<0.000000e+00> : vector<128x8xf32>
    %30 = tpu.matmul %29, %5, %cst_29 {dimension_numbers = #tpu.dot_dimension_numbers<[1], [0], [0], [1], [0, 0, 1, 1], [], []>} : vector<128x128xbf16>, vector<128x8xbf16>, vector<128x8xf32> -> vector<128x8xf32>
    %c0_30 = arith.constant 0 : index
    %c0_31 = arith.constant 0 : index
    %31 = vector.load %arg12[%c0_30, %c0_31] : memref<128x128xf32, #tpu.memory_space<vmem>>, vector<128x128xf32>
    %c0_32 = arith.constant 0 : index
    %c0_33 = arith.constant 0 : index
    %32 = vector.load %arg13[%c0_32, %c0_33] : memref<128x128xf32, #tpu.memory_space<vmem>>, vector<128x128xf32>
    %c0_34 = arith.constant 0 : index
    %c0_35 = arith.constant 0 : index
    %33 = vector.load %arg14[%c0_34, %c0_35] : memref<4x128xbf16, #tpu.memory_space<vmem>>, vector<4x128xbf16>
    %c0_36 = arith.constant 0 : index
    %c0_37 = arith.constant 0 : index
    %34 = vector.load %arg15[%c0_36, %c0_37] : memref<4x128xbf16, #tpu.memory_space<vmem>>, vector<4x128xbf16>
    %c0_38 = arith.constant 0 : index
    %c0_39 = arith.constant 0 : index
    %35 = vector.load %arg16[%c0_38, %c0_39] : memref<4x128xbf16, #tpu.memory_space<vmem>>, vector<4x128xbf16>
    %c0_40 = arith.constant 0 : index
    %c0_41 = arith.constant 0 : index
    %36 = vector.load %arg17[%c0_40, %c0_41] : memref<4x128xbf16, #tpu.memory_space<vmem>>, vector<4x128xbf16>
    %37 = vector.extract_strided_slice %24 {offsets = [0, 0], sizes = [128, 4], strides = [1, 1]} : vector<128x8xf32> to vector<128x4xf32>
    %38 = arith.truncf %37 : vector<128x4xf32> to vector<128x4xbf16>
    %cst_42 = arith.constant dense<0.000000e+00> : vector<128x128xf32>
    %39 = tpu.matmul %38, %33, %cst_42 {dimension_numbers = #tpu.dot_dimension_numbers<[1], [0], [0], [1], [0, 0, 1, 1], [], []>} : vector<128x4xbf16>, vector<4x128xbf16>, vector<128x128xf32> -> vector<128x128xf32>
    %40 = vector.extract_strided_slice %26 {offsets = [0, 0], sizes = [128, 4], strides = [1, 1]} : vector<128x8xf32> to vector<128x4xf32>
    %41 = arith.truncf %40 : vector<128x4xf32> to vector<128x4xbf16>
    %cst_43 = arith.constant dense<0.000000e+00> : vector<128x128xf32>
    %42 = tpu.matmul %41, %34, %cst_43 {dimension_numbers = #tpu.dot_dimension_numbers<[1], [0], [0], [1], [0, 0, 1, 1], [], []>} : vector<128x4xbf16>, vector<4x128xbf16>, vector<128x128xf32> -> vector<128x128xf32>
    %43 = arith.addf %39, %42 : vector<128x128xf32>
    %44 = arith.addf %43, %31 : vector<128x128xf32>
    %45 = vector.extract_strided_slice %28 {offsets = [0, 0], sizes = [128, 4], strides = [1, 1]} : vector<128x8xf32> to vector<128x4xf32>
    %46 = arith.truncf %45 : vector<128x4xf32> to vector<128x4xbf16>
    %cst_44 = arith.constant dense<0.000000e+00> : vector<128x128xf32>
    %47 = tpu.matmul %46, %35, %cst_44 {dimension_numbers = #tpu.dot_dimension_numbers<[1], [0], [0], [1], [0, 0, 1, 1], [], []>} : vector<128x4xbf16>, vector<4x128xbf16>, vector<128x128xf32> -> vector<128x128xf32>
    %48 = vector.extract_strided_slice %30 {offsets = [0, 0], sizes = [128, 4], strides = [1, 1]} : vector<128x8xf32> to vector<128x4xf32>
    %49 = arith.truncf %48 : vector<128x4xf32> to vector<128x4xbf16>
    %cst_45 = arith.constant dense<0.000000e+00> : vector<128x128xf32>
    %50 = tpu.matmul %49, %36, %cst_45 {dimension_numbers = #tpu.dot_dimension_numbers<[1], [0], [0], [1], [0, 0, 1, 1], [], []>} : vector<128x4xbf16>, vector<4x128xbf16>, vector<128x128xf32> -> vector<128x128xf32>
    %51 = arith.addf %47, %50 : vector<128x128xf32>
    %52 = arith.addf %51, %32 : vector<128x128xf32>
    %cst_46 = arith.constant dense<0xFF800000> : vector<128xf32>
    %53 = vector.multi_reduction <maximumf>, %44, %cst_46 [1] : vector<128x128xf32> to vector<128xf32>
    %54 = vector.shape_cast %53 : vector<128xf32> to vector<128x1xf32>
    %55 = vector.broadcast %54 : vector<128x1xf32> to vector<128x128xf32>
    %56 = arith.subf %44, %55 : vector<128x128xf32>
    %57 = math.exp %56 : vector<128x128xf32>
    %cst_47 = arith.constant dense<0.000000e+00> : vector<128xf32>
    %58 = vector.multi_reduction <add>, %57, %cst_47 [1] : vector<128x128xf32> to vector<128xf32>
    %59 = vector.shape_cast %58 : vector<128xf32> to vector<128x1xf32>
    %cst_48 = arith.constant dense<0xFF800000> : vector<128xf32>
    %60 = vector.multi_reduction <maximumf>, %52, %cst_48 [1] : vector<128x128xf32> to vector<128xf32>
    %61 = vector.shape_cast %60 : vector<128xf32> to vector<128x1xf32>
    %62 = vector.broadcast %61 : vector<128x1xf32> to vector<128x128xf32>
    %63 = arith.subf %52, %62 : vector<128x128xf32>
    %64 = math.exp %63 : vector<128x128xf32>
    %cst_49 = arith.constant dense<0.000000e+00> : vector<128xf32>
    %65 = vector.multi_reduction <add>, %64, %cst_49 [1] : vector<128x128xf32> to vector<128xf32>
    %66 = vector.shape_cast %65 : vector<128xf32> to vector<128x1xf32>
    %c0_50 = arith.constant 0 : index
    %c0_51 = arith.constant 0 : index
    %c0_52 = arith.constant 0 : index
    %67 = vector.load %arg2[%c0_50, %c0_51, %c0_52] : memref<1x2x128xf32, #tpu.memory_space<vmem>>, vector<1x1x128xf32>
    %68 = vector.shape_cast %67 : vector<1x1x128xf32> to vector<1x128xf32>
    %c0_53 = arith.constant 0 : index
    %c0_54 = arith.constant 0 : index
    %c0_55 = arith.constant 0 : index
    %69 = vector.load %arg3[%c0_53, %c0_54, %c0_55] : memref<1x2x128xf32, #tpu.memory_space<vmem>>, vector<1x1x128xf32>
    %70 = vector.shape_cast %69 : vector<1x1x128xf32> to vector<1x128xf32>
    %71 = vector.broadcast %68 : vector<1x128xf32> to vector<128x128xf32>
    %72 = arith.mulf %57, %71 : vector<128x128xf32>
    %cst_56 = arith.constant dense<0.000000e+00> : vector<128xf32>
    %73 = vector.multi_reduction <add>, %72, %cst_56 [1] : vector<128x128xf32> to vector<128xf32>
    %74 = vector.shape_cast %73 : vector<128xf32> to vector<128x1xf32>
    %75 = tpu.reciprocal %59 {approx = true} : vector<128x1xf32> -> vector<128x1xf32>
    %76 = arith.mulf %74, %75 : vector<128x1xf32>
    %77 = vector.broadcast %70 : vector<1x128xf32> to vector<128x128xf32>
    %78 = arith.mulf %64, %77 : vector<128x128xf32>
    %cst_57 = arith.constant dense<0.000000e+00> : vector<128xf32>
    %79 = vector.multi_reduction <add>, %78, %cst_57 [1] : vector<128x128xf32> to vector<128xf32>
    %80 = vector.shape_cast %79 : vector<128xf32> to vector<128x1xf32>
    %81 = tpu.reciprocal %66 {approx = true} : vector<128x1xf32> -> vector<128x1xf32>
    %82 = arith.mulf %80, %81 : vector<128x1xf32>
    %83 = vector.extract_strided_slice %22 {offsets = [0, 0], sizes = [128, 1], strides = [1, 1]} : vector<128x4xf32> to vector<128x1xf32>
    %84 = arith.addf %76, %83 : vector<128x1xf32>
    %c0_58 = arith.constant 0 : index
    %c0_59 = arith.constant 0 : index
    %c0_60 = arith.constant 0 : index
    %85 = vector.load %arg36[%c0_58, %c0_59, %c0_60] : memref<1x128x4xf32, #tpu.memory_space<vmem>>, vector<1x128x1xf32>
    %86 = vector.shape_cast %85 : vector<1x128x1xf32> to vector<128x1xf32>
    %87 = vector.shape_cast %84 : vector<128x1xf32> to vector<1x128x1xf32>
    tpu.vector_store %arg36[%c0_58, %c0_59, %c0_60], %87 {strides = array<i32>} : memref<1x128x4xf32, #tpu.memory_space<vmem>>, vector<1x128x1xf32>,
    %88 = vector.extract_strided_slice %22 {offsets = [0, 1], sizes = [128, 1], strides = [1, 1]} : vector<128x4xf32> to vector<128x1xf32>
    %89 = arith.addf %82, %88 : vector<128x1xf32>
    %c0_61 = arith.constant 0 : index
    %c0_62 = arith.constant 0 : index
    %c1 = arith.constant 1 : index
    %90 = vector.load %arg36[%c0_61, %c0_62, %c1] : memref<1x128x4xf32, #tpu.memory_space<vmem>>, vector<1x128x1xf32>
    %91 = vector.shape_cast %90 : vector<1x128x1xf32> to vector<128x1xf32>
    %92 = vector.shape_cast %89 : vector<128x1xf32> to vector<1x128x1xf32>
    tpu.vector_store %arg36[%c0_61, %c0_62, %c1], %92 {strides = array<i32>} : memref<1x128x4xf32, #tpu.memory_space<vmem>>, vector<1x128x1xf32>,
    %93 = vector.extract_strided_slice %24 {offsets = [0, 4], sizes = [128, 4], strides = [1, 1]} : vector<128x8xf32> to vector<128x4xf32>
    %94 = arith.truncf %93 : vector<128x4xf32> to vector<128x4xbf16>
    %cst_63 = arith.constant dense<0.000000e+00> : vector<128x128xf32>
    %95 = tpu.matmul %94, %33, %cst_63 {dimension_numbers = #tpu.dot_dimension_numbers<[1], [0], [0], [1], [0, 0, 1, 1], [], []>} : vector<128x4xbf16>, vector<4x128xbf16>, vector<128x128xf32> -> vector<128x128xf32>
    %96 = vector.extract_strided_slice %26 {offsets = [0, 4], sizes = [128, 4], strides = [1, 1]} : vector<128x8xf32> to vector<128x4xf32>
    %97 = arith.truncf %96 : vector<128x4xf32> to vector<128x4xbf16>
    %cst_64 = arith.constant dense<0.000000e+00> : vector<128x128xf32>
    %98 = tpu.matmul %97, %34, %cst_64 {dimension_numbers = #tpu.dot_dimension_numbers<[1], [0], [0], [1], [0, 0, 1, 1], [], []>} : vector<128x4xbf16>, vector<4x128xbf16>, vector<128x128xf32> -> vector<128x128xf32>
    %99 = arith.addf %95, %98 : vector<128x128xf32>
    %100 = arith.addf %99, %31 : vector<128x128xf32>
    %101 = vector.extract_strided_slice %28 {offsets = [0, 4], sizes = [128, 4], strides = [1, 1]} : vector<128x8xf32> to vector<128x4xf32>
    %102 = arith.truncf %101 : vector<128x4xf32> to vector<128x4xbf16>
    %cst_65 = arith.constant dense<0.000000e+00> : vector<128x128xf32>
    %103 = tpu.matmul %102, %35, %cst_65 {dimension_numbers = #tpu.dot_dimension_numbers<[1], [0], [0], [1], [0, 0, 1, 1], [], []>} : vector<128x4xbf16>, vector<4x128xbf16>, vector<128x128xf32> -> vector<128x128xf32>
    %104 = vector.extract_strided_slice %30 {offsets = [0, 4], sizes = [128, 4], strides = [1, 1]} : vector<128x8xf32> to vector<128x4xf32>
    %105 = arith.truncf %104 : vector<128x4xf32> to vector<128x4xbf16>
    %cst_66 = arith.constant dense<0.000000e+00> : vector<128x128xf32>
    %106 = tpu.matmul %105, %36, %cst_66 {dimension_numbers = #tpu.dot_dimension_numbers<[1], [0], [0], [1], [0, 0, 1, 1], [], []>} : vector<128x4xbf16>, vector<4x128xbf16>, vector<128x128xf32> -> vector<128x128xf32>
    %107 = arith.addf %103, %106 : vector<128x128xf32>
    %108 = arith.addf %107, %32 : vector<128x128xf32>
    %cst_67 = arith.constant dense<0xFF800000> : vector<128xf32>
    %109 = vector.multi_reduction <maximumf>, %100, %cst_67 [1] : vector<128x128xf32> to vector<128xf32>
    %110 = vector.shape_cast %109 : vector<128xf32> to vector<128x1xf32>
    %111 = vector.broadcast %110 : vector<128x1xf32> to vector<128x128xf32>
    %112 = arith.subf %100, %111 : vector<128x128xf32>
    %113 = math.exp %112 : vector<128x128xf32>
    %cst_68 = arith.constant dense<0.000000e+00> : vector<128xf32>
    %114 = vector.multi_reduction <add>, %113, %cst_68 [1] : vector<128x128xf32> to vector<128xf32>
    %115 = vector.shape_cast %114 : vector<128xf32> to vector<128x1xf32>
    %cst_69 = arith.constant dense<0xFF800000> : vector<128xf32>
    %116 = vector.multi_reduction <maximumf>, %108, %cst_69 [1] : vector<128x128xf32> to vector<128xf32>
    %117 = vector.shape_cast %116 : vector<128xf32> to vector<128x1xf32>
    %118 = vector.broadcast %117 : vector<128x1xf32> to vector<128x128xf32>
    %119 = arith.subf %108, %118 : vector<128x128xf32>
    %120 = math.exp %119 : vector<128x128xf32>
    %cst_70 = arith.constant dense<0.000000e+00> : vector<128xf32>
    %121 = vector.multi_reduction <add>, %120, %cst_70 [1] : vector<128x128xf32> to vector<128xf32>
    %122 = vector.shape_cast %121 : vector<128xf32> to vector<128x1xf32>
    %c0_71 = arith.constant 0 : index
    %c1_72 = arith.constant 1 : index
    %c0_73 = arith.constant 0 : index
    %123 = vector.load %arg2[%c0_71, %c1_72, %c0_73] : memref<1x2x128xf32, #tpu.memory_space<vmem>>, vector<1x1x128xf32>
    %124 = vector.shape_cast %123 : vector<1x1x128xf32> to vector<1x128xf32>
    %c0_74 = arith.constant 0 : index
    %c1_75 = arith.constant 1 : index
    %c0_76 = arith.constant 0 : index
    %125 = vector.load %arg3[%c0_74, %c1_75, %c0_76] : memref<1x2x128xf32, #tpu.memory_space<vmem>>, vector<1x1x128xf32>
    %126 = vector.shape_cast %125 : vector<1x1x128xf32> to vector<1x128xf32>
    %127 = vector.broadcast %124 : vector<1x128xf32> to vector<128x128xf32>
    %128 = arith.mulf %113, %127 : vector<128x128xf32>
    %cst_77 = arith.constant dense<0.000000e+00> : vector<128xf32>
    %129 = vector.multi_reduction <add>, %128, %cst_77 [1] : vector<128x128xf32> to vector<128xf32>
    %130 = vector.shape_cast %129 : vector<128xf32> to vector<128x1xf32>
    %131 = tpu.reciprocal %115 {approx = true} : vector<128x1xf32> -> vector<128x1xf32>
    %132 = arith.mulf %130, %131 : vector<128x1xf32>
    %133 = vector.broadcast %126 : vector<1x128xf32> to vector<128x128xf32>
    %134 = arith.mulf %120, %133 : vector<128x128xf32>
    %cst_78 = arith.constant dense<0.000000e+00> : vector<128xf32>
    %135 = vector.multi_reduction <add>, %134, %cst_78 [1] : vector<128x128xf32> to vector<128xf32>
    %136 = vector.shape_cast %135 : vector<128xf32> to vector<128x1xf32>
    %137 = tpu.reciprocal %122 {approx = true} : vector<128x1xf32> -> vector<128x1xf32>
    %138 = arith.mulf %136, %137 : vector<128x1xf32>
    %139 = vector.extract_strided_slice %22 {offsets = [0, 2], sizes = [128, 1], strides = [1, 1]} : vector<128x4xf32> to vector<128x1xf32>
    %140 = arith.addf %132, %139 : vector<128x1xf32>
    %c0_79 = arith.constant 0 : index
    %c0_80 = arith.constant 0 : index
    %c2 = arith.constant 2 : index
    %141 = vector.load %arg36[%c0_79, %c0_80, %c2] : memref<1x128x4xf32, #tpu.memory_space<vmem>>, vector<1x128x1xf32>
    %142 = vector.shape_cast %141 : vector<1x128x1xf32> to vector<128x1xf32>
    %143 = vector.shape_cast %140 : vector<128x1xf32> to vector<1x128x1xf32>
    tpu.vector_store %arg36[%c0_79, %c0_80, %c2], %143 {strides = array<i32>} : memref<1x128x4xf32, #tpu.memory_space<vmem>>, vector<1x128x1xf32>,
    %144 = vector.extract_strided_slice %22 {offsets = [0, 3], sizes = [128, 1], strides = [1, 1]} : vector<128x4xf32> to vector<128x1xf32>
    %145 = arith.addf %138, %144 : vector<128x1xf32>
    %c0_81 = arith.constant 0 : index
    %c0_82 = arith.constant 0 : index
    %c3 = arith.constant 3 : index
    %146 = vector.load %arg36[%c0_81, %c0_82, %c3] : memref<1x128x4xf32, #tpu.memory_space<vmem>>, vector<1x128x1xf32>
    %147 = vector.shape_cast %146 : vector<1x128x1xf32> to vector<128x1xf32>
    %148 = vector.shape_cast %145 : vector<128x1xf32> to vector<1x128x1xf32>
    tpu.vector_store %arg36[%c0_81, %c0_82, %c3], %148 {strides = array<i32>} : memref<1x128x4xf32, #tpu.memory_space<vmem>>, vector<1x128x1xf32>,
    %c0_83 = arith.constant 0 : index
    %c0_84 = arith.constant 0 : index
    %c0_85 = arith.constant 0 : index
    %149 = vector.load %arg36[%c0_83, %c0_84, %c0_85] : memref<1x128x4xf32, #tpu.memory_space<vmem>>, vector<1x128x4xf32>
    %150 = vector.shape_cast %149 : vector<1x128x4xf32> to vector<128x4xf32>
    %151 = arith.truncf %150 : vector<128x4xf32> to vector<128x4xbf16>
    %c0_86 = arith.constant 0 : index
    %c0_87 = arith.constant 0 : index
    %152 = vector.load %arg18[%c0_86, %c0_87] : memref<128x128xbf16, #tpu.memory_space<vmem>>, vector<128x128xbf16>
    %cst_88 = arith.constant dense<0.000000e+00> : vector<128x4xf32>
    %153 = tpu.matmul %152, %151, %cst_88 {dimension_numbers = #tpu.dot_dimension_numbers<[1], [0], [0], [1], [0, 0, 1, 1], [], []>} : vector<128x128xbf16>, vector<128x4xbf16>, vector<128x4xf32> -> vector<128x4xf32>
    %c0_89 = arith.constant 0 : index
    %c0_90 = arith.constant 0 : index
    %154 = vector.load %arg19[%c0_89, %c0_90] : memref<1x4xf32, #tpu.memory_space<vmem>>, vector<1x4xf32>
    %155 = vector.broadcast %154 : vector<1x4xf32> to vector<128x4xf32>
    %156 = arith.addf %153, %155 : vector<128x4xf32>
    %157 = arith.truncf %156 : vector<128x4xf32> to vector<128x4xbf16>
    %cst_91 = arith.constant dense<0.000000e+00> : vector<128x8xf32>
    %158 = tpu.matmul %152, %5, %cst_91 {dimension_numbers = #tpu.dot_dimension_numbers<[1], [0], [0], [1], [0, 0, 1, 1], [], []>} : vector<128x128xbf16>, vector<128x8xbf16>, vector<128x8xf32> -> vector<128x8xf32>
    %c0_92 = arith.constant 0 : index
    %c0_93 = arith.constant 0 : index
    %159 = vector.load %arg20[%c0_92, %c0_93] : memref<1x8xf32, #tpu.memory_space<vmem>>, vector<1x8xf32>
    %160 = vector.broadcast %159 : vector<1x8xf32> to vector<128x8xf32>
    %161 = arith.addf %158, %160 : vector<128x8xf32>
    %162 = arith.truncf %161 : vector<128x8xf32> to vector<128x8xbf16>
    %c0_94 = arith.constant 0 : index
    %c0_95 = arith.constant 0 : index
    %163 = vector.load %arg21[%c0_94, %c0_95] : memref<4x8xbf16, #tpu.memory_space<vmem>>, vector<4x8xbf16>
    %cst_96 = arith.constant dense<0.000000e+00> : vector<128x8xf32>
    %164 = tpu.matmul %157, %163, %cst_96 {dimension_numbers = #tpu.dot_dimension_numbers<[1], [0], [0], [1], [0, 0, 1, 1], [], []>} : vector<128x4xbf16>, vector<4x8xbf16>, vector<128x8xf32> -> vector<128x8xf32>
    %c0_97 = arith.constant 0 : index
    %c0_98 = arith.constant 0 : index
    %165 = vector.load %arg22[%c0_97, %c0_98] : memref<8x8xbf16, #tpu.memory_space<vmem>>, vector<8x8xbf16>
    %cst_99 = arith.constant dense<0.000000e+00> : vector<128x8xf32>
    %166 = tpu.matmul %162, %165, %cst_99 {dimension_numbers = #tpu.dot_dimension_numbers<[1], [0], [0], [1], [0, 0, 1, 1], [], []>} : vector<128x8xbf16>, vector<8x8xbf16>, vector<128x8xf32> -> vector<128x8xf32>
    %167 = arith.addf %164, %166 : vector<128x8xf32>
    %c0_100 = arith.constant 0 : index
    %c0_101 = arith.constant 0 : index
    %168 = vector.load %arg23[%c0_100, %c0_101] : memref<1x8xf32, #tpu.memory_space<vmem>>, vector<1x8xf32>
    %169 = vector.broadcast %168 : vector<1x8xf32> to vector<128x8xf32>
    %170 = arith.addf %167, %169 : vector<128x8xf32>
    %171 = arith.negf %170 : vector<128x8xf32>
    %172 = math.exp %171 : vector<128x8xf32>
    %cst_102 = arith.constant 1.000000e+00 : f32
    %173 = vector.broadcast %cst_102 : f32 to vector<128x8xf32>
    %174 = arith.addf %173, %172 : vector<128x8xf32>
    %175 = arith.divf %173, %174 : vector<128x8xf32>
    %c0_103 = arith.constant 0 : index
    %c0_104 = arith.constant 0 : index
    %176 = vector.load %arg24[%c0_103, %c0_104] : memref<128x128xbf16, #tpu.memory_space<vmem>>, vector<128x128xbf16>
    %cst_105 = arith.constant dense<0.000000e+00> : vector<128x4xf32>
    %177 = tpu.matmul %176, %151, %cst_105 {dimension_numbers = #tpu.dot_dimension_numbers<[1], [0], [0], [1], [0, 0, 1, 1], [], []>} : vector<128x128xbf16>, vector<128x4xbf16>, vector<128x4xf32> -> vector<128x4xf32>
    %c0_106 = arith.constant 0 : index
    %c0_107 = arith.constant 0 : index
    %178 = vector.load %arg25[%c0_106, %c0_107] : memref<1x4xf32, #tpu.memory_space<vmem>>, vector<1x4xf32>
    %179 = vector.broadcast %178 : vector<1x4xf32> to vector<128x4xf32>
    %180 = arith.addf %177, %179 : vector<128x4xf32>
    %181 = arith.truncf %180 : vector<128x4xf32> to vector<128x4xbf16>
    %cst_108 = arith.constant dense<0.000000e+00> : vector<128x8xf32>
    %182 = tpu.matmul %176, %5, %cst_108 {dimension_numbers = #tpu.dot_dimension_numbers<[1], [0], [0], [1], [0, 0, 1, 1], [], []>} : vector<128x128xbf16>, vector<128x8xbf16>, vector<128x8xf32> -> vector<128x8xf32>
    %c0_109 = arith.constant 0 : index
    %c0_110 = arith.constant 0 : index
    %183 = vector.load %arg26[%c0_109, %c0_110] : memref<1x8xf32, #tpu.memory_space<vmem>>, vector<1x8xf32>
    %184 = vector.broadcast %183 : vector<1x8xf32> to vector<128x8xf32>
    %185 = arith.addf %182, %184 : vector<128x8xf32>
    %186 = arith.truncf %185 : vector<128x8xf32> to vector<128x8xbf16>
    %c0_111 = arith.constant 0 : index
    %c0_112 = arith.constant 0 : index
    %187 = vector.load %arg27[%c0_111, %c0_112] : memref<4x8xbf16, #tpu.memory_space<vmem>>, vector<4x8xbf16>
    %cst_113 = arith.constant dense<0.000000e+00> : vector<128x8xf32>
    %188 = tpu.matmul %181, %187, %cst_113 {dimension_numbers = #tpu.dot_dimension_numbers<[1], [0], [0], [1], [0, 0, 1, 1], [], []>} : vector<128x4xbf16>, vector<4x8xbf16>, vector<128x8xf32> -> vector<128x8xf32>
    %c0_114 = arith.constant 0 : index
    %c0_115 = arith.constant 0 : index
    %189 = vector.load %arg28[%c0_114, %c0_115] : memref<8x8xbf16, #tpu.memory_space<vmem>>, vector<8x8xbf16>
    %cst_116 = arith.constant dense<0.000000e+00> : vector<128x8xf32>
    %190 = tpu.matmul %186, %189, %cst_116 {dimension_numbers = #tpu.dot_dimension_numbers<[1], [0], [0], [1], [0, 0, 1, 1], [], []>} : vector<128x8xbf16>, vector<8x8xbf16>, vector<128x8xf32> -> vector<128x8xf32>
    %191 = arith.addf %188, %190 : vector<128x8xf32>
    %c0_117 = arith.constant 0 : index
    %c0_118 = arith.constant 0 : index
    %192 = vector.load %arg29[%c0_117, %c0_118] : memref<1x8xf32, #tpu.memory_space<vmem>>, vector<1x8xf32>
    %193 = vector.broadcast %192 : vector<1x8xf32> to vector<128x8xf32>
    %194 = arith.addf %191, %193 : vector<128x8xf32>
    %195 = arith.negf %194 : vector<128x8xf32>
    %196 = math.exp %195 : vector<128x8xf32>
    %cst_119 = arith.constant 1.000000e+00 : f32
    %197 = vector.broadcast %cst_119 : f32 to vector<128x8xf32>
    %198 = arith.addf %197, %196 : vector<128x8xf32>
    %199 = arith.divf %197, %198 : vector<128x8xf32>
    %c0_120 = arith.constant 0 : index
    %c0_121 = arith.constant 0 : index
    %200 = vector.load %arg30[%c0_120, %c0_121] : memref<128x128xbf16, #tpu.memory_space<vmem>>, vector<128x128xbf16>
    %201 = arith.mulf %175, %3 : vector<128x8xf32>
    %202 = arith.truncf %201 : vector<128x8xf32> to vector<128x8xbf16>
    %cst_122 = arith.constant dense<0.000000e+00> : vector<128x8xf32>
    %203 = tpu.matmul %200, %11, %cst_122 {dimension_numbers = #tpu.dot_dimension_numbers<[1], [0], [0], [1], [0, 0, 1, 1], [], []>} : vector<128x128xbf16>, vector<128x8xbf16>, vector<128x8xf32> -> vector<128x8xf32>
    %c0_123 = arith.constant 0 : index
    %c0_124 = arith.constant 0 : index
    %204 = vector.load %arg31[%c0_123, %c0_124] : memref<1x8xf32, #tpu.memory_space<vmem>>, vector<1x8xf32>
    %205 = vector.broadcast %204 : vector<1x8xf32> to vector<128x8xf32>
    %206 = arith.addf %203, %205 : vector<128x8xf32>
    %207 = arith.truncf %206 : vector<128x8xf32> to vector<128x8xbf16>
    %cst_125 = arith.constant dense<0.000000e+00> : vector<128x8xf32>
    %208 = tpu.matmul %200, %202, %cst_125 {dimension_numbers = #tpu.dot_dimension_numbers<[1], [0], [0], [1], [0, 0, 1, 1], [], []>} : vector<128x128xbf16>, vector<128x8xbf16>, vector<128x8xf32> -> vector<128x8xf32>
    %c0_126 = arith.constant 0 : index
    %c0_127 = arith.constant 0 : index
    %209 = vector.load %arg32[%c0_126, %c0_127] : memref<1x8xf32, #tpu.memory_space<vmem>>, vector<1x8xf32>
    %210 = vector.broadcast %209 : vector<1x8xf32> to vector<128x8xf32>
    %211 = arith.addf %208, %210 : vector<128x8xf32>
    %212 = arith.truncf %211 : vector<128x8xf32> to vector<128x8xbf16>
    %c0_128 = arith.constant 0 : index
    %c0_129 = arith.constant 0 : index
    %213 = vector.load %arg33[%c0_128, %c0_129] : memref<8x8xbf16, #tpu.memory_space<vmem>>, vector<8x8xbf16>
    %cst_130 = arith.constant dense<0.000000e+00> : vector<128x8xf32>
    %214 = tpu.matmul %207, %213, %cst_130 {dimension_numbers = #tpu.dot_dimension_numbers<[1], [0], [0], [1], [0, 0, 1, 1], [], []>} : vector<128x8xbf16>, vector<8x8xbf16>, vector<128x8xf32> -> vector<128x8xf32>
    %c0_131 = arith.constant 0 : index
    %c0_132 = arith.constant 0 : index
    %215 = vector.load %arg34[%c0_131, %c0_132] : memref<8x8xbf16, #tpu.memory_space<vmem>>, vector<8x8xbf16>
    %cst_133 = arith.constant dense<0.000000e+00> : vector<128x8xf32>
    %216 = tpu.matmul %212, %215, %cst_133 {dimension_numbers = #tpu.dot_dimension_numbers<[1], [0], [0], [1], [0, 0, 1, 1], [], []>} : vector<128x8xbf16>, vector<8x8xbf16>, vector<128x8xf32> -> vector<128x8xf32>
    %217 = arith.addf %214, %216 : vector<128x8xf32>
    %c0_134 = arith.constant 0 : index
    %c0_135 = arith.constant 0 : index
    %218 = vector.load %arg35[%c0_134, %c0_135] : memref<1x8xf32, #tpu.memory_space<vmem>>, vector<1x8xf32>
    %219 = vector.broadcast %218 : vector<1x8xf32> to vector<128x8xf32>
    %220 = arith.addf %217, %219 : vector<128x8xf32>
    %221 = math.tanh %220 : vector<128x8xf32>
    %222 = arith.mulf %199, %3 : vector<128x8xf32>
    %cst_136 = arith.constant 1.000000e+00 : f32
    %223 = vector.broadcast %cst_136 : f32 to vector<128x8xf32>
    %224 = arith.subf %223, %199 : vector<128x8xf32>
    %225 = arith.mulf %224, %221 : vector<128x8xf32>
    %226 = arith.addf %222, %225 : vector<128x8xf32>
    %c0_137 = arith.constant 0 : index
    %c0_138 = arith.constant 0 : index
    %c0_139 = arith.constant 0 : index
    %227 = vector.load %arg37[%c0_137, %c0_138, %c0_139] : memref<1x128x8xf32, #tpu.memory_space<vmem>>, vector<1x128x8xf32>
    %228 = vector.shape_cast %227 : vector<1x128x8xf32> to vector<128x8xf32>
    %229 = vector.shape_cast %226 : vector<128x8xf32> to vector<1x128x8xf32>
    tpu.vector_store %arg37[%c0_137, %c0_138, %c0_139], %229 {strides = array<i32>} : memref<1x128x8xf32, #tpu.memory_space<vmem>>, vector<1x128x8xf32>,
    return
  }
  func.func @transform_0(%arg0: i32) -> (i32, i32, i32) {
    %c0_i32 = arith.constant 0 : i32
    %c0_i32_0 = arith.constant 0 : i32
    %c0_i32_1 = arith.constant 0 : i32
    return %arg0, %c0_i32, %c0_i32_0 : i32, i32, i32
  }
  func.func @transform_1(%arg0: i32) -> (i32, i32, i32) {
    %c0_i32 = arith.constant 0 : i32
    %c0_i32_0 = arith.constant 0 : i32
    %c0_i32_1 = arith.constant 0 : i32
    return %arg0, %c0_i32, %c0_i32_0 : i32, i32, i32
  }
  func.func @transform_2(%arg0: i32) -> (i32, i32, i32) {
    %c0_i32 = arith.constant 0 : i32
    %c0_i32_0 = arith.constant 0 : i32
    %c0_i32_1 = arith.constant 0 : i32
    return %arg0, %c0_i32, %c0_i32_0 : i32, i32, i32
  }
  func.func @transform_3(%arg0: i32) -> (i32, i32, i32) {
    %c0_i32 = arith.constant 0 : i32
    %c0_i32_0 = arith.constant 0 : i32
    %c0_i32_1 = arith.constant 0 : i32
    return %arg0, %c0_i32, %c0_i32_0 : i32, i32, i32
  }
  func.func @transform_4(%arg0: i32) -> (i32, i32) {
    %c0_i32 = arith.constant 0 : i32
    %c0_i32_0 = arith.constant 0 : i32
    %c0_i32_1 = arith.constant 0 : i32
    return %c0_i32, %c0_i32_0 : i32, i32
  }
  func.func @transform_5(%arg0: i32) -> (i32, i32) {
    %c0_i32 = arith.constant 0 : i32
    %c0_i32_0 = arith.constant 0 : i32
    %c0_i32_1 = arith.constant 0 : i32
    return %c0_i32, %c0_i32_0 : i32, i32
  }
  func.func @transform_6(%arg0: i32) -> (i32, i32) {
    %c0_i32 = arith.constant 0 : i32
    %c0_i32_0 = arith.constant 0 : i32
    %c0_i32_1 = arith.constant 0 : i32
    return %c0_i32, %c0_i32_0 : i32, i32
  }
  func.func @transform_7(%arg0: i32) -> (i32, i32) {
    %c0_i32 = arith.constant 0 : i32
    %c0_i32_0 = arith.constant 0 : i32
    %c0_i32_1 = arith.constant 0 : i32
    return %c0_i32, %c0_i32_0 : i32, i32
  }
  func.func @transform_8(%arg0: i32) -> (i32, i32) {
    %c0_i32 = arith.constant 0 : i32
    %c0_i32_0 = arith.constant 0 : i32
    %c0_i32_1 = arith.constant 0 : i32
    return %c0_i32, %c0_i32_0 : i32, i32
  }
  func.func @transform_9(%arg0: i32) -> (i32, i32) {
    %c0_i32 = arith.constant 0 : i32
    %c0_i32_0 = arith.constant 0 : i32
    %c0_i32_1 = arith.constant 0 : i32
    return %c0_i32, %c0_i32_0 : i32, i32
  }
  func.func @transform_10(%arg0: i32) -> (i32, i32) {
    %c0_i32 = arith.constant 0 : i32
    %c0_i32_0 = arith.constant 0 : i32
    %c0_i32_1 = arith.constant 0 : i32
    return %c0_i32, %c0_i32_0 : i32, i32
  }
  func.func @transform_11(%arg0: i32) -> (i32, i32) {
    %c0_i32 = arith.constant 0 : i32
    %c0_i32_0 = arith.constant 0 : i32
    %c0_i32_1 = arith.constant 0 : i32
    return %c0_i32, %c0_i32_0 : i32, i32
  }
  func.func @transform_12(%arg0: i32) -> (i32, i32) {
    %c0_i32 = arith.constant 0 : i32
    %c0_i32_0 = arith.constant 0 : i32
    %c0_i32_1 = arith.constant 0 : i32
    return %c0_i32, %c0_i32_0 : i32, i32
  }
  func.func @transform_13(%arg0: i32) -> (i32, i32) {
    %c0_i32 = arith.constant 0 : i32
    %c0_i32_0 = arith.constant 0 : i32
    %c0_i32_1 = arith.constant 0 : i32
    return %c0_i32, %c0_i32_0 : i32, i32
  }
  func.func @transform_14(%arg0: i32) -> (i32, i32) {
    %c0_i32 = arith.constant 0 : i32
    %c0_i32_0 = arith.constant 0 : i32
    %c0_i32_1 = arith.constant 0 : i32
    return %c0_i32, %c0_i32_0 : i32, i32
  }
  func.func @transform_15(%arg0: i32) -> (i32, i32) {
    %c0_i32 = arith.constant 0 : i32
    %c0_i32_0 = arith.constant 0 : i32
    %c0_i32_1 = arith.constant 0 : i32
    return %c0_i32, %c0_i32_0 : i32, i32
  }
  func.func @transform_16(%arg0: i32) -> (i32, i32) {
    %c0_i32 = arith.constant 0 : i32
    %c0_i32_0 = arith.constant 0 : i32
    %c0_i32_1 = arith.constant 0 : i32
    return %c0_i32, %c0_i32_0 : i32, i32
  }
  func.func @transform_17(%arg0: i32) -> (i32, i32) {
    %c0_i32 = arith.constant 0 : i32
    %c0_i32_0 = arith.constant 0 : i32
    %c0_i32_1 = arith.constant 0 : i32
    return %c0_i32, %c0_i32_0 : i32, i32
  }
  func.func @transform_18(%arg0: i32) -> (i32, i32) {
    %c0_i32 = arith.constant 0 : i32
    %c0_i32_0 = arith.constant 0 : i32
    %c0_i32_1 = arith.constant 0 : i32
    return %c0_i32, %c0_i32_0 : i32, i32
  }
  func.func @transform_19(%arg0: i32) -> (i32, i32) {
    %c0_i32 = arith.constant 0 : i32
    %c0_i32_0 = arith.constant 0 : i32
    %c0_i32_1 = arith.constant 0 : i32
    return %c0_i32, %c0_i32_0 : i32, i32
  }
  func.func @transform_20(%arg0: i32) -> (i32, i32) {
    %c0_i32 = arith.constant 0 : i32
    %c0_i32_0 = arith.constant 0 : i32
    %c0_i32_1 = arith.constant 0 : i32
    return %c0_i32, %c0_i32_0 : i32, i32
  }
  func.func @transform_21(%arg0: i32) -> (i32, i32) {
    %c0_i32 = arith.constant 0 : i32
    %c0_i32_0 = arith.constant 0 : i32
    %c0_i32_1 = arith.constant 0 : i32
    return %c0_i32, %c0_i32_0 : i32, i32
  }
  func.func @transform_22(%arg0: i32) -> (i32, i32) {
    %c0_i32 = arith.constant 0 : i32
    %c0_i32_0 = arith.constant 0 : i32
    %c0_i32_1 = arith.constant 0 : i32
    return %c0_i32, %c0_i32_0 : i32, i32
  }
  func.func @transform_23(%arg0: i32) -> (i32, i32) {
    %c0_i32 = arith.constant 0 : i32
    %c0_i32_0 = arith.constant 0 : i32
    %c0_i32_1 = arith.constant 0 : i32
    return %c0_i32, %c0_i32_0 : i32, i32
  }
  func.func @transform_24(%arg0: i32) -> (i32, i32) {
    %c0_i32 = arith.constant 0 : i32
    %c0_i32_0 = arith.constant 0 : i32
    %c0_i32_1 = arith.constant 0 : i32
    return %c0_i32, %c0_i32_0 : i32, i32
  }
  func.func @transform_25(%arg0: i32) -> (i32, i32) {
    %c0_i32 = arith.constant 0 : i32
    %c0_i32_0 = arith.constant 0 : i32
    %c0_i32_1 = arith.constant 0 : i32
    return %c0_i32, %c0_i32_0 : i32, i32
  }
  func.func @transform_26(%arg0: i32) -> (i32, i32) {
    %c0_i32 = arith.constant 0 : i32
    %c0_i32_0 = arith.constant 0 : i32
    %c0_i32_1 = arith.constant 0 : i32
    return %c0_i32, %c0_i32_0 : i32, i32
  }
  func.func @transform_27(%arg0: i32) -> (i32, i32) {
    %c0_i32 = arith.constant 0 : i32
    %c0_i32_0 = arith.constant 0 : i32
    %c0_i32_1 = arith.constant 0 : i32
    return %c0_i32, %c0_i32_0 : i32, i32
  }
  func.func @transform_28(%arg0: i32) -> (i32, i32) {
    %c0_i32 = arith.constant 0 : i32
    %c0_i32_0 = arith.constant 0 : i32
    %c0_i32_1 = arith.constant 0 : i32
    return %c0_i32, %c0_i32_0 : i32, i32
  }
  func.func @transform_29(%arg0: i32) -> (i32, i32) {
    %c0_i32 = arith.constant 0 : i32
    %c0_i32_0 = arith.constant 0 : i32
    %c0_i32_1 = arith.constant 0 : i32
    return %c0_i32, %c0_i32_0 : i32, i32
  }
  func.func @transform_30(%arg0: i32) -> (i32, i32) {
    %c0_i32 = arith.constant 0 : i32
    %c0_i32_0 = arith.constant 0 : i32
    %c0_i32_1 = arith.constant 0 : i32
    return %c0_i32, %c0_i32_0 : i32, i32
  }
  func.func @transform_31(%arg0: i32) -> (i32, i32) {
    %c0_i32 = arith.constant 0 : i32
    %c0_i32_0 = arith.constant 0 : i32
    %c0_i32_1 = arith.constant 0 : i32
    return %c0_i32, %c0_i32_0 : i32, i32
  }
  func.func @transform_32(%arg0: i32) -> (i32, i32) {
    %c0_i32 = arith.constant 0 : i32
    %c0_i32_0 = arith.constant 0 : i32
    %c0_i32_1 = arith.constant 0 : i32
    return %c0_i32, %c0_i32_0 : i32, i32
  }
  func.func @transform_33(%arg0: i32) -> (i32, i32) {
    %c0_i32 = arith.constant 0 : i32
    %c0_i32_0 = arith.constant 0 : i32
    %c0_i32_1 = arith.constant 0 : i32
    return %c0_i32, %c0_i32_0 : i32, i32
  }
  func.func @transform_34(%arg0: i32) -> (i32, i32) {
    %c0_i32 = arith.constant 0 : i32
    %c0_i32_0 = arith.constant 0 : i32
    %c0_i32_1 = arith.constant 0 : i32
    return %c0_i32, %c0_i32_0 : i32, i32
  }
  func.func @transform_35(%arg0: i32) -> (i32, i32, i32) {
    %c0_i32 = arith.constant 0 : i32
    %c0_i32_0 = arith.constant 0 : i32
    %c0_i32_1 = arith.constant 0 : i32
    return %arg0, %c0_i32, %c0_i32_0 : i32, i32, i32
  }
  func.func @transform_36(%arg0: i32) -> (i32, i32, i32) {
    %c0_i32 = arith.constant 0 : i32
    %c0_i32_0 = arith.constant 0 : i32
    %c0_i32_1 = arith.constant 0 : i32
    return %arg0, %c0_i32, %c0_i32_0 : i32, i32, i32
  }
}

</mosaic_0001>

<bundles_post_ra>
// kernel: tpu_custom_call.1
= control target key start
LH: loop header
LB: loop body
LE: loop exit
PB: predicated region body
PF: predicated region fallthrough
CT: control target
= control target key end

     0   :  { %s8765_s6 = smov 1   ;;  %s8766_s10 = smov 2   ;;  %s11203_s0 = inlined_call_operand.smem [shape: u32[37], index: -1, kind: input, shape index: {}] }
   0x1   :  { %s8815_s5 = sld [smem:[%s11203_s0]]   ;;  %s8767_s14 = smov 3  }
   0x2   :  { %s8820_s9 = sld [smem:[%s11203_s0 + %s8765_s6]]   ;;  %s8768_s18 = smov 4  }
   0x3   :  { %s8825_s13 = sld [smem:[%s11203_s0 + %s8766_s10]]   ;;  %s8769_s22 = smov 5  }
   0x4   :  { %s8830_s17 = sld [smem:[%s11203_s0 + %s8767_s14]]   ;;  %s8770_s26 = smov 6  }
   0x5   :  { %s8835_s21 = sld [smem:[%s11203_s0 + %s8768_s18]]   ;;  %s8771_s30 = smov 7  }
   0x6   :  { %s8840_s25 = sld [smem:[%s11203_s0 + %s8769_s22]]   ;;  %s8772_s4 = smov 8  }
   0x7   :  { %s8845_s29 = sld [smem:[%s11203_s0 + %s8770_s26]]   ;;  %s8773_s10 = smov 9  }
   0x8   :  { %11275 = sst [smem:[#allocation14_spill]] %s8820_s9  ;;  %s8774_s15 = smov 10  }
   0x9   :  { %s8850_s3 = sld [smem:[%s11203_s0 + %s8771_s30]]   ;;  %s8775_s20 = smov 11  }
   0xa   :  { %s8855_s8 = sld [smem:[%s11203_s0 + %s8772_s4]]   ;;  %s8776_s26 = smov 12  }
   0xb   :  { %11276 = sst [smem:[#allocation15_spill]] %s8835_s21  ;;  %s8777_s1 = smov 13  }
   0xc   :  { %s8860_s14 = sld [smem:[%s11203_s0 + %s8773_s10]]   ;;  %s8778_s7 = smov 14  }
   0xd   :  { %s8865_s19 = sld [smem:[%s11203_s0 + %s8774_s15]]   ;;  %s8779_s15 = smov 15  }
   0xe   :  { %s8870_s24 = sld [smem:[%s11203_s0 + %s8775_s20]]   ;;  %s8780_s22 = smov 16  }
   0xf   :  { %s8875_s30 = sld [smem:[%s11203_s0 + %s8776_s26]]   ;;  %s8781_s28 = smov 17  }
  0x10   :  { %11277 = sst [smem:[#allocation16_spill]] %s8855_s8 }
  0x11   :  { %s8880_s6 = sld [smem:[%s11203_s0 + %s8777_s1]]  }
  0x12   :  { %s8885_s12 = sld [smem:[%s11203_s0 + %s8778_s7]]   ;;  %s8782_s7 = smov 18  }
  0x13   :  { %s8890_s20 = sld [smem:[%s11203_s0 + %s8779_s15]]   ;;  %s8783_s15 = smov 19  }
  0x14   :  { %11278 = sst [smem:[#allocation17_spill]] %s8870_s24 }
  0x15   :  { %11279 = sst [smem:[#allocation18_spill]] %s8875_s30 }
  0x16   :  { %s8895_s27 = sld [smem:[%s11203_s0 + %s8780_s22]]   ;;  %s8784_s22 = smov 20  }
  0x17   :  { %11280 = sst [smem:[#allocation19_spill]] %s8880_s6 }
  0x18   :  { %s8900_s4 = sld [smem:[%s11203_s0 + %s8781_s28]]   ;;  %s8785_s28 = smov 21  }
  0x19   :  { %11281 = sst [smem:[#allocation20_spill]] %s8890_s20 }
  0x1a   :  { %s8905_s30 = sld [smem:[%s11203_s0 + %s8782_s7]]   ;;  %s8786_s7 = smov 22  }
  0x1b   :  { %s8910_s24 = sld [smem:[%s11203_s0 + %s8783_s15]]   ;;  %s8787_s15 = smov 23  }
  0x1c   :  { %s8915_s20 = sld [smem:[%s11203_s0 + %s8784_s22]]   ;;  %s8788_s22 = smov 24  }
  0x1e   :  { %11282 = sst [smem:[#allocation21_spill]] %s8900_s4 }
  0x1f   :  { %s8920_s4 = sld [smem:[%s11203_s0 + %s8785_s28]]   ;;  %s8789_s28 = smov 25  }
  0x20   :  { %11283 = sst [smem:[#allocation22_spill]] %s8905_s30 }
  0x21   :  { %11284 = sst [smem:[#allocation23_spill]] %s8910_s24 }
  0x22   :  { %11285 = sst [smem:[#allocation24_spill]] %s8915_s20 }
  0x23   :  { %s8925_s30 = sld [smem:[%s11203_s0 + %s8786_s7]]   ;;  %s8790_s7 = smov 26  }
  0x24   :  { %s8930_s24 = sld [smem:[%s11203_s0 + %s8787_s15]]   ;;  %s8791_s15 = smov 27  }
  0x25   :  { %11286 = sst [smem:[#allocation25_spill]] %s8920_s4 }
  0x26   :  { %s8935_s20 = sld [smem:[%s11203_s0 + %s8788_s22]]   ;;  %s8792_s22 = smov 28  }
  0x27   :  { %s8940_s4 = sld [smem:[%s11203_s0 + %s8789_s28]]   ;;  %s8793_s28 = smov 29  }
  0x29   :  { %11287 = sst [smem:[#allocation26_spill]] %s8925_s30 }
  0x2a   :  { %11288 = sst [smem:[#allocation27_spill]] %s8930_s24 }
  0x2b   :  { %s8945_s30 = sld [smem:[%s11203_s0 + %s8790_s7]]   ;;  %s8794_s7 = smov 30  }
  0x2c   :  { %11289 = sst [smem:[#allocation28_spill]] %s8935_s20 }
  0x2d   :  { %11290 = sst [smem:[#allocation29_spill]] %s8940_s4 }
  0x2e   :  { %s8950_s24 = sld [smem:[%s11203_s0 + %s8791_s15]]   ;;  %s8795_s15 = smov 31  }
  0x2f   :  { %s8955_s20 = sld [smem:[%s11203_s0 + %s8792_s22]]   ;;  %s8796_s22 = smov 32  }
  0x30   :  { %s8960_s4 = sld [smem:[%s11203_s0 + %s8793_s28]]   ;;  %s8797_s28 = smov 33  }
  0x31   :  { %11291 = sst [smem:[#allocation30_spill]] %s8945_s30 }
  0x32   :  { %s8965_s30 = sld [smem:[%s11203_s0 + %s8794_s7]]   ;;  %s8798_s7 = smov 34  }
  0x34   :  { %11292 = sst [smem:[#allocation31_spill]] %s8950_s24 }
  0x35   :  { %11293 = sst [smem:[#allocation32_spill]] %s8955_s20 }
  0x36   :  { %11294 = sst [smem:[#allocation33_spill]] %s8960_s4 }
  0x37   :  { %s8970_s24 = sld [smem:[%s11203_s0 + %s8795_s15]]   ;;  %s8799_s15 = smov 35  }
  0x38   :  { %11295 = sst [smem:[#allocation34_spill]] %s8965_s30 }
  0x39   :  { %s8975_s20 = sld [smem:[%s11203_s0 + %s8796_s22]]   ;;  %s8800_s22 = smov 36  }
  0x3a   :  { %s8980_s4 = sld [smem:[%s11203_s0 + %s8797_s28]]  }
  0x3b   :  { %s8985_s30 = sld [smem:[%s11203_s0 + %s8798_s7]]  }
  0x3d   :  { %11296 = sst [smem:[#allocation35_spill]] %s8970_s24 }
  0x3e   :  { %s8990_s24 = sld [smem:[%s11203_s0 + %s8799_s15]]  }
  0x3f   :  { %11297 = sst [smem:[#allocation36_spill]] %s8975_s20 }
  0x40   :  { %s8995_s20 = sld [smem:[%s11203_s0 + %s8800_s22]]  }
  0x46   :  { %11298 = sst [smem:[#allocation37_spill]] %s8995_s20 }
  0x47   :  { %79 = vsyncpa [#allocation3], 0 }
  0x48   :  { %81 = vsyncpa [#allocation3 + $0x1], 0 }
  0x49   :  { %82 = vsyncpa [#allocation5], 0 }
  0x4a   :  { %84 = vsyncpa [#allocation5 + $0x1], 0 }
  0x4b   :  { %85 = vsyncpa [#allocation8], 0  ;;  %s8997_s28 = smov 0   ;;  %s8999_s1 = smov 0  }
  0x4c   :  { %s9001_s2 = smov 0   ;;  %s9003_s7 = smov 0  }
  0x4d LB: > { %s11299_s9 = sld [smem:[#allocation14_spill]]  ;;  %s11300_s21 = sld [smem:[#allocation15_spill]]  ;;  %s8763_s7 = sphi %s9003_s7, %s11471_s7   ;;  %s8759_s2 = sphi %s9001_s2, %s11468_s2   ;;  %s8755_s1 = sphi %s8999_s1, %s11470_s1   ;;  %s8751_s28 = sphi %s8997_s28, %s11469_s28  }
  0x4e   : > { %s11301_s8 = sld [smem:[#allocation16_spill]]  ;;  %s11302_s6 = sld [smem:[#allocation19_spill]] }
  0x4f   : > { %11303 = sst [smem:[#allocation38_spill]] %s8759_s2  ;;  %s9016_s0 = sadd.s32 4294967295, %s8763_s7  }
  0x50   : > { %p137_p0 = scmp.ne.s32.totalorder %s8755_s1, %s8751_s28  ;;  %p11209_p1 = scmp.eq.s32.totalorder %s9016_s0, 0 }
  0x51   : > { %p6616_p2 = scmp.ge.s32.totalorder %s8763_s7, 1  ;;  %p903_p3 = scmp.lt.s32.totalorder %s8763_s7, 3 }
  0x52   : > { %p9024_p4 = por %p11209_p1, %p137_p0  ;;  %s8801_s15 = smov [#allocation6]  }
  0x53   : > { %p9028_p5 = pnand %p6616_p2, %p903_p3  ;;  %s916_s16 = sshll.u32 %s8801_s15, 4  ;;  %s917_s16 = int_to_ptr.vmem [resolvable:$true] %s916_s16 }
  0x54   : > { %s11304_s10 = scalar_select %p9024_p4, 1, 0 }
  0x55   : > { %s11305_s11 = scalar_select %p9028_p5, 1, 0 }
  0x56   : > { %p7971_p6 = pneg %p9028_p5  ;;  %s8802_s18 = smov [#allocation7]  }
  0x57   : > { %s936_s22 = sshll.u32 %s8802_s18, 4  ;;  %s8803_s26 = smov [#allocation9]   ;;  %s9040_s22 = int_to_ptr.vmem [resolvable:$true] %s936_s22 }
  0x58   : > { %p9036_p7 = pnand %p7971_p6, %p11209_p1  ;;  %s959_s28 = sshll.u32 %s8803_s26, 4  ;;  %s9042_s28 = int_to_ptr.vmem [resolvable:$true] %s959_s28 }
  0x59   : > { %s8573_s20 = scalar_lea.hbm %s11300_s21, 32 }
  0x5a   : > { %p8574_p8 = scmp.ne.s32.totalorder %s11300_s21, %s8573_s20  ;;  %p9048_p9 = pneg %p9036_p7 }
  0x5b   : > { %p8580_p12 = scmp.lt.u32.totalorder %s8573_s20, %s11300_s21 }
  0x5c   : > { %p8576_p10 = pnand %p9048_p9, %p8574_p8 }
  0x5e   : > { %p8577_p11 = pneg %p8576_p10 }
  0x60   : > { %p8582_p13 = pnand %p8580_p12, %p8577_p11 }
  0x62   : > { %8585 = shalt.err (!%p8582_p13)
}
  0x63   : > { %s8586_s18 = scalar_lea.vmem %s917_s16, 32  ;;  %p8594_p6 = scmp.lt.s32.totalorder %s917_s16, %s917_s16 }
  0x64   : > { %p8587_p0 = scmp.ne.s32.totalorder %s917_s16, %s8586_s18  ;;  %p8595_p1 = scmp.lt.s32.totalorder %s8586_s18, %s8586_s18 }
  0x66   : > { %p8589_p2 = pnand %p8587_p0, %p9048_p9  ;;  %p8596_p4 = por %p8595_p1, %p8594_p6 }
  0x68   : > { %p8590_p3 = pneg %p8589_p2 }
  0x6a   : > { %p8597_p5 = pnand %p8596_p4, %p8590_p3 }
  0x6c   : > { %8600 = shalt.err (!%p8597_p5)
}
  0x6d   : > { %7974 = dma.hbm_to_vmem [thread:$0]  (!%p9036_p7), %s11300_s21, 32, %s917_s16, [#allocation5]  }
  0x6e   : > { %s8601_s20 = scalar_lea.hbm %s11301_s8, 16 }
  0x6f   : > { %p8602_p8 = scmp.ne.s32.totalorder %s11301_s8, %s8601_s20  ;;  %p8608_p12 = scmp.lt.u32.totalorder %s8601_s20, %s11301_s8 }
  0x71   : > { %p8604_p10 = pnand %p8602_p8, %p9048_p9 }
  0x73   : > { %p8605_p11 = pneg %p8604_p10 }
  0x75   : > { %p8610_p13 = pnand %p8608_p12, %p8605_p11 }
  0x77   : > { %8613 = shalt.err (!%p8610_p13)
}
  0x78   : > { %s8614_s26 = scalar_lea.vmem %s9040_s22, 16  ;;  %s8621_s18 = scalar_lea.vmem %s9040_s22, 32 }
  0x79   : > { %p8615_p1 = scmp.ne.s32.totalorder %s9040_s22, %s8614_s26  ;;  %p8622_p0 = scmp.lt.s32.totalorder %s9040_s22, %s9040_s22 }
  0x7a   : > { %p8623_p2 = scmp.lt.s32.totalorder %s8621_s18, %s8614_s26 }
  0x7b   : > { %p8617_p4 = pnand %p8615_p1, %p9048_p9 }
  0x7c   : > { %p8624_p3 = por %p8623_p2, %p8622_p0 }
  0x7d   : > { %p8618_p5 = pneg %p8617_p4 }
  0x7f   : > { %p8625_p6 = pnand %p8624_p3, %p8618_p5 }
  0x81   : > { %8628 = shalt.err (!%p8625_p6)
}
  0x82   : > { %7977 = dma.hbm_to_vmem [thread:$0]  (!%p9036_p7), %s11301_s8, 16, %s9040_s22, [#allocation8]  }
  0x83   : > { %s8629_s16 = scalar_lea.hbm %s11302_s6, 32 }
  0x84   : > { %p8630_p8 = scmp.ne.s32.totalorder %s11302_s6, %s8629_s16  ;;  %p8636_p12 = scmp.lt.u32.totalorder %s8629_s16, %s11302_s6 }
  0x86   : > { %p8632_p10 = pnand %p8630_p8, %p9048_p9 }
  0x88   : > { %p8633_p11 = pneg %p8632_p10 }
  0x8a   : > { %p8638_p13 = pnand %p8636_p12, %p8633_p11 }
  0x8c   : > { %8641 = shalt.err (!%p8638_p13)
}
  0x8d   : > { %s8642_s20 = scalar_lea.vmem %s9042_s28, 32  ;;  %p8650_p0 = scmp.lt.s32.totalorder %s9042_s28, %s9042_s28 }
  0x8e   : > { %p8643_p1 = scmp.ne.s32.totalorder %s9042_s28, %s8642_s20  ;;  %p8651_p2 = scmp.lt.s32.totalorder %s8642_s20, %s8642_s20 }
  0x90   : > { %p8645_p4 = pnand %p8643_p1, %p9048_p9  ;;  %p8652_p3 = por %p8651_p2, %p8650_p0 }
  0x92   : > { %p8646_p5 = pneg %p8645_p4 }
  0x94   : > { %p8653_p6 = pnand %p8652_p3, %p8646_p5 }
  0x96   : > { %8656 = shalt.err (!%p8653_p6)
}
  0x97   : > { %7980 = dma.hbm_to_vmem [thread:$0]  (!%p9036_p7), %s11302_s6, 32, %s9042_s28, [#allocation8]  }
  0x98   : > { %s9092_s22 = sadd.s32 1, %s8763_s7   ;;  %s124_s23 = sadd.s32 1, %s8759_s2 }
  0x99   : > { %s121_s15 = ssub.s32 %s8763_s7, %s9092_s22  ;;  %p131_p8 = scmp.ne.s32.totalorder %s8759_s2, %s8755_s1 }
  0x9a   : > { %p122_p9 = scmp.eq.s32.totalorder %s121_s15, 0  ;;  %p132_p10 = scmp.eq.s32.totalorder %s8763_s7, 0 }
  0x9b   : > { %p7991_p11 = scmp.lt.s32.totalorder %s8763_s7, 2  ;;  %s1041_s18 = sand.u32 1, %s8759_s2  }
  0x9c   : > { %s9102_s26 = scalar_select %p122_p9, %s8759_s2, %s124_s23  }
  0x9d   : > { %p133_p12 = por %p132_p10, %p131_p8  ;;  %s9105_s16 = sshll.u32 %s1041_s18, 1 }
  0x9e   : > { %11308 = sst [smem:[#allocation39_spill]] %s9102_s26  ;;  %s6622_s28 = sshll.u32 %s8763_s7, 5 }
  0x9f   : > { %s9109_s20 = scalar_lea.hbm %s11299_s9, %s6622_s28  ;;  %s1045_s6 = scalar_lea.vmem [#allocation2], %s9105_s16 }
  0xa0   : > { %s1052_s15 = sshll.u32 %s1045_s6, 4  ;;  %p9114_p7 = pnand %p7991_p11, %p133_p12  ;;  %s9112_s15 = int_to_ptr.vmem [resolvable:$true] %s1052_s15 }
  0xa1   : > { %s9119_s8 = scalar_lea.hbm %s8825_s13, %s6622_s28  ;;  %s1042_s26 = scalar_lea.sflag [#allocation3], %s1041_s18 }
  0xa2   : > { %s8657_s2 = scalar_lea.hbm %s9109_s20, 32  ;;  %p8659_p1 = pneg %p9114_p7 }
  0xa3   : > { %p8658_p13 = scmp.ne.s32.totalorder %s9109_s20, %s8657_s2  ;;  %s8662_s6 = scalar_lea.hbm %s11299_s9, 64 }
  0xa4   : > { %p8663_p0 = scmp.lt.u32.totalorder %s9109_s20, %s11299_s9  ;;  %p8664_p2 = scmp.lt.u32.totalorder %s8662_s6, %s8657_s2 }
  0xa5   : > { %p8660_p4 = pnand %p8659_p1, %p8658_p13  ;;  %p8666_p6 = scmp.lt.u32.totalorder %s8657_s2, %s9109_s20 }
  0xa6   : > { %p8665_p3 = por %p8664_p2, %p8663_p0 }
  0xa7   : > { %p8661_p5 = pneg %p8660_p4 }
  0xa8   : > { %p8667_p9 = por %p8666_p6, %p8665_p3 }
  0xaa   : > { %p8668_p8 = pnand %p8667_p9, %p8661_p5 }
  0xac   : > { %8671 = shalt.err (!%p8668_p8)
}
  0xad   : > { %s8672_s18 = scalar_lea.vmem %s9112_s15, 32  ;;  %s8804_s28 = smov [#allocation2]  }
  0xae   : > { %p8673_p10 = scmp.ne.s32.totalorder %s9112_s15, %s8672_s18  ;;  %s8677_s21 = sshll.u32 %s8804_s28, 4  ;;  %s8678_s21 = int_to_ptr.vmem [resolvable:$false] %s8677_s21 }
  0xaf   : > { %s8679_s9 = scalar_lea.vmem %s8678_s21, 64  ;;  %p8680_p13 = scmp.lt.s32.totalorder %s9112_s15, %s8678_s21 }
  0xb0   : > { %p8675_p11 = pnand %p8673_p10, %p8659_p1  ;;  %p8681_p4 = scmp.lt.s32.totalorder %s8679_s9, %s8672_s18 }
  0xb2   : > { %p8676_p12 = pneg %p8675_p11  ;;  %p8682_p0 = por %p8681_p4, %p8680_p13 }
  0xb4   : > { %p8683_p2 = pnand %p8682_p0, %p8676_p12 }
  0xb6   : > { %8686 = shalt.err (!%p8683_p2)
}
  0xb7   : > { %7984 = dma.hbm_to_vmem [thread:$0]  (!%p9114_p7), %s9109_s20, 32, %s9112_s15, %s1042_s26  }
  0xb8   : > { %s1063_s2 = scalar_lea.vmem [#allocation4], %s9105_s16  ;;  %s11310_s9 = sand.u32 1, %s8763_s7  }
  0xb9   : > { %s1070_s21 = sshll.u32 %s1063_s2, 4  ;;  %s1060_s6 = scalar_lea.sflag [#allocation5], %s11310_s9  ;;  %s1071_s21 = int_to_ptr.vmem [resolvable:$true] %s1070_s21 }
  0xba   : > { %s8687_s18 = scalar_lea.hbm %s9119_s8, 32  ;;  %s8692_s28 = scalar_lea.hbm %s8825_s13, 64 }
  0xbb   : > { %p8688_p5 = scmp.ne.s32.totalorder %s9119_s8, %s8687_s18  ;;  %p8693_p9 = scmp.lt.u32.totalorder %s9119_s8, %s8825_s13 }
  0xbc   : > { %p8694_p8 = scmp.lt.u32.totalorder %s8692_s28, %s8687_s18  ;;  %p8696_p11 = scmp.lt.u32.totalorder %s8687_s18, %s9119_s8 }
  0xbd   : > { %p8690_p3 = pnand %p8688_p5, %p8659_p1 }
  0xbe   : > { %p8695_p10 = por %p8694_p8, %p8693_p9 }
  0xbf   : > { %p8691_p6 = pneg %p8690_p3 }
  0xc0   : > { %p8697_p12 = por %p8696_p11, %p8695_p10 }
  0xc2   : > { %p8698_p13 = pnand %p8697_p12, %p8691_p6 }
  0xc4   : > { %8701 = shalt.err (!%p8698_p13)
}
  0xc5   : > { %s8702_s26 = scalar_lea.vmem %s1071_s21, 32  ;;  %s8805_s7 = smov [#allocation4]  }
  0xc6   : > { %p8703_p4 = scmp.ne.s32.totalorder %s1071_s21, %s8702_s26  ;;  %s8707_s16 = sshll.u32 %s8805_s7, 4  ;;  %s8708_s16 = int_to_ptr.vmem [resolvable:$false] %s8707_s16 }
  0xc7   : > { %s8709_s20 = scalar_lea.vmem %s8708_s16, 64  ;;  %p8710_p5 = scmp.lt.s32.totalorder %s1071_s21, %s8708_s16 }
  0xc8   : > { %p8705_p0 = pnand %p8703_p4, %p8659_p1  ;;  %p8711_p3 = scmp.lt.s32.totalorder %s8709_s20, %s8702_s26 }
  0xca   : > { %p8706_p2 = pneg %p8705_p0  ;;  %p8712_p8 = por %p8711_p3, %p8710_p5 }
  0xcc   : > { %p8713_p9 = pnand %p8712_p8, %p8706_p2 }
  0xce   : > { %8716 = shalt.err (!%p8713_p9)
}
  0xcf   : > { %7987 = dma.hbm_to_vmem [thread:$0]  (!%p9114_p7), %s9119_s8, 32, %s1071_s21, %s1060_s6  }
  0xd0   : > { %p11311_p6 = scmp.ne.s32.totalorder %s11305_s11, 0 }
  0xd2   : > { %1087 = sbr.rel (%p11311_p6) target bundleno = 2607 (0xa2f), region = 160 }
  0xd9   : > { %s1089_s15 = sand.u32 1, %s8755_s1   ;;  %p11312_p1 = scmp.ne.s32.totalorder %s11304_s10, 0 }
  0xda   : > { %s9164_s2 = sshll.u32 %s1089_s15, 1  ;;  %s1090_s9 = scalar_lea.sflag [#allocation3], %s1089_s15 }
  0xdb   : > { %s1093_s18 = scalar_lea.vmem [#allocation2], %s9164_s2 }
  0xdc   : > { %8734 = dma.done.wait (%p11312_p1), %s1090_s9, 32  }
  0xdd   : > { %8736 = vsyncadd (%p11312_p1), %s1090_s9, 4294967264  ;;  %s1098_s8 = sand.u32 1, %s9016_s0   ;;  %s9173_s11 = scalar_lea.vmem [#allocation4], %s9164_s2 }
  0xde   : > { %s1099_s23 = scalar_lea.sflag [#allocation5], %s1098_s8 }
  0xdf   : > { %8738 = dma.done.wait (%p11312_p1), %s1099_s23, 32  }
  0xe0   : > { %8740 = vsyncadd (%p11312_p1), %s1099_s23, 4294967264  ;;  %p11313_p7 = scmp.eq.s32.totalorder %s9016_s0, 0 }
  0xe2   : > { %8742 = dma.done.wait (%p11313_p7), [#allocation5], 32   ;;  %p11314_p10 = pmov %p11313_p7 }
  0xe3   : > { %p11315_p11 = pmov %p11313_p7 }
  0xe4   : > { %8744 = vsyncadd (%p11314_p10), [#allocation5], 4294967264 }
  0xe5   : > { %8746 = dma.done.wait (%p11315_p11), [#allocation8], 48   ;;  %p11316_p12 = pmov %p11313_p7 }
  0xe6   : > { %p1223_p13 = scmp.lt.s32.totalorder %s9016_s0, 1  ;;  %vm1325_vm0 = vcmask 1041408   ;;  %v1292_v0 = vld [vmem:[#allocation6] sm:$0x3]  ;;  %vm1300_vm1 = vcmask 31744   ;;  %vm1461_vm2 = vcmask 1043456  }
  0xe7   : > { %8748 = vsyncadd (%p11316_p12), [#allocation8], 4294967248  ;;  %7937 = vmatprep.subr.msk.bf16.mxu0 %vm1325_vm0, %v1292_v0  ;;  %v1327_v3 = vsel %vm1325_vm0, %v1292_v0, 0  ;;  %v1435_v15 = vld [vmem:[%s8850_s3] sm:$0xf]  ;;  %vm1436_vm3 = vcmask 64512  }
  0xe8   : > { %s11473_s0 = smov (!%p1223_p13, %s9016_s0), 1  ;;  %7182 = vmatpush3.bf16.msra.mxu0 %v1327_v3  ;;  %7938 = vmatprep.subr.msk.bf16.mxu1 %vm1461_vm2, %v1435_v15  ;;  %v1463_v16 = vsel %vm1461_vm2, %v1435_v15, 0  ;;  %v1434_v52 = vld [vmem:[%s8845_s29] sm:$0xf]  ;;  %s8806_s6 = smov 124   ;;  %vm3263_vm4 = vcmask 7168  }
  0xe9   : > { %s9189_s21 = sshll.u32 %s11473_s0, 7  ;;  %7200 = vmatpush3.bf16.msra.mxu1 %v1463_v16  ;;  %v1587_v53 = vsel %vm1461_vm2, %v1434_v52, 0  ;;  %v9280_v54 = vld [vmem:[%s8860_s14] sm:$0xff]   ;;  %s11349_s28 = sld [smem:[#allocation20_spill]]  ;;  %vm3296_vm5 = vcmask 15368   ;;  %vm4335_vm6 = vcmask 23568  }
  0xea   : > { %s9193_s10 = scalar_lea.vmem %s8815_s5, %s9189_s21  ;;  %s9205_s0 = scalar_lea.vmem %s8830_s17, %s9189_s21  ;;  %7939 = vmatprep.subr.msk.bf16.mxu1 %vm1461_vm2, %v1434_v52  ;;  %v9284_v56 = vld [vmem:[%s8840_s25] ss:$0 sm:$0xff]  ;;  %v8081_v52 = vld [vmem:[%s8865_s19 + $0x30] sm:$0xff]   ;;  %vm4368_vm7 = vcmask 31768  }
  0xeb   : > { %v1244_v1 = vld [vmem:[%s9193_s10] sm:$0xff]  ;;  %v1245_v2 = vld [vmem:[%s9193_s10 + $0x8] sm:$0xff]  ;;  %v1246_v5 = vld [vmem:[%s9193_s10 + $0x10] sm:$0xff]  ;;  %s11350_s26 = sld [smem:[#allocation17_spill]]  ;;  %s11351_s7 = sld [smem:[#allocation18_spill]] }
  0xec   : > { %v1276_v4 = vpack.c.bf16 %v1245_v2, %v1244_v1  ;;  %v1247_v6 = vld [vmem:[%s9193_s10 + $0x18] sm:$0xff]  ;;  %v1248_v7 = vld [vmem:[%s9193_s10 + $0x20] sm:$0xff]  ;;  %v1249_v9 = vld [vmem:[%s9193_s10 + $0x28] sm:$0xff]  ;;  %s10240_s20 = scalar_lea.vmem %s8990_s24, %s9189_s21  ;;  %s11415_s15 = sld [smem:[#allocation21_spill]] }
  0xed   : > { %v1277_v8 = vpack.c.bf16 %v1247_v6, %v1246_v5  ;;  %v1278_v10 = vpack.c.bf16 %v1249_v9, %v1248_v7  ;;  %v1250_v11 = vld [vmem:[%s9193_s10 + $0x30] sm:$0xff]  ;;  %v1251_v12 = vld [vmem:[%s9193_s10 + $0x38] sm:$0xff]  ;;  %v1252_v13 = vld [vmem:[%s9193_s10 + $0x40] sm:$0xff]  ;;  %s11418_s2 = sld [smem:[#allocation27_spill]]  ;;  %s11421_s8 = sld [smem:[#allocation24_spill]] }
  0xee   : > { %7183 = vmatprep.mubr.msk.bf16.mxu0 %vm1300_vm1, %v1276_v4  ;;  %v1253_v14 = vld [vmem:[%s9193_s10 + $0x48] sm:$0xff]  ;;  %v1260_v17 = vld [vmem:[%s9205_s0] sm:$0xff]  ;;  %v1262_v19 = vld [vmem:[%s9205_s0 + $0x10] sm:$0xff]  ;;  %v1279_v26 = vpack.c.bf16 %v1251_v12, %v1250_v11  ;;  %s11427_s23 = sld [smem:[#allocation23_spill]] }
  0xef   : > { %7184 = vmatmul.mubr.msk.bf16.vlgmr.msra.gmra.mrb[0].mxu0 %vm1300_vm1, %v1277_v8  ;;  %v1261_v18 = vld [vmem:[%s9205_s0 + $0x8] sm:$0xff]  ;;  %v1263_v21 = vld [vmem:[%s9205_s0 + $0x18] sm:$0xff]  ;;  %v1264_v22 = vld [vmem:[%s9205_s0 + $0x20] sm:$0xff]  ;;  %v1280_v29 = vpack.c.bf16 %v1253_v14, %v1252_v13 }
  0xf0   : > { %7187 = vmatprep.mubr.msk.bf16.mxu0 %vm1300_vm1, %v1278_v10  ;;  %v9220_v20 = vpack.c.bf16 %v1261_v18, %v1260_v17  ;;  %v1265_v23 = vld [vmem:[%s9205_s0 + $0x28] sm:$0xff]  ;;  %v9225_v24 = vpack.c.bf16 %v1263_v21, %v1262_v19  ;;  %v1266_v27 = vld [vmem:[%s9205_s0 + $0x30] sm:$0xff]  ;;  %v1267_v28 = vld [vmem:[%s9205_s0 + $0x38] sm:$0xff] }
  0xf1   : > { %v9227_v25 = vpack.c.bf16 %v1265_v23, %v1264_v22  ;;  %v1268_v30 = vld [vmem:[%s9205_s0 + $0x40] sm:$0xff]  ;;  %v1269_v31 = vld [vmem:[%s9205_s0 + $0x48] sm:$0xff]  ;;  %v1254_v32 = vld [vmem:[%s9193_s10 + $0x50] sm:$0xff]  ;;  %v9245_v36 = vpack.c.bf16 %v1267_v28, %v1266_v27  ;;  %s11352_s16 = smov %s11351_s7 }
  0xf2   : > { %11317 = vst [vmem:[#allocation40_spill] sm:$0xff] %v9220_v20  ;;  %11318 = vst [vmem:[#allocation41_spill] sm:$0xff] %v9225_v24  ;;  %7201 = vmatprep.mubr.msk.bf16.mxu1 %vm1436_vm3, %v9220_v20  ;;  %v1255_v33 = vld [vmem:[%s9193_s10 + $0x58] sm:$0xff]  ;;  %v1256_v34 = vld [vmem:[%s9193_s10 + $0x60] sm:$0xff]  ;;  %v9247_v37 = vpack.c.bf16 %v1269_v31, %v1268_v30 }
  0xf3   : > { %11319 = vst [vmem:[#allocation42_spill] sm:$0xff] %v9227_v25  ;;  %7202 = vmatmul.mubr.msk.bf16.vlgmr.msra.gmra.mrb[0].mxu1 %vm1436_vm3, %v9225_v24  ;;  %v1257_v35 = vld [vmem:[%s9193_s10 + $0x68] sm:$0xff]  ;;  %11320 = vst [vmem:[#allocation43_spill] sm:$0xff] %v9245_v36  ;;  %v1281_v38 = vpack.c.bf16 %v1255_v33, %v1254_v32  ;;  %v1270_v39 = vld [vmem:[%s9205_s0 + $0x50] sm:$0xff]  ;;  %s11419_s9 = smov %s11418_s2 }
  0xf4   : > { %7205 = vmatprep.mubr.msk.bf16.mxu1 %vm1436_vm3, %v9227_v25  ;;  %11321 = vst [vmem:[#allocation44_spill] sm:$0xff] %v9247_v37  ;;  %v1271_v40 = vld [vmem:[%s9205_s0 + $0x58] sm:$0xff]  ;;  %v1282_v41 = vpack.c.bf16 %v1257_v35, %v1256_v34  ;;  %v1258_v42 = vld [vmem:[%s9193_s10 + $0x70] sm:$0xff]  ;;  %v1272_v46 = vld [vmem:[%s9205_s0 + $0x60] sm:$0xff]  ;;  %7218 = vmatpush3.bf16.msra.mxu1 %v1587_v53 }
  0xf5   : > { %v1259_v43 = vld [vmem:[%s9193_s10 + $0x78] sm:$0xff]  ;;  %v9259_v44 = vpack.c.bf16 %v1271_v40, %v1270_v39  ;;  %v1273_v47 = vld [vmem:[%s9205_s0 + $0x68] sm:$0xff]  ;;  %v1274_v49 = vld [vmem:[%s9205_s0 + $0x70] sm:$0xff]  ;;  %s11440_s10 = sld [smem:[#allocation33_spill]] }
  0xf6   : > { %v1283_v45 = vpack.c.bf16 %v1259_v43, %v1258_v42  ;;  %v9266_v48 = vpack.c.bf16 %v1273_v47, %v1272_v46  ;;  %v1275_v50 = vld [vmem:[%s9205_s0 + $0x78] sm:$0xff]  ;;  %v9358_v35 = vld [vmem:[%s8865_s19] sm:$0xff]   ;;  %v9370_v39 = vld [vmem:[%s8865_s19 + $0x8] sm:$0xff]  }
  0xf7   : > { %7188 = vmatmul.mubr.msk.bf16.gmra.mrb[4].mxu0 %vm1300_vm1, %v1279_v26  ;;  %11322 = vst [vmem:[#allocation45_spill] sm:$0xff] %v9259_v44  ;;  %v9270_v51 = vpack.c.bf16 %v1275_v50, %v1274_v49  ;;  %v8069_v40 = vld [vmem:[%s8860_s14 + $0x10] sm:$0xff]   ;;  %v8070_v42 = vld [vmem:[%s8860_s14 + $0x18] sm:$0xff]   ;;  %v8079_v46 = vld [vmem:[%s8865_s19 + $0x20] sm:$0xff]  }
  0xf8   : > { %7191 = vmatprep.mubr.msk.bf16.mxu0 %vm1300_vm1, %v1280_v29  ;;  %11323 = vst [vmem:[#allocation46_spill] sm:$0xff] %v9266_v48  ;;  %v8078_v43 = vld [vmem:[%s8865_s19 + $0x18] sm:$0xff]   ;;  %v8072_v47 = vld [vmem:[%s8860_s14 + $0x28] sm:$0xff]   ;;  %v8073_v49 = vld [vmem:[%s8860_s14 + $0x30] sm:$0xff]  }
  0xf9   : > { %11324 = vst [vmem:[#allocation47_spill] sm:$0xff] %v9270_v51  ;;  %v8080_v50 = vld [vmem:[%s8865_s19 + $0x28] sm:$0xff]   ;;  %v8074_v53 = vld [vmem:[%s8860_s14 + $0x38] sm:$0xff]  }
  0xfb   : > { %7206 = vmatmul.mubr.msk.bf16.gmra.mrb[4].mxu1 %vm1436_vm3, %v9245_v36 }
  0xfc   : > { %7209 = vmatprep.mubr.msk.bf16.mxu1 %vm1436_vm3, %v9247_v37 }
  0xff   : > { %7192 = vmatmul.mubr.msk.bf16.gmra.mrb[8].mxu0 %vm1300_vm1, %v1281_v38  ;;  %v8068_v38 = vld [vmem:[%s8860_s14 + $0x8] sm:$0xff]  }
 0x100   : > { %7195 = vmatprep.mubr.msk.bf16.mxu0 %vm1300_vm1, %v1282_v41  ;;  %v9377_v41 = vld [vmem:[%s8865_s19 + $0x10] sm:$0xff]  }
 0x103   : > { %7210 = vmatmul.mubr.msk.bf16.gmra.mrb[8].mxu1 %vm1436_vm3, %v9259_v44 }
 0x104   : > { %7213 = vmatprep.mubr.msk.bf16.mxu1 %vm1436_vm3, %v9266_v48 }
 0x107   : > { %7196 = vmatmul.mubr.msk.bf16.gmra.mrb[12].mxu0 %vm1300_vm1, %v1283_v45  ;;  %v8071_v45 = vld [vmem:[%s8860_s14 + $0x20] sm:$0xff]  }
 0x108   : > { %7251 = vmatprep.mubr.bf16.mxu0 %v9280_v54 }
 0x10b   : > { %7214 = vmatmul.mubr.msk.bf16.gmra.mrb[12].mxu1 %vm1436_vm3, %v9270_v51 }
 0x1c2   : > { %v7185_v55 = vpop.f32.mrb[0].mxu0 }
 0x1c3   : > { %v1363_v57 = vpop.f32.mrb[1].mxu0  ;;  %v1372_v59 = vadd.f32 %v7185_v55, %v9284_v56  ;;  %v8082_v55 = vld [vmem:[%s8865_s19 + $0x38] sm:$0xff]  }
 0x1c4   : > { %v7186_v58 = vpop.f32.mrb[2].mxu0  ;;  %v1364_v62 = vadd.f32 %v9284_v56, %v1363_v57  ;;  %v9439_v57 = vld [vmem:[#allocation9] sm:$0x3] }
 0x1c5   : > { %v1375_v60 = vadd.f32 %v7186_v58, %v9284_v56  ;;  %v1366_v61 = vpop.f32.mrb[3].mxu0  ;;  %v9442_v58 = vld [vmem:[%s8895_s27] sm:$0x3] }
 0x1c6   : > { %v1367_v63 = vadd.f32 %v9284_v56, %v1366_v61 }
 0x1c7   : > { %v9290_v0 = vpack.c.bf16 %v1375_v60, %v1372_v59 }
 0x1c8   : > { %v9292_v1 = vpack.c.bf16 %v1367_v63, %v1364_v62 }
 0x1c9   : > { %11325 = vst [vmem:[#allocation48_spill] sm:$0xff] %v9290_v0 }
 0x1ca   : > { %11326 = vst [vmem:[#allocation49_spill] sm:$0xff] %v9292_v1  ;;  %v7189_v2 = vpop.f32.mrb[4].mxu0  ;;  %7219 = vmatprep.mubr.msk.bf16.mxu1 %vm1436_vm3, %v9292_v1  ;;  %7235 = vmatprep.subr.bf16.mxu0 %v9292_v1 }
 0x1cb   : > { %7299 = vmatprep.subr.bf16.mxu1 %v9292_v1  ;;  %v1379_v3 = vpop.f32.mrb[5].mxu0  ;;  %7220 = vmatmul.mubr.msk.bf16.vlgmr.msra.gmra.mrb[0].mxu1 %vm1436_vm3, %v9290_v0  ;;  %v1388_v5 = vadd.f32 %v7189_v2, %v9284_v56 }
 0x1cc   : > { %7236 = vmatpush3.bf16.msra.mxu0 %v9292_v1  ;;  %7300 = vmatpush3.bf16.msra.mxu1 %v9292_v1  ;;  %v7190_v4 = vpop.f32.mrb[6].mxu0  ;;  %v1380_v8 = vadd.f32 %v9284_v56, %v1379_v3 }
 0x1cd   : > { %v1391_v6 = vadd.f32 %v7190_v4, %v9284_v56  ;;  %7237 = vmatprep.subr.bf16.mxu0 %v9290_v0  ;;  %7301 = vmatprep.subr.bf16.mxu1 %v9290_v0  ;;  %v1382_v7 = vpop.f32.mrb[7].mxu0 }
 0x1ce   : > { %v1383_v9 = vadd.f32 %v9284_v56, %v1382_v7 }
 0x1cf   : > { %v9308_v10 = vpack.c.bf16 %v1391_v6, %v1388_v5 }
 0x1d0   : > { %v9310_v11 = vpack.c.bf16 %v1383_v9, %v1380_v8  ;;  %7238 = vmatpush3.bf16.msra.mxu0 %v9290_v0  ;;  %7302 = vmatpush3.bf16.msra.mxu1 %v9290_v0 }
 0x1d1   : > { %11327 = vst [vmem:[#allocation50_spill] sm:$0xff] %v9308_v10 }
 0x1d2   : > { %11328 = vst [vmem:[#allocation51_spill] sm:$0xff] %v9310_v11  ;;  %v7193_v12 = vpop.f32.mrb[8].mxu0  ;;  %7223 = vmatprep.mubr.msk.bf16.mxu1 %vm1436_vm3, %v9310_v11  ;;  %7239 = vmatprep.subr.bf16.mxu0 %v9310_v11 }
 0x1d3   : > { %7303 = vmatprep.subr.bf16.mxu1 %v9310_v11  ;;  %v1395_v13 = vpop.f32.mrb[9].mxu0  ;;  %7224 = vmatmul.mubr.msk.bf16.gmra.mrb[4].mxu1 %vm1436_vm3, %v9308_v10  ;;  %v1404_v15 = vadd.f32 %v7193_v12, %v9284_v56  ;;  %v6664_v12 = vld [vmem:[#allocation7] ss:$0 sm:$0xff] }
 0x1d4   : > { %7240 = vmatpush3.bf16.msra.mxu0 %v9310_v11  ;;  %7304 = vmatpush3.bf16.msra.mxu1 %v9310_v11  ;;  %v7194_v14 = vpop.f32.mrb[10].mxu0  ;;  %v1396_v18 = vadd.f32 %v9284_v56, %v1395_v13 }
 0x1d5   : > { %v1407_v16 = vadd.f32 %v7194_v14, %v9284_v56  ;;  %7241 = vmatprep.subr.bf16.mxu0 %v9308_v10  ;;  %7305 = vmatprep.subr.bf16.mxu1 %v9308_v10  ;;  %v1398_v17 = vpop.f32.mrb[11].mxu0 }
 0x1d6   : > { %v1399_v19 = vadd.f32 %v9284_v56, %v1398_v17 }
 0x1d7   : > { %v9328_v21 = vpack.c.bf16 %v1407_v16, %v1404_v15 }
 0x1d8   : > { %v9330_v22 = vpack.c.bf16 %v1399_v19, %v1396_v18  ;;  %7242 = vmatpush3.bf16.msra.mxu0 %v9308_v10  ;;  %7306 = vmatpush3.bf16.msra.mxu1 %v9308_v10 }
 0x1d9   : > { %11329 = vst [vmem:[#allocation52_spill] sm:$0xff] %v9328_v21 }
 0x1da   : > { %11330 = vst [vmem:[#allocation53_spill] sm:$0xff] %v9330_v22  ;;  %v7197_v23 = vpop.f32.mrb[12].mxu0  ;;  %7227 = vmatprep.mubr.msk.bf16.mxu1 %vm1436_vm3, %v9330_v22  ;;  %7243 = vmatprep.subr.bf16.mxu0 %v9330_v22 }
 0x1db   : > { %7307 = vmatprep.subr.bf16.mxu1 %v9330_v22  ;;  %v1411_v26 = vpop.f32.mrb[13].mxu0  ;;  %7228 = vmatmul.mubr.msk.bf16.gmra.mrb[8].mxu1 %vm1436_vm3, %v9328_v21  ;;  %v1420_v28 = vadd.f32 %v7197_v23, %v9284_v56 }
 0x1dc   : > { %7244 = vmatpush3.bf16.msra.mxu0 %v9330_v22  ;;  %7308 = vmatpush3.bf16.msra.mxu1 %v9330_v22  ;;  %v7198_v27 = vpop.f32.mrb[14].mxu0  ;;  %v1412_v31 = vadd.f32 %v9284_v56, %v1411_v26 }
 0x1dd   : > { %v1423_v29 = vadd.f32 %v7198_v27, %v9284_v56  ;;  %7245 = vmatprep.subr.bf16.mxu0 %v9328_v21  ;;  %7309 = vmatprep.subr.bf16.mxu1 %v9328_v21  ;;  %v1414_v30 = vpop.f32.mrb[15].mxu0 }
 0x1de   : > { %v1415_v32 = vadd.f32 %v9284_v56, %v1414_v30 }
 0x1df   : > { %v9348_v33 = vpack.c.bf16 %v1423_v29, %v1420_v28 }
 0x1e0   : > { %v9350_v34 = vpack.c.bf16 %v1415_v32, %v1412_v31  ;;  %7246 = vmatpush3.bf16.msra.mxu0 %v9328_v21  ;;  %7310 = vmatpush3.bf16.msra.mxu1 %v9328_v21 }
 0x1e1   : > { %11331 = vst [vmem:[#allocation54_spill] sm:$0xff] %v9348_v33 }
 0x1e2   : > { %11332 = vst [vmem:[#allocation55_spill] sm:$0xff] %v9350_v34  ;;  %7231 = vmatprep.mubr.msk.bf16.mxu1 %vm1436_vm3, %v9350_v34  ;;  %7247 = vmatprep.subr.bf16.mxu0 %v9350_v34 }
 0x1e3   : > { %7311 = vmatprep.subr.bf16.mxu1 %v9350_v34  ;;  %7232 = vmatmul.mubr.msk.bf16.gmra.mrb[12].mxu1 %vm1436_vm3, %v9348_v33 }
 0x1e4   : > { %7248 = vmatpush3.bf16.msra.mxu0 %v9350_v34  ;;  %7312 = vmatpush3.bf16.msra.mxu1 %v9350_v34 }
 0x1e5   : > { %7249 = vmatprep.subr.bf16.mxu0 %v9348_v33  ;;  %7313 = vmatprep.subr.bf16.mxu1 %v9348_v33 }
 0x1e6   : > { %7315 = vmatprep.mubr.bf16.mxu1 %v9358_v35 }
 0x1e8   : > { %7250 = vmatpush3.bf16.msra.mxu0 %v9348_v33  ;;  %7314 = vmatpush3.bf16.msra.mxu1 %v9348_v33 }
 0x1e9   : > { %7267 = vmatprep.subr.bf16.mxu0 %v9220_v20 }
 0x1eb   : > { %7252 = vmatmul.mubr.bf16.vlgmr.msra.gmra.mrb[16].mxu0 %v8068_v38  ;;  %7316 = vmatmul.mubr.bf16.vlgmr.msra.gmra.mrb[16].mxu1 %v9370_v39 }
 0x1ec   : > { %7268 = vmatpush3.bf16.msra.mxu0 %v9220_v20  ;;  %7255 = vmatprep.mubr.bf16.mxu0 %v8069_v40 }
 0x1ed   : > { %7269 = vmatprep.subr.bf16.mxu0 %v9225_v24  ;;  %7319 = vmatprep.mubr.bf16.mxu1 %v9377_v41 }
 0x1f0   : > { %7270 = vmatpush3.bf16.msra.mxu0 %v9225_v24 }
 0x1f1   : > { %7271 = vmatprep.subr.bf16.mxu0 %v9227_v25 }
 0x1f3   : > { %7256 = vmatmul.mubr.bf16.gmra.mrb[20].mxu0 %v8070_v42  ;;  %7320 = vmatmul.mubr.bf16.gmra.mrb[20].mxu1 %v8078_v43 }
 0x1f4   : > { %7272 = vmatpush3.bf16.msra.mxu0 %v9227_v25  ;;  %7259 = vmatprep.mubr.bf16.mxu0 %v8071_v45 }
 0x1f5   : > { %7273 = vmatprep.subr.bf16.mxu0 %v9245_v36  ;;  %7323 = vmatprep.mubr.bf16.mxu1 %v8079_v46 }
 0x1f8   : > { %7274 = vmatpush3.bf16.msra.mxu0 %v9245_v36 }
 0x1f9   : > { %7275 = vmatprep.subr.bf16.mxu0 %v9247_v37 }
 0x1fb   : > { %7260 = vmatmul.mubr.bf16.gmra.mrb[24].mxu0 %v8072_v47  ;;  %7324 = vmatmul.mubr.bf16.gmra.mrb[24].mxu1 %v8080_v50 }
 0x1fc   : > { %7276 = vmatpush3.bf16.msra.mxu0 %v9247_v37  ;;  %7263 = vmatprep.mubr.bf16.mxu0 %v8073_v49 }
 0x1fd   : > { %7277 = vmatprep.subr.bf16.mxu0 %v9259_v44  ;;  %7327 = vmatprep.mubr.bf16.mxu1 %v8081_v52 }
 0x200   : > { %7278 = vmatpush3.bf16.msra.mxu0 %v9259_v44 }
 0x201   : > { %7279 = vmatprep.subr.bf16.mxu0 %v9266_v48 }
 0x203   : > { %7264 = vmatmul.mubr.bf16.gmra.mrb[28].mxu0 %v8074_v53  ;;  %7328 = vmatmul.mubr.bf16.gmra.mrb[28].mxu1 %v8082_v55 }
 0x204   : > { %7280 = vmatpush3.bf16.msra.mxu0 %v9266_v48  ;;  %7283 = vmatprep.mubr.bf16.mxu0 %v9280_v54  ;;  %v9427_v54 = vld [vmem:[%s8885_s12] sm:$0x3] }
 0x205   : > { %7281 = vmatprep.subr.bf16.mxu0 %v9270_v51  ;;  %v9433_v56 = vsel %vm1325_vm0, %v9427_v54, 0  ;;  %7941 = vmatprep.subr.msk.bf16.mxu1 %vm1325_vm0, %v9427_v54 }
 0x206   : > { %7808 = vmatpush3.bf16.msra.mxu1 %v9433_v56 }
 0x207   : > { %7942 = vmatprep.subr.msk.bf16.mxu1 %vm1325_vm0, %v9439_v57 }
 0x208   : > { %7282 = vmatpush3.bf16.msra.mxu0 %v9270_v51 }
 0x209   : > { %7331 = vmatprep.subr.bf16.mxu0 %v9220_v20 }
 0x20b   : > { %7284 = vmatmul.mubr.bf16.vlgmr.msra.gmra.mrb[32].mxu0 %v8068_v38 }
 0x20c   : > { %7332 = vmatpush3.bf16.msra.mxu0 %v9220_v20  ;;  %7287 = vmatprep.mubr.bf16.mxu0 %v8069_v40 }
 0x20d   : > { %7333 = vmatprep.subr.bf16.mxu0 %v9225_v24 }
 0x210   : > { %7334 = vmatpush3.bf16.msra.mxu0 %v9225_v24 }
 0x211   : > { %7335 = vmatprep.subr.bf16.mxu0 %v9227_v25 }
 0x213   : > { %7288 = vmatmul.mubr.bf16.gmra.mrb[36].mxu0 %v8070_v42 }
 0x214   : > { %7336 = vmatpush3.bf16.msra.mxu0 %v9227_v25  ;;  %7291 = vmatprep.mubr.bf16.mxu0 %v8071_v45 }
 0x215   : > { %7337 = vmatprep.subr.bf16.mxu0 %v9245_v36 }
 0x218   : > { %7338 = vmatpush3.bf16.msra.mxu0 %v9245_v36 }
 0x219   : > { %7339 = vmatprep.subr.bf16.mxu0 %v9247_v37 }
 0x21b   : > { %7292 = vmatmul.mubr.bf16.gmra.mrb[40].mxu0 %v8072_v47 }
 0x21c   : > { %7340 = vmatpush3.bf16.msra.mxu0 %v9247_v37  ;;  %7295 = vmatprep.mubr.bf16.mxu0 %v8073_v49 }
 0x21d   : > { %7341 = vmatprep.subr.bf16.mxu0 %v9259_v44 }
 0x220   : > { %7342 = vmatpush3.bf16.msra.mxu0 %v9259_v44 }
 0x221   : > { %7343 = vmatprep.subr.bf16.mxu0 %v9266_v48 }
 0x223   : > { %7296 = vmatmul.mubr.bf16.gmra.mrb[44].mxu0 %v8074_v53 }
 0x224   : > { %7344 = vmatpush3.bf16.msra.mxu0 %v9266_v48  ;;  %7347 = vmatprep.mubr.bf16.mxu0 %v9358_v35 }
 0x225   : > { %7345 = vmatprep.subr.bf16.mxu0 %v9270_v51 }
 0x228   : > { %7346 = vmatpush3.bf16.msra.mxu0 %v9270_v51 }
 0x229   : > { %7940 = vmatprep.subr.msk.bf16.mxu0 %vm1325_vm0, %v9427_v54 }
 0x22b   : > { %7348 = vmatmul.mubr.bf16.vlgmr.msra.gmra.mrb[48].mxu0 %v9370_v39 }
 0x22c   : > { %7351 = vmatprep.mubr.bf16.mxu0 %v9377_v41  ;;  %7364 = vmatpush3.bf16.msra.mxu0 %v9433_v56 }
 0x22d   : > { %7943 = vmatprep.subr.msk.bf16.mxu0 %vm1325_vm0, %v9442_v58 }
 0x233   : > { %7352 = vmatmul.mubr.bf16.gmra.mrb[52].mxu0 %v8078_v43 }
 0x234   : > { %7355 = vmatprep.mubr.bf16.mxu0 %v8079_v46 }
 0x23b   : > { %7356 = vmatmul.mubr.bf16.gmra.mrb[56].mxu0 %v8080_v50 }
 0x23c   : > { %7359 = vmatprep.mubr.bf16.mxu0 %v8081_v52 }
 0x243   : > { %7360 = vmatmul.mubr.bf16.gmra.mrb[60].mxu0 %v8082_v55 }
 0x29e   : > { %v9448_v59 = vpop.f32.mrb[0].mxu1 }
 0x29f   : > { %11333 = vst [vmem:[#allocation56_spill] sm:$0xff] %v9448_v59  ;;  %v9450_v60 = vpop.f32.mrb[1].mxu1 }
 0x2a0   : > { %11334 = vst [vmem:[#allocation57_spill] sm:$0xff] %v9450_v60  ;;  %v9452_v61 = vpop.f32.mrb[2].mxu1 }
 0x2a1   : > { %11335 = vst [vmem:[#allocation58_spill] sm:$0xff] %v9452_v61  ;;  %v9454_v62 = vpop.f32.mrb[3].mxu1  ;;  %v9886_v61 = vld [vmem:[%s11352_s16 + $0x60] sm:$0xff] }
 0x2a2   : > { %11336 = vst [vmem:[#allocation59_spill] sm:$0xff] %v9454_v62 }
 0x2a6   : > { %v9456_v63 = vpop.f32.mrb[4].mxu1 }
 0x2a7   : > { %11337 = vst [vmem:[#allocation60_spill] sm:$0xff] %v9456_v63  ;;  %v9458_v2 = vpop.f32.mrb[5].mxu1 }
 0x2a8   : > { %11338 = vst [vmem:[#allocation61_spill] sm:$0xff] %v9458_v2  ;;  %v9460_v3 = vpop.f32.mrb[6].mxu1 }
 0x2a9   : > { %11339 = vst [vmem:[#allocation62_spill] sm:$0xff] %v9460_v3  ;;  %v9462_v4 = vpop.f32.mrb[7].mxu1  ;;  %v9872_v3 = vld [vmem:[%s11352_s16 + $0x70] sm:$0xff] }
 0x2aa   : > { %11340 = vst [vmem:[#allocation63_spill] sm:$0xff] %v9462_v4 }
 0x2ae   : > { %v9464_v5 = vpop.f32.mrb[8].mxu1 }
 0x2af   : > { %11341 = vst [vmem:[#allocation64_spill] sm:$0xff] %v9464_v5  ;;  %v9466_v6 = vpop.f32.mrb[9].mxu1 }
 0x2b0   : > { %11342 = vst [vmem:[#allocation65_spill] sm:$0xff] %v9466_v6  ;;  %v9468_v7 = vpop.f32.mrb[10].mxu1 }
 0x2b1   : > { %11343 = vst [vmem:[#allocation66_spill] sm:$0xff] %v9468_v7  ;;  %v9470_v8 = vpop.f32.mrb[11].mxu1  ;;  %v9858_v7 = vld [vmem:[%s11352_s16 + $0x40] sm:$0xff] }
 0x2b2   : > { %11344 = vst [vmem:[#allocation67_spill] sm:$0xff] %v9470_v8 }
 0x2b6   : > { %v9472_v9 = vpop.f32.mrb[12].mxu1 }
 0x2b7   : > { %11345 = vst [vmem:[#allocation68_spill] sm:$0xff] %v9472_v9  ;;  %v1671_v13 = vpop.f32.mrb[13].mxu1 }
 0x2b8   : > { %v9474_v14 = vadd.f32 %v6664_v12, %v1671_v13  ;;  %v7234_v15 = vpop.f32.mrb[14].mxu1 }
 0x2b9   : > { %v9476_v16 = vadd.f32 %v7234_v15, %v6664_v12  ;;  %v1674_v17 = vpop.f32.mrb[15].mxu1 }
 0x2ba   : > { %11346 = vst [vmem:[#allocation69_spill] sm:$0xff] %v9474_v14  ;;  %v9478_v18 = vadd.f32 %v6664_v12, %v1674_v17 }
 0x2bb   : > { %11347 = vst [vmem:[#allocation70_spill] sm:$0xff] %v9476_v16  ;;  %v9844_v16 = vld [vmem:[%s11352_s16 + $0x50] sm:$0xff] }
 0x2bc   : > { %11348 = vst [vmem:[#allocation71_spill] sm:$0xff] %v9478_v18 }
 0x2be   : > { %v7253_v19 = vpop.f32.mrb[16].mxu0  ;;  %v7317_v23 = vpop.f32.mrb[16].mxu1 }
 0x2bf   : > { %v1839_v26 = vpop.f32.mrb[17].mxu0  ;;  %v2097_v27 = vpop.f32.mrb[17].mxu1 }
 0x2c0   : > { %v7254_v28 = vpop.f32.mrb[18].mxu0  ;;  %v7318_v29 = vpop.f32.mrb[18].mxu1 }
 0x2c1   : > { %v9480_v30 = vpack.c.bf16 %v7254_v28, %v7253_v19  ;;  %v1842_v31 = vpop.f32.mrb[19].mxu0  ;;  %v9482_v32 = vpack.c.bf16 %v7318_v29, %v7317_v23  ;;  %v2100_v35 = vpop.f32.mrb[19].mxu1 }
 0x2c2   : > { %v9484_v38 = vpack.c.bf16 %v1842_v31, %v1839_v26  ;;  %v9486_v39 = vpack.c.bf16 %v2100_v35, %v2097_v27 }
 0x2c4   : > { %3466 = vrot.lane.b32.xlu0 %v9484_v38, %s8806_s6 }
 0x2c6   : > { %v7257_v40 = vpop.f32.mrb[20].mxu0  ;;  %v7321_v41 = vpop.f32.mrb[20].mxu1 }
 0x2c7   : > { %v1855_v42 = vpop.f32.mrb[21].mxu0  ;;  %v2113_v43 = vpop.f32.mrb[21].mxu1 }
 0x2c8   : > { %v7258_v45 = vpop.f32.mrb[22].mxu0  ;;  %v7322_v46 = vpop.f32.mrb[22].mxu1 }
 0x2c9   : > { %v9490_v47 = vpack.c.bf16 %v7258_v45, %v7257_v40  ;;  %v1858_v49 = vpop.f32.mrb[23].mxu0  ;;  %v9492_v50 = vpack.c.bf16 %v7322_v46, %v7321_v41  ;;  %v2116_v52 = vpop.f32.mrb[23].mxu1 }
 0x2ca   : > { %v9494_v53 = vpack.c.bf16 %v1858_v49, %v1855_v42  ;;  %v9496_v55 = vpack.c.bf16 %v2116_v52, %v2113_v43 }
 0x2ce   : > { %v7261_v12 = vpop.f32.mrb[24].mxu0  ;;  %v7325_v13 = vpop.f32.mrb[24].mxu1 }
 0x2cf   : > { %v1871_v15 = vpop.f32.mrb[25].mxu0  ;;  %v2129_v17 = vpop.f32.mrb[25].mxu1 }
 0x2d0   : > { %v7262_v19 = vpop.f32.mrb[26].mxu0  ;;  %v7326_v23 = vpop.f32.mrb[26].mxu1 }
 0x2d1   : > { %v9498_v26 = vpack.c.bf16 %v7262_v19, %v7261_v12  ;;  %v1874_v27 = vpop.f32.mrb[27].mxu0  ;;  %v9500_v28 = vpack.c.bf16 %v7326_v23, %v7325_v13  ;;  %v2132_v29 = vpop.f32.mrb[27].mxu1 }
 0x2d2   : > { %v9502_v31 = vpack.c.bf16 %v1874_v27, %v1871_v15  ;;  %v9504_v35 = vpack.c.bf16 %v2132_v29, %v2129_v17 }
 0x2d6   : > { %v7265_v40 = vpop.f32.mrb[28].mxu0  ;;  %v7329_v41 = vpop.f32.mrb[28].mxu1 }
 0x2d7   : > { %v1887_v42 = vpop.f32.mrb[29].mxu0  ;;  %v2145_v43 = vpop.f32.mrb[29].mxu1 }
 0x2d8   : > { %v7266_v45 = vpop.f32.mrb[30].mxu0  ;;  %v7330_v46 = vpop.f32.mrb[30].mxu1 }
 0x2d9   : > { %v9506_v49 = vpack.c.bf16 %v7266_v45, %v7265_v40  ;;  %v1890_v52 = vpop.f32.mrb[31].mxu0  ;;  %v9508_v12 = vpack.c.bf16 %v7330_v46, %v7329_v41  ;;  %v2148_v19 = vpop.f32.mrb[31].mxu1  ;;  %v9517_v40 = vsel %vm1325_vm0, %v9442_v58, 0  ;;  %v9521_v41 = vld [vmem:[%s11349_s28] sm:$0x3]  ;;  %s11442_s28 = sld [smem:[#allocation31_spill]] }
 0x2da   : > { %v9510_v13 = vpack.c.bf16 %v1890_v52, %v1887_v42  ;;  %v9512_v23 = vpack.c.bf16 %v2148_v19, %v2145_v43 }
 0x2de   : > { %v7285_v15 = vpop.f32.mrb[32].mxu0 }
 0x2df   : > { %v1936_v17 = vpop.f32.mrb[33].mxu0 }
 0x2e0   : > { %v7286_v27 = vpop.f32.mrb[34].mxu0 }
 0x2e1   : > { %v2302_v29 = vpack.c.bf16 %v7286_v27, %v7285_v15  ;;  %v1939_v33 = vpop.f32.mrb[35].mxu0 }
 0x2e2   : > { %v2301_v34 = vpack.c.bf16 %v1939_v33, %v1936_v17 }
 0x2e3   : > { %3323 = vrot.lane.b32.xlu0 %v2302_v29, %s8806_s6 }
 0x2e4   : > { %7365 = vmatprep.mubr.msk.bf16.mxu0 %vm1300_vm1, %v2301_v34 }
 0x2e5   : > { %7366 = vmatmul.mubr.msk.bf16.vlgmr.msra.gmra.mrb[64].mxu0 %vm1300_vm1, %v2302_v29 }
 0x2e6   : > { %v7289_v42 = vpop.f32.mrb[36].mxu0  ;;  %7400 = vmatpush3.bf16.msra.mxu0 %v9517_v40 }
 0x2e7   : > { %3321 = vrot.lane.b32.xlu0 %v2301_v34, %s8806_s6  ;;  %v1952_v43 = vpop.f32.mrb[37].mxu0  ;;  %7944 = vmatprep.subr.msk.bf16.mxu0 %vm1325_vm0, %v9521_v41 }
 0x2e8   : > { %v7290_v33 = vpop.f32.mrb[38].mxu0 }
 0x2e9   : > { %v2304_v45 = vpack.c.bf16 %v7290_v33, %v7289_v42  ;;  %v1955_v46 = vpop.f32.mrb[39].mxu0  ;;  %v9535_v42 = vsel %vm1325_vm0, %v9439_v57, 0 }
 0x2ea   : > { %v2303_v52 = vpack.c.bf16 %v1955_v46, %v1952_v43 }
 0x2eb   : > { %3327 = vrot.lane.b32.xlu1 %v2304_v45, %s8806_s6 }
 0x2ec   : > { %3325 = vrot.lane.b32.xlu0 %v2303_v52, %s8806_s6  ;;  %7369 = vmatprep.mubr.msk.bf16.mxu0 %vm1300_vm1, %v2303_v52 }
 0x2ed   : > { %7370 = vmatmul.mubr.msk.bf16.gmra.mrb[68].mxu0 %vm1300_vm1, %v2304_v45 }
 0x2ee   : > { %v7293_v19 = vpop.f32.mrb[40].mxu0 }
 0x2ef   : > { %v1968_v15 = vpop.f32.mrb[41].mxu0 }
 0x2f0   : > { %v7294_v17 = vpop.f32.mrb[42].mxu0 }
 0x2f1   : > { %v2306_v34 = vpack.c.bf16 %v7294_v17, %v7293_v19  ;;  %v1971_v27 = vpop.f32.mrb[43].mxu0 }
 0x2f2   : > { %v2305_v29 = vpack.c.bf16 %v1971_v27, %v1968_v15 }
 0x2f3   : > { %3331 = vrot.lane.b32.xlu1 %v2306_v34, %s8806_s6 }
 0x2f4   : > { %3329 = vrot.lane.b32.xlu0 %v2305_v29, %s8806_s6  ;;  %7373 = vmatprep.mubr.msk.bf16.mxu1 %vm1300_vm1, %v2305_v29 }
 0x2f5   : > { %7374 = vmatmul.mubr.msk.bf16.vlgmr.msra.gmra.mrb[32].mxu1 %vm1300_vm1, %v2306_v34 }
 0x2f6   : > { %v7297_v43 = vpop.f32.mrb[44].mxu0  ;;  %7382 = vmatpush3.bf16.msra.mxu1 %v9535_v42 }
 0x2f7   : > { %v1984_v33 = vpop.f32.mrb[45].mxu0  ;;  %7945 = vmatprep.subr.msk.bf16.mxu1 %vm1325_vm0, %v9427_v54 }
 0x2f8   : > { %v7298_v45 = vpop.f32.mrb[46].mxu0 }
 0x2f9   : > { %v2308_v46 = vpack.c.bf16 %v7298_v45, %v7297_v43  ;;  %v1987_v52 = vpop.f32.mrb[47].mxu0  ;;  %v9554_v43 = vsel %vm1325_vm0, %v9521_v41, 0 }
 0x2fa   : > { %v2307_v19 = vpack.c.bf16 %v1987_v52, %v1984_v33 }
 0x2fb   : > { %3335 = vrot.lane.b32.xlu1 %v2308_v46, %s8806_s6 }
 0x2fc   : > { %3333 = vrot.lane.b32.xlu0 %v2307_v19, %s8806_s6  ;;  %7377 = vmatprep.mubr.msk.bf16.mxu1 %vm1300_vm1, %v2307_v19 }
 0x2fd   : > { %7378 = vmatmul.mubr.msk.bf16.gmra.mrb[36].mxu1 %vm1300_vm1, %v2308_v46 }
 0x2fe   : > { %v7349_v15 = vpop.f32.mrb[48].mxu0  ;;  %7383 = vmatprep.mubr.msk.bf16.mxu1 %vm1300_vm1, %v9484_v38 }
 0x2ff   : > { %v2194_v17 = vpop.f32.mrb[49].mxu0 }
 0x300   : > { %v7350_v34 = vpop.f32.mrb[50].mxu0  ;;  %3772 = vrot.lane.b32.xlu0 %v9486_v39, %s8806_s6 }
 0x301   : > { %v2582_v54 = vpack.c.bf16 %v7350_v34, %v7349_v15  ;;  %v2197_v27 = vpop.f32.mrb[51].mxu0 }
 0x302   : > { %v2581_v29 = vpack.c.bf16 %v2197_v27, %v2194_v17 }
 0x303   : > { %3629 = vrot.lane.b32.xlu1 %v2582_v54, %s8806_s6 }
 0x304   : > { %7401 = vmatprep.mubr.msk.bf16.mxu0 %vm1300_vm1, %v2581_v29  ;;  %3470 = vrot.lane.b32.xlu0 %v9494_v53, %s8806_s6 }
 0x305   : > { %7384 = vmatmul.mubr.msk.bf16.vlgmr.msra.gmra.mrb[40].mxu1 %vm1300_vm1, %v9480_v30  ;;  %7402 = vmatmul.mubr.msk.bf16.vlgmr.msra.gmra.mrb[72].mxu0 %vm1300_vm1, %v2582_v54 }
 0x306   : > { %v7353_v38 = vpop.f32.mrb[52].mxu0  ;;  %7387 = vmatprep.mubr.msk.bf16.mxu1 %vm1300_vm1, %v9494_v53  ;;  %7418 = vmatpush3.bf16.msra.mxu0 %v9554_v43 }
 0x307   : > { %3627 = vrot.lane.b32.xlu1 %v2581_v29, %s8806_s6  ;;  %v2210_v33 = vpop.f32.mrb[53].mxu0  ;;  %7436 = vmatpush3.bf16.msra.mxu1 %v9433_v56 }
 0x308   : > { %v7354_v45 = vpop.f32.mrb[54].mxu0  ;;  %3776 = vrot.lane.b32.xlu0 %v9496_v55, %s8806_s6  ;;  %7946 = vmatprep.subr.msk.bf16.mxu1 %vm1325_vm0, %v9439_v57 }
 0x309   : > { %v2584_v46 = vpack.c.bf16 %v7354_v45, %v7353_v38  ;;  %v2213_v52 = vpop.f32.mrb[55].mxu0  ;;  %7947 = vmatprep.subr.msk.bf16.mxu0 %vm1325_vm0, %v9442_v58 }
 0x30a   : > { %v2583_v53 = vpack.c.bf16 %v2213_v52, %v2210_v33 }
 0x30b   : > { %3468 = vrot.lane.b32.xlu1 %v9480_v30, %s8806_s6 }
 0x30c   : > { %7405 = vmatprep.mubr.msk.bf16.mxu0 %vm1300_vm1, %v2583_v53  ;;  %3631 = vrot.lane.b32.xlu0 %v2583_v53, %s8806_s6 }
 0x30d   : > { %7388 = vmatmul.mubr.msk.bf16.gmra.mrb[44].mxu1 %vm1300_vm1, %v9490_v47  ;;  %7406 = vmatmul.mubr.msk.bf16.gmra.mrb[76].mxu0 %vm1300_vm1, %v2584_v46 }
 0x30e   : > { %v7357_v56 = vpop.f32.mrb[56].mxu0  ;;  %7391 = vmatprep.mubr.msk.bf16.mxu1 %vm1300_vm1, %v9502_v31 }
 0x30f   : > { %v2226_v57 = vpop.f32.mrb[57].mxu0  ;;  %3774 = vrot.lane.b32.xlu1 %v9482_v32, %s8806_s6 }
 0x310   : > { %v7358_v58 = vpop.f32.mrb[58].mxu0  ;;  %3474 = vrot.lane.b32.xlu0 %v9502_v31, %s8806_s6 }
 0x311   : > { %v2586_v30 = vpack.c.bf16 %v7358_v58, %v7357_v56  ;;  %v2229_v19 = vpop.f32.mrb[59].mxu0 }
 0x312   : > { %v2585_v15 = vpack.c.bf16 %v2229_v19, %v2226_v57 }
 0x313   : > { %3633 = vrot.lane.b32.xlu1 %v2584_v46, %s8806_s6 }
 0x314   : > { %7409 = vmatprep.mubr.msk.bf16.mxu0 %vm1300_vm1, %v2585_v15  ;;  %3635 = vrot.lane.b32.xlu0 %v2585_v15, %s8806_s6 }
 0x315   : > { %7392 = vmatmul.mubr.msk.bf16.gmra.mrb[32].mxu1 %vm1300_vm1, %v9498_v26  ;;  %7410 = vmatmul.mubr.msk.bf16.gmra.mrb[80].mxu0 %vm1300_vm1, %v2586_v30 }
 0x316   : > { %v7361_v17 = vpop.f32.mrb[60].mxu0  ;;  %7395 = vmatprep.mubr.msk.bf16.mxu1 %vm1300_vm1, %v9510_v13 }
 0x317   : > { %v2242_v34 = vpop.f32.mrb[61].mxu0  ;;  %3472 = vrot.lane.b32.xlu1 %v9490_v47, %s8806_s6 }
 0x318   : > { %v7362_v31 = vpop.f32.mrb[62].mxu0  ;;  %3780 = vrot.lane.b32.xlu0 %v9504_v35, %s8806_s6 }
 0x319   : > { %v2588_v54 = vpack.c.bf16 %v7362_v31, %v7361_v17  ;;  %v2245_v27 = vpop.f32.mrb[63].mxu0 }
 0x31a   : > { %v2587_v29 = vpack.c.bf16 %v2245_v27, %v2242_v34 }
 0x31b   : > { %3637 = vrot.lane.b32.xlu1 %v2586_v30, %s8806_s6 }
 0x31c   : > { %7413 = vmatprep.mubr.msk.bf16.mxu0 %vm1300_vm1, %v2587_v29  ;;  %3478 = vrot.lane.b32.xlu0 %v9510_v13, %s8806_s6 }
 0x31d   : > { %7396 = vmatmul.mubr.msk.bf16.gmra.mrb[36].mxu1 %vm1300_vm1, %v9506_v49  ;;  %7414 = vmatmul.mubr.msk.bf16.gmra.mrb[84].mxu0 %vm1300_vm1, %v2588_v54 }
 0x31e   : > { %7419 = vmatprep.mubr.msk.bf16.mxu0 %vm1300_vm1, %v9486_v39 }
 0x31f   : > { %3778 = vrot.lane.b32.xlu1 %v9492_v50, %s8806_s6 }
 0x320   : > { %3639 = vrot.lane.b32.xlu0 %v2587_v29, %s8806_s6 }
 0x323   : > { %3641 = vrot.lane.b32.xlu1 %v2588_v54, %s8806_s6 }
 0x324   : > { %3784 = vrot.lane.b32.xlu0 %v9512_v23, %s8806_s6 }
 0x325   : > { %7420 = vmatmul.mubr.msk.bf16.vlgmr.msra.gmra.mrb[72].mxu0 %vm1300_vm1, %v9482_v32 }
 0x326   : > { %7423 = vmatprep.mubr.msk.bf16.mxu0 %vm1300_vm1, %v9496_v55  ;;  %7472 = vmatpush3.bf16.msra.mxu0 %v9517_v40 }
 0x327   : > { %3476 = vrot.lane.b32.xlu1 %v9498_v26, %s8806_s6  ;;  %7948 = vmatprep.subr.msk.bf16.mxu0 %vm1325_vm0, %v9521_v41 }
 0x32b   : > { %3782 = vrot.lane.b32.xlu1 %v9500_v28, %s8806_s6 }
 0x32d   : > { %7424 = vmatmul.mubr.msk.bf16.gmra.mrb[76].mxu0 %vm1300_vm1, %v9492_v50 }
 0x32e   : > { %7427 = vmatprep.mubr.msk.bf16.mxu0 %vm1300_vm1, %v9504_v35 }
 0x32f   : > { %3480 = vrot.lane.b32.xlu1 %v9506_v49, %s8806_s6 }
 0x333   : > { %3786 = vrot.lane.b32.xlu1 %v9508_v12, %s8806_s6  ;;  %s11441_s6 = sld [smem:[#allocation28_spill]] }
 0x335   : > { %7428 = vmatmul.mubr.msk.bf16.gmra.mrb[80].mxu0 %vm1300_vm1, %v9500_v28 }
 0x336   : > { %7431 = vmatprep.mubr.msk.bf16.mxu0 %vm1300_vm1, %v9512_v23  ;;  %v3467_v32 = vpop.permute.xlu0 %3466 }
 0x33d   : > { %7432 = vmatmul.mubr.msk.bf16.gmra.mrb[84].mxu0 %vm1300_vm1, %v9508_v12 }
 0x355   : > { %v3324_v39 = vpop.permute.xlu0 %3323 }
 0x359   : > { %v3322_v47 = vpop.permute.xlu0 %3321 }
 0x35a   : > { %7437 = vmatprep.mubr.msk.bf16.mxu1 %vm1300_vm1, %v3322_v47 }
 0x35b   : > { %7438 = vmatmul.mubr.msk.bf16.vlgmr.msra.gmra.mrb[48].mxu1 %vm1300_vm1, %v3324_v39 }
 0x35c   : > { %7454 = vmatpush3.bf16.msra.mxu1 %v9535_v42 }
 0x35d   : > { %v3328_v55 = vpop.permute.xlu1 %3327 }
 0x35e   : > { %v3326_v50 = vpop.permute.xlu0 %3325 }
 0x35f   : > { %7441 = vmatprep.mubr.msk.bf16.mxu1 %vm1300_vm1, %v3326_v50 }
 0x363   : > { %7442 = vmatmul.mubr.msk.bf16.gmra.mrb[52].mxu1 %vm1300_vm1, %v3328_v55 }
 0x365   : > { %v3332_v28 = vpop.permute.xlu1 %3331 }
 0x366   : > { %v3330_v26 = vpop.permute.xlu0 %3329 }
 0x367   : > { %7445 = vmatprep.mubr.msk.bf16.mxu1 %vm1300_vm1, %v3330_v26 }
 0x36b   : > { %7446 = vmatmul.mubr.msk.bf16.gmra.mrb[56].mxu1 %vm1300_vm1, %v3332_v28 }
 0x36d   : > { %v3336_v49 = vpop.permute.xlu1 %3335 }
 0x36e   : > { %v3334_v35 = vpop.permute.xlu0 %3333 }
 0x36f   : > { %7449 = vmatprep.mubr.msk.bf16.mxu1 %vm1300_vm1, %v3334_v35  ;;  %v9689_v35 = vld [vmem:[%s11350_s26 + $0x10] sm:$0xff] }
 0x372   : > { %v3773_v12 = vpop.permute.xlu0 %3772 }
 0x373   : > { %7450 = vmatmul.mubr.msk.bf16.gmra.mrb[60].mxu1 %vm1300_vm1, %v3336_v49 }
 0x374   : > { %7455 = vmatprep.mubr.msk.bf16.mxu1 %vm1300_vm1, %v3467_v32 }
 0x375   : > { %v3630_v13 = vpop.permute.xlu1 %3629 }
 0x376   : > { %v3471_v23 = vpop.permute.xlu0 %3470 }
 0x379   : > { %v3628_v40 = vpop.permute.xlu1 %3627 }
 0x37a   : > { %v3777_v41 = vpop.permute.xlu0 %3776  ;;  %7473 = vmatprep.mubr.msk.bf16.mxu0 %vm1300_vm1, %v3628_v40 }
 0x37b   : > { %7474 = vmatmul.mubr.msk.bf16.vlgmr.msra.gmra.mrb[88].mxu0 %vm1300_vm1, %v3630_v13  ;;  %v9692_v13 = vld [vmem:[%s11350_s26] sm:$0xff] }
 0x37c   : > { %7490 = vmatpush3.bf16.msra.mxu0 %v9554_v43 }
 0x37d   : > { %v3469_v42 = vpop.permute.xlu1 %3468  ;;  %7539 = vmatprep.subr.bf16.mxu0 %v9220_v20 }
 0x37e   : > { %7456 = vmatmul.mubr.msk.bf16.vlgmr.msra.gmra.mrb[48].mxu1 %vm1300_vm1, %v3469_v42  ;;  %v3632_v38 = vpop.permute.xlu0 %3631 }
 0x37f   : > { %7459 = vmatprep.mubr.msk.bf16.mxu1 %vm1300_vm1, %v3471_v23  ;;  %7477 = vmatprep.mubr.msk.bf16.mxu0 %vm1300_vm1, %v3632_v38 }
 0x381   : > { %v3775_v33 = vpop.permute.xlu1 %3774 }
 0x382   : > { %v3475_v45 = vpop.permute.xlu0 %3474 }
 0x385   : > { %v3634_v46 = vpop.permute.xlu1 %3633 }
 0x386   : > { %v3636_v52 = vpop.permute.xlu0 %3635  ;;  %7478 = vmatmul.mubr.msk.bf16.gmra.mrb[92].mxu0 %vm1300_vm1, %v3634_v46 }
 0x387   : > { %7481 = vmatprep.mubr.msk.bf16.mxu0 %vm1300_vm1, %v3636_v52  ;;  %v9705_v52 = vld [vmem:[%s11350_s26 + $0x18] sm:$0xff] }
 0x389   : > { %v3473_v53 = vpop.permute.xlu1 %3472 }
 0x38a   : > { %7460 = vmatmul.mubr.msk.bf16.gmra.mrb[52].mxu1 %vm1300_vm1, %v3473_v53  ;;  %v3781_v43 = vpop.permute.xlu0 %3780 }
 0x38b   : > { %7463 = vmatprep.mubr.msk.bf16.mxu1 %vm1300_vm1, %v3475_v45 }
 0x38d   : > { %v3638_v56 = vpop.permute.xlu1 %3637 }
 0x38e   : > { %v3479_v57 = vpop.permute.xlu0 %3478  ;;  %7482 = vmatmul.mubr.msk.bf16.gmra.mrb[96].mxu0 %vm1300_vm1, %v3638_v56 }
 0x391   : > { %v3779_v58 = vpop.permute.xlu1 %3778 }
 0x392   : > { %v3640_v30 = vpop.permute.xlu0 %3639 }
 0x393   : > { %7485 = vmatprep.mubr.msk.bf16.mxu0 %vm1300_vm1, %v3640_v30 }
 0x395   : > { %v3642_v19 = vpop.permute.xlu1 %3641 }
 0x396   : > { %7486 = vmatmul.mubr.msk.bf16.gmra.mrb[100].mxu0 %vm1300_vm1, %v3642_v19  ;;  %v3785_v31 = vpop.permute.xlu0 %3784 }
 0x397   : > { %7491 = vmatprep.mubr.msk.bf16.mxu0 %vm1300_vm1, %v3773_v12 }
 0x399   : > { %v3477_v15 = vpop.permute.xlu1 %3476 }
 0x39a   : > { %7464 = vmatmul.mubr.msk.bf16.gmra.mrb[56].mxu1 %vm1300_vm1, %v3477_v15 }
 0x39b   : > { %7467 = vmatprep.mubr.msk.bf16.mxu1 %vm1300_vm1, %v3479_v57  ;;  %v9715_v57 = vld [vmem:[%s11350_s26 + $0x30] sm:$0xff] }
 0x39d   : > { %v3783_v17 = vpop.permute.xlu1 %3782 }
 0x39e   : > { %7492 = vmatmul.mubr.msk.bf16.vlgmr.msra.gmra.mrb[88].mxu0 %vm1300_vm1, %v3775_v33  ;;  %v9698_v33 = vld [vmem:[%s11350_s26 + $0x8] sm:$0xff] }
 0x39f   : > { %7495 = vmatprep.mubr.msk.bf16.mxu0 %vm1300_vm1, %v3777_v41  ;;  %7540 = vmatpush3.bf16.msra.mxu0 %v9220_v20 }
 0x3a0   : > { %7541 = vmatprep.subr.bf16.mxu0 %v9225_v24 }
 0x3a1   : > { %v3481_v34 = vpop.permute.xlu1 %3480 }
 0x3a2   : > { %7468 = vmatmul.mubr.msk.bf16.gmra.mrb[60].mxu1 %vm1300_vm1, %v3481_v34 }
 0x3a3   : > { %7542 = vmatpush3.bf16.msra.mxu0 %v9225_v24 }
 0x3a4   : > { %7543 = vmatprep.subr.bf16.mxu0 %v9227_v25 }
 0x3a5   : > { %v3787_v54 = vpop.permute.xlu1 %3786 }
 0x3a6   : > { %7496 = vmatmul.mubr.msk.bf16.gmra.mrb[92].mxu0 %vm1300_vm1, %v3779_v58 }
 0x3a7   : > { %7499 = vmatprep.mubr.msk.bf16.mxu0 %vm1300_vm1, %v3781_v43  ;;  %7544 = vmatpush3.bf16.msra.mxu0 %v9227_v25  ;;  %v9830_v25 = vld [vmem:[%s11352_s16 + $0x20] sm:$0xff] }
 0x3a8   : > { %7545 = vmatprep.subr.bf16.mxu0 %v9245_v36 }
 0x3ab   : > { %7546 = vmatpush3.bf16.msra.mxu0 %v9245_v36 }
 0x3ac   : > { %7547 = vmatprep.subr.bf16.mxu0 %v9247_v37 }
 0x3ae   : > { %7500 = vmatmul.mubr.msk.bf16.gmra.mrb[96].mxu0 %vm1300_vm1, %v3783_v17  ;;  %v9720_v17 = vld [vmem:[%s11350_s26 + $0x38] sm:$0xff] }
 0x3af   : > { %7503 = vmatprep.mubr.msk.bf16.mxu0 %vm1300_vm1, %v3785_v31  ;;  %7548 = vmatpush3.bf16.msra.mxu0 %v9247_v37 }
 0x3b0   : > { %7549 = vmatprep.subr.bf16.mxu0 %v9259_v44 }
 0x3b3   : > { %7550 = vmatpush3.bf16.msra.mxu0 %v9259_v44 }
 0x3b4   : > { %7551 = vmatprep.subr.bf16.mxu0 %v9266_v48 }
 0x3b6   : > { %7504 = vmatmul.mubr.msk.bf16.gmra.mrb[100].mxu0 %vm1300_vm1, %v3787_v54 }
 0x3b7   : > { %7552 = vmatpush3.bf16.msra.mxu0 %v9266_v48  ;;  %v9817_v48 = vld [vmem:[%s11352_s16 + $0x30] sm:$0xff] }
 0x3b8   : > { %v7367_v27 = vpop.f32.mrb[64].mxu0  ;;  %7553 = vmatprep.subr.bf16.mxu0 %v9270_v51 }
 0x3b9   : > { %v2370_v29 = vpop.f32.mrb[65].mxu0 }
 0x3ba   : > { %v7368_v32 = vpop.f32.mrb[66].mxu0 }
 0x3bb   : > { %v2373_v39 = vpop.f32.mrb[67].mxu0  ;;  %7554 = vmatpush3.bf16.msra.mxu0 %v9270_v51 }
 0x3c0   : > { %v7371_v47 = vpop.f32.mrb[68].mxu0 }
 0x3c1   : > { %v2386_v50 = vpop.f32.mrb[69].mxu0 }
 0x3c2   : > { %v7372_v55 = vpop.f32.mrb[70].mxu0 }
 0x3c3   : > { %v2389_v26 = vpop.f32.mrb[71].mxu0 }
 0x3d8   : > { %v7385_v28 = vpop.f32.mrb[40].mxu1 }
 0x3d9   : > { %v2503_v49 = vadd.f32 %v7385_v28, %v7367_v27  ;;  %v2494_v12 = vpop.f32.mrb[41].mxu1 }
 0x3da   : > { %v2495_v23 = vadd.f32 %v2494_v12, %v2370_v29  ;;  %v7386_v40 = vpop.f32.mrb[42].mxu1  ;;  %v9726_v29 = vld [vmem:[%s11350_s26 + $0x20] sm:$0xff] }
 0x3db   : > { %v2506_v41 = vadd.f32 %v7386_v40, %v7368_v32  ;;  %v2497_v42 = vpop.f32.mrb[43].mxu1  ;;  %v9695_v38 = vadd.f32 %v2503_v49, %v9689_v35  ;;  %v9747_v49 = vld [vmem:[%s11350_s26 + $0x58] sm:$0xff] }
 0x3dc   : > { %v2498_v45 = vadd.f32 %v2497_v42, %v2373_v39  ;;  %v9701_v46 = vadd.f32 %v2495_v23, %v9692_v13  ;;  %v9733_v39 = vld [vmem:[%s11350_s26 + $0x28] sm:$0xff] }
 0x3dd   : > { %2857 = vmax.xlane.f32.xlu1 %v9695_v38  ;;  %v9712_v56 = vadd.f32 %v2506_v41, %v9705_v52  ;;  %v9754_v41 = vld [vmem:[%s11350_s26 + $0x40] sm:$0xff] }
 0x3de   : > { %2853 = vmax.xlane.f32.xlu0 %v9701_v46  ;;  %v9709_v53 = vadd.f32 %v2498_v45, %v9698_v33  ;;  %v9761_v45 = vld [vmem:[%s11350_s26 + $0x48] sm:$0xff] }
 0x3e0   : > { %v7389_v43 = vpop.f32.mrb[44].mxu1 }
 0x3e1   : > { %v2519_v58 = vadd.f32 %v7389_v43, %v7371_v47  ;;  %v2510_v30 = vpop.f32.mrb[45].mxu1  ;;  %2855 = vmax.xlane.f32.xlu1 %v9709_v53 }
 0x3e2   : > { %v2511_v19 = vadd.f32 %v2510_v30, %v2386_v50  ;;  %v7390_v15 = vpop.f32.mrb[46].mxu1  ;;  %2859 = vmax.xlane.f32.xlu0 %v9712_v56  ;;  %v9740_v50 = vld [vmem:[%s11350_s26 + $0x50] sm:$0xff] }
 0x3e3   : > { %v2522_v34 = vadd.f32 %v7390_v15, %v7372_v55  ;;  %v2513_v31 = vpop.f32.mrb[47].mxu1  ;;  %v9723_v54 = vadd.f32 %v2519_v58, %v9715_v57  ;;  %v9768_v58 = vld [vmem:[%s11350_s26 + $0x70] sm:$0xff] }
 0x3e4   : > { %v2514_v27 = vadd.f32 %v2513_v31, %v2389_v26  ;;  %v9737_v47 = vadd.f32 %v2511_v19, %v9726_v29 }
 0x3e5   : > { %2865 = vmax.xlane.f32.xlu1 %v9723_v54  ;;  %v9730_v32 = vadd.f32 %v2522_v34, %v9720_v17  ;;  %v9775_v34 = vld [vmem:[%s11350_s26 + $0x78] sm:$0xff] }
 0x3e6   : > { %v9744_v28 = vadd.f32 %v2514_v27, %v9733_v39 }
 0x3e7   : > { %2867 = vmax.xlane.f32.xlu0 %v9730_v32 }
 0x3e8   : > { %v7393_v55 = vpop.f32.mrb[32].mxu1 }
 0x3e9   : > { %v2526_v26 = vpop.f32.mrb[33].mxu1  ;;  %2861 = vmax.xlane.f32.xlu1 %v9737_v47  ;;  %v9750_v23 = vadd.f32 %v7393_v55, %v9740_v50 }
 0x3ea   : > { %v7394_v12 = vpop.f32.mrb[34].mxu1  ;;  %v9764_v43 = vadd.f32 %v2526_v26, %v9754_v41  ;;  %v9782_v26 = vld [vmem:[%s11350_s26 + $0x60] sm:$0xff] }
 0x3eb   : > { %v2529_v40 = vpop.f32.mrb[35].mxu1  ;;  %2863 = vmax.xlane.f32.xlu0 %v9744_v28  ;;  %v9757_v42 = vadd.f32 %v7394_v12, %v9747_v49 }
 0x3ec   : > { %v9771_v19 = vadd.f32 %v2529_v40, %v9761_v45  ;;  %v9789_v40 = vld [vmem:[%s11350_s26 + $0x68] sm:$0xff] }
 0x3ed   : > { %2873 = vmax.xlane.f32.xlu1 %v9750_v23 }
 0x3ef   : > { %2875 = vmax.xlane.f32.xlu0 %v9757_v42 }
 0x3f0   : > { %v7397_v30 = vpop.f32.mrb[36].mxu1 }
 0x3f1   : > { %v2542_v15 = vpop.f32.mrb[37].mxu1  ;;  %2869 = vmax.xlane.f32.xlu1 %v9764_v43  ;;  %v9778_v27 = vadd.f32 %v7397_v30, %v9768_v58  ;;  %v9796_v30 = vld [vmem:[%s11351_s7 + $0x10] sm:$0xff]  ;;  %s11443_s7 = sld [smem:[#allocation30_spill]] }
 0x3f2   : > { %v7398_v31 = vpop.f32.mrb[38].mxu1  ;;  %v9792_v21 = vadd.f32 %v2542_v15, %v9782_v26 }
 0x3f3   : > { %v2545_v55 = vpop.f32.mrb[39].mxu1  ;;  %2871 = vmax.xlane.f32.xlu0 %v9771_v19  ;;  %v9785_v12 = vadd.f32 %v7398_v31, %v9775_v34  ;;  %v9803_v31 = vld [vmem:[%s11352_s16] sm:$0xff] }
 0x3f4   : > { %v9799_v10 = vadd.f32 %v2545_v55, %v9789_v40  ;;  %v9814_v55 = vld [vmem:[%s11352_s16 + $0x18] sm:$0xff] }
 0x3f5   : > { %2881 = vmax.xlane.f32.xlu1 %v9778_v27 }
 0x3f7   : > { %2883 = vmax.xlane.f32.xlu0 %v9785_v12 }
 0x3f8   : > { %v7421_v22 = vpop.f32.mrb[72].mxu0 }
 0x3f9   : > { %v2774_v11 = vpop.f32.mrb[73].mxu0  ;;  %2877 = vmax.xlane.f32.xlu1 %v9792_v21  ;;  %v9806_v1 = vadd.f32 %v7421_v22, %v9796_v30 }
 0x3fa   : > { %v7422_v0 = vpop.f32.mrb[74].mxu0  ;;  %v9810_v51 = vadd.f32 %v2774_v11, %v9803_v31  ;;  %v9827_v11 = vld [vmem:[%s11352_s16 + $0x8] sm:$0xff] }
 0x3fb   : > { %v2777_v15 = vpop.f32.mrb[75].mxu0  ;;  %2879 = vmax.xlane.f32.xlu0 %v9799_v10  ;;  %v9821_v22 = vadd.f32 %v7422_v0, %v9814_v55 }
 0x3fc   : > { %v9835_v18 = vadd.f32 %v2777_v15, %v9827_v11 }
 0x3fd   : > { %2969 = vmax.xlane.f32.xlu1 %v9806_v1 }
 0x3ff   : > { %2965 = vmax.xlane.f32.xlu0 %v9810_v51 }
 0x400   : > { %v7425_v44 = vpop.f32.mrb[76].mxu0 }
 0x401   : > { %v9824_v37 = vadd.f32 %v7425_v44, %v9817_v48  ;;  %v2790_v36 = vpop.f32.mrb[77].mxu0  ;;  %v9841_v44 = vld [vmem:[%s11352_s16 + $0x38] sm:$0xff] }
 0x402   : > { %v7426_v24 = vpop.f32.mrb[78].mxu0  ;;  %v9838_v0 = vadd.f32 %v2790_v36, %v9830_v25  ;;  %v9855_v36 = vld [vmem:[%s11352_s16 + $0x28] sm:$0xff] }
 0x403   : > { %v2793_v20 = vpop.f32.mrb[79].mxu0  ;;  %2977 = vmax.xlane.f32.xlu1 %v9824_v37  ;;  %2971 = vmax.xlane.f32.xlu0 %v9821_v22  ;;  %v9849_v9 = vadd.f32 %v7426_v24, %v9841_v44 }
 0x404   : > { %11353 = vst [vmem:[#allocation72_spill] sm:$0xff] %v9838_v0  ;;  %v9863_v4 = vadd.f32 %v2793_v20, %v9855_v36 }
 0x406   : > { %11355 = vst [vmem:[#allocation74_spill] sm:$0xff] %v9863_v4 }
 0x407   : > { %2973 = vmax.xlane.f32.xlu1 %v9838_v0  ;;  %2967 = vmax.xlane.f32.xlu0 %v9835_v18 }
 0x408   : > { %v7429_v14 = vpop.f32.mrb[80].mxu0 }
 0x409   : > { %v9852_v15 = vadd.f32 %v7429_v14, %v9844_v16  ;;  %v2806_v8 = vpop.f32.mrb[81].mxu0  ;;  %v9869_v14 = vld [vmem:[%s11352_s16 + $0x58] sm:$0xff] }
 0x40a   : > { %v7430_v6 = vpop.f32.mrb[82].mxu0  ;;  %v9866_v24 = vadd.f32 %v2806_v8, %v9858_v7  ;;  %v9883_v8 = vld [vmem:[%s11352_s16 + $0x48] sm:$0xff] }
 0x40b   : > { %11354 = vst [vmem:[#allocation73_spill] sm:$0xff] %v9852_v15  ;;  %v2809_v5 = vpop.f32.mrb[83].mxu0  ;;  %2985 = vmax.xlane.f32.xlu1 %v9852_v15  ;;  %2979 = vmax.xlane.f32.xlu0 %v9849_v9  ;;  %v9877_v63 = vadd.f32 %v7430_v6, %v9869_v14  ;;  %v9897_v15 = vld [vmem:[%s11352_s16 + $0x78] sm:$0xff] }
 0x40c   : > { %11356 = vst [vmem:[#allocation75_spill] sm:$0xff] %v9866_v24 }
 0x40d   : > { %11357 = vst [vmem:[#allocation76_spill] sm:$0xff] %v9877_v63 }
 0x40f   : > { %2981 = vmax.xlane.f32.xlu1 %v9866_v24  ;;  %2975 = vmax.xlane.f32.xlu0 %v9863_v4  ;;  %v9891_v24 = vadd.f32 %v2809_v5, %v9883_v8  ;;  %v9905_v4 = vld [vmem:[%s11352_s16 + $0x68] sm:$0xff] }
 0x410   : > { %v7433_v2 = vpop.f32.mrb[84].mxu0 }
 0x411   : > { %v9880_v20 = vadd.f32 %v7433_v2, %v9872_v3  ;;  %v2822_v62 = vpop.f32.mrb[85].mxu0  ;;  %11359 = vst [vmem:[#allocation78_spill] sm:$0xff] %v9891_v24 }
 0x412   : > { %v7434_v60 = vpop.f32.mrb[86].mxu0  ;;  %v9894_v6 = vadd.f32 %v2822_v62, %v9886_v61 }
 0x413   : > { %11358 = vst [vmem:[#allocation77_spill] sm:$0xff] %v9880_v20  ;;  %v2825_v59 = vpop.f32.mrb[87].mxu0  ;;  %2993 = vmax.xlane.f32.xlu1 %v9880_v20  ;;  %2987 = vmax.xlane.f32.xlu0 %v9877_v63  ;;  %v9902_v2 = vadd.f32 %v7434_v60, %v9897_v15 }
 0x414   : > { %11360 = vst [vmem:[#allocation79_spill] sm:$0xff] %v9894_v6  ;;  %v9909_v20 = vadd.f32 %v2825_v59, %v9905_v4 }
 0x417   : > { %2989 = vmax.xlane.f32.xlu1 %v9894_v6  ;;  %2983 = vmax.xlane.f32.xlu0 %v9891_v24 }
 0x41b   : > { %2995 = vmax.xlane.f32.xlu0 %v9902_v2 }
 0x41f   : > { %2991 = vmax.xlane.f32.xlu0 %v9909_v20 }
 0x451   : > { %v7457_v62 = vpop.f32.mrb[48].mxu1 }
 0x452   : > { %v9913_v5 = vadd.f32 %v7457_v62, %v9689_v35  ;;  %v3540_v63 = vpop.f32.mrb[49].mxu1 }
 0x453   : > { %v7458_v6 = vpop.f32.mrb[50].mxu1  ;;  %v9920_v0 = vadd.f32 %v3540_v63, %v9692_v13 }
 0x454   : > { %11361 = vst [vmem:[#allocation80_spill] sm:$0xff] %v9913_v5  ;;  %v9916_v24 = vadd.f32 %v7458_v6, %v9705_v52  ;;  %v3543_v60 = vpop.f32.mrb[51].mxu1  ;;  %3929 = vmax.xlane.f32.xlu1 %v9913_v5 }
 0x455   : > { %11362 = vst [vmem:[#allocation81_spill] sm:$0xff] %v9920_v0  ;;  %v9924_v59 = vadd.f32 %v3543_v60, %v9698_v33 }
 0x456   : > { %3931 = vmax.xlane.f32.xlu0 %v9916_v24 }
 0x457   : > { %11363 = vst [vmem:[#allocation82_spill] sm:$0xff] %v9924_v59 }
 0x458   : > { %3925 = vmax.xlane.f32.xlu1 %v9920_v0 }
 0x45a   : > { %3927 = vmax.xlane.f32.xlu0 %v9924_v59 }
 0x45d   : > { %v7461_v35 = vpop.f32.mrb[52].mxu1 }
 0x45e   : > { %v9929_v62 = vadd.f32 %v7461_v35, %v9715_v57  ;;  %v3556_v52 = vpop.f32.mrb[53].mxu1 }
 0x45f   : > { %v7462_v6 = vpop.f32.mrb[54].mxu1  ;;  %v9936_v13 = vadd.f32 %v3556_v52, %v9726_v29 }
 0x460   : > { %11364 = vst [vmem:[#allocation83_spill] sm:$0xff] %v9929_v62  ;;  %v9932_v5 = vadd.f32 %v7462_v6, %v9720_v17  ;;  %v3559_v63 = vpop.f32.mrb[55].mxu1  ;;  %3937 = vmax.xlane.f32.xlu1 %v9929_v62 }
 0x461   : > { %11366 = vst [vmem:[#allocation85_spill] sm:$0xff] %v9936_v13  ;;  %v9940_v33 = vadd.f32 %v3559_v63, %v9733_v39 }
 0x462   : > { %11365 = vst [vmem:[#allocation84_spill] sm:$0xff] %v9932_v5  ;;  %3939 = vmax.xlane.f32.xlu0 %v9932_v5 }
 0x463   : > { %11367 = vst [vmem:[#allocation86_spill] sm:$0xff] %v9940_v33 }
 0x464   : > { %3933 = vmax.xlane.f32.xlu1 %v9936_v13 }
 0x466   : > { %3935 = vmax.xlane.f32.xlu0 %v9940_v33 }
 0x46d   : > { %v7465_v57 = vpop.f32.mrb[56].mxu1 }
 0x46e   : > { %v9945_v60 = vadd.f32 %v7465_v57, %v9740_v50  ;;  %v3572_v17 = vpop.f32.mrb[57].mxu1 }
 0x46f   : > { %v7466_v35 = vpop.f32.mrb[58].mxu1  ;;  %v9952_v39 = vadd.f32 %v3572_v17, %v9754_v41 }
 0x470   : > { %11368 = vst [vmem:[#allocation87_spill] sm:$0xff] %v9945_v60  ;;  %v9948_v6 = vadd.f32 %v7466_v35, %v9747_v49  ;;  %v3575_v29 = vpop.f32.mrb[59].mxu1  ;;  %3945 = vmax.xlane.f32.xlu1 %v9945_v60  ;;  %v2854_v49 = vpop.xlane.xlu0 %2853 }
 0x471   : > { %v7493_v52 = vpop.f32.mrb[88].mxu0  ;;  %11370 = vst [vmem:[#allocation89_spill] sm:$0xff] %v9952_v39  ;;  %v9956_v13 = vadd.f32 %v3575_v29, %v9761_v45  ;;  %v2858_v29 = vpop.xlane.xlu1 %2857 }
 0x472   : > { %11369 = vst [vmem:[#allocation88_spill] sm:$0xff] %v9948_v6  ;;  %v3846_v63 = vpop.f32.mrb[89].mxu0  ;;  %3947 = vmax.xlane.f32.xlu0 %v9948_v6 }
 0x473   : > { %v7494_v33 = vpop.f32.mrb[90].mxu0  ;;  %11371 = vst [vmem:[#allocation90_spill] sm:$0xff] %v9956_v13 }
 0x474   : > { %v3849_v50 = vpop.f32.mrb[91].mxu0  ;;  %3941 = vmax.xlane.f32.xlu1 %v9952_v39  ;;  %v9982_v59 = vadd.f32 %v7494_v33, %v9814_v55 }
 0x475   : > { %v7469_v57 = vpop.f32.mrb[60].mxu1  ;;  %v9994_v55 = vadd.f32 %v3849_v50, %v9827_v11 }
 0x476   : > { %v9960_v35 = vadd.f32 %v7469_v57, %v9768_v58  ;;  %v3588_v60 = vpop.f32.mrb[61].mxu1  ;;  %3943 = vmax.xlane.f32.xlu0 %v9956_v13  ;;  %v2860_v57 = vpop.xlane.xlu0 %2859 }
 0x477   : > { %v7470_v41 = vpop.f32.mrb[62].mxu1  ;;  %v9968_v5 = vadd.f32 %v3588_v60, %v9782_v26  ;;  %v2888_v26 = vsub.f32 %v9712_v56, %v2860_v57  ;;  %v2856_v60 = vpop.xlane.xlu1 %2855 }
 0x478   : > { %v9964_v17 = vadd.f32 %v7470_v41, %v9775_v34  ;;  %v3591_v6 = vpop.f32.mrb[63].mxu1  ;;  %3953 = vmax.xlane.f32.xlu1 %v9960_v35  ;;  %v2887_v34 = vsub.f32 %v9695_v38, %v2858_v29  ;;  %v9977_v41 = vadd.f32 %v7493_v52, %v9796_v30  ;;  %v2886_v30 = vsub.f32 %v9709_v53, %v2856_v60 }
 0x479   : > { %v7497_v45 = vpop.f32.mrb[92].mxu0  ;;  %11372 = vst [vmem:[#allocation91_spill] sm:$0xff] %v9968_v5  ;;  %v9972_v62 = vadd.f32 %v3591_v6, %v9789_v40  ;;  %v2885_v6 = vsub.f32 %v9701_v46, %v2854_v49  ;;  %v2907_v56 = vmul.f32 1.442695, %v2888_v26 }
 0x47a   : > { %v3862_v39 = vpop.f32.mrb[93].mxu0  ;;  %3955 = vmax.xlane.f32.xlu0 %v9964_v17  ;;  %v2905_v40 = vmul.f32 1.442695, %v2887_v34  ;;  %v9998_v49 = vadd.f32 %v7497_v45, %v9817_v48  ;;  %v10024_v34 = vld [vmem:[%s1093_s18] ss:$0 sm:$0xff] }
 0x47b   : > { %v7498_v58 = vpop.f32.mrb[94].mxu0  ;;  %v2901_v46 = vmul.f32 1.442695, %v2885_v6  ;;  %v10008_v11 = vadd.f32 %v3862_v39, %v9830_v25  ;;  %v2866_v25 = vpop.xlane.xlu1 %2865 }
 0x47c   : > { %v3865_v13 = vpop.f32.mrb[95].mxu0  ;;  %3949 = vmax.xlane.f32.xlu1 %v9968_v5  ;;  %v9987_v5 = vadd.f32 %v3846_v63, %v9803_v31  ;;  %8107 = vpow2.f32 %v2905_v40  ;;  %v2903_v31 = vmul.f32 1.442695, %v2886_v30  ;;  %v10002_v63 = vadd.f32 %v7498_v58, %v9841_v44  ;;  %v2868_v58 = vpop.xlane.xlu0 %2867 }
 0x47d   : > { %8109 = vpow2.f32 %v2907_v56  ;;  %11373 = vst [vmem:[#allocation92_spill] sm:$0xff] %v10008_v11  ;;  %v10016_v45 = vadd.f32 %v3865_v13, %v9855_v36  ;;  %v2891_v36 = vsub.f32 %v9723_v54, %v2866_v25  ;;  %v2892_v40 = vsub.f32 %v9730_v32, %v2868_v58 }
 0x47e   : > { %3951 = vmax.xlane.f32.xlu0 %v9972_v62  ;;  %8111 = vpow2.f32 %v2901_v46 }
 0x47f   : > { %8113 = vpow2.f32 %v2903_v31  ;;  %11374 = vst [vmem:[#allocation93_spill] sm:$0xff] %v10016_v45  ;;  %v2862_v13 = vpop.xlane.xlu1 %2861  ;;  %v2913_v56 = vmul.f32 1.442695, %v2891_v36 }
 0x480   : > { %4041 = vmax.xlane.f32.xlu1 %v9977_v41  ;;  %v2864_v6 = vpop.xlane.xlu0 %2863  ;;  %v2889_v46 = vsub.f32 %v9737_v47, %v2862_v13 }
 0x481   : > { %v7501_v0 = vpop.f32.mrb[96].mxu0  ;;  %8115 = vpow2.f32 %v2913_v56 }
 0x482   : > { %v9989_v38 = vpop.f32.mrb[97].mxu0  ;;  %4043 = vmax.xlane.f32.xlu0 %v9982_v59  ;;  %v10035_v32 = vadd.f32 %v7501_v0, %v9844_v16 }
 0x483   : > { %v7502_v52 = vpop.f32.mrb[98].mxu0 }
 0x484   : > { %v3881_v33 = vpop.f32.mrb[99].mxu0  ;;  %4037 = vmax.xlane.f32.xlu1 %v9987_v5  ;;  %v10038_v47 = vadd.f32 %v7502_v52, %v9869_v14  ;;  %v2874_v52 = vpop.xlane.xlu1 %2873 }
 0x485   : > { %v10047_v16 = vadd.f32 %v3881_v33, %v9883_v8 }
 0x486   : > { %4039 = vmax.xlane.f32.xlu0 %v9994_v55  ;;  %v8108_v29 = vpop.eup %8107 }
 0x487   : > { %v8110_v39 = vpop.eup %8109  ;;  %v3085_v60 = vmul.f32 %v8108_v29, %v10024_v34 }
 0x488   : > { %4049 = vmax.xlane.f32.xlu1 %v9998_v49  ;;  %v8112_v57 = vpop.eup %8111  ;;  %v3086_v30 = vmul.f32 %v8110_v39, %v10024_v34 }
 0x489   : > { %v10005_v53 = vpop.f32.mrb[100].mxu0  ;;  %v8114_v26 = vpop.eup %8113  ;;  %v3083_v31 = vmul.f32 %v8112_v57, %v10024_v34 }
 0x48a   : > { %v10010_v50 = vpop.f32.mrb[101].mxu0  ;;  %4051 = vmax.xlane.f32.xlu0 %v10002_v63  ;;  %v3084_v54 = vmul.f32 %v8114_v26, %v10024_v34 }
 0x48b   : > { %v10013_v48 = vpop.f32.mrb[102].mxu0  ;;  %v8116_v14 = vpop.eup %8115 }
 0x48c   : > { %v10018_v44 = vpop.f32.mrb[103].mxu0  ;;  %4045 = vmax.xlane.f32.xlu1 %v10008_v11  ;;  %v2890_v11 = vsub.f32 %v9744_v28, %v2864_v6  ;;  %v10043_v28 = vadd.f32 %v9989_v38, %v9858_v7  ;;  %v2895_v38 = vsub.f32 %v9750_v23, %v2874_v52  ;;  %v3089_v8 = vmul.f32 %v8116_v14, %v10024_v34 }
 0x48e   : > { %4047 = vmax.xlane.f32.xlu0 %v10016_v45  ;;  %v2915_v45 = vmul.f32 1.442695, %v2892_v40  ;;  %v2911_v25 = vmul.f32 1.442695, %v2890_v11  ;;  %v2921_v36 = vmul.f32 1.442695, %v2895_v38 }
 0x490   : > { %2937 = vadd.xlane.f32.xlu1 %v8108_v29  ;;  %v2909_v29 = vmul.f32 1.442695, %v2889_v46  ;;  %8117 = vpow2.f32 %v2915_v45 }
 0x492   : > { %2939 = vadd.xlane.f32.xlu0 %v8110_v39  ;;  %v2876_v39 = vpop.xlane.xlu0 %2875  ;;  %8119 = vpow2.f32 %v2909_v29 }
 0x493   : > { %8121 = vpow2.f32 %v2911_v25  ;;  %v2896_v33 = vsub.f32 %v9757_v42, %v2876_v39  ;;  %v10061_v42 = vadd.f32 %v10005_v53, %v9872_v3  ;;  %v10075_v3 = vadd.f32 %v10018_v44, %v9905_v4 }
 0x494   : > { %2933 = vadd.xlane.f32.xlu1 %v8112_v57  ;;  %v2870_v57 = vpop.xlane.xlu1 %2869  ;;  %8123 = vpow2.f32 %v2921_v36 }
 0x495   : > { %v2893_v13 = vsub.f32 %v9764_v43, %v2870_v57  ;;  %v2923_v6 = vmul.f32 1.442695, %v2896_v33 }
 0x496   : > { %2935 = vadd.xlane.f32.xlu0 %v8114_v26  ;;  %v2872_v0 = vpop.xlane.xlu0 %2871 }
 0x497   : > { %v2917_v56 = vmul.f32 1.442695, %v2893_v13  ;;  %8125 = vpow2.f32 %v2923_v6 }
 0x498   : > { %3103 = vadd.xlane.f32.xlu1 %v3085_v60  ;;  %v2882_v43 = vpop.xlane.xlu1 %2881 }
 0x499   : > { %8127 = vpow2.f32 %v2917_v56  ;;  %v2899_v53 = vsub.f32 %v9778_v27, %v2882_v43 }
 0x49a   : > { %3105 = vadd.xlane.f32.xlu0 %v3086_v30  ;;  %v8118_v11 = vpop.eup %8117  ;;  %v2884_v58 = vpop.xlane.xlu0 %2883  ;;  %v2894_v30 = vsub.f32 %v9771_v19, %v2872_v0  ;;  %v10070_v19 = vadd.f32 %v10010_v50, %v9886_v61 }
 0x49b   : > { %v3090_v26 = vmul.f32 %v8118_v11, %v10024_v34  ;;  %v2900_v25 = vsub.f32 %v9785_v12, %v2884_v58  ;;  %v2929_v50 = vmul.f32 1.442695, %v2899_v53 }
 0x49c   : > { %3099 = vadd.xlane.f32.xlu1 %v3083_v31  ;;  %v8120_v45 = vpop.eup %8119  ;;  %v2919_v46 = vmul.f32 1.442695, %v2894_v30 }
 0x49d   : > { %v8122_v7 = vpop.eup %8121  ;;  %v3087_v40 = vmul.f32 %v8120_v45, %v10024_v34  ;;  %v2931_v4 = vmul.f32 1.442695, %v2900_v25 }
 0x49e   : > { %3101 = vadd.xlane.f32.xlu0 %v3084_v54  ;;  %v2880_v60 = vpop.xlane.xlu0 %2879  ;;  %v3088_v23 = vmul.f32 %v8122_v7, %v10024_v34  ;;  %v10065_v54 = vadd.f32 %v10013_v48, %v9897_v15  ;;  %8129 = vpow2.f32 %v2919_v46  ;;  %v2878_v15 = vpop.xlane.xlu1 %2877 }
 0x49f   : > { %v8124_v29 = vpop.eup %8123  ;;  %v2897_v39 = vsub.f32 %v9792_v21, %v2878_v15  ;;  %v2898_v44 = vsub.f32 %v9799_v10, %v2880_v60  ;;  %8131 = vpow2.f32 %v2929_v50 }
 0x4a0   : > { %4057 = vmax.xlane.f32.xlu1 %v10035_v32  ;;  %8133 = vpow2.f32 %v2931_v4  ;;  %v11375_v4 = vld [vmem:[#allocation72_spill] sm:$0xff] }
 0x4a1   : > { %v8126_v61 = vpop.eup %8125  ;;  %v2927_v12 = vmul.f32 1.442695, %v2898_v44 }
 0x4a2   : > { %4059 = vmax.xlane.f32.xlu0 %v10038_v47  ;;  %v2966_v31 = vpop.xlane.xlu0 %2965  ;;  %v3094_v21 = vmul.f32 %v8126_v61, %v10024_v34 }
 0x4a3   : > { %v8128_v0 = vpop.eup %8127 }
 0x4a4   : > { %4053 = vmax.xlane.f32.xlu1 %v10043_v28  ;;  %v3091_v10 = vmul.f32 %v8128_v0, %v10024_v34 }
 0x4a6   : > { %4055 = vmax.xlane.f32.xlu0 %v10047_v16  ;;  %v2972_v48 = vpop.xlane.xlu0 %2971 }
 0x4a8   : > { %2945 = vadd.xlane.f32.xlu1 %v8116_v14  ;;  %v2970_v14 = vpop.xlane.xlu1 %2969  ;;  %v8130_v27 = vpop.eup %8129 }
 0x4a9   : > { %v3092_v38 = vmul.f32 %v8130_v27, %v10024_v34  ;;  %v2999_v57 = vsub.f32 %v9806_v1, %v2970_v14  ;;  %v8132_v33 = vpop.eup %8131 }
 0x4aa   : > { %2947 = vadd.xlane.f32.xlu0 %v8118_v11  ;;  %v2968_v52 = vpop.xlane.xlu0 %2967  ;;  %v2925_v11 = vmul.f32 1.442695, %v2897_v39  ;;  %v8134_v13 = vpop.eup %8133 }
 0x4ab   : > { %v3017_v60 = vmul.f32 1.442695, %v2999_v57  ;;  %v3098_v15 = vmul.f32 %v8134_v13, %v10024_v34 }
 0x4ac   : > { %2941 = vadd.xlane.f32.xlu1 %v8120_v45  ;;  %v3093_v45 = vmul.f32 %v8124_v29, %v10024_v34  ;;  %v2978_v58 = vpop.xlane.xlu1 %2977  ;;  %8135 = vpow2.f32 %v2925_v11  ;;  %v11376_v11 = vld [vmem:[#allocation74_spill] sm:$0xff] }
 0x4ad   : > { %8137 = vpow2.f32 %v2927_v12 }
 0x4ae   : > { %2943 = vadd.xlane.f32.xlu0 %v8122_v7  ;;  %v2980_v7 = vpop.xlane.xlu0 %2979  ;;  %8139 = vpow2.f32 %v3017_v60  ;;  %v11378_v60 = vld [vmem:[#allocation76_spill] sm:$0xff] }
 0x4b0   : > { %3111 = vadd.xlane.f32.xlu1 %v3089_v8  ;;  %v2974_v8 = vpop.xlane.xlu1 %2973 }
 0x4b1   : > { %v3001_v44 = vsub.f32 %v11375_v4, %v2974_v8 }
 0x4b2   : > { %3113 = vadd.xlane.f32.xlu0 %v3090_v26  ;;  %v3000_v26 = vsub.f32 %v9821_v22, %v2972_v48  ;;  %v2976_v36 = vpop.xlane.xlu0 %2975  ;;  %v3097_v22 = vmul.f32 %v8132_v33, %v10024_v34 }
 0x4b4   : > { %3107 = vadd.xlane.f32.xlu1 %v3087_v40  ;;  %v2997_v40 = vsub.f32 %v9810_v51, %v2966_v31  ;;  %v3019_v30 = vmul.f32 1.442695, %v3000_v26  ;;  %v2986_v56 = vpop.xlane.xlu1 %2985  ;;  %v11377_v26 = vld [vmem:[#allocation73_spill] sm:$0xff] }
 0x4b6   : > { %3109 = vadd.xlane.f32.xlu0 %v3088_v23  ;;  %v8136_v6 = vpop.eup %8135  ;;  %v2998_v23 = vsub.f32 %v9835_v18, %v2968_v52  ;;  %v3013_v1 = vmul.f32 1.442695, %v2997_v40  ;;  %v2988_v43 = vpop.xlane.xlu0 %2987  ;;  %8141 = vpow2.f32 %v3019_v30 }
 0x4b7   : > { %v8138_v46 = vpop.eup %8137  ;;  %v3095_v31 = vmul.f32 %v8136_v6, %v10024_v34  ;;  %v3008_v40 = vsub.f32 %v11378_v60, %v2988_v43 }
 0x4b8   : > { %4065 = vmax.xlane.f32.xlu1 %v10061_v42  ;;  %v3015_v53 = vmul.f32 1.442695, %v2998_v23  ;;  %8143 = vpow2.f32 %v3013_v1  ;;  %v2982_v51 = vpop.xlane.xlu1 %2981  ;;  %v3096_v48 = vmul.f32 %v8138_v46, %v10024_v34  ;;  %v8140_v25 = vpop.eup %8139  ;;  %v3002_v34 = vsub.f32 %v11376_v11, %v2976_v36 }
 0x4b9   : > { %v3007_v36 = vsub.f32 %v11377_v26, %v2986_v56 }
 0x4ba   : > { %4067 = vmax.xlane.f32.xlu0 %v10065_v54  ;;  %8145 = vpow2.f32 %v3015_v53  ;;  %v2984_v18 = vpop.xlane.xlu0 %2983 }
 0x4bb   : > { %v3033_v23 = vmul.f32 1.442695, %v3007_v36 }
 0x4bc   : > { %4061 = vmax.xlane.f32.xlu1 %v10070_v19  ;;  %v10097_v50 = vpop.xlane.xlu1 %2993 }
 0x4be   : > { %4063 = vmax.xlane.f32.xlu0 %v10075_v3  ;;  %v10100_v14 = vpop.xlane.xlu0 %2995 }
 0x4c0   : > { %2953 = vadd.xlane.f32.xlu1 %v8124_v29  ;;  %v3003_v29 = vsub.f32 %v9824_v37, %v2978_v58  ;;  %v8142_v39 = vpop.eup %8141  ;;  %v10106_v12 = vpop.xlane.xlu1 %2989 }
 0x4c2   : > { %2955 = vadd.xlane.f32.xlu0 %v8126_v61  ;;  %v3004_v61 = vsub.f32 %v9849_v9, %v2980_v7  ;;  %v8144_v52 = vpop.eup %8143  ;;  %v3021_v9 = vmul.f32 1.442695, %v3001_v44  ;;  %v10109_v7 = vpop.xlane.xlu0 %2991 }
 0x4c3   : > { %v3010_v36 = vsub.f32 %v9909_v20, %v10109_v7  ;;  %v11383_v7 = vld [vmem:[#allocation80_spill] sm:$0xff] }
 0x4c4   : > { %2949 = vadd.xlane.f32.xlu1 %v8128_v0  ;;  %v3025_v0 = vmul.f32 1.442695, %v3003_v29  ;;  %v8146_v37 = vpop.eup %8145 }
 0x4c6   : > { %2951 = vadd.xlane.f32.xlu0 %v8130_v27  ;;  %v3027_v27 = vmul.f32 1.442695, %v3004_v61  ;;  %8147 = vpow2.f32 %v3025_v0 }
 0x4c8   : > { %3119 = vadd.xlane.f32.xlu1 %v3093_v45  ;;  %v10104_v45 = vld [vmem:[%s9173_s11] ss:$0 sm:$0xff]  ;;  %8149 = vpow2.f32 %v3027_v27 }
 0x4c9   : > { %v3169_v58 = vmul.f32 %v8140_v25, %v10104_v45  ;;  %8151 = vpow2.f32 %v3021_v9  ;;  %v3167_v57 = vmul.f32 %v8144_v52, %v10104_v45 }
 0x4ca   : > { %3121 = vadd.xlane.f32.xlu0 %v3094_v21  ;;  %v3023_v21 = vmul.f32 1.442695, %v3002_v34 }
 0x4cc   : > { %3115 = vadd.xlane.f32.xlu1 %v3091_v10  ;;  %v3170_v10 = vmul.f32 %v8142_v39, %v10104_v45  ;;  %8153 = vpow2.f32 %v3023_v21 }
 0x4cd   : > { %8155 = vpow2.f32 %v3033_v23 }
 0x4ce   : > { %3117 = vadd.xlane.f32.xlu0 %v3092_v38 }
 0x4d0   : > { %2961 = vadd.xlane.f32.xlu1 %v8132_v33  ;;  %v3168_v33 = vmul.f32 %v8146_v37, %v10104_v45 }
 0x4d2   : > { %2963 = vadd.xlane.f32.xlu0 %v8134_v13  ;;  %v8148_v13 = vpop.eup %8147 }
 0x4d3   : > { %v8150_v30 = vpop.eup %8149  ;;  %v3173_v61 = vmul.f32 %v8148_v13, %v10104_v45 }
 0x4d4   : > { %2957 = vadd.xlane.f32.xlu1 %v8136_v6  ;;  %v8152_v53 = vpop.eup %8151 }
 0x4d6   : > { %2959 = vadd.xlane.f32.xlu0 %v8138_v46  ;;  %v11379_v46 = vld [vmem:[#allocation75_spill] sm:$0xff]  ;;  %v8154_v56 = vpop.eup %8153 }
 0x4d7   : > { %v3005_v1 = vsub.f32 %v11379_v46, %v2982_v51  ;;  %v3172_v44 = vmul.f32 %v8154_v56, %v10104_v45  ;;  %v8156_v34 = vpop.eup %8155 }
 0x4d8   : > { %3127 = vadd.xlane.f32.xlu1 %v3097_v22 }
 0x4d9   : > { %v3029_v43 = vmul.f32 1.442695, %v3005_v1 }
 0x4da   : > { %3129 = vadd.xlane.f32.xlu0 %v3098_v15  ;;  %v3035_v15 = vmul.f32 1.442695, %v3008_v40 }
 0x4dc   : > { %3123 = vadd.xlane.f32.xlu1 %v3095_v31  ;;  %v11380_v31 = vld [vmem:[#allocation78_spill] sm:$0xff]  ;;  %8157 = vpow2.f32 %v3035_v15 }
 0x4dd   : > { %8159 = vpow2.f32 %v3029_v43 }
 0x4de   : > { %3125 = vadd.xlane.f32.xlu0 %v3096_v48  ;;  %v3006_v48 = vsub.f32 %v11380_v31, %v2984_v18  ;;  %v3171_v18 = vmul.f32 %v8152_v53, %v10104_v45 }
 0x4e0   : > { %3049 = vadd.xlane.f32.xlu1 %v8140_v25  ;;  %v3031_v51 = vmul.f32 1.442695, %v3006_v48 }
 0x4e1   : > { %v10112_v38 = vpop.xlane.xlu1 %3929 }
 0x4e2   : > { %3051 = vadd.xlane.f32.xlu0 %v8142_v39  ;;  %v3174_v39 = vmul.f32 %v8150_v30, %v10104_v45  ;;  %8161 = vpow2.f32 %v3031_v51 }
 0x4e3   : > { %v10115_v8 = vpop.xlane.xlu0 %3931 }
 0x4e4   : > { %3045 = vadd.xlane.f32.xlu1 %v8144_v52  ;;  %v11381_v52 = vld [vmem:[#allocation77_spill] sm:$0xff]  ;;  %v3960_v48 = vsub.f32 %v9916_v24, %v10115_v8 }
 0x4e5   : > { %v10120_v6 = vpop.xlane.xlu1 %3925  ;;  %v3011_v27 = vsub.f32 %v11381_v52, %v10097_v50 }
 0x4e6   : > { %3047 = vadd.xlane.f32.xlu0 %v8146_v37  ;;  %v3012_v37 = vsub.f32 %v9902_v2, %v10100_v14 }
 0x4e7   : > { %v10123_v22 = vpop.xlane.xlu0 %3927  ;;  %v3041_v21 = vmul.f32 1.442695, %v3011_v27 }
 0x4e8   : > { %3187 = vadd.xlane.f32.xlu1 %v3169_v58  ;;  %v8158_v58 = vpop.eup %8157  ;;  %v3043_v50 = vmul.f32 1.442695, %v3012_v37 }
 0x4e9   : > { %v8160_v26 = vpop.eup %8159  ;;  %8163 = vpow2.f32 %v3041_v21  ;;  %v3178_v20 = vmul.f32 %v8158_v58, %v10104_v45 }
 0x4ea   : > { %3189 = vadd.xlane.f32.xlu0 %v3170_v10  ;;  %v11382_v10 = vld [vmem:[#allocation79_spill] sm:$0xff]  ;;  %8165 = vpow2.f32 %v3043_v50  ;;  %v3175_v31 = vmul.f32 %v8160_v26, %v10104_v45 }
 0x4ec   : > { %3183 = vadd.xlane.f32.xlu1 %v3167_v57  ;;  %v3009_v57 = vsub.f32 %v11382_v10, %v10106_v12  ;;  %v8162_v2 = vpop.eup %8161  ;;  %v3177_v12 = vmul.f32 %v8156_v34, %v10104_v45 }
 0x4ed   : > { %v10126_v29 = vpop.xlane.xlu1 %3937 }
 0x4ee   : > { %3185 = vadd.xlane.f32.xlu0 %v3168_v33  ;;  %v3037_v14 = vmul.f32 1.442695, %v3009_v57 }
 0x4ef   : > { %v10128_v25 = vpop.xlane.xlu0 %3939 }
 0x4f0   : > { %3057 = vadd.xlane.f32.xlu1 %v8148_v13  ;;  %8167 = vpow2.f32 %v3037_v14  ;;  %v11387_v14 = vld [vmem:[#allocation56_spill] sm:$0xff] }
 0x4f1   : > { %v10132_v0 = vpop.xlane.xlu1 %3933 }
 0x4f2   : > { %3059 = vadd.xlane.f32.xlu0 %v8150_v30  ;;  %v3039_v30 = vmul.f32 1.442695, %v3010_v36 }
 0x4f3   : > { %v10135_v4 = vpop.xlane.xlu0 %3935 }
 0x4f4   : > { %3053 = vadd.xlane.f32.xlu1 %v8152_v53  ;;  %v3959_v53 = vsub.f32 %v11383_v7, %v10112_v38  ;;  %v11384_v38 = vld [vmem:[#allocation81_spill] sm:$0xff]  ;;  %v11391_v7 = vld [vmem:[#allocation58_spill] sm:$0xff] }
 0x4f6   : > { %3055 = vadd.xlane.f32.xlu0 %v8154_v56  ;;  %v3977_v43 = vmul.f32 1.442695, %v3959_v53 }
 0x4f8   : > { %3195 = vadd.xlane.f32.xlu1 %v3173_v61  ;;  %v3957_v61 = vsub.f32 %v11384_v38, %v10120_v6 }
 0x4fa   : > { %3197 = vadd.xlane.f32.xlu0 %v3174_v39  ;;  %v10172_v39 = vpop.eup %8163  ;;  %v3973_v27 = vmul.f32 1.442695, %v3957_v61 }
 0x4fb   : > { %v10179_v52 = vpop.eup %8165 }
 0x4fc   : > { %3191 = vadd.xlane.f32.xlu1 %v3171_v18  ;;  %v3979_v18 = vmul.f32 1.442695, %v3960_v48  ;;  %v8168_v6 = vpop.eup %8167 }
 0x4fd   : > { %v10140_v11 = vpop.xlane.xlu1 %3945  ;;  %v3179_v36 = vmul.f32 %v8168_v6, %v10104_v45 }
 0x4fe   : > { %3193 = vadd.xlane.f32.xlu0 %v3172_v44  ;;  %v11385_v44 = vld [vmem:[#allocation82_spill] sm:$0xff] }
 0x4ff   : > { %v10144_v9 = vpop.xlane.xlu0 %3947  ;;  %v3958_v24 = vsub.f32 %v11385_v44, %v10123_v22  ;;  %v10190_v22 = vld [vmem:[%s1093_s18 + $0x1] ss:$0 sm:$0xff]  ;;  %s11420_s18 = sld [smem:[#allocation25_spill]] }
 0x500   : > { %3065 = vadd.xlane.f32.xlu1 %v8156_v34 }
 0x501   : > { %v10148_v33 = vpop.xlane.xlu1 %3941  ;;  %v3975_v37 = vmul.f32 1.442695, %v3958_v24 }
 0x502   : > { %3067 = vadd.xlane.f32.xlu0 %v8158_v58 }
 0x503   : > { %v10152_v13 = vpop.xlane.xlu0 %3943 }
 0x504   : > { %3061 = vadd.xlane.f32.xlu1 %v8160_v26 }
 0x505   : > { %v3954_v60 = vpop.xlane.xlu1 %3953 }
 0x506   : > { %v3971_v40 = vsub.f32 %v9960_v35, %v3954_v60  ;;  %3063 = vadd.xlane.f32.xlu0 %v8162_v2 }
 0x507   : > { %v3956_v23 = vpop.xlane.xlu0 %3955 }
 0x508   : > { %v4001_v46 = vmul.f32 1.442695, %v3971_v40  ;;  %v3972_v1 = vsub.f32 %v9964_v17, %v3956_v23  ;;  %3203 = vadd.xlane.f32.xlu1 %v3177_v12  ;;  %v3176_v17 = vmul.f32 %v8162_v2, %v10104_v45  ;;  %v10201_v2 = vld [vmem:[#allocation7] ss:$0 sm:$0xff] }
 0x509   : > { %v10160_v15 = vpop.xlane.xlu1 %3949  ;;  %v1695_v60 = vadd.f32 %v10201_v2, %v11387_v14  ;;  %v1696_v53 = vadd.f32 %v10201_v2, %v11391_v7 }
 0x50a   : > { %8169 = vpow2.f32 %v4001_v46  ;;  %v4003_v35 = vmul.f32 1.442695, %v3972_v1  ;;  %3205 = vadd.xlane.f32.xlu0 %v3178_v20  ;;  %v11390_v46 = vld [vmem:[#allocation83_spill] sm:$0xff] }
 0x50b   : > { %8171 = vpow2.f32 %v3039_v30  ;;  %v10165_v56 = vpop.xlane.xlu0 %3951  ;;  %v11389_v30 = vld [vmem:[#allocation57_spill] sm:$0xff]  ;;  %v3963_v1 = vsub.f32 %v11390_v46, %v10126_v29 }
 0x50c   : > { %8173 = vpow2.f32 %v4003_v35  ;;  %3199 = vadd.xlane.f32.xlu1 %v3175_v31  ;;  %v1693_v23 = vadd.f32 %v10201_v2, %v11389_v30  ;;  %v11392_v31 = vld [vmem:[#allocation59_spill] sm:$0xff] }
 0x50d   : > { %v10170_v51 = vpop.xlane.xlu1 %4041  ;;  %8175 = vpow2.f32 %v3977_v43  ;;  %v1694_v48 = vadd.f32 %v10201_v2, %v11392_v31  ;;  %v11393_v43 = vld [vmem:[#allocation84_spill] sm:$0xff]  ;;  %v3985_v29 = vmul.f32 1.442695, %v3963_v1 }
 0x50e   : > { %3201 = vadd.xlane.f32.xlu0 %v3176_v17  ;;  %8177 = vpow2.f32 %v3979_v18  ;;  %v3964_v38 = vsub.f32 %v11393_v43, %v10128_v25  ;;  %v11394_v18 = vld [vmem:[#allocation85_spill] sm:$0xff] }
 0x50f   : > { %v10176_v8 = vpop.xlane.xlu0 %4043  ;;  %8179 = vpow2.f32 %v3973_v27  ;;  %v3961_v44 = vsub.f32 %v11394_v18, %v10132_v0 }
 0x510   : > { %3073 = vadd.xlane.f32.xlu1 %v10172_v39  ;;  %8181 = vpow2.f32 %v3975_v37  ;;  %v11395_v37 = vld [vmem:[#allocation86_spill] sm:$0xff] }
 0x511   : > { %v10181_v34 = vpop.xlane.xlu1 %4037  ;;  %8183 = vtanh.f32 %v1695_v60  ;;  %v3981_v14 = vmul.f32 1.442695, %v3961_v44 }
 0x512   : > { %3075 = vadd.xlane.f32.xlu0 %v10179_v52  ;;  %8185 = vtanh.f32 %v1693_v23 }
 0x513   : > { %v10184_v58 = vpop.xlane.xlu0 %4039  ;;  %8187 = vtanh.f32 %v1696_v53 }
 0x514   : > { %v10186_v21 = vpop.eup %8169  ;;  %3069 = vadd.xlane.f32.xlu1 %v8168_v6  ;;  %8189 = vtanh.f32 %v1694_v48  ;;  %v3987_v6 = vmul.f32 1.442695, %v3964_v38  ;;  %v11396_v38 = vld [vmem:[#allocation87_spill] sm:$0xff] }
 0x515   : > { %v8172_v10 = vpop.eup %8171  ;;  %v10192_v57 = vpop.xlane.xlu1 %4049  ;;  %v10196_v26 = vmul.f32 %v10186_v21, %v10190_v22 }
 0x516   : > { %v10198_v50 = vpop.eup %8173  ;;  %3071 = vadd.xlane.f32.xlu0 %v8172_v10  ;;  %v3180_v20 = vmul.f32 %v8172_v10, %v10104_v45  ;;  %v3962_v10 = vsub.f32 %v11395_v37, %v10135_v4 }
 0x517   : > { %11386 = vst [vmem:[#allocation72_spill] sm:$0xff] %v10196_v26  ;;  %v10205_v40 = vpop.xlane.xlu0 %4051  ;;  %v10209_v12 = vmul.f32 %v10198_v50, %v10190_v22  ;;  %v8176_v17 = vpop.eup %8175  ;;  %v11407_v26 = vld [vmem:[#allocation66_spill] sm:$0xff] }
 0x518   : > { %3207 = vadd.xlane.f32.xlu1 %v3179_v36  ;;  %v8178_v45 = vpop.eup %8177  ;;  %v4157_v0 = vmul.f32 %v8176_v17, %v10190_v22  ;;  %v3983_v30 = vmul.f32 1.442695, %v3962_v10 }
 0x519   : > { %11388 = vst [vmem:[#allocation74_spill] sm:$0xff] %v10209_v12  ;;  %v10218_v35 = vpop.xlane.xlu1 %4045  ;;  %v8180_v27 = vpop.eup %8179  ;;  %v4158_v46 = vmul.f32 %v8178_v45, %v10190_v22 }
 0x51a   : > { %3209 = vadd.xlane.f32.xlu0 %v3180_v20  ;;  %v8182_v36 = vpop.eup %8181  ;;  %v4155_v7 = vmul.f32 %v8180_v27, %v10190_v22 }
 0x51b   : > { %v10224_v61 = vpop.xlane.xlu0 %4047  ;;  %v8184_v4 = vpop.eup %8183 }
 0x51c   : > { %4009 = vadd.xlane.f32.xlu1 %v8176_v17  ;;  %v8186_v20 = vpop.eup %8185  ;;  %v4156_v17 = vmul.f32 %v8182_v36, %v10190_v22  ;;  %v10236_v44 = vmul.f32 0.5, %v8184_v4  ;;  %v11399_v4 = vld [vmem:[#allocation89_spill] sm:$0xff] }
 0x51d   : > { %v2938_v24 = vpop.xlane.xlu1 %2937  ;;  %v8188_v53 = vpop.eup %8187 }
 0x51e   : > { %4011 = vadd.xlane.f32.xlu0 %v8178_v45  ;;  %8191 = vrcp.f32 %v2938_v24  ;;  %v8190_v48 = vpop.eup %8189 }
 0x51f   : > { %v2940_v25 = vpop.xlane.xlu0 %2939  ;;  %8193 = vpow2.f32 %v3985_v29  ;;  %v3967_v29 = vsub.f32 %v11396_v38, %v10140_v11  ;;  %v11401_v38 = vld [vmem:[#allocation90_spill] sm:$0xff] }
 0x520   : > { %4005 = vadd.xlane.f32.xlu1 %v8180_v27  ;;  %8195 = vrcp.f32 %v2940_v25  ;;  %v11397_v27 = vld [vmem:[#allocation88_spill] sm:$0xff] }
 0x521   : > { %v2934_v60 = vpop.xlane.xlu1 %2933  ;;  %v3968_v37 = vsub.f32 %v11397_v27, %v10144_v9  ;;  %v3965_v9 = vsub.f32 %v11399_v4, %v10148_v33  ;;  %v11403_v4 = vld [vmem:[#allocation63_spill] sm:$0xff] }
 0x522   : > { %8197 = vrcp.f32 %v2934_v60  ;;  %4007 = vadd.xlane.f32.xlu0 %v8182_v36  ;;  %v10244_v36 = vmul.f32 0.5, %v8188_v53 }
 0x523   : > { %8199 = vpow2.f32 %v3987_v6  ;;  %v2936_v23 = vpop.xlane.xlu0 %2935  ;;  %v3995_v33 = vmul.f32 1.442695, %v3968_v37 }
 0x524   : > { %8201 = vrcp.f32 %v2936_v23  ;;  %4175 = vadd.xlane.f32.xlu1 %v4157_v0  ;;  %v10249_v23 = vmul.f32 0.5, %v8186_v20 }
 0x525   : > { %8203 = vpow2.f32 %v3981_v14  ;;  %v3104_v1 = vpop.xlane.xlu1 %3103  ;;  %v11398_v14 = vld [vmem:[#allocation60_spill] sm:$0xff] }
 0x526   : > { %4177 = vadd.xlane.f32.xlu0 %v4158_v46  ;;  %8205 = vpow2.f32 %v3983_v30  ;;  %v1699_v11 = vadd.f32 %v10201_v2, %v11398_v14  ;;  %v3993_v46 = vmul.f32 1.442695, %v3967_v29  ;;  %v10262_v29 = vmul.f32 0.5, %v8190_v48 }
 0x527   : > { %v3106_v31 = vpop.xlane.xlu0 %3105 }
 0x528   : > { %4171 = vadd.xlane.f32.xlu1 %v4155_v7  ;;  %v8192_v43 = vpop.eup %8191  ;;  %8207 = vtanh.f32 %v1699_v11 }
 0x529   : > { %v3100_v45 = vpop.xlane.xlu1 %3099  ;;  %v8194_v18 = vpop.eup %8193  ;;  %v3149_v24 = vmul.f32 %v8192_v43, %v3104_v1  ;;  %8209 = vpow2.f32 %v3993_v46  ;;  %v1698_v46 = vadd.f32 %v10201_v2, %v11403_v4 }
 0x52a   : > { %4173 = vadd.xlane.f32.xlu0 %v4156_v17  ;;  %v8196_v6 = vpop.eup %8195  ;;  %v11400_v17 = vld [vmem:[#allocation61_spill] sm:$0xff]  ;;  %v4161_v11 = vmul.f32 %v8194_v18, %v10190_v22 }
 0x52b   : > { %v3102_v10 = vpop.xlane.xlu0 %3101  ;;  %v3249_v60 = vadd.f32 %v3149_v24, %v10236_v44  ;;  %v3150_v0 = vmul.f32 %v8196_v6, %v3106_v31  ;;  %v1697_v43 = vadd.f32 %v10201_v2, %v11400_v17  ;;  %v3966_v24 = vsub.f32 %v11401_v38, %v10152_v13 }
 0x52c   : > { %v8198_v25 = vpop.eup %8197  ;;  %4017 = vadd.xlane.f32.xlu1 %v8194_v18 }
 0x52d   : > { %v8200_v30 = vpop.eup %8199  ;;  %v3147_v1 = vmul.f32 %v8198_v25, %v3100_v45  ;;  %v10253_v7 = vpop.xlane.xlu1 %4057  ;;  %3266 = vst.msk [vmem:[%s10240_s20 + $0x10] sm:$0xff] %vm3263_vm4, %v3249_v60  ;;  %v3250_v20 = vadd.f32 %v3150_v0, %v10244_v36  ;;  %v11402_v25 = vld [vmem:[#allocation62_spill] sm:$0xff]  ;;  %v3989_v60 = vmul.f32 1.442695, %v3965_v9  ;;  %8211 = vtanh.f32 %v1697_v43 }
 0x52e   : > { %v8202_v53 = vpop.eup %8201  ;;  %4019 = vadd.xlane.f32.xlu0 %v8200_v30  ;;  %v1700_v13 = vadd.f32 %v10201_v2, %v11402_v25  ;;  %8213 = vpow2.f32 %v3995_v33  ;;  %v4162_v9 = vmul.f32 %v8200_v30, %v10190_v22 }
 0x52f   : > { %v8204_v31 = vpop.eup %8203  ;;  %v3247_v45 = vadd.f32 %v3147_v1, %v10249_v23  ;;  %v3148_v6 = vmul.f32 %v8202_v53, %v3102_v10  ;;  %v10265_v27 = vpop.xlane.xlu0 %4059  ;;  %3267 = vst.msk [vmem:[%s10240_s20 + $0x18] sm:$0xff] %vm3263_vm4, %v3250_v20  ;;  %v3991_v10 = vmul.f32 1.442695, %v3966_v24 }
 0x530   : > { %4013 = vadd.xlane.f32.xlu1 %v8204_v31  ;;  %v8206_v14 = vpop.eup %8205  ;;  %8215 = vtanh.f32 %v1700_v13  ;;  %v4159_v53 = vmul.f32 %v8204_v31, %v10190_v22 }
 0x531   : > { %3264 = vst.msk [vmem:[%s10240_s20] sm:$0xff] %vm3263_vm4, %v3247_v45  ;;  %v3248_v48 = vadd.f32 %v3148_v6, %v10262_v29  ;;  %v10274_v37 = vpop.xlane.xlu1 %4053  ;;  %8217 = vpow2.f32 %v3989_v60  ;;  %v4160_v17 = vmul.f32 %v8206_v14, %v10190_v22  ;;  %v11404_v45 = vld [vmem:[#allocation91_spill] sm:$0xff] }
 0x532   : > { %4015 = vadd.xlane.f32.xlu0 %v8206_v14  ;;  %8219 = vpow2.f32 %v3991_v10  ;;  %v8208_v38 = vpop.eup %8207  ;;  %v3969_v31 = vsub.f32 %v11404_v45, %v10160_v15  ;;  %v3970_v14 = vsub.f32 %v9972_v62, %v10165_v56 }
 0x533   : > { %3265 = vst.msk [vmem:[%s10240_s20 + $0x8] sm:$0xff] %vm3263_vm4, %v3248_v48  ;;  %v10279_v0 = vpop.xlane.xlu0 %4055  ;;  %v8210_v24 = vpop.eup %8209 }
 0x534   : > { %4183 = vadd.xlane.f32.xlu1 %v4161_v11  ;;  %v3997_v11 = vmul.f32 1.442695, %v3969_v31  ;;  %v4165_v15 = vmul.f32 %v8210_v24, %v10190_v22  ;;  %v3999_v56 = vmul.f32 1.442695, %v3970_v14 }
 0x535   : > { %v2946_v1 = vpop.xlane.xlu1 %2945 }
 0x536   : > { %4185 = vadd.xlane.f32.xlu0 %v4162_v9  ;;  %8221 = vrcp.f32 %v2946_v1  ;;  %v10290_v9 = vmul.f32 0.5, %v8208_v38 }
 0x537   : > { %v2948_v18 = vpop.xlane.xlu0 %2947  ;;  %8223 = vtanh.f32 %v1698_v46  ;;  %v8212_v30 = vpop.eup %8211 }
 0x538   : > { %4179 = vadd.xlane.f32.xlu1 %v4159_v53  ;;  %8225 = vrcp.f32 %v2948_v18  ;;  %v8214_v33 = vpop.eup %8213  ;;  %v11405_v18 = vld [vmem:[#allocation64_spill] sm:$0xff] }
 0x539   : > { %v2942_v43 = vpop.xlane.xlu1 %2941 }
 0x53a   : > { %8227 = vrcp.f32 %v2942_v43  ;;  %4181 = vadd.xlane.f32.xlu0 %v4160_v17  ;;  %v8216_v25 = vpop.eup %8215  ;;  %v1703_v17 = vadd.f32 %v10201_v2, %v11405_v18  ;;  %v11406_v43 = vld [vmem:[#allocation65_spill] sm:$0xff] }
 0x53b   : > { %v2944_v20 = vpop.xlane.xlu0 %2943  ;;  %v8218_v13 = vpop.eup %8217  ;;  %v1701_v62 = vadd.f32 %v10201_v2, %v11406_v43  ;;  %v10297_v31 = vmul.f32 0.5, %v8216_v25  ;;  %v1704_v25 = vadd.f32 %v10201_v2, %v11407_v26  ;;  %v11408_v26 = vld [vmem:[#allocation67_spill] sm:$0xff] }
 0x53c   : > { %8229 = vrcp.f32 %v2944_v20  ;;  %4025 = vadd.xlane.f32.xlu1 %v8210_v24  ;;  %v8220_v48 = vpop.eup %8219  ;;  %v10301_v24 = vmul.f32 0.5, %v8212_v30 }
 0x53d   : > { %v3112_v6 = vpop.xlane.xlu1 %3111  ;;  %8231 = vpow2.f32 %v3997_v11 }
 0x53e   : > { %4027 = vadd.xlane.f32.xlu0 %v8214_v33  ;;  %8233 = vpow2.f32 %v3999_v56 }
 0x53f   : > { %v3114_v60 = vpop.xlane.xlu0 %3113  ;;  %8235 = vtanh.f32 %v1703_v17 }
 0x540   : > { %4021 = vadd.xlane.f32.xlu1 %v8218_v13  ;;  %v8222_v10 = vpop.eup %8221  ;;  %8237 = vtanh.f32 %v1701_v62 }
 0x541   : > { %v3108_v4 = vpop.xlane.xlu1 %3107  ;;  %v8224_v46 = vpop.eup %8223  ;;  %v3153_v1 = vmul.f32 %v8222_v10, %v3112_v6  ;;  %v4166_v6 = vmul.f32 %v8214_v33, %v10190_v22  ;;  %v4071_v10 = vsub.f32 %v9977_v41, %v10170_v51  ;;  %v4163_v33 = vmul.f32 %v8218_v13, %v10190_v22 }
 0x542   : > { %4023 = vadd.xlane.f32.xlu0 %v8220_v48  ;;  %v8226_v53 = vpop.eup %8225  ;;  %v10315_v41 = vmul.f32 0.5, %v8224_v46  ;;  %8239 = vtanh.f32 %v1704_v25 }
 0x543   : > { %v3110_v20 = vpop.xlane.xlu0 %3109  ;;  %v3253_v38 = vadd.f32 %v3153_v1, %v10290_v9  ;;  %v3154_v12 = vmul.f32 %v8226_v53, %v3114_v60  ;;  %v4072_v60 = vsub.f32 %v9982_v59, %v10176_v8  ;;  %v1702_v59 = vadd.f32 %v10201_v2, %v11408_v26 }
 0x544   : > { %v8228_v45 = vpop.eup %8227  ;;  %4191 = vadd.xlane.f32.xlu1 %v4165_v15  ;;  %v4069_v8 = vsub.f32 %v9987_v5, %v10181_v34  ;;  %v4089_v13 = vmul.f32 1.442695, %v4071_v10  ;;  %v4070_v5 = vsub.f32 %v9994_v55, %v10184_v58  ;;  %v11409_v10 = vld [vmem:[#allocation68_spill] sm:$0xff] }
 0x545   : > { %v3151_v18 = vmul.f32 %v8228_v45, %v3108_v4  ;;  %v10305_v14 = vpop.xlane.xlu1 %4065  ;;  %3270 = vst.msk [vmem:[%s10240_s20 + $0x30] sm:$0xff] %vm3263_vm4, %v3253_v38  ;;  %v3254_v30 = vadd.f32 %v3154_v12, %v10297_v31  ;;  %v4164_v12 = vmul.f32 %v8220_v48, %v10190_v22  ;;  %v4091_v15 = vmul.f32 1.442695, %v4072_v60 }
 0x546   : > { %v8230_v43 = vpop.eup %8229  ;;  %4193 = vadd.xlane.f32.xlu0 %v4166_v6  ;;  %8241 = vtanh.f32 %v1702_v59  ;;  %v4085_v48 = vmul.f32 1.442695, %v4069_v8  ;;  %v4087_v62 = vmul.f32 1.442695, %v4070_v5  ;;  %v11410_v59 = vld [vmem:[#allocation92_spill] sm:$0xff] }
 0x547   : > { %v3251_v51 = vadd.f32 %v3151_v18, %v10301_v24  ;;  %v3152_v11 = vmul.f32 %v8230_v43, %v3110_v20  ;;  %v10318_v4 = vpop.xlane.xlu0 %4067  ;;  %3271 = vst.msk [vmem:[%s10240_s20 + $0x38] sm:$0xff] %vm3263_vm4, %v3254_v30  ;;  %8243 = vpow2.f32 %v4089_v13  ;;  %v8232_v17 = vpop.eup %8231  ;;  %v1707_v18 = vadd.f32 %v10201_v2, %v11409_v10 }
 0x548   : > { %4187 = vadd.xlane.f32.xlu1 %v4163_v33  ;;  %8245 = vpow2.f32 %v4091_v15  ;;  %v8234_v55 = vpop.eup %8233  ;;  %v4167_v20 = vmul.f32 %v8232_v17, %v10190_v22  ;;  %v4075_v43 = vsub.f32 %v9998_v49, %v10192_v57  ;;  %v4076_v33 = vsub.f32 %v10002_v63, %v10205_v40  ;;  %v11411_v57 = vld [vmem:[#allocation69_spill] sm:$0xff]  ;;  %v11412_v63 = vld [vmem:[#allocation70_spill] sm:$0xff] }
 0x549   : > { %3268 = vst.msk [vmem:[%s10240_s20 + $0x20] sm:$0xff] %vm3263_vm4, %v3251_v51  ;;  %v3252_v46 = vadd.f32 %v3152_v11, %v10315_v41  ;;  %v10330_v1 = vpop.xlane.xlu1 %4061  ;;  %v8236_v45 = vpop.eup %8235  ;;  %v4073_v2 = vsub.f32 %v11410_v59, %v10218_v35  ;;  %v11413_v15 = vld [vmem:[#allocation93_spill] sm:$0xff] }
 0x54a   : > { %4189 = vadd.xlane.f32.xlu0 %v4164_v12  ;;  %v8238_v38 = vpop.eup %8237  ;;  %v10350_v49 = vmul.f32 0.5, %v8236_v45  ;;  %v4099_v40 = vmul.f32 1.442695, %v4076_v33  ;;  %v4074_v5 = vsub.f32 %v11413_v15, %v10224_v61 }
 0x54b   : > { %3269 = vst.msk [vmem:[%s10240_s20 + $0x28] sm:$0xff] %vm3263_vm4, %v3252_v46  ;;  %v10336_v34 = vpop.xlane.xlu0 %4063  ;;  %v4093_v45 = vmul.f32 1.442695, %v4073_v2 }
 0x54c   : > { %4033 = vadd.xlane.f32.xlu1 %v10186_v21  ;;  %v8240_v6 = vpop.eup %8239 }
 0x54d   : > { %v2954_v53 = vpop.xlane.xlu1 %2953 }
 0x54e   : > { %4035 = vadd.xlane.f32.xlu0 %v10198_v50  ;;  %8247 = vrcp.f32 %v2954_v53  ;;  %v4168_v50 = vmul.f32 %v8234_v55, %v10190_v22  ;;  %v4097_v22 = vmul.f32 1.442695, %v4075_v43  ;;  %v10357_v53 = vld [vmem:[%s9173_s11 + $0x1] ss:$0 sm:$0xff] }
 0x54f   : > { %v2956_v56 = vpop.xlane.xlu0 %2955  ;;  %8249 = vpow2.f32 %v4085_v48 }
 0x550   : > { %4029 = vadd.xlane.f32.xlu1 %v8232_v17  ;;  %8251 = vrcp.f32 %v2956_v56  ;;  %v8242_v60 = vpop.eup %8241  ;;  %v10359_v17 = vmul.f32 0.5, %v8240_v6 }
 0x551   : > { %v2950_v58 = vpop.xlane.xlu1 %2949  ;;  %v8244_v30 = vpop.eup %8243  ;;  %v10365_v10 = vmul.f32 0.5, %v8242_v60 }
 0x552   : > { %8253 = vrcp.f32 %v2950_v58  ;;  %4031 = vadd.xlane.f32.xlu0 %v8234_v55  ;;  %v8246_v11 = vpop.eup %8245 }
 0x553   : > { %8255 = vpow2.f32 %v4087_v62  ;;  %v2952_v21 = vpop.xlane.xlu0 %2951  ;;  %v11414_v62 = vld [vmem:[#allocation71_spill] sm:$0xff]  ;;  %v4242_v60 = vmul.f32 %v8246_v11, %v10357_v53 }
 0x554   : > { %8257 = vrcp.f32 %v2952_v21  ;;  %4195 = vadd.xlane.f32.xlu1 %v4167_v20  ;;  %v10363_v20 = vmul.f32 0.5, %v8238_v38  ;;  %v4095_v38 = vmul.f32 1.442695, %v4074_v5 }
 0x555   : > { %v3120_v25 = vpop.xlane.xlu1 %3119  ;;  %8259 = vtanh.f32 %v1707_v18  ;;  %v4241_v18 = vmul.f32 %v8244_v30, %v10357_v53 }
 0x556   : > { %4197 = vadd.xlane.f32.xlu0 %v4168_v50  ;;  %8261 = vtanh.f32 %v11411_v57  ;;  %v4079_v57 = vsub.f32 %v10035_v32, %v10253_v7 }
 0x557   : > { %v3122_v51 = vpop.xlane.xlu0 %3121  ;;  %8263 = vtanh.f32 %v11412_v63 }
 0x558   : > { %4121 = vadd.xlane.f32.xlu1 %v8244_v30  ;;  %v8248_v26 = vpop.eup %8247  ;;  %8265 = vtanh.f32 %v11414_v62  ;;  %v4077_v62 = vsub.f32 %v10043_v28, %v10274_v37 }
 0x559   : > { %v3116_v8 = vpop.xlane.xlu1 %3115  ;;  %v8250_v12 = vpop.eup %8249  ;;  %v3157_v13 = vmul.f32 %v8248_v26, %v3120_v25  ;;  %8267 = vpow2.f32 %v4097_v22 }
 0x55a   : > { %4123 = vadd.xlane.f32.xlu0 %v8246_v11  ;;  %v8252_v46 = vpop.eup %8251  ;;  %v4239_v30 = vmul.f32 %v8250_v12, %v10357_v53  ;;  %v4101_v37 = vmul.f32 1.442695, %v4077_v62 }
 0x55b   : > { %v3118_v48 = vpop.xlane.xlu0 %3117  ;;  %v3257_v56 = vadd.f32 %v3157_v13, %v10350_v49  ;;  %v3158_v55 = vmul.f32 %v8252_v46, %v3122_v51 }
 0x55c   : > { %v8254_v35 = vpop.eup %8253  ;;  %4117 = vadd.xlane.f32.xlu1 %v8250_v12  ;;  %v4080_v12 = vsub.f32 %v10038_v47, %v10265_v27  ;;  %v4078_v47 = vsub.f32 %v10047_v16, %v10279_v0 }
 0x55d   : > { %v8256_v58 = vpop.eup %8255  ;;  %v3155_v61 = vmul.f32 %v8254_v35, %v3116_v8  ;;  %v2962_v21 = vpop.xlane.xlu1 %2961  ;;  %3274 = vst.msk [vmem:[%s10240_s20 + $0x50] sm:$0xff] %vm3263_vm4, %v3257_v56  ;;  %v3258_v6 = vadd.f32 %v3158_v55, %v10359_v17  ;;  %v4105_v35 = vmul.f32 1.442695, %v4079_v57  ;;  %v4083_v57 = vsub.f32 %v10061_v42, %v10305_v14 }
 0x55e   : > { %v8258_v50 = vpop.eup %8257  ;;  %8269 = vrcp.f32 %v2962_v21  ;;  %4119 = vadd.xlane.f32.xlu0 %v8256_v58  ;;  %v4240_v11 = vmul.f32 %v8256_v58, %v10357_v53 }
 0x55f   : > { %8271 = vpow2.f32 %v4099_v40  ;;  %v3255_v43 = vadd.f32 %v3155_v61, %v10363_v20  ;;  %v3156_v25 = vmul.f32 %v8258_v50, %v3118_v48  ;;  %v2964_v33 = vpop.xlane.xlu0 %2963  ;;  %3275 = vst.msk [vmem:[%s10240_s20 + $0x58] sm:$0xff] %vm3263_vm4, %v3258_v6  ;;  %v8260_v22 = vpop.eup %8259 }
 0x560   : > { %8273 = vrcp.f32 %v2964_v33  ;;  %4259 = vadd.xlane.f32.xlu1 %v4241_v18  ;;  %v8262_v2 = vpop.eup %8261  ;;  %v10386_v48 = vmul.f32 0.5, %v8260_v22  ;;  %v4103_v33 = vmul.f32 1.442695, %v4078_v47 }
 0x561   : > { %8275 = vpow2.f32 %v4093_v45  ;;  %3272 = vst.msk [vmem:[%s10240_s20 + $0x40] sm:$0xff] %vm3263_vm4, %v3255_v43  ;;  %v3256_v51 = vadd.f32 %v3156_v25, %v10365_v10  ;;  %v2958_v26 = vpop.xlane.xlu1 %2957  ;;  %v8264_v8 = vpop.eup %8263  ;;  %v4107_v45 = vmul.f32 1.442695, %v4080_v12  ;;  %v10395_v6 = vmul.f32 0.5, %v8262_v2 }
 0x562   : > { %8277 = vrcp.f32 %v2958_v26  ;;  %4261 = vadd.xlane.f32.xlu0 %v4242_v60  ;;  %v8266_v46 = vpop.eup %8265  ;;  %v10390_v7 = vmul.f32 0.5, %v8264_v8 }
 0x563   : > { %8279 = vpow2.f32 %v4095_v38  ;;  %3273 = vst.msk [vmem:[%s10240_s20 + $0x48] sm:$0xff] %vm3263_vm4, %v3256_v51  ;;  %v2960_v59 = vpop.xlane.xlu0 %2959  ;;  %v8268_v63 = vpop.eup %8267  ;;  %v10400_v0 = vmul.f32 0.5, %v8266_v46 }
 0x564   : > { %8281 = vrcp.f32 %v2960_v59  ;;  %4255 = vadd.xlane.f32.xlu1 %v4239_v30  ;;  %v4245_v25 = vmul.f32 %v8268_v63, %v10357_v53 }
 0x565   : > { %v3128_v13 = vpop.xlane.xlu1 %3127  ;;  %8283 = vpow2.f32 %v4105_v35  ;;  %v4081_v35 = vsub.f32 %v10070_v19, %v10330_v1 }
 0x566   : > { %4257 = vadd.xlane.f32.xlu0 %v4240_v11 }
 0x567   : > { %v3130_v40 = vpop.xlane.xlu0 %3129  ;;  %v4109_v19 = vmul.f32 1.442695, %v4081_v35 }
 0x568   : > { %v8270_v15 = vpop.eup %8269  ;;  %4129 = vadd.xlane.f32.xlu1 %v8268_v63  ;;  %v4084_v63 = vsub.f32 %v10065_v54, %v10318_v4 }
 0x569   : > { %v8272_v5 = vpop.eup %8271  ;;  %v3161_v56 = vmul.f32 %v8270_v15, %v3128_v13  ;;  %v3124_v55 = vpop.xlane.xlu1 %3123 }
 0x56a   : > { %v8274_v32 = vpop.eup %8273  ;;  %4131 = vadd.xlane.f32.xlu0 %v8272_v5  ;;  %v4246_v30 = vmul.f32 %v8272_v5, %v10357_v53  ;;  %v4113_v5 = vmul.f32 1.442695, %v4083_v57  ;;  %v4115_v14 = vmul.f32 1.442695, %v4084_v63 }
 0x56b   : > { %v8276_v58 = vpop.eup %8275  ;;  %v3261_v27 = vadd.f32 %v3161_v56, %v10386_v48  ;;  %v3162_v61 = vmul.f32 %v8274_v32, %v3130_v40  ;;  %v3126_v21 = vpop.xlane.xlu0 %3125  ;;  %v4082_v32 = vsub.f32 %v10075_v3, %v10336_v34 }
 0x56c   : > { %v8278_v50 = vpop.eup %8277  ;;  %4125 = vadd.xlane.f32.xlu1 %v8276_v58  ;;  %v4243_v2 = vmul.f32 %v8276_v58, %v10357_v53 }
 0x56d   : > { %v8280_v28 = vpop.eup %8279  ;;  %3278 = vst.msk [vmem:[%s10240_s20 + $0x70] sm:$0xff] %vm3263_vm4, %v3261_v27  ;;  %v3262_v18 = vadd.f32 %v3162_v61, %v10390_v7  ;;  %v3159_v38 = vmul.f32 %v8278_v50, %v3124_v55  ;;  %v3050_v43 = vpop.xlane.xlu1 %3049  ;;  %v4111_v34 = vmul.f32 1.442695, %v4082_v32 }
 0x56e   : > { %v8282_v16 = vpop.eup %8281  ;;  %8285 = vrcp.f32 %v3050_v43  ;;  %4127 = vadd.xlane.f32.xlu0 %v8280_v28  ;;  %v4244_v8 = vmul.f32 %v8280_v28, %v10357_v53 }
 0x56f   : > { %8287 = vpow2.f32 %v4107_v45  ;;  %3279 = vst.msk [vmem:[%s10240_s20 + $0x78] sm:$0xff] %vm3263_vm4, %v3262_v18  ;;  %v3259_v60 = vadd.f32 %v3159_v38, %v10395_v6  ;;  %v3160_v51 = vmul.f32 %v8282_v16, %v3126_v21  ;;  %v3052_v26 = vpop.xlane.xlu0 %3051  ;;  %v8284_v46 = vpop.eup %8283 }
 0x570   : > { %8289 = vrcp.f32 %v3052_v26  ;;  %4267 = vadd.xlane.f32.xlu1 %v4245_v25  ;;  %v4249_v3 = vmul.f32 %v8284_v46, %v10357_v53  ;;  %v10440_v26 = vld [vmem:[%s11415_s15 + $0x8] sm:$0xff]  }
 0x571   : > { %8291 = vpow2.f32 %v4101_v37  ;;  %3276 = vst.msk [vmem:[%s10240_s20 + $0x60] sm:$0xff] %vm3263_vm4, %v3259_v60  ;;  %v3260_v22 = vadd.f32 %v3160_v51, %v10400_v0  ;;  %v3046_v59 = vpop.xlane.xlu1 %3045  ;;  %v8083_v60 = vld [vmem:[%s11415_s15] sm:$0xff]  }
 0x572   : > { %8293 = vrcp.f32 %v3046_v59  ;;  %4269 = vadd.xlane.f32.xlu0 %v4246_v30  ;;  %7555 = vmatprep.mubr.bf16.mxu0 %v8083_v60 }
 0x573   : > { %8295 = vpow2.f32 %v4103_v33  ;;  %3277 = vst.msk [vmem:[%s10240_s20 + $0x68] sm:$0xff] %vm3263_vm4, %v3260_v22  ;;  %v3048_v11 = vpop.xlane.xlu0 %3047  ;;  %7556 = vmatmul.mubr.bf16.vlgmr.msra.gmra.mrb[104].mxu0 %v10440_v26  ;;  %7523 = vmatprep.mubr.bf16.mxu1 %v8083_v60 }
 0x574   : > { %8297 = vrcp.f32 %v3048_v11  ;;  %4263 = vadd.xlane.f32.xlu1 %v4243_v2 }
 0x575   : > { %v3188_v13 = vpop.xlane.xlu1 %3187  ;;  %8299 = vpow2.f32 %v4113_v5 }
 0x576   : > { %4265 = vadd.xlane.f32.xlu0 %v4244_v8 }
 0x577   : > { %v3190_v12 = vpop.xlane.xlu0 %3189 }
 0x578   : > { %v8286_v40 = vpop.eup %8285  ;;  %4137 = vadd.xlane.f32.xlu1 %v8284_v46 }
 0x579   : > { %v8288_v15 = vpop.eup %8287  ;;  %v3233_v62 = vmul.f32 %v8286_v40, %v3188_v13  ;;  %v3184_v56 = vpop.xlane.xlu1 %3183 }
 0x57a   : > { %v8290_v55 = vpop.eup %8289  ;;  %4139 = vadd.xlane.f32.xlu0 %v8288_v15  ;;  %v4250_v18 = vmul.f32 %v8288_v15, %v10357_v53 }
 0x57b   : > { %v8292_v42 = vpop.eup %8291  ;;  %v3282_v54 = vadd.f32 %v3233_v62, %v10236_v44  ;;  %v3234_v4 = vmul.f32 %v8290_v55, %v3190_v12  ;;  %v3186_v58 = vpop.xlane.xlu0 %3185  ;;  %v8556_v55 = vld [vmem:[%s9173_s11] ss:$0 sm:$0xff]  ;;  %s11439_s11 = sld [smem:[#allocation22_spill]] }
 0x57c   : > { %v8294_v45 = vpop.eup %8293  ;;  %4133 = vadd.xlane.f32.xlu1 %v8292_v42  ;;  %v4247_v16 = vmul.f32 %v8292_v42, %v10357_v53  ;;  %v3181_v42 = vmul.f32 %v8556_v55, %v10172_v39 }
 0x57d   : > { %v8296_v47 = vpop.eup %8295  ;;  %3299 = vst.msk [vmem:[%s10240_s20 + $0x10] sm:$0xff] %vm3296_vm5, %v3282_v54  ;;  %v3283_v1 = vadd.f32 %v3234_v4, %v10244_v36  ;;  %v3231_v27 = vmul.f32 %v8294_v45, %v3184_v56  ;;  %v3058_v61 = vpop.xlane.xlu1 %3057  ;;  %v3182_v4 = vmul.f32 %v8556_v55, %v10179_v52 }
 0x57e   : > { %v8298_v21 = vpop.eup %8297  ;;  %8301 = vrcp.f32 %v3058_v61  ;;  %4135 = vadd.xlane.f32.xlu0 %v8296_v47  ;;  %v4248_v33 = vmul.f32 %v8296_v47, %v10357_v53  ;;  %v11416_v47 = vld [vmem:[#allocation72_spill] sm:$0xff] }
 0x57f   : > { %8303 = vpow2.f32 %v4115_v14  ;;  %3300 = vst.msk [vmem:[%s10240_s20 + $0x18] sm:$0xff] %vm3296_vm5, %v3283_v1  ;;  %v3280_v50 = vadd.f32 %v3231_v27, %v10249_v23  ;;  %v3232_v28 = vmul.f32 %v8298_v21, %v3186_v58  ;;  %v3060_v37 = vpop.xlane.xlu0 %3059  ;;  %v8300_v30 = vpop.eup %8299  ;;  %v11417_v1 = vld [vmem:[#allocation74_spill] sm:$0xff] }
 0x580   : > { %8305 = vrcp.f32 %v3060_v37  ;;  %4275 = vadd.xlane.f32.xlu1 %v4249_v3 }
 0x581   : > { %8307 = vpow2.f32 %v4109_v19  ;;  %3297 = vst.msk [vmem:[%s10240_s20] sm:$0xff] %vm3296_vm5, %v3280_v50  ;;  %v3281_v38 = vadd.f32 %v3232_v28, %v10262_v29  ;;  %v3054_v43 = vpop.xlane.xlu1 %3053  ;;  %v4253_v28 = vmul.f32 %v8300_v30, %v10357_v53 }
 0x582   : > { %8309 = vrcp.f32 %v3054_v43  ;;  %4277 = vadd.xlane.f32.xlu0 %v4250_v18 }
 0x583   : > { %8311 = vpow2.f32 %v4111_v34  ;;  %3298 = vst.msk [vmem:[%s10240_s20 + $0x8] sm:$0xff] %vm3296_vm5, %v3281_v38  ;;  %v3056_v25 = vpop.xlane.xlu0 %3055 }
 0x584   : > { %8313 = vrcp.f32 %v3056_v25  ;;  %4271 = vadd.xlane.f32.xlu1 %v4247_v16 }
 0x585   : > { %v3196_v51 = vpop.xlane.xlu1 %3195 }
 0x586   : > { %4273 = vadd.xlane.f32.xlu0 %v4248_v33 }
 0x587   : > { %v3198_v22 = vpop.xlane.xlu0 %3197 }
 0x588   : > { %v8302_v59 = vpop.eup %8301  ;;  %4145 = vadd.xlane.f32.xlu1 %v8300_v30 }
 0x589   : > { %v8304_v2 = vpop.eup %8303  ;;  %v3237_v11 = vmul.f32 %v8302_v59, %v3196_v51  ;;  %v3192_v8 = vpop.xlane.xlu1 %3191 }
 0x58a   : > { %v8306_v57 = vpop.eup %8305  ;;  %4147 = vadd.xlane.f32.xlu0 %v8304_v2  ;;  %v4254_v16 = vmul.f32 %v8304_v2, %v10357_v53 }
 0x58b   : > { %v8308_v13 = vpop.eup %8307  ;;  %v3286_v46 = vadd.f32 %v3237_v11, %v10290_v9  ;;  %v3238_v63 = vmul.f32 %v8306_v57, %v3198_v22  ;;  %v3194_v12 = vpop.xlane.xlu0 %3193 }
 0x58c   : > { %v8310_v40 = vpop.eup %8309  ;;  %4141 = vadd.xlane.f32.xlu1 %v8308_v13  ;;  %v4251_v27 = vmul.f32 %v8308_v13, %v10357_v53 }
 0x58d   : > { %v8312_v15 = vpop.eup %8311  ;;  %3303 = vst.msk [vmem:[%s10240_s20 + $0x30] sm:$0xff] %vm3296_vm5, %v3286_v46  ;;  %v3287_v5 = vadd.f32 %v3238_v63, %v10297_v31  ;;  %v3235_v35 = vmul.f32 %v8310_v40, %v3192_v8  ;;  %v3066_v62 = vpop.xlane.xlu1 %3065  ;;  %v10482_v8 = vld [vmem:[%s11415_s15 + $0x18] sm:$0xff]   ;;  %v10489_v63 = vld [vmem:[%s11415_s15 + $0x20] sm:$0xff]   ;;  %v10492_v40 = vld [vmem:[%s11415_s15 + $0x28] sm:$0xff]  }
 0x58e   : > { %v8314_v56 = vpop.eup %8313  ;;  %8315 = vrcp.f32 %v3066_v62  ;;  %4143 = vadd.xlane.f32.xlu0 %v8312_v15  ;;  %v4252_v21 = vmul.f32 %v8312_v15, %v10357_v53  ;;  %v10476_v53 = vld [vmem:[%s11415_s15 + $0x10] sm:$0xff]  }
 0x58f   : > { %3304 = vst.msk [vmem:[%s10240_s20 + $0x38] sm:$0xff] %vm3296_vm5, %v3287_v5  ;;  %v3284_v14 = vadd.f32 %v3235_v35, %v10301_v24  ;;  %v3236_v32 = vmul.f32 %v8314_v56, %v3194_v12  ;;  %v3068_v54 = vpop.xlane.xlu0 %3067  ;;  %7559 = vmatprep.mubr.bf16.mxu0 %v10476_v53 }
 0x590   : > { %8317 = vrcp.f32 %v3068_v54  ;;  %3211 = vadd.xlane.f32.xlu1 %v3181_v42  ;;  %7560 = vmatmul.mubr.bf16.gmra.mrb[108].mxu0 %v10482_v8  ;;  %v10501_v54 = vld [vmem:[%s11415_s15 + $0x38] sm:$0xff]  }
 0x591   : > { %3301 = vst.msk [vmem:[%s10240_s20 + $0x20] sm:$0xff] %vm3296_vm5, %v3284_v14  ;;  %v3285_v58 = vadd.f32 %v3236_v32, %v10315_v41  ;;  %v3062_v45 = vpop.xlane.xlu1 %3061  ;;  %7563 = vmatprep.mubr.bf16.mxu0 %v10489_v63  ;;  %v10498_v32 = vld [vmem:[%s11415_s15 + $0x30] sm:$0xff]  }
 0x592   : > { %8319 = vrcp.f32 %v3062_v45  ;;  %3213 = vadd.xlane.f32.xlu0 %v3182_v4 }
 0x593   : > { %3302 = vst.msk [vmem:[%s10240_s20 + $0x28] sm:$0xff] %vm3296_vm5, %v3285_v58  ;;  %v3064_v39 = vpop.xlane.xlu0 %3063 }
 0x594   : > { %8321 = vrcp.f32 %v3064_v39  ;;  %4199 = vadd.xlane.f32.xlu1 %v11416_v47 }
 0x595   : > { %v3204_v19 = vpop.xlane.xlu1 %3203 }
 0x596   : > { %4201 = vadd.xlane.f32.xlu0 %v11417_v1 }
 0x597   : > { %v3206_v52 = vpop.xlane.xlu0 %3205 }
 0x598   : > { %v8316_v61 = vpop.eup %8315  ;;  %4279 = vadd.xlane.f32.xlu1 %v4251_v27  ;;  %7564 = vmatmul.mubr.bf16.gmra.mrb[112].mxu0 %v10492_v40 }
 0x599   : > { %v3241_v3 = vmul.f32 %v8316_v61, %v3204_v19  ;;  %v3200_v34 = vpop.xlane.xlu1 %3199  ;;  %7567 = vmatprep.mubr.bf16.mxu0 %v10498_v32 }
 0x59a   : > { %v8318_v50 = vpop.eup %8317  ;;  %4281 = vadd.xlane.f32.xlu0 %v4252_v21 }
 0x59b   : > { %v3290_v37 = vadd.f32 %v3241_v3, %v10350_v49  ;;  %v3242_v18 = vmul.f32 %v8318_v50, %v3206_v52  ;;  %v3202_v38 = vpop.xlane.xlu0 %3201 }
 0x59c   : > { %v8320_v43 = vpop.eup %8319  ;;  %4283 = vadd.xlane.f32.xlu1 %v4253_v28 }
 0x59d   : > { %3307 = vst.msk [vmem:[%s10240_s20 + $0x50] sm:$0xff] %vm3296_vm5, %v3290_v37  ;;  %v3291_v25 = vadd.f32 %v3242_v18, %v10359_v17  ;;  %v3239_v33 = vmul.f32 %v8320_v43, %v3200_v34  ;;  %v10468_v60 = vpop.xlane.xlu1 %3073 }
 0x59e   : > { %v8322_v51 = vpop.eup %8321  ;;  %4285 = vadd.xlane.f32.xlu0 %v4254_v16 }
 0x59f   : > { %3308 = vst.msk [vmem:[%s10240_s20 + $0x58] sm:$0xff] %vm3296_vm5, %v3291_v25  ;;  %v3288_v30 = vadd.f32 %v3239_v33, %v10363_v20  ;;  %v3240_v22 = vmul.f32 %v8322_v51, %v3202_v38  ;;  %v10473_v59 = vpop.xlane.xlu0 %3075  ;;  %v10521_v25 = vld [vmem:[%s11418_s2] sm:$0xff]   ;;  %s11445_s2 = sld [smem:[#allocation26_spill]] }
 0x5a0   : > { %7568 = vmatmul.mubr.bf16.gmra.mrb[116].mxu0 %v10501_v54 }
 0x5a1   : > { %3305 = vst.msk [vmem:[%s10240_s20 + $0x40] sm:$0xff] %vm3296_vm5, %v3288_v30  ;;  %v3289_v2 = vadd.f32 %v3240_v22, %v10365_v10  ;;  %v3070_v11 = vpop.xlane.xlu1 %3069  ;;  %7623 = vmatprep.mubr.bf16.mxu0 %v10521_v25 }
 0x5a2   : > { %8323 = vrcp.f32 %v3070_v11 }
 0x5a3   : > { %3306 = vst.msk [vmem:[%s10240_s20 + $0x48] sm:$0xff] %vm3296_vm5, %v3289_v2  ;;  %v3072_v57 = vpop.xlane.xlu0 %3071 }
 0x5a4   : > { %8325 = vrcp.f32 %v3072_v57 }
 0x5a5   : > { %v3208_v13 = vpop.xlane.xlu1 %3207 }
 0x5a7   : > { %v3210_v46 = vpop.xlane.xlu0 %3209 }
 0x5a9   : > { %v4010_v12 = vpop.xlane.xlu1 %4009 }
 0x5aa   : > { %8327 = vrcp.f32 %v4010_v12 }
 0x5ab   : > { %v4012_v15 = vpop.xlane.xlu0 %4011 }
 0x5ac   : > { %v8324_v5 = vpop.eup %8323  ;;  %8329 = vrcp.f32 %v4012_v15 }
 0x5ad   : > { %v3243_v35 = vmul.f32 %v8324_v5, %v3208_v13  ;;  %v4006_v62 = vpop.xlane.xlu1 %4005 }
 0x5ae   : > { %v8326_v56 = vpop.eup %8325  ;;  %8331 = vrcp.f32 %v4006_v62 }
 0x5af   : > { %v3292_v55 = vadd.f32 %v3243_v35, %v10395_v6  ;;  %v3244_v42 = vmul.f32 %v8326_v56, %v3210_v46  ;;  %v4008_v14 = vpop.xlane.xlu0 %4007 }
 0x5b0   : > { %8333 = vrcp.f32 %v4008_v14 }
 0x5b1   : > { %3309 = vst.msk [vmem:[%s10240_s20 + $0x60] sm:$0xff] %vm3296_vm5, %v3292_v55  ;;  %v3293_v4 = vadd.f32 %v3244_v42, %v10400_v0  ;;  %v4176_v58 = vpop.xlane.xlu1 %4175 }
 0x5b3   : > { %3310 = vst.msk [vmem:[%s10240_s20 + $0x68] sm:$0xff] %vm3296_vm5, %v3293_v4  ;;  %v4178_v45 = vpop.xlane.xlu0 %4177 }
 0x5b4   : > { %v8328_v39 = vpop.eup %8327 }
 0x5b5   : > { %v4221_v47 = vmul.f32 %v8328_v39, %v4176_v58  ;;  %v4172_v19 = vpop.xlane.xlu1 %4171 }
 0x5b6   : > { %v8330_v1 = vpop.eup %8329 }
 0x5b7   : > { %v4321_v27 = vadd.f32 %v4221_v47, %v10236_v44  ;;  %v4222_v52 = vmul.f32 %v8330_v1, %v4178_v45  ;;  %v4174_v61 = vpop.xlane.xlu0 %4173 }
 0x5b8   : > { %v8332_v21 = vpop.eup %8331 }
 0x5b9   : > { %4338 = vst.msk [vmem:[%s10240_s20 + $0x10] sm:$0xff] %vm4335_vm6, %v4321_v27  ;;  %v4322_v3 = vadd.f32 %v4222_v52, %v10244_v36  ;;  %v4219_v34 = vmul.f32 %v8332_v21, %v4172_v19  ;;  %v4018_v50 = vpop.xlane.xlu1 %4017 }
 0x5ba   : > { %v8334_v28 = vpop.eup %8333  ;;  %8335 = vrcp.f32 %v4018_v50 }
 0x5bb   : > { %4339 = vst.msk [vmem:[%s10240_s20 + $0x18] sm:$0xff] %vm4335_vm6, %v4322_v3  ;;  %v4319_v37 = vadd.f32 %v4219_v34, %v10249_v23  ;;  %v4220_v18 = vmul.f32 %v8334_v28, %v4174_v61  ;;  %v4020_v38 = vpop.xlane.xlu0 %4019 }
 0x5bc   : > { %8337 = vrcp.f32 %v4020_v38 }
 0x5bd   : > { %4336 = vst.msk [vmem:[%s10240_s20] sm:$0xff] %vm4335_vm6, %v4319_v37  ;;  %v4320_v43 = vadd.f32 %v4220_v18, %v10262_v29  ;;  %v4014_v16 = vpop.xlane.xlu1 %4013 }
 0x5be   : > { %8339 = vrcp.f32 %v4014_v16 }
 0x5bf   : > { %4337 = vst.msk [vmem:[%s10240_s20 + $0x8] sm:$0xff] %vm4335_vm6, %v4320_v43  ;;  %v4016_v33 = vpop.xlane.xlu0 %4015 }
 0x5c0   : > { %8341 = vrcp.f32 %v4016_v33 }
 0x5c1   : > { %v4184_v51 = vpop.xlane.xlu1 %4183 }
 0x5c3   : > { %v4186_v30 = vpop.xlane.xlu0 %4185 }
 0x5c4   : > { %v8336_v22 = vpop.eup %8335 }
 0x5c5   : > { %v4225_v2 = vmul.f32 %v8336_v22, %v4184_v51  ;;  %v4180_v11 = vpop.xlane.xlu1 %4179 }
 0x5c6   : > { %v8338_v57 = vpop.eup %8337 }
 0x5c7   : > { %v4325_v13 = vadd.f32 %v4225_v2, %v10290_v9  ;;  %v4226_v46 = vmul.f32 %v8338_v57, %v4186_v30  ;;  %v4182_v12 = vpop.xlane.xlu0 %4181 }
 0x5c8   : > { %v8340_v15 = vpop.eup %8339 }
 0x5c9   : > { %4342 = vst.msk [vmem:[%s10240_s20 + $0x30] sm:$0xff] %vm4335_vm6, %v4325_v13  ;;  %v4326_v5 = vadd.f32 %v4226_v46, %v10297_v31  ;;  %v4223_v35 = vmul.f32 %v8340_v15, %v4180_v11  ;;  %v4026_v62 = vpop.xlane.xlu1 %4025 }
 0x5ca   : > { %v8342_v56 = vpop.eup %8341  ;;  %8343 = vrcp.f32 %v4026_v62 }
 0x5cb   : > { %4343 = vst.msk [vmem:[%s10240_s20 + $0x38] sm:$0xff] %vm4335_vm6, %v4326_v5  ;;  %v4323_v55 = vadd.f32 %v4223_v35, %v10301_v24  ;;  %v4224_v42 = vmul.f32 %v8342_v56, %v4182_v12  ;;  %v4028_v14 = vpop.xlane.xlu0 %4027 }
 0x5cc   : > { %8345 = vrcp.f32 %v4028_v14 }
 0x5cd   : > { %4340 = vst.msk [vmem:[%s10240_s20 + $0x20] sm:$0xff] %vm4335_vm6, %v4323_v55  ;;  %v4324_v4 = vadd.f32 %v4224_v42, %v10315_v41  ;;  %v4022_v58 = vpop.xlane.xlu1 %4021 }
 0x5ce   : > { %8347 = vrcp.f32 %v4022_v58 }
 0x5cf   : > { %4341 = vst.msk [vmem:[%s10240_s20 + $0x28] sm:$0xff] %vm4335_vm6, %v4324_v4  ;;  %v4024_v45 = vpop.xlane.xlu0 %4023 }
 0x5d0   : > { %8349 = vrcp.f32 %v4024_v45 }
 0x5d1   : > { %v4192_v39 = vpop.xlane.xlu1 %4191 }
 0x5d3   : > { %v4194_v47 = vpop.xlane.xlu0 %4193 }
 0x5d4   : > { %v8344_v19 = vpop.eup %8343 }
 0x5d5   : > { %v4229_v1 = vmul.f32 %v8344_v19, %v4192_v39  ;;  %v4188_v27 = vpop.xlane.xlu1 %4187 }
 0x5d6   : > { %v8346_v52 = vpop.eup %8345 }
 0x5d7   : > { %v4329_v61 = vadd.f32 %v4229_v1, %v10350_v49  ;;  %v4230_v21 = vmul.f32 %v8346_v52, %v4194_v47  ;;  %v4190_v3 = vpop.xlane.xlu0 %4189 }
 0x5d8   : > { %v8348_v34 = vpop.eup %8347 }
 0x5d9   : > { %4346 = vst.msk [vmem:[%s10240_s20 + $0x50] sm:$0xff] %vm4335_vm6, %v4329_v61  ;;  %v4330_v50 = vadd.f32 %v4230_v21, %v10359_v17  ;;  %v4227_v28 = vmul.f32 %v8348_v34, %v4188_v27  ;;  %v10542_v37 = vpop.xlane.xlu1 %4033 }
 0x5da   : > { %v8350_v18 = vpop.eup %8349 }
 0x5db   : > { %4347 = vst.msk [vmem:[%s10240_s20 + $0x58] sm:$0xff] %vm4335_vm6, %v4330_v50  ;;  %v4327_v38 = vadd.f32 %v4227_v28, %v10363_v20  ;;  %v4228_v43 = vmul.f32 %v8350_v18, %v4190_v3  ;;  %v10547_v16 = vpop.xlane.xlu0 %4035 }
 0x5dd   : > { %4344 = vst.msk [vmem:[%s10240_s20 + $0x40] sm:$0xff] %vm4335_vm6, %v4327_v38  ;;  %v4328_v33 = vadd.f32 %v4228_v43, %v10365_v10  ;;  %v4030_v51 = vpop.xlane.xlu1 %4029 }
 0x5de   : > { %8351 = vrcp.f32 %v4030_v51 }
 0x5df   : > { %4345 = vst.msk [vmem:[%s10240_s20 + $0x48] sm:$0xff] %vm4335_vm6, %v4328_v33  ;;  %v4032_v30 = vpop.xlane.xlu0 %4031 }
 0x5e0   : > { %8353 = vrcp.f32 %v4032_v30 }
 0x5e1   : > { %v4196_v22 = vpop.xlane.xlu1 %4195 }
 0x5e3   : > { %v4198_v2 = vpop.xlane.xlu0 %4197 }
 0x5e5   : > { %v4122_v11 = vpop.xlane.xlu1 %4121 }
 0x5e6   : > { %8355 = vrcp.f32 %v4122_v11 }
 0x5e7   : > { %v4124_v57 = vpop.xlane.xlu0 %4123 }
 0x5e8   : > { %v8352_v13 = vpop.eup %8351  ;;  %8357 = vrcp.f32 %v4124_v57 }
 0x5e9   : > { %v4231_v46 = vmul.f32 %v8352_v13, %v4196_v22  ;;  %v4118_v12 = vpop.xlane.xlu1 %4117 }
 0x5ea   : > { %v8354_v15 = vpop.eup %8353  ;;  %8359 = vrcp.f32 %v4118_v12 }
 0x5eb   : > { %v4331_v5 = vadd.f32 %v4231_v46, %v10395_v6  ;;  %v4232_v35 = vmul.f32 %v8354_v15, %v4198_v2  ;;  %v4120_v62 = vpop.xlane.xlu0 %4119 }
 0x5ec   : > { %8361 = vrcp.f32 %v4120_v62 }
 0x5ed   : > { %4348 = vst.msk [vmem:[%s10240_s20 + $0x60] sm:$0xff] %vm4335_vm6, %v4331_v5  ;;  %v4332_v56 = vadd.f32 %v4232_v35, %v10400_v0  ;;  %v4260_v55 = vpop.xlane.xlu1 %4259 }
 0x5ef   : > { %4349 = vst.msk [vmem:[%s10240_s20 + $0x68] sm:$0xff] %vm4335_vm6, %v4332_v56  ;;  %v4262_v42 = vpop.xlane.xlu0 %4261 }
 0x5f0   : > { %v8356_v14 = vpop.eup %8355 }
 0x5f1   : > { %v4305_v4 = vmul.f32 %v8356_v14, %v4260_v55  ;;  %v4256_v58 = vpop.xlane.xlu1 %4255 }
 0x5f2   : > { %v8358_v45 = vpop.eup %8357 }
 0x5f3   : > { %v4354_v39 = vadd.f32 %v4305_v4, %v10236_v44  ;;  %v4306_v47 = vmul.f32 %v8358_v45, %v4262_v42  ;;  %v4258_v19 = vpop.xlane.xlu0 %4257 }
 0x5f4   : > { %v8360_v1 = vpop.eup %8359 }
 0x5f5   : > { %4371 = vst.msk [vmem:[%s10240_s20 + $0x10] sm:$0xff] %vm4368_vm7, %v4354_v39  ;;  %v4355_v27 = vadd.f32 %v4306_v47, %v10244_v36  ;;  %v4303_v52 = vmul.f32 %v8360_v1, %v4256_v58  ;;  %v4130_v61 = vpop.xlane.xlu1 %4129 }
 0x5f6   : > { %v8362_v21 = vpop.eup %8361  ;;  %8363 = vrcp.f32 %v4130_v61 }
 0x5f7   : > { %4372 = vst.msk [vmem:[%s10240_s20 + $0x18] sm:$0xff] %vm4368_vm7, %v4355_v27  ;;  %v4352_v3 = vadd.f32 %v4303_v52, %v10249_v23  ;;  %v4304_v34 = vmul.f32 %v8362_v21, %v4258_v19  ;;  %v4132_v50 = vpop.xlane.xlu0 %4131 }
 0x5f8   : > { %8365 = vrcp.f32 %v4132_v50 }
 0x5f9   : > { %4369 = vst.msk [vmem:[%s10240_s20] sm:$0xff] %vm4368_vm7, %v4352_v3  ;;  %v4353_v44 = vadd.f32 %v4304_v34, %v10262_v29  ;;  %v4126_v28 = vpop.xlane.xlu1 %4125 }
 0x5fa   : > { %8367 = vrcp.f32 %v4126_v28 }
 0x5fb   : > { %4370 = vst.msk [vmem:[%s10240_s20 + $0x8] sm:$0xff] %vm4368_vm7, %v4353_v44  ;;  %v4128_v36 = vpop.xlane.xlu0 %4127 }
 0x5fc   : > { %8369 = vrcp.f32 %v4128_v36  ;;  %v4387_v12 = vld [vmem:[%s10240_s20 + $0x10] sm:$0xff] }
 0x5fd   : > { %v4268_v18 = vpop.xlane.xlu1 %4267 }
 0x5fe   : > { %v4388_v2 = vld [vmem:[%s10240_s20 + $0x18] sm:$0xff] }
 0x5ff   : > { %v4270_v23 = vpop.xlane.xlu0 %4269  ;;  %v4402_v62 = vpack.c.bf16 %v4388_v2, %v4387_v12 }
 0x600   : > { %v8364_v38 = vpop.eup %8363  ;;  %v4385_v30 = vld [vmem:[%s10240_s20] sm:$0xff] }
 0x601   : > { %v4309_v43 = vmul.f32 %v8364_v38, %v4268_v18  ;;  %v4264_v33 = vpop.xlane.xlu1 %4263 }
 0x602   : > { %v8366_v51 = vpop.eup %8365  ;;  %v4386_v22 = vld [vmem:[%s10240_s20 + $0x8] sm:$0xff] }
 0x603   : > { %v4358_v11 = vadd.f32 %v4309_v43, %v10290_v9  ;;  %v4310_v29 = vmul.f32 %v8366_v51, %v4270_v23  ;;  %v4266_v57 = vpop.xlane.xlu0 %4265  ;;  %v4401_v13 = vpack.c.bf16 %v4386_v22, %v4385_v30 }
 0x604   : > { %v8368_v46 = vpop.eup %8367 }
 0x605   : > { %4375 = vst.msk [vmem:[%s10240_s20 + $0x30] sm:$0xff] %vm4368_vm7, %v4358_v11  ;;  %v4359_v15 = vadd.f32 %v4310_v29, %v10297_v31  ;;  %v4307_v5 = vmul.f32 %v8368_v46, %v4264_v33  ;;  %v4138_v35 = vpop.xlane.xlu1 %4137  ;;  %7507 = vmatprep.subr.bf16.mxu1 %v4401_v13  ;;  %7607 = vmatprep.subr.bf16.mxu0 %v4401_v13 }
 0x606   : > { %v8370_v56 = vpop.eup %8369  ;;  %8371 = vrcp.f32 %v4138_v35  ;;  %7508 = vmatpush3.bf16.msra.mxu1 %v4401_v13  ;;  %7608 = vmatpush3.bf16.msra.mxu0 %v4401_v13 }
 0x607   : > { %4376 = vst.msk [vmem:[%s10240_s20 + $0x38] sm:$0xff] %vm4368_vm7, %v4359_v15  ;;  %v4356_v9 = vadd.f32 %v4307_v5, %v10301_v24  ;;  %v4308_v55 = vmul.f32 %v8370_v56, %v4266_v57  ;;  %7509 = vmatprep.subr.bf16.mxu1 %v4402_v62  ;;  %7609 = vmatprep.subr.bf16.mxu0 %v4402_v62  ;;  %v4140_v42 = vpop.xlane.xlu0 %4139 }
 0x608   : > { %8373 = vrcp.f32 %v4140_v42 }
 0x609   : > { %4373 = vst.msk [vmem:[%s10240_s20 + $0x20] sm:$0xff] %vm4368_vm7, %v4356_v9  ;;  %v4357_v31 = vadd.f32 %v4308_v55, %v10315_v41  ;;  %v4134_v14 = vpop.xlane.xlu1 %4133 }
 0x60a   : > { %8375 = vrcp.f32 %v4134_v14  ;;  %7510 = vmatpush3.bf16.msra.mxu1 %v4402_v62  ;;  %7610 = vmatpush3.bf16.msra.mxu0 %v4402_v62 }
 0x60b   : > { %4374 = vst.msk [vmem:[%s10240_s20 + $0x28] sm:$0xff] %vm4368_vm7, %v4357_v31  ;;  %v4136_v4 = vpop.xlane.xlu0 %4135 }
 0x60c   : > { %8377 = vrcp.f32 %v4136_v4  ;;  %v4391_v50 = vld [vmem:[%s10240_s20 + $0x30] sm:$0xff] }
 0x60d   : > { %v4276_v24 = vpop.xlane.xlu1 %4275  ;;  %8379 = vrcp.f32 %v10468_v60 }
 0x60e   : > { %v4392_v41 = vld [vmem:[%s10240_s20 + $0x38] sm:$0xff]  ;;  %8381 = vrcp.f32 %v10473_v59 }
 0x60f   : > { %v4278_v58 = vpop.xlane.xlu0 %4277  ;;  %v4404_v60 = vpack.c.bf16 %v4392_v41, %v4391_v50  ;;  %8383 = vrcp.f32 %v10542_v37 }
 0x610   : > { %v8372_v45 = vpop.eup %8371  ;;  %v4389_v1 = vld [vmem:[%s10240_s20 + $0x20] sm:$0xff]  ;;  %8385 = vrcp.f32 %v10547_v16 }
 0x611   : > { %v4313_v39 = vmul.f32 %v8372_v45, %v4276_v24  ;;  %v4272_v47 = vpop.xlane.xlu1 %4271 }
 0x612   : > { %v8374_v19 = vpop.eup %8373  ;;  %v4390_v27 = vld [vmem:[%s10240_s20 + $0x28] sm:$0xff] }
 0x613   : > { %v4362_v52 = vadd.f32 %v4313_v39, %v10350_v49  ;;  %v4314_v61 = vmul.f32 %v8374_v19, %v4278_v58  ;;  %v4274_v21 = vpop.xlane.xlu0 %4273  ;;  %v4403_v3 = vpack.c.bf16 %v4390_v27, %v4389_v1 }
 0x614   : > { %v8376_v34 = vpop.eup %8375 }
 0x615   : > { %4379 = vst.msk [vmem:[%s10240_s20 + $0x50] sm:$0xff] %vm4368_vm7, %v4362_v52  ;;  %v4363_v44 = vadd.f32 %v4314_v61, %v10359_v17  ;;  %v4311_v28 = vmul.f32 %v8376_v34, %v4272_v47  ;;  %v4146_v36 = vpop.xlane.xlu1 %4145  ;;  %7511 = vmatprep.subr.bf16.mxu1 %v4403_v3  ;;  %7611 = vmatprep.subr.bf16.mxu0 %v4403_v3 }
 0x616   : > { %v8378_v18 = vpop.eup %8377  ;;  %7512 = vmatpush3.bf16.msra.mxu1 %v4403_v3  ;;  %7612 = vmatpush3.bf16.msra.mxu0 %v4403_v3 }
 0x617   : > { %4380 = vst.msk [vmem:[%s10240_s20 + $0x58] sm:$0xff] %vm4368_vm7, %v4363_v44  ;;  %v4360_v49 = vadd.f32 %v4311_v28, %v10363_v20  ;;  %v4312_v59 = vmul.f32 %v8378_v18, %v4274_v21  ;;  %7513 = vmatprep.subr.bf16.mxu1 %v4404_v60  ;;  %7613 = vmatprep.subr.bf16.mxu0 %v4404_v60  ;;  %v4148_v17 = vpop.xlane.xlu0 %4147  ;;  %v8380_v20 = vpop.eup %8379  ;;  %v4698_v44 = vld [vmem:[%s11420_s18] sm:$0xf]  ;;  %v8092_v28 = vld [vmem:[%s11419_s9 + $0x8] sm:$0xff]   ;;  %s11450_s18 = sld [smem:[#allocation34_spill]] }
 0x618   : > { %v8382_v16 = vpop.eup %8381  ;;  %v4697_v18 = vld [vmem:[%s11421_s8] sm:$0x3]  ;;  %s11452_s8 = sld [smem:[#allocation35_spill]] }
 0x619   : > { %4377 = vst.msk [vmem:[%s10240_s20 + $0x40] sm:$0xff] %vm4368_vm7, %v4360_v49  ;;  %v4361_v23 = vadd.f32 %v4312_v59, %v10365_v10  ;;  %v4142_v38 = vpop.xlane.xlu1 %4141  ;;  %v8384_v22 = vpop.eup %8383  ;;  %v11423_v49 = vld [vmem:[#allocation41_spill] sm:$0xff] }
 0x61a   : > { %8387 = vrcp.f32 %v4142_v38  ;;  %7514 = vmatpush3.bf16.msra.mxu1 %v4404_v60  ;;  %7614 = vmatpush3.bf16.msra.mxu0 %v4404_v60  ;;  %v8386_v12 = vpop.eup %8385  ;;  %v4724_v60 = vsel %vm1461_vm2, %v4698_v44, 0  ;;  %v8094_v59 = vld [vmem:[%s11419_s9 + $0x18] sm:$0xff]   ;;  %v11426_v38 = vld [vmem:[#allocation44_spill] sm:$0xff] }
 0x61b   : > { %4378 = vst.msk [vmem:[%s10240_s20 + $0x48] sm:$0xff] %vm4368_vm7, %v4361_v23  ;;  %v4144_v37 = vpop.xlane.xlu0 %4143  ;;  %v8096_v23 = vld [vmem:[%s11419_s9 + $0x28] sm:$0xff]  }
 0x61c   : > { %8389 = vrcp.f32 %v4144_v37  ;;  %v4395_v9 = vld [vmem:[%s10240_s20 + $0x50] sm:$0xff] }
 0x61d   : > { %v3212_v43 = vpop.xlane.xlu1 %3211  ;;  %8391 = vrcp.f32 %v4146_v36  ;;  %v8093_v36 = vld [vmem:[%s11419_s9 + $0x10] sm:$0xff]  }
 0x61e   : > { %v3245_v33 = vmul.f32 %v8380_v20, %v3212_v43  ;;  %8393 = vrcp.f32 %v4148_v17  ;;  %v4396_v46 = vld [vmem:[%s10240_s20 + $0x58] sm:$0xff]  ;;  %v8095_v17 = vld [vmem:[%s11419_s9 + $0x20] sm:$0xff]   ;;  %v8097_v37 = vld [vmem:[%s11419_s9 + $0x30] sm:$0xff]  }
 0x61f   : > { %v3214_v51 = vpop.xlane.xlu0 %3213  ;;  %v4406_v42 = vpack.c.bf16 %v4396_v46, %v4395_v9  ;;  %v11429_v20 = vld [vmem:[#allocation46_spill] sm:$0xff] }
 0x620   : > { %v3294_v10 = vadd.f32 %v3245_v33, %v10386_v48  ;;  %v3246_v30 = vmul.f32 %v8382_v16, %v3214_v51  ;;  %v4393_v57 = vld [vmem:[%s10240_s20 + $0x40] sm:$0xff]  ;;  %v11431_v51 = vld [vmem:[#allocation49_spill] sm:$0xff] }
 0x621   : > { %v4200_v2 = vpop.xlane.xlu1 %4199  ;;  %v10676_v43 = vld [vmem:[%s11427_s23] ss:$0 sm:$0xff]  ;;  %s11453_s23 = sld [smem:[#allocation32_spill]] }
 0x622   : > { %3311 = vst.msk [vmem:[%s10240_s20 + $0x70] sm:$0xff] %vm3296_vm5, %v3294_v10  ;;  %v3295_v11 = vadd.f32 %v3246_v30, %v10390_v7  ;;  %v4233_v29 = vmul.f32 %v8384_v22, %v4200_v2  ;;  %v4394_v13 = vld [vmem:[%s10240_s20 + $0x48] sm:$0xff]  ;;  %v11434_v46 = vld [vmem:[#allocation50_spill] sm:$0xff] }
 0x623   : > { %v4202_v15 = vpop.xlane.xlu0 %4201  ;;  %v4405_v5 = vpack.c.bf16 %v4394_v13, %v4393_v57  ;;  %v4848_v57 = vsel %vm1325_vm0, %v4697_v18, 0  ;;  %v11433_v13 = vld [vmem:[#allocation51_spill] sm:$0xff]  ;;  %v11438_v9 = vld [vmem:[#allocation54_spill] sm:$0xff] }
 0x624   : > { %v8388_v35 = vpop.eup %8387  ;;  %3312 = vst.msk [vmem:[%s10240_s20 + $0x78] sm:$0xff] %vm3296_vm5, %v3295_v11  ;;  %v4333_v62 = vadd.f32 %v4233_v29, %v10386_v48  ;;  %v4234_v56 = vmul.f32 %v8386_v12, %v4202_v15  ;;  %v11432_v11 = vld [vmem:[#allocation48_spill] sm:$0xff]  ;;  %v11435_v12 = vld [vmem:[#allocation53_spill] sm:$0xff] }
 0x625   : > { %v4280_v55 = vpop.xlane.xlu1 %4279  ;;  %7515 = vmatprep.subr.bf16.mxu1 %v4405_v5  ;;  %7615 = vmatprep.subr.bf16.mxu0 %v4405_v5  ;;  %v11436_v15 = vld [vmem:[#allocation52_spill] sm:$0xff] }
 0x626   : > { %v8390_v31 = vpop.eup %8389  ;;  %4350 = vst.msk [vmem:[%s10240_s20 + $0x70] sm:$0xff] %vm4335_vm6, %v4333_v62  ;;  %v4334_v14 = vadd.f32 %v4234_v56, %v10390_v7  ;;  %v4315_v4 = vmul.f32 %v8388_v35, %v4280_v55  ;;  %7516 = vmatpush3.bf16.msra.mxu1 %v4405_v5  ;;  %7616 = vmatpush3.bf16.msra.mxu0 %v4405_v5  ;;  %v11437_v5 = vld [vmem:[#allocation55_spill] sm:$0xff] }
 0x627   : > { %7517 = vmatprep.subr.bf16.mxu1 %v4406_v42  ;;  %7617 = vmatprep.subr.bf16.mxu0 %v4406_v42  ;;  %v4282_v24 = vpop.xlane.xlu0 %4281  ;;  %v8392_v39 = vpop.eup %8391 }
 0x628   : > { %4351 = vst.msk [vmem:[%s10240_s20 + $0x78] sm:$0xff] %vm4335_vm6, %v4334_v14  ;;  %v4364_v58 = vadd.f32 %v4315_v4, %v10395_v6  ;;  %v4316_v45 = vmul.f32 %v8390_v31, %v4282_v24  ;;  %v8394_v27 = vpop.eup %8393 }
 0x629   : > { %v4284_v47 = vpop.xlane.xlu1 %4283 }
 0x62a   : > { %4381 = vst.msk [vmem:[%s10240_s20 + $0x60] sm:$0xff] %vm4368_vm7, %v4364_v58  ;;  %v4365_v19 = vadd.f32 %v4316_v45, %v10400_v0  ;;  %v4317_v1 = vmul.f32 %v8392_v39, %v4284_v47  ;;  %7518 = vmatpush3.bf16.msra.mxu1 %v4406_v42  ;;  %7618 = vmatpush3.bf16.msra.mxu0 %v4406_v42 }
 0x62b   : > { %v4286_v41 = vpop.xlane.xlu0 %4285 }
 0x62c   : > { %4382 = vst.msk [vmem:[%s10240_s20 + $0x68] sm:$0xff] %vm4368_vm7, %v4365_v19  ;;  %v4366_v6 = vadd.f32 %v4317_v1, %v10386_v48  ;;  %v4318_v52 = vmul.f32 %v8394_v27, %v4286_v41 }
 0x62e   : > { %4383 = vst.msk [vmem:[%s10240_s20 + $0x70] sm:$0xff] %vm4368_vm7, %v4366_v6  ;;  %v4367_v61 = vadd.f32 %v4318_v52, %v10390_v7  ;;  %v11422_v7 = vld [vmem:[#allocation40_spill] sm:$0xff] }
 0x630   : > { %4384 = vst.msk [vmem:[%s10240_s20 + $0x78] sm:$0xff] %vm4368_vm7, %v4367_v61 }
 0x631   : > { %v4397_v0 = vld [vmem:[%s10240_s20 + $0x60] sm:$0xff] }
 0x633   : > { %v4398_v21 = vld [vmem:[%s10240_s20 + $0x68] sm:$0xff] }
 0x634   : > { %v4407_v3 = vpack.c.bf16 %v4398_v21, %v4397_v0 }
 0x635   : > { %v4399_v34 = vld [vmem:[%s10240_s20 + $0x70] sm:$0xff] }
 0x636   : > { %7519 = vmatprep.subr.bf16.mxu1 %v4407_v3  ;;  %7619 = vmatprep.subr.bf16.mxu0 %v4407_v3 }
 0x637   : > { %7520 = vmatpush3.bf16.msra.mxu1 %v4407_v3  ;;  %7620 = vmatpush3.bf16.msra.mxu0 %v4407_v3  ;;  %v4400_v50 = vld [vmem:[%s10240_s20 + $0x78] sm:$0xff]  ;;  %s11444_s20 = sld [smem:[#allocation29_spill]] }
 0x638   : > { %v4408_v48 = vpack.c.bf16 %v4400_v50, %v4399_v34 }
 0x63a   : > { %7521 = vmatprep.subr.bf16.mxu1 %v4408_v48  ;;  %7621 = vmatprep.subr.bf16.mxu0 %v4408_v48 }
 0x63b   : > { %7522 = vmatpush3.bf16.msra.mxu1 %v4408_v48  ;;  %7622 = vmatpush3.bf16.msra.mxu0 %v4408_v48 }
 0x63c   : > { %7639 = vmatprep.subr.bf16.mxu0 %v11422_v7  ;;  %7949 = vmatprep.subr.msk.bf16.mxu1 %vm1461_vm2, %v4698_v44 }
 0x63e   : > { %7524 = vmatmul.mubr.bf16.vlgmr.msra.gmra.mrb[64].mxu1 %v10440_v26  ;;  %7624 = vmatmul.mubr.bf16.vlgmr.msra.gmra.mrb[120].mxu0 %v8092_v28  ;;  %v11424_v26 = vld [vmem:[#allocation42_spill] sm:$0xff] }
 0x63f   : > { %7640 = vmatpush3.bf16.msra.mxu0 %v11422_v7  ;;  %7527 = vmatprep.mubr.bf16.mxu1 %v10476_v53  ;;  %v11425_v53 = vld [vmem:[#allocation43_spill] sm:$0xff] }
 0x640   : > { %7641 = vmatprep.subr.bf16.mxu0 %v11423_v49  ;;  %7627 = vmatprep.mubr.bf16.mxu0 %v8093_v36 }
 0x641   : > { %7572 = vmatpush3.bf16.msra.mxu1 %v4724_v60 }
 0x642   : > { %7950 = vmatprep.subr.msk.bf16.mxu1 %vm1325_vm0, %v4697_v18  ;;  %v6749_v18 = vld [vmem:[%s11439_s11] ss:$0 sm:$0xff]  ;;  %s11462_s11 = sld [smem:[#allocation37_spill]] }
 0x643   : > { %7642 = vmatpush3.bf16.msra.mxu0 %v11423_v49 }
 0x644   : > { %7643 = vmatprep.subr.bf16.mxu0 %v11424_v26 }
 0x646   : > { %7528 = vmatmul.mubr.bf16.gmra.mrb[68].mxu1 %v10482_v8  ;;  %7628 = vmatmul.mubr.bf16.gmra.mrb[124].mxu0 %v8094_v59  ;;  %v11428_v8 = vld [vmem:[#allocation45_spill] sm:$0xff] }
 0x647   : > { %7644 = vmatpush3.bf16.msra.mxu0 %v11424_v26  ;;  %7531 = vmatprep.mubr.bf16.mxu1 %v10489_v63  ;;  %v8098_v63 = vld [vmem:[%s11419_s9 + $0x38] sm:$0xff]  }
 0x648   : > { %7645 = vmatprep.subr.bf16.mxu0 %v11425_v53  ;;  %7631 = vmatprep.mubr.bf16.mxu0 %v8095_v17 }
 0x64b   : > { %7646 = vmatpush3.bf16.msra.mxu0 %v11425_v53 }
 0x64c   : > { %7647 = vmatprep.subr.bf16.mxu0 %v11426_v38 }
 0x64e   : > { %7532 = vmatmul.mubr.bf16.gmra.mrb[72].mxu1 %v10492_v40  ;;  %7632 = vmatmul.mubr.bf16.gmra.mrb[128].mxu0 %v8096_v23  ;;  %v11430_v40 = vld [vmem:[#allocation47_spill] sm:$0xff] }
 0x64f   : > { %7648 = vmatpush3.bf16.msra.mxu0 %v11426_v38  ;;  %7535 = vmatprep.mubr.bf16.mxu1 %v10498_v32  ;;  %v7557_v32 = vpop.f32.mrb[104].mxu0 }
 0x650   : > { %7649 = vmatprep.subr.bf16.mxu0 %v11428_v8  ;;  %7635 = vmatprep.mubr.bf16.mxu0 %v8097_v37  ;;  %v4635_v33 = vadd.f32 %v7557_v32, %v10676_v43  ;;  %v4626_v16 = vpop.f32.mrb[105].mxu0 }
 0x651   : > { %v4627_v10 = vadd.f32 %v10676_v43, %v4626_v16 }
 0x653   : > { %7650 = vmatpush3.bf16.msra.mxu0 %v11428_v8 }
 0x654   : > { %7651 = vmatprep.subr.bf16.mxu0 %v11429_v20 }
 0x656   : > { %7536 = vmatmul.mubr.bf16.gmra.mrb[76].mxu1 %v10501_v54  ;;  %7636 = vmatmul.mubr.bf16.gmra.mrb[132].mxu0 %v8098_v63  ;;  %v7558_v54 = vpop.f32.mrb[106].mxu0 }
 0x657   : > { %7652 = vmatpush3.bf16.msra.mxu0 %v11429_v20  ;;  %7655 = vmatprep.mubr.bf16.mxu0 %v10521_v25  ;;  %v4638_v30 = vadd.f32 %v7558_v54, %v10676_v43  ;;  %v4629_v22 = vpop.f32.mrb[107].mxu0 }
 0x658   : > { %7653 = vmatprep.subr.bf16.mxu0 %v11430_v40  ;;  %v4630_v25 = vadd.f32 %v10676_v43, %v4629_v22 }
 0x659   : > { %v4690_v2 = vpack.c.bf16 %v4638_v30, %v4635_v33 }
 0x65a   : > { %v4689_v29 = vpack.c.bf16 %v4630_v25, %v4627_v10 }
 0x65b   : > { %7654 = vmatpush3.bf16.msra.mxu0 %v11430_v40 }
 0x65c   : > { %7707 = vmatprep.subr.bf16.mxu0 %v11431_v51  ;;  %7573 = vmatprep.mubr.msk.bf16.mxu1 %vm1436_vm3, %v4689_v29 }
 0x65e   : > { %7656 = vmatmul.mubr.bf16.vlgmr.msra.gmra.mrb[136].mxu0 %v8092_v28  ;;  %7574 = vmatmul.mubr.msk.bf16.vlgmr.msra.gmra.mrb[80].mxu1 %vm1436_vm3, %v4690_v2 }
 0x65f   : > { %7708 = vmatpush3.bf16.msra.mxu0 %v11431_v51  ;;  %7659 = vmatprep.mubr.bf16.mxu0 %v8093_v36 }
 0x660   : > { %7709 = vmatprep.subr.bf16.mxu0 %v11432_v11  ;;  %7590 = vmatpush3.bf16.msra.mxu1 %v4848_v57 }
 0x663   : > { %7710 = vmatpush3.bf16.msra.mxu0 %v11432_v11  ;;  %v7561_v35 = vpop.f32.mrb[108].mxu0 }
 0x664   : > { %7711 = vmatprep.subr.bf16.mxu0 %v11433_v13  ;;  %v4651_v62 = vadd.f32 %v7561_v35, %v10676_v43  ;;  %v4642_v56 = vpop.f32.mrb[109].mxu0 }
 0x665   : > { %v4643_v55 = vadd.f32 %v10676_v43, %v4642_v56  ;;  %v7562_v42 = vpop.f32.mrb[110].mxu0 }
 0x666   : > { %7660 = vmatmul.mubr.bf16.gmra.mrb[140].mxu0 %v8094_v59  ;;  %v4654_v31 = vadd.f32 %v7562_v42, %v10676_v43  ;;  %v4645_v14 = vpop.f32.mrb[111].mxu0 }
 0x667   : > { %7712 = vmatpush3.bf16.msra.mxu0 %v11433_v13  ;;  %7663 = vmatprep.mubr.bf16.mxu0 %v8095_v17  ;;  %v4646_v4 = vadd.f32 %v10676_v43, %v4645_v14 }
 0x668   : > { %7713 = vmatprep.subr.bf16.mxu0 %v11434_v46  ;;  %v4692_v24 = vpack.c.bf16 %v4654_v31, %v4651_v62 }
 0x669   : > { %v4691_v58 = vpack.c.bf16 %v4646_v4, %v4643_v55  ;;  %v8099_v4 = vld [vmem:[%s11440_s10] sm:$0xff]  }
 0x66b   : > { %7714 = vmatpush3.bf16.msra.mxu0 %v11434_v46  ;;  %v7565_v45 = vpop.f32.mrb[112].mxu0  ;;  %7577 = vmatprep.mubr.msk.bf16.mxu1 %vm1436_vm3, %v4691_v58  ;;  %v10735_v58 = vld [vmem:[%s11440_s10 + $0x10] sm:$0xff]  }
 0x66c   : > { %7715 = vmatprep.subr.bf16.mxu0 %v11435_v12  ;;  %v4667_v39 = vadd.f32 %v7565_v45, %v10676_v43  ;;  %v4658_v47 = vpop.f32.mrb[113].mxu0  ;;  %7578 = vmatmul.mubr.msk.bf16.gmra.mrb[84].mxu1 %vm1436_vm3, %v4692_v24  ;;  %v10731_v24 = vld [vmem:[%s11440_s10 + $0x8] sm:$0xff]   ;;  %v10738_v45 = vld [vmem:[%s11440_s10 + $0x18] sm:$0xff]  }
 0x66d   : > { %v4659_v19 = vadd.f32 %v10676_v43, %v4658_v47  ;;  %v7566_v1 = vpop.f32.mrb[114].mxu0  ;;  %v10747_v47 = vld [vmem:[%s11440_s10 + $0x28] sm:$0xff]  }
 0x66e   : > { %7664 = vmatmul.mubr.bf16.gmra.mrb[144].mxu0 %v8096_v23  ;;  %v4670_v27 = vadd.f32 %v7566_v1, %v10676_v43  ;;  %v4661_v41 = vpop.f32.mrb[115].mxu0  ;;  %v10754_v1 = vld [vmem:[%s11440_s10 + $0x38] sm:$0xff]  }
 0x66f   : > { %7716 = vmatpush3.bf16.msra.mxu0 %v11435_v12  ;;  %7667 = vmatprep.mubr.bf16.mxu0 %v8097_v37  ;;  %v4662_v6 = vadd.f32 %v10676_v43, %v4661_v41  ;;  %v6792_v41 = vld [vmem:[%s11441_s6] ss:$0 sm:$0xff]  ;;  %s11128_s6 = scalar_lea.vmem %s11462_s11, %s9189_s21 }
 0x670   : > { %7717 = vmatprep.subr.bf16.mxu0 %v11436_v15  ;;  %v4694_v52 = vpack.c.bf16 %v4670_v27, %v4667_v39  ;;  %v10743_v39 = vld [vmem:[%s11440_s10 + $0x20] sm:$0xff]  }
 0x671   : > { %v4693_v61 = vpack.c.bf16 %v4662_v6, %v4659_v19  ;;  %v10751_v19 = vld [vmem:[%s11440_s10 + $0x30] sm:$0xff]  }
 0x673   : > { %7718 = vmatpush3.bf16.msra.mxu0 %v11436_v15  ;;  %v7569_v0 = vpop.f32.mrb[116].mxu0  ;;  %7581 = vmatprep.mubr.msk.bf16.mxu1 %vm1436_vm3, %v4693_v61  ;;  %v5355_v61 = vld [vmem:[%s11442_s28] sm:$0xf] }
 0x674   : > { %7719 = vmatprep.subr.bf16.mxu0 %v11437_v5  ;;  %v4683_v21 = vadd.f32 %v7569_v0, %v10676_v43  ;;  %v4674_v3 = vpop.f32.mrb[117].mxu0  ;;  %7582 = vmatmul.mubr.msk.bf16.gmra.mrb[88].mxu1 %vm1436_vm3, %v4694_v52  ;;  %v5354_v0 = vld [vmem:[%s11443_s7] sm:$0x3] }
 0x675   : > { %v4675_v34 = vadd.f32 %v10676_v43, %v4674_v3  ;;  %v7570_v50 = vpop.f32.mrb[118].mxu0  ;;  %7951 = vmatprep.subr.msk.bf16.mxu1 %vm1461_vm2, %v5355_v61 }
 0x676   : > { %7668 = vmatmul.mubr.bf16.gmra.mrb[148].mxu0 %v8098_v63  ;;  %v4686_v48 = vadd.f32 %v7570_v50, %v10676_v43  ;;  %v4677_v44 = vpop.f32.mrb[119].mxu0 }
 0x677   : > { %7720 = vmatpush3.bf16.msra.mxu0 %v11437_v5  ;;  %v4678_v28 = vadd.f32 %v10676_v43, %v4677_v44  ;;  %7723 = vmatprep.mubr.bf16.mxu0 %v8099_v4 }
 0x678   : > { %7721 = vmatprep.subr.bf16.mxu0 %v11438_v9  ;;  %v4696_v7 = vpack.c.bf16 %v4686_v48, %v4683_v21 }
 0x679   : > { %v4695_v36 = vpack.c.bf16 %v4678_v28, %v4675_v34  ;;  %v5381_v34 = vsel %vm1461_vm2, %v5355_v61, 0 }
 0x67b   : > { %7722 = vmatpush3.bf16.msra.mxu0 %v11438_v9  ;;  %7585 = vmatprep.mubr.msk.bf16.mxu1 %vm1436_vm3, %v4695_v36 }
 0x67c   : > { %7586 = vmatmul.mubr.msk.bf16.gmra.mrb[92].mxu1 %vm1436_vm3, %v4696_v7 }
 0x67e   : > { %7724 = vmatmul.mubr.bf16.vlgmr.msra.gmra.mrb[152].mxu0 %v10731_v24 }
 0x67f   : > { %7727 = vmatprep.mubr.bf16.mxu0 %v10735_v58 }
 0x686   : > { %7728 = vmatmul.mubr.bf16.gmra.mrb[156].mxu0 %v10738_v45 }
 0x687   : > { %7731 = vmatprep.mubr.bf16.mxu0 %v10743_v39 }
 0x68e   : > { %7732 = vmatmul.mubr.bf16.gmra.mrb[160].mxu0 %v10747_v47 }
 0x68f   : > { %7735 = vmatprep.mubr.bf16.mxu0 %v10751_v19 }
 0x696   : > { %7736 = vmatmul.mubr.bf16.gmra.mrb[164].mxu0 %v10754_v1 }
 0x697   : > { %7755 = vmatprep.mubr.bf16.mxu0 %v8099_v4 }
 0x711   : > { %v7525_v60 = vpop.f32.mrb[64].mxu1  ;;  %v7625_v27 = vpop.f32.mrb[120].mxu0 }
 0x712   : > { %v4514_v49 = vpop.f32.mrb[65].mxu1  ;;  %v4523_v26 = vadd.f32 %v7525_v60, %v6749_v18  ;;  %v10759_v6 = vadd.f32 %v7625_v27, %v6792_v41  ;;  %v5171_v52 = vpop.f32.mrb[121].mxu0 }
 0x713   : > { %v7526_v59 = vpop.f32.mrb[66].mxu1  ;;  %v4515_v23 = vadd.f32 %v6749_v18, %v4514_v49  ;;  %v10763_v21 = vadd.f32 %v6792_v41, %v5171_v52  ;;  %v7626_v3 = vpop.f32.mrb[122].mxu0 }
 0x714   : > { %v4526_v17 = vadd.f32 %v7526_v59, %v6749_v18  ;;  %v4517_v53 = vpop.f32.mrb[67].mxu1  ;;  %v10767_v50 = vadd.f32 %v7626_v3, %v6792_v41  ;;  %v5174_v48 = vpop.f32.mrb[123].mxu0 }
 0x715   : > { %v4518_v38 = vadd.f32 %v6749_v18, %v4517_v53  ;;  %v10769_v44 = vadd.f32 %v6792_v41, %v5174_v48 }
 0x716   : > { %v4578_v37 = vpack.c.bf16 %v4526_v17, %v4523_v26  ;;  %v5235_v7 = vpack.c.bf16 %v10767_v50, %v10759_v6 }
 0x717   : > { %v4577_v8 = vpack.c.bf16 %v4518_v38, %v4515_v23 }
 0x719   : > { %v7529_v63 = vpop.f32.mrb[68].mxu1  ;;  %7591 = vmatprep.mubr.msk.bf16.mxu1 %vm1300_vm1, %v4577_v8  ;;  %v7629_v28 = vpop.f32.mrb[124].mxu0 }
 0x71a   : > { %v4530_v20 = vpop.f32.mrb[69].mxu1  ;;  %7592 = vmatmul.mubr.msk.bf16.vlgmr.msra.gmra.mrb[80].mxu1 %vm1300_vm1, %v4578_v37  ;;  %v4539_v43 = vadd.f32 %v7529_v63, %v6749_v18  ;;  %v10774_v36 = vadd.f32 %v7629_v28, %v6792_v41  ;;  %v5187_v60 = vpop.f32.mrb[125].mxu0 }
 0x71b   : > { %v7530_v40 = vpop.f32.mrb[70].mxu1  ;;  %v4531_v16 = vadd.f32 %v6749_v18, %v4530_v20  ;;  %7672 = vmatpush3.bf16.msra.mxu1 %v5381_v34  ;;  %v10778_v49 = vadd.f32 %v6792_v41, %v5187_v60  ;;  %v7630_v59 = vpop.f32.mrb[126].mxu0  ;;  %v5505_v34 = vsel %vm1325_vm0, %v5354_v0, 0 }
 0x71c   : > { %v4542_v32 = vadd.f32 %v7530_v40, %v6749_v18  ;;  %v4533_v33 = vpop.f32.mrb[71].mxu1  ;;  %7952 = vmatprep.subr.msk.bf16.mxu1 %vm1325_vm0, %v5354_v0  ;;  %v10780_v26 = vadd.f32 %v7630_v59, %v6792_v41  ;;  %v5190_v17 = vpop.f32.mrb[127].mxu0 }
 0x71d   : > { %v4534_v51 = vadd.f32 %v6749_v18, %v4533_v33  ;;  %v10782_v53 = vadd.f32 %v6792_v41, %v5190_v17 }
 0x71e   : > { %v4580_v10 = vpack.c.bf16 %v4542_v32, %v4539_v43  ;;  %v5237_v38 = vpack.c.bf16 %v10780_v26, %v10774_v36  ;;  %v10873_v36 = vld [vmem:[%s9205_s0] sm:$0xff] }
 0x71f   : > { %v4579_v54 = vpack.c.bf16 %v4534_v51, %v4531_v16  ;;  %v5236_v63 = vpack.c.bf16 %v10782_v53, %v10778_v49 }
 0x721   : > { %v7533_v30 = vpop.f32.mrb[72].mxu1  ;;  %7595 = vmatprep.mubr.msk.bf16.mxu1 %vm1300_vm1, %v4579_v54  ;;  %v7633_v23 = vpop.f32.mrb[128].mxu0 }
 0x722   : > { %v4546_v22 = vpop.f32.mrb[73].mxu1  ;;  %7596 = vmatmul.mubr.msk.bf16.gmra.mrb[84].mxu1 %vm1300_vm1, %v4580_v10  ;;  %v4555_v2 = vadd.f32 %v7533_v30, %v6749_v18  ;;  %v10786_v37 = vadd.f32 %v7633_v23, %v6792_v41  ;;  %v5203_v8 = vpop.f32.mrb[129].mxu0 }
 0x723   : > { %v7534_v25 = vpop.f32.mrb[74].mxu1  ;;  %v4547_v57 = vadd.f32 %v6749_v18, %v4546_v22  ;;  %v10790_v20 = vadd.f32 %v6792_v41, %v5203_v8  ;;  %v7634_v40 = vpop.f32.mrb[130].mxu0 }
 0x724   : > { %v4558_v11 = vadd.f32 %v7534_v25, %v6749_v18  ;;  %v4549_v29 = vpop.f32.mrb[75].mxu1  ;;  %v10792_v43 = vadd.f32 %v7634_v40, %v6792_v41  ;;  %v5206_v32 = vpop.f32.mrb[131].mxu0 }
 0x725   : > { %v4550_v13 = vadd.f32 %v6749_v18, %v4549_v29  ;;  %v10794_v33 = vadd.f32 %v6792_v41, %v5206_v32 }
 0x726   : > { %v4582_v46 = vpack.c.bf16 %v4558_v11, %v4555_v2  ;;  %v5239_v51 = vpack.c.bf16 %v10792_v43, %v10786_v37  ;;  %v6801_v2 = vld [vmem:[%s11444_s20] ss:$0 sm:$0xff]  ;;  %v10901_v43 = vld [vmem:[%s9205_s0 + $0x28] sm:$0xff] }
 0x727   : > { %v4581_v12 = vpack.c.bf16 %v4550_v13, %v4547_v57  ;;  %v5238_v30 = vpack.c.bf16 %v10794_v33, %v10790_v20 }
 0x729   : > { %v7537_v15 = vpop.f32.mrb[76].mxu1  ;;  %7599 = vmatprep.mubr.msk.bf16.mxu1 %vm1300_vm1, %v4581_v12  ;;  %v7637_v16 = vpop.f32.mrb[132].mxu0 }
 0x72a   : > { %v4562_v5 = vpop.f32.mrb[77].mxu1  ;;  %7600 = vmatmul.mubr.msk.bf16.gmra.mrb[88].mxu1 %vm1300_vm1, %v4582_v46  ;;  %v4571_v62 = vadd.f32 %v7537_v15, %v6749_v18  ;;  %v10798_v10 = vadd.f32 %v7637_v16, %v6792_v41  ;;  %v5219_v54 = vpop.f32.mrb[133].mxu0 }
 0x72b   : > { %v7538_v35 = vpop.f32.mrb[78].mxu1  ;;  %v4563_v55 = vadd.f32 %v6749_v18, %v4562_v5  ;;  %v10802_v22 = vadd.f32 %v6792_v41, %v5219_v54  ;;  %v7638_v25 = vpop.f32.mrb[134].mxu0 }
 0x72c   : > { %v4574_v56 = vadd.f32 %v7538_v35, %v6749_v18  ;;  %v4565_v9 = vpop.f32.mrb[79].mxu1  ;;  %v10805_v11 = vadd.f32 %v7638_v25, %v6792_v41  ;;  %v5222_v29 = vpop.f32.mrb[135].mxu0 }
 0x72d   : > { %v4566_v42 = vadd.f32 %v6749_v18, %v4565_v9  ;;  %v5234_v18 = vpack.c.bf16 %v10769_v44, %v10763_v21  ;;  %v10807_v57 = vadd.f32 %v6792_v41, %v5222_v29 }
 0x72e   : > { %v4584_v31 = vpack.c.bf16 %v4574_v56, %v4571_v62  ;;  %v5241_v46 = vpack.c.bf16 %v10805_v11, %v10798_v10  ;;  %v10921_v10 = vld [vmem:[%s9205_s0 + $0x48] sm:$0xff] }
 0x72f   : > { %v4583_v14 = vpack.c.bf16 %v4566_v42, %v4563_v55  ;;  %v5240_v5 = vpack.c.bf16 %v10807_v57, %v10802_v22 }
 0x731   : > { %7603 = vmatprep.mubr.msk.bf16.mxu1 %vm1300_vm1, %v4583_v14  ;;  %v7657_v13 = vpop.f32.mrb[136].mxu0 }
 0x732   : > { %7604 = vmatmul.mubr.msk.bf16.gmra.mrb[92].mxu1 %vm1300_vm1, %v4584_v31  ;;  %v5292_v12 = vadd.f32 %v7657_v13, %v6801_v2  ;;  %v5283_v15 = vpop.f32.mrb[137].mxu0 }
 0x733   : > { %v5284_v35 = vadd.f32 %v6801_v2, %v5283_v15  ;;  %v7658_v62 = vpop.f32.mrb[138].mxu0 }
 0x734   : > { %v5295_v56 = vadd.f32 %v7658_v62, %v6801_v2  ;;  %v5286_v9 = vpop.f32.mrb[139].mxu0 }
 0x735   : > { %v5287_v55 = vadd.f32 %v6801_v2, %v5286_v9 }
 0x736   : > { %v5347_v31 = vpack.c.bf16 %v5295_v56, %v5292_v12 }
 0x737   : > { %v5346_v27 = vpack.c.bf16 %v5287_v55, %v5284_v35  ;;  %v10818_v55 = vld [vmem:[%s11445_s2] ss:$0 sm:$0xff] }
 0x739   : > { %v7661_v42 = vpop.f32.mrb[140].mxu0  ;;  %7673 = vmatprep.mubr.msk.bf16.mxu1 %vm1436_vm3, %v5346_v27 }
 0x73a   : > { %v5308_v14 = vadd.f32 %v7661_v42, %v6801_v2  ;;  %v5299_v4 = vpop.f32.mrb[141].mxu0  ;;  %7674 = vmatmul.mubr.msk.bf16.vlgmr.msra.gmra.mrb[96].mxu1 %vm1436_vm3, %v5347_v31 }
 0x73b   : > { %v5300_v41 = vadd.f32 %v6801_v2, %v5299_v4  ;;  %v7662_v52 = vpop.f32.mrb[142].mxu0  ;;  %7690 = vmatpush3.bf16.msra.mxu1 %v5505_v34 }
 0x73c   : > { %v5311_v61 = vadd.f32 %v7662_v52, %v6801_v2  ;;  %v5302_v3 = vpop.f32.mrb[143].mxu0 }
 0x73d   : > { %v5303_v48 = vadd.f32 %v6801_v2, %v5302_v3 }
 0x73e   : > { %v5349_v60 = vpack.c.bf16 %v5311_v61, %v5308_v14 }
 0x73f   : > { %v5348_v23 = vpack.c.bf16 %v5303_v48, %v5300_v41 }
 0x741   : > { %v7665_v28 = vpop.f32.mrb[144].mxu0  ;;  %7677 = vmatprep.mubr.msk.bf16.mxu1 %vm1436_vm3, %v5348_v23 }
 0x742   : > { %v5324_v59 = vadd.f32 %v7665_v28, %v6801_v2  ;;  %v5315_v17 = vpop.f32.mrb[145].mxu0  ;;  %7678 = vmatmul.mubr.msk.bf16.gmra.mrb[100].mxu1 %vm1436_vm3, %v5349_v60 }
 0x743   : > { %v5316_v8 = vadd.f32 %v6801_v2, %v5315_v17  ;;  %v7666_v40 = vpop.f32.mrb[146].mxu0 }
 0x744   : > { %v5327_v32 = vadd.f32 %v7666_v40, %v6801_v2  ;;  %v5318_v16 = vpop.f32.mrb[147].mxu0 }
 0x745   : > { %v5319_v54 = vadd.f32 %v6801_v2, %v5318_v16 }
 0x746   : > { %v5351_v25 = vpack.c.bf16 %v5327_v32, %v5324_v59 }
 0x747   : > { %v5350_v12 = vpack.c.bf16 %v5319_v54, %v5316_v8 }
 0x749   : > { %v7669_v0 = vpop.f32.mrb[148].mxu0  ;;  %7681 = vmatprep.mubr.msk.bf16.mxu1 %vm1436_vm3, %v5350_v12 }
 0x74a   : > { %v5340_v29 = vadd.f32 %v7669_v0, %v6801_v2  ;;  %v5331_v13 = vpop.f32.mrb[149].mxu0  ;;  %7682 = vmatmul.mubr.msk.bf16.gmra.mrb[104].mxu1 %vm1436_vm3, %v5351_v25 }
 0x74b   : > { %v5332_v15 = vadd.f32 %v6801_v2, %v5331_v13  ;;  %v7670_v35 = vpop.f32.mrb[150].mxu0 }
 0x74c   : > { %v5343_v62 = vadd.f32 %v7670_v35, %v6801_v2  ;;  %v5334_v56 = vpop.f32.mrb[151].mxu0 }
 0x74d   : > { %v5335_v9 = vadd.f32 %v6801_v2, %v5334_v56  ;;  %v6036_v2 = vld [vmem:[%s8980_s4] sm:$0xf] }
 0x74e   : > { %v5353_v42 = vpack.c.bf16 %v5343_v62, %v5340_v29  ;;  %7953 = vmatprep.subr.msk.bf16.mxu1 %vm1461_vm2, %v6036_v2 }
 0x74f   : > { %v5352_v31 = vpack.c.bf16 %v5335_v9, %v5332_v15 }
 0x751   : > { %7685 = vmatprep.mubr.msk.bf16.mxu1 %vm1436_vm3, %v5352_v31 }
 0x752   : > { %7686 = vmatmul.mubr.msk.bf16.gmra.mrb[108].mxu1 %vm1436_vm3, %v5353_v42 }
 0x753   : > { %7691 = vmatprep.mubr.msk.bf16.mxu1 %vm1300_vm1, %v5234_v18 }
 0x75a   : > { %7692 = vmatmul.mubr.msk.bf16.vlgmr.msra.gmra.mrb[96].mxu1 %vm1300_vm1, %v5235_v7 }
 0x75b   : > { %7695 = vmatprep.mubr.msk.bf16.mxu1 %vm1300_vm1, %v5236_v63 }
 0x762   : > { %7696 = vmatmul.mubr.msk.bf16.gmra.mrb[100].mxu1 %vm1300_vm1, %v5237_v38  ;;  %v10877_v38 = vld [vmem:[%s9205_s0 + $0x8] sm:$0xff] }
 0x763   : > { %7699 = vmatprep.mubr.msk.bf16.mxu1 %vm1300_vm1, %v5238_v30 }
 0x76a   : > { %7700 = vmatmul.mubr.msk.bf16.gmra.mrb[104].mxu1 %vm1300_vm1, %v5239_v51 }
 0x76b   : > { %7703 = vmatprep.mubr.msk.bf16.mxu1 %vm1300_vm1, %v5240_v5 }
 0x772   : > { %7704 = vmatmul.mubr.msk.bf16.gmra.mrb[108].mxu1 %vm1300_vm1, %v5241_v46 }
 0x7ed   : > { %v7593_v14 = vpop.f32.mrb[80].mxu1 }
 0x7ee   : > { %v4956_v4 = vadd.f32 %v7593_v14, %v10818_v55  ;;  %v4884_v27 = vpop.f32.mrb[81].mxu1 }
 0x7ef   : > { %v4954_v41 = vadd.f32 %v10818_v55, %v4884_v27  ;;  %v7594_v52 = vpop.f32.mrb[82].mxu1 }
 0x7f0   : > { %v6778_v61 = vmul.f32 -1.442695, %v4956_v4  ;;  %v4957_v3 = vadd.f32 %v7594_v52, %v10818_v55  ;;  %v4887_v34 = vpop.f32.mrb[83].mxu1 }
 0x7f1   : > { %v6776_v48 = vmul.f32 -1.442695, %v4954_v41  ;;  %v4955_v28 = vadd.f32 %v10818_v55, %v4887_v34 }
 0x7f2   : > { %8395 = vpow2.f32 %v6778_v61  ;;  %v6779_v60 = vmul.f32 -1.442695, %v4957_v3 }
 0x7f3   : > { %8397 = vpow2.f32 %v6776_v48  ;;  %v6777_v59 = vmul.f32 -1.442695, %v4955_v28  ;;  %v6062_v48 = vsel %vm1461_vm2, %v6036_v2, 0 }
 0x7f4   : > { %8399 = vpow2.f32 %v6779_v60  ;;  %7772 = vmatpush3.bf16.msra.mxu1 %v6062_v48 }
 0x7f5   : > { %8401 = vpow2.f32 %v6777_v59  ;;  %v7597_v17 = vpop.f32.mrb[84].mxu1 }
 0x7f6   : > { %v4960_v23 = vadd.f32 %v7597_v17, %v10818_v55  ;;  %v4900_v8 = vpop.f32.mrb[85].mxu1 }
 0x7f7   : > { %v4958_v40 = vadd.f32 %v10818_v55, %v4900_v8  ;;  %v7598_v32 = vpop.f32.mrb[86].mxu1 }
 0x7f8   : > { %v6782_v16 = vmul.f32 -1.442695, %v4960_v23  ;;  %v4961_v54 = vadd.f32 %v7598_v32, %v10818_v55  ;;  %v4903_v0 = vpop.f32.mrb[87].mxu1 }
 0x7f9   : > { %v6780_v29 = vmul.f32 -1.442695, %v4958_v40  ;;  %v4959_v13 = vadd.f32 %v10818_v55, %v4903_v0 }
 0x7fa   : > { %8403 = vpow2.f32 %v6782_v16  ;;  %v6783_v25 = vmul.f32 -1.442695, %v4961_v54 }
 0x7fb   : > { %8405 = vpow2.f32 %v6780_v29  ;;  %v6781_v12 = vmul.f32 -1.442695, %v4959_v13 }
 0x7fc   : > { %v8396_v15 = vpop.eup %8395  ;;  %8407 = vpow2.f32 %v6783_v25 }
 0x7fd   : > { %v8398_v35 = vpop.eup %8397  ;;  %v5020_v62 = vadd.f32 1.0, %v8396_v15  ;;  %8409 = vpow2.f32 %v6781_v12  ;;  %v7601_v56 = vpop.f32.mrb[88].mxu1 }
 0x7fe   : > { %v8400_v9 = vpop.eup %8399  ;;  %v5018_v31 = vadd.f32 1.0, %v8398_v35  ;;  %v4964_v14 = vadd.f32 %v7601_v56, %v10818_v55  ;;  %v4916_v4 = vpop.f32.mrb[89].mxu1 }
 0x7ff   : > { %v8402_v27 = vpop.eup %8401  ;;  %8411 = vrcp.f32 %v5020_v62  ;;  %v5021_v41 = vadd.f32 1.0, %v8400_v9  ;;  %v4962_v42 = vadd.f32 %v10818_v55, %v4916_v4  ;;  %v7602_v52 = vpop.f32.mrb[90].mxu1  ;;  %v10861_v9 = vld [vmem:[%s9205_s0 + $0x10] sm:$0xff] }
 0x800   : > { %8413 = vrcp.f32 %v5018_v31  ;;  %v5019_v61 = vadd.f32 1.0, %v8402_v27  ;;  %v6786_v21 = vmul.f32 -1.442695, %v4964_v14  ;;  %v4965_v44 = vadd.f32 %v7602_v52, %v10818_v55  ;;  %v4919_v18 = vpop.f32.mrb[91].mxu1 }
 0x801   : > { %8415 = vrcp.f32 %v5021_v41  ;;  %v6784_v3 = vmul.f32 -1.442695, %v4962_v42  ;;  %v4963_v34 = vadd.f32 %v10818_v55, %v4919_v18 }
 0x802   : > { %8417 = vrcp.f32 %v5019_v61  ;;  %v6787_v28 = vmul.f32 -1.442695, %v4965_v44 }
 0x803   : > { %8419 = vpow2.f32 %v6786_v21  ;;  %v6785_v60 = vmul.f32 -1.442695, %v4963_v34 }
 0x804   : > { %v8404_v59 = vpop.eup %8403  ;;  %8421 = vpow2.f32 %v6784_v3 }
 0x805   : > { %v8406_v17 = vpop.eup %8405  ;;  %v5024_v23 = vadd.f32 1.0, %v8404_v59  ;;  %8423 = vpow2.f32 %v6787_v28  ;;  %v7605_v2 = vpop.f32.mrb[92].mxu1  ;;  %v10885_v28 = vld [vmem:[%s9205_s0 + $0x30] sm:$0xff]  ;;  %v10889_v59 = vld [vmem:[%s9205_s0 + $0x38] sm:$0xff] }
 0x806   : > { %v8408_v8 = vpop.eup %8407  ;;  %v5022_v40 = vadd.f32 1.0, %v8406_v17  ;;  %8425 = vpow2.f32 %v6785_v60  ;;  %v4968_v32 = vadd.f32 %v7605_v2, %v10818_v55  ;;  %v4932_v6 = vpop.f32.mrb[93].mxu1  ;;  %v10897_v2 = vld [vmem:[%s9205_s0 + $0x20] sm:$0xff] }
 0x807   : > { %v8410_v50 = vpop.eup %8409  ;;  %8427 = vrcp.f32 %v5024_v23  ;;  %v5025_v7 = vadd.f32 1.0, %v8408_v8  ;;  %v4966_v16 = vadd.f32 %v10818_v55, %v4932_v6  ;;  %v7606_v54 = vpop.f32.mrb[94].mxu1 }
 0x808   : > { %8429 = vrcp.f32 %v5022_v40  ;;  %v5023_v49 = vadd.f32 1.0, %v8410_v50  ;;  %v6790_v53 = vmul.f32 -1.442695, %v4968_v32  ;;  %v4969_v63 = vadd.f32 %v7606_v54, %v10818_v55  ;;  %v4935_v0 = vpop.f32.mrb[95].mxu1 }
 0x809   : > { %v8412_v29 = vpop.eup %8411  ;;  %8431 = vrcp.f32 %v5025_v7  ;;  %v6788_v13 = vmul.f32 -1.442695, %v4966_v16  ;;  %v4967_v25 = vadd.f32 %v10818_v55, %v4935_v0  ;;  %v10865_v55 = vld [vmem:[%s9205_s0 + $0x18] sm:$0xff] }
 0x80a   : > { %v8414_v12 = vpop.eup %8413  ;;  %8433 = vrcp.f32 %v5023_v49  ;;  %v6791_v15 = vmul.f32 -1.442695, %v4969_v63  ;;  %v5741_v31 = vmul.f32 %v10861_v9, %v8412_v29  ;;  %v10909_v63 = vld [vmem:[%s9205_s0 + $0x50] sm:$0xff]  ;;  %v10913_v29 = vld [vmem:[%s9205_s0 + $0x58] sm:$0xff] }
 0x80b   : > { %v8416_v35 = vpop.eup %8415  ;;  %8435 = vpow2.f32 %v6790_v53  ;;  %v6789_v62 = vmul.f32 -1.442695, %v4967_v25  ;;  %v5739_v26 = vmul.f32 %v10873_v36, %v8414_v12  ;;  %v10917_v25 = vld [vmem:[%s9205_s0 + $0x40] sm:$0xff] }
 0x80c   : > { %v8418_v56 = vpop.eup %8417  ;;  %8437 = vpow2.f32 %v6788_v13  ;;  %v5742_v14 = vmul.f32 %v10865_v55, %v8416_v35 }
 0x80d   : > { %v8420_v4 = vpop.eup %8419  ;;  %8439 = vpow2.f32 %v6791_v15  ;;  %v5740_v27 = vmul.f32 %v10877_v38, %v8418_v56 }
 0x80e   : > { %v8422_v41 = vpop.eup %8421  ;;  %v5028_v42 = vadd.f32 1.0, %v8420_v4  ;;  %8441 = vpow2.f32 %v6789_v62  ;;  %v5756_v52 = vpack.c.bf16 %v5742_v14, %v5741_v31  ;;  %v10925_v14 = vld [vmem:[%s9205_s0 + $0x70] sm:$0xff] }
 0x80f   : > { %v8424_v61 = vpop.eup %8423  ;;  %v5026_v21 = vadd.f32 1.0, %v8422_v41  ;;  %v5755_v44 = vpack.c.bf16 %v5740_v27, %v5739_v26  ;;  %11446 = vst [vmem:[#allocation73_spill] sm:$0xff] %v10925_v14  ;;  %v10929_v26 = vld [vmem:[%s9205_s0 + $0x78] sm:$0xff]  ;;  %v10933_v41 = vld [vmem:[%s9205_s0 + $0x60] sm:$0xff] }
 0x810   : > { %v8426_v20 = vpop.eup %8425  ;;  %8443 = vrcp.f32 %v5028_v42  ;;  %v5029_v33 = vadd.f32 1.0, %v8424_v61  ;;  %11447 = vst [vmem:[#allocation76_spill] sm:$0xff] %v10929_v26  ;;  %11448 = vst [vmem:[#allocation75_spill] sm:$0xff] %v10933_v41 }
 0x811   : > { %v8428_v30 = vpop.eup %8427  ;;  %8445 = vrcp.f32 %v5026_v21  ;;  %v5027_v18 = vadd.f32 1.0, %v8426_v20  ;;  %7739 = vmatprep.subr.bf16.mxu0 %v5755_v44  ;;  %v6835_v20 = vld [vmem:[%s11450_s18] ss:$0 sm:$0xff] }
 0x812   : > { %v8430_v3 = vpop.eup %8429  ;;  %8447 = vrcp.f32 %v5029_v33  ;;  %7740 = vmatpush3.bf16.msra.mxu0 %v5755_v44  ;;  %v5745_v60 = vmul.f32 %v10885_v28, %v8428_v30  ;;  %v7725_v33 = vpop.f32.mrb[152].mxu0 }
 0x813   : > { %v8432_v34 = vpop.eup %8431  ;;  %8449 = vrcp.f32 %v5027_v18  ;;  %7741 = vmatprep.subr.bf16.mxu0 %v5756_v52  ;;  %v5743_v37 = vmul.f32 %v10897_v2, %v8430_v3  ;;  %v10948_v30 = vadd.f32 %v7725_v33, %v6835_v20  ;;  %v5852_v18 = vpop.f32.mrb[153].mxu0 }
 0x814   : > { %v8434_v48 = vpop.eup %8433  ;;  %v5746_v17 = vmul.f32 %v10889_v59, %v8432_v34  ;;  %v10950_v3 = vadd.f32 %v6835_v20, %v5852_v18 }
 0x815   : > { %v8436_v23 = vpop.eup %8435  ;;  %v5744_v51 = vmul.f32 %v10901_v43, %v8434_v48 }
 0x816   : > { %v8438_v8 = vpop.eup %8437  ;;  %v5032_v40 = vadd.f32 1.0, %v8436_v23  ;;  %7742 = vmatpush3.bf16.msra.mxu0 %v5756_v52  ;;  %v5758_v32 = vpack.c.bf16 %v5746_v17, %v5745_v60  ;;  %v10937_v52 = vld [vmem:[%s9205_s0 + $0x68] sm:$0xff]  ;;  %s11451_s0 = sld [smem:[#allocation36_spill]] }
 0x817   : > { %v8440_v6 = vpop.eup %8439  ;;  %v5030_v50 = vadd.f32 1.0, %v8438_v8  ;;  %v5757_v7 = vpack.c.bf16 %v5744_v51, %v5743_v37  ;;  %11449 = vst [vmem:[#allocation78_spill] sm:$0xff] %v10937_v52 }
 0x818   : > { %v8442_v22 = vpop.eup %8441  ;;  %8451 = vrcp.f32 %v5032_v40  ;;  %v5033_v57 = vadd.f32 1.0, %v8440_v6 }
 0x819   : > { %8453 = vrcp.f32 %v5030_v50  ;;  %v5031_v5 = vadd.f32 1.0, %v8442_v22  ;;  %7743 = vmatprep.subr.bf16.mxu0 %v5757_v7 }
 0x81a   : > { %v8444_v16 = vpop.eup %8443  ;;  %8455 = vrcp.f32 %v5033_v57  ;;  %7744 = vmatpush3.bf16.msra.mxu0 %v5757_v7 }
 0x81b   : > { %v8446_v54 = vpop.eup %8445  ;;  %8457 = vrcp.f32 %v5031_v5  ;;  %7745 = vmatprep.subr.bf16.mxu0 %v5758_v32  ;;  %v5749_v0 = vmul.f32 %v10909_v63, %v8444_v16 }
 0x81c   : > { %v8448_v49 = vpop.eup %8447  ;;  %v5747_v12 = vmul.f32 %v10917_v25, %v8446_v54 }
 0x81d   : > { %v8450_v53 = vpop.eup %8449  ;;  %v5750_v13 = vmul.f32 %v10913_v29, %v8448_v49 }
 0x81e   : > { %7746 = vmatpush3.bf16.msra.mxu0 %v5758_v32  ;;  %v5748_v11 = vmul.f32 %v10921_v10, %v8450_v53 }
 0x81f   : > { %v5760_v46 = vpack.c.bf16 %v5750_v13, %v5749_v0 }
 0x820   : > { %v5759_v15 = vpack.c.bf16 %v5748_v11, %v5747_v12 }
 0x822   : > { %v8452_v35 = vpop.eup %8451  ;;  %7747 = vmatprep.subr.bf16.mxu0 %v5759_v15 }
 0x823   : > { %v8454_v62 = vpop.eup %8453  ;;  %7748 = vmatpush3.bf16.msra.mxu0 %v5759_v15  ;;  %v5753_v4 = vmul.f32 %v10925_v14, %v8452_v35 }
 0x824   : > { %v8456_v56 = vpop.eup %8455  ;;  %7749 = vmatprep.subr.bf16.mxu0 %v5760_v46  ;;  %v5751_v42 = vmul.f32 %v10933_v41, %v8454_v62 }
 0x825   : > { %v8458_v31 = vpop.eup %8457  ;;  %v5754_v27 = vmul.f32 %v10929_v26, %v8456_v56 }
 0x826   : > { %v5752_v61 = vmul.f32 %v10937_v52, %v8458_v31  ;;  %v6035_v31 = vld [vmem:[%s11451_s0] sm:$0xf] }
 0x827   : > { %7750 = vmatpush3.bf16.msra.mxu0 %v5760_v46  ;;  %v5762_v21 = vpack.c.bf16 %v5754_v27, %v5753_v4  ;;  %7954 = vmatprep.subr.msk.bf16.mxu1 %vm1461_vm2, %v6035_v31  ;;  %v6186_v8 = vsel %vm1461_vm2, %v6035_v31, 0 }
 0x828   : > { %v5761_v44 = vpack.c.bf16 %v5752_v61, %v5751_v42 }
 0x82a   : > { %7751 = vmatprep.subr.bf16.mxu0 %v5761_v44 }
 0x82b   : > { %7752 = vmatpush3.bf16.msra.mxu0 %v5761_v44 }
 0x82c   : > { %7753 = vmatprep.subr.bf16.mxu0 %v5762_v21 }
 0x82d   : > { %v10998_v4 = vpop.f32.mrb[96].mxu1 }
 0x82e   : > { %v11000_v27 = vpop.f32.mrb[97].mxu1 }
 0x82f   : > { %7754 = vmatpush3.bf16.msra.mxu0 %v5762_v21  ;;  %v11002_v42 = vpop.f32.mrb[98].mxu1 }
 0x830   : > { %v11004_v61 = vpop.f32.mrb[99].mxu1 }
 0x832   : > { %7756 = vmatmul.mubr.bf16.vlgmr.msra.gmra.mrb[168].mxu0 %v10731_v24  ;;  %v7726_v24 = vpop.f32.mrb[154].mxu0 }
 0x833   : > { %7759 = vmatprep.mubr.bf16.mxu0 %v10735_v58  ;;  %v10952_v34 = vadd.f32 %v7726_v24, %v6835_v20  ;;  %v5855_v58 = vpop.f32.mrb[155].mxu0 }
 0x835   : > { %v11006_v21 = vpop.f32.mrb[100].mxu1 }
 0x836   : > { %v11008_v44 = vpop.f32.mrb[101].mxu1 }
 0x83a   : > { %7760 = vmatmul.mubr.bf16.gmra.mrb[172].mxu0 %v10738_v45  ;;  %v10954_v45 = vadd.f32 %v6835_v20, %v5855_v58 }
 0x83b   : > { %7763 = vmatprep.mubr.bf16.mxu0 %v10743_v39 }
 0x842   : > { %7764 = vmatmul.mubr.bf16.gmra.mrb[176].mxu0 %v10747_v47 }
 0x843   : > { %7767 = vmatprep.mubr.bf16.mxu0 %v10751_v19  ;;  %v7729_v19 = vpop.f32.mrb[156].mxu0 }
 0x844   : > { %v5868_v48 = vpop.f32.mrb[157].mxu0 }
 0x845   : > { %v10962_v60 = vadd.f32 %v6835_v20, %v5868_v48  ;;  %v7730_v17 = vpop.f32.mrb[158].mxu0 }
 0x846   : > { %v10964_v23 = vadd.f32 %v7730_v17, %v6835_v20  ;;  %v5871_v37 = vpop.f32.mrb[159].mxu0 }
 0x847   : > { %v10966_v51 = vadd.f32 %v6835_v20, %v5871_v37  ;;  %v7733_v32 = vpop.f32.mrb[160].mxu0 }
 0x848   : > { %v10972_v6 = vadd.f32 %v7733_v32, %v6835_v20  ;;  %v5884_v50 = vpop.f32.mrb[161].mxu0 }
 0x849   : > { %v10974_v7 = vadd.f32 %v6835_v20, %v5884_v50  ;;  %v7734_v22 = vpop.f32.mrb[162].mxu0 }
 0x84a   : > { %7768 = vmatmul.mubr.bf16.gmra.mrb[180].mxu0 %v10754_v1  ;;  %v10960_v1 = vadd.f32 %v7729_v19, %v6835_v20  ;;  %v10976_v57 = vadd.f32 %v7734_v22, %v6835_v20  ;;  %v5887_v5 = vpop.f32.mrb[163].mxu0  ;;  %v6844_v22 = vld [vmem:[%s11452_s8] ss:$0 sm:$0xff] }
 0x84b   : > { %v10978_v16 = vadd.f32 %v6835_v20, %v5887_v5  ;;  %v7737_v53 = vpop.f32.mrb[164].mxu0 }
 0x84c   : > { %v10984_v0 = vadd.f32 %v7737_v53, %v6835_v20  ;;  %v5900_v13 = vpop.f32.mrb[165].mxu0 }
 0x84d   : > { %v10986_v12 = vadd.f32 %v6835_v20, %v5900_v13  ;;  %v7738_v11 = vpop.f32.mrb[166].mxu0 }
 0x84e   : > { %v10988_v46 = vadd.f32 %v7738_v11, %v6835_v20  ;;  %v5903_v15 = vpop.f32.mrb[167].mxu0 }
 0x84f   : > { %v10990_v35 = vadd.f32 %v6835_v20, %v5903_v15  ;;  %v11010_v20 = vpop.f32.mrb[102].mxu1 }
 0x850   : > { %v11012_v33 = vpop.f32.mrb[103].mxu1 }
 0x851   : > { %v11014_v18 = vpop.f32.mrb[104].mxu1 }
 0x852   : > { %v11016_v24 = vpop.f32.mrb[105].mxu1 }
 0x853   : > { %v11018_v58 = vpop.f32.mrb[106].mxu1 }
 0x854   : > { %v11020_v19 = vpop.f32.mrb[107].mxu1 }
 0x855   : > { %v11022_v48 = vpop.f32.mrb[108].mxu1 }
 0x856   : > { %v11024_v17 = vpop.f32.mrb[109].mxu1 }
 0x857   : > { %v11026_v37 = vpop.f32.mrb[110].mxu1 }
 0x858   : > { %v11028_v32 = vpop.f32.mrb[111].mxu1 }
 0x905   : > { %v7757_v50 = vpop.f32.mrb[168].mxu0 }
 0x906   : > { %v5964_v5 = vpop.f32.mrb[169].mxu0  ;;  %v5973_v13 = vadd.f32 %v7757_v50, %v6844_v22 }
 0x907   : > { %v7758_v53 = vpop.f32.mrb[170].mxu0  ;;  %v5965_v62 = vadd.f32 %v6844_v22, %v5964_v5 }
 0x908   : > { %v5976_v11 = vadd.f32 %v7758_v53, %v6844_v22  ;;  %v5967_v15 = vpop.f32.mrb[171].mxu0 }
 0x909   : > { %v5968_v56 = vadd.f32 %v6844_v22, %v5967_v15 }
 0x90a   : > { %v6028_v54 = vpack.c.bf16 %v5976_v11, %v5973_v13 }
 0x90b   : > { %v6027_v49 = vpack.c.bf16 %v5968_v56, %v5965_v62 }
 0x90d   : > { %v7761_v40 = vpop.f32.mrb[172].mxu0  ;;  %7773 = vmatprep.mubr.msk.bf16.mxu1 %vm1436_vm3, %v6027_v49 }
 0x90e   : > { %v5980_v39 = vpop.f32.mrb[173].mxu0  ;;  %7774 = vmatmul.mubr.msk.bf16.vlgmr.msra.gmra.mrb[112].mxu1 %vm1436_vm3, %v6028_v54  ;;  %v5989_v52 = vadd.f32 %v7761_v40, %v6844_v22 }
 0x90f   : > { %v7762_v47 = vpop.f32.mrb[174].mxu0  ;;  %7790 = vmatpush3.bf16.msra.mxu1 %v6186_v8  ;;  %v5981_v50 = vadd.f32 %v6844_v22, %v5980_v39 }
 0x910   : > { %v5992_v26 = vadd.f32 %v7762_v47, %v6844_v22  ;;  %v5983_v41 = vpop.f32.mrb[175].mxu0 }
 0x911   : > { %v5984_v53 = vadd.f32 %v6844_v22, %v5983_v41 }
 0x912   : > { %v6030_v14 = vpack.c.bf16 %v5992_v26, %v5989_v52 }
 0x913   : > { %v6029_v5 = vpack.c.bf16 %v5984_v53, %v5981_v50 }
 0x915   : > { %v7765_v15 = vpop.f32.mrb[176].mxu0  ;;  %7777 = vmatprep.mubr.msk.bf16.mxu1 %vm1436_vm3, %v6029_v5 }
 0x916   : > { %v5996_v62 = vpop.f32.mrb[177].mxu0  ;;  %7778 = vmatmul.mubr.msk.bf16.gmra.mrb[116].mxu1 %vm1436_vm3, %v6030_v14  ;;  %v6005_v49 = vadd.f32 %v7765_v15, %v6844_v22 }
 0x917   : > { %v7766_v56 = vpop.f32.mrb[178].mxu0  ;;  %v5997_v54 = vadd.f32 %v6844_v22, %v5996_v62  ;;  %v11454_v62 = vpack.c.bf16 %v10954_v45, %v10950_v3  ;;  %v11458_v3 = vpack.c.bf16 %v10978_v16, %v10974_v7  ;;  %v11461_v45 = vpack.c.bf16 %v10988_v46, %v10984_v0 }
 0x918   : > { %v6008_v31 = vadd.f32 %v7766_v56, %v6844_v22  ;;  %v5999_v13 = vpop.f32.mrb[179].mxu0  ;;  %v11455_v56 = vpack.c.bf16 %v10952_v34, %v10948_v30  ;;  %v11459_v30 = vpack.c.bf16 %v10976_v57, %v10972_v6  ;;  %v11460_v34 = vpack.c.bf16 %v10990_v35, %v10986_v12 }
 0x919   : > { %v6000_v11 = vadd.f32 %v6844_v22, %v5999_v13 }
 0x91a   : > { %v6032_v8 = vpack.c.bf16 %v6008_v31, %v6005_v49  ;;  %v11456_v49 = vpack.c.bf16 %v10966_v51, %v10962_v60 }
 0x91b   : > { %v6031_v40 = vpack.c.bf16 %v6000_v11, %v5997_v54 }
 0x91d   : > { %v7769_v47 = vpop.f32.mrb[180].mxu0  ;;  %7781 = vmatprep.mubr.msk.bf16.mxu1 %vm1436_vm3, %v6031_v40 }
 0x91e   : > { %v6012_v41 = vpop.f32.mrb[181].mxu0  ;;  %7782 = vmatmul.mubr.msk.bf16.gmra.mrb[120].mxu1 %vm1436_vm3, %v6032_v8  ;;  %v6021_v52 = vadd.f32 %v7769_v47, %v6844_v22 }
 0x91f   : > { %v7770_v26 = vpop.f32.mrb[182].mxu0  ;;  %v6013_v14 = vadd.f32 %v6844_v22, %v6012_v41 }
 0x920   : > { %v6024_v39 = vadd.f32 %v7770_v26, %v6844_v22  ;;  %v6015_v50 = vpop.f32.mrb[183].mxu0 }
 0x921   : > { %v6016_v53 = vadd.f32 %v6844_v22, %v6015_v50  ;;  %v11457_v22 = vpack.c.bf16 %v10964_v23, %v10960_v1  ;;  %v11073_v1 = vld [vmem:[%s11453_s23] ss:$0 sm:$0xff] }
 0x922   : > { %v6034_v5 = vpack.c.bf16 %v6024_v39, %v6021_v52  ;;  %v5613_v60 = vadd.f32 %v10998_v4, %v11073_v1  ;;  %v5611_v23 = vadd.f32 %v11073_v1, %v11000_v27  ;;  %v5614_v51 = vadd.f32 %v11002_v42, %v11073_v1 }
 0x923   : > { %v6033_v15 = vpack.c.bf16 %v6016_v53, %v6013_v14  ;;  %v5612_v6 = vadd.f32 %v11073_v1, %v11004_v61  ;;  %v5617_v12 = vadd.f32 %v11006_v21, %v11073_v1  ;;  %v5615_v46 = vadd.f32 %v11073_v1, %v11008_v44 }
 0x924   : > { %v6821_v7 = vmul.f32 -1.442695, %v5613_v60  ;;  %v6819_v57 = vmul.f32 -1.442695, %v5611_v23  ;;  %v6822_v16 = vmul.f32 -1.442695, %v5614_v51  ;;  %v5618_v35 = vadd.f32 %v11010_v20, %v11073_v1 }
 0x925   : > { %7785 = vmatprep.mubr.msk.bf16.mxu1 %vm1436_vm3, %v6033_v15  ;;  %v6820_v0 = vmul.f32 -1.442695, %v5612_v6  ;;  %v6825_v4 = vmul.f32 -1.442695, %v5617_v12  ;;  %v6823_v27 = vmul.f32 -1.442695, %v5615_v46  ;;  %v5616_v61 = vadd.f32 %v11073_v1, %v11012_v33 }
 0x926   : > { %7786 = vmatmul.mubr.msk.bf16.gmra.mrb[124].mxu1 %vm1436_vm3, %v6034_v5  ;;  %8459 = vpow2.f32 %v6821_v7  ;;  %v6826_v42 = vmul.f32 -1.442695, %v5618_v35  ;;  %v5621_v8 = vadd.f32 %v11014_v18, %v11073_v1  ;;  %v5619_v40 = vadd.f32 %v11073_v1, %v11016_v24 }
 0x927   : > { %7791 = vmatprep.mubr.msk.bf16.mxu1 %vm1436_vm3, %v11454_v62  ;;  %8461 = vpow2.f32 %v6819_v57  ;;  %v6824_v54 = vmul.f32 -1.442695, %v5616_v61  ;;  %v5622_v41 = vadd.f32 %v11018_v58, %v11073_v1  ;;  %v5620_v26 = vadd.f32 %v11073_v1, %v11020_v19 }
 0x928   : > { %8463 = vpow2.f32 %v6822_v16  ;;  %v6829_v52 = vmul.f32 -1.442695, %v5621_v8  ;;  %v6827_v50 = vmul.f32 -1.442695, %v5619_v40  ;;  %v5625_v58 = vadd.f32 %v11022_v48, %v11073_v1 }
 0x929   : > { %8465 = vpow2.f32 %v6820_v0  ;;  %v6830_v14 = vmul.f32 -1.442695, %v5622_v41  ;;  %v6828_v24 = vmul.f32 -1.442695, %v5620_v26 }
 0x92a   : > { %8467 = vpow2.f32 %v6825_v4  ;;  %v6833_v62 = vmul.f32 -1.442695, %v5625_v58 }
 0x92b   : > { %8469 = vpow2.f32 %v6823_v27 }
 0x92c   : > { %8471 = vpow2.f32 %v6826_v42 }
 0x92d   : > { %8473 = vpow2.f32 %v6824_v54 }
 0x92e   : > { %7792 = vmatmul.mubr.msk.bf16.vlgmr.msra.gmra.mrb[112].mxu1 %vm1436_vm3, %v11455_v56  ;;  %v11102_v56 = vld [vmem:[%s8985_s30] ss:$0 sm:$0xff] }
 0x92f   : > { %7795 = vmatprep.mubr.msk.bf16.mxu1 %vm1436_vm3, %v11456_v49  ;;  %v5623_v49 = vadd.f32 %v11073_v1, %v11024_v17 }
 0x930   : > { %v8460_v31 = vpop.eup %8459 }
 0x931   : > { %v8462_v21 = vpop.eup %8461  ;;  %v5677_v44 = vadd.f32 1.0, %v8460_v31  ;;  %v6831_v7 = vmul.f32 -1.442695, %v5623_v49 }
 0x932   : > { %v8464_v13 = vpop.eup %8463  ;;  %v5675_v20 = vadd.f32 1.0, %v8462_v21 }
 0x933   : > { %v8466_v11 = vpop.eup %8465  ;;  %v5678_v47 = vadd.f32 1.0, %v8464_v13  ;;  %8475 = vrcp.f32 %v5677_v44 }
 0x934   : > { %v5676_v33 = vadd.f32 1.0, %v8466_v11  ;;  %v8468_v39 = vpop.eup %8467  ;;  %8477 = vrcp.f32 %v5675_v20 }
 0x935   : > { %v8470_v18 = vpop.eup %8469  ;;  %8479 = vrcp.f32 %v5678_v47  ;;  %v5681_v5 = vadd.f32 1.0, %v8468_v39 }
 0x936   : > { %7796 = vmatmul.mubr.msk.bf16.gmra.mrb[116].mxu1 %vm1436_vm3, %v11457_v22  ;;  %v8472_v53 = vpop.eup %8471  ;;  %8481 = vrcp.f32 %v5676_v33  ;;  %v5679_v15 = vadd.f32 1.0, %v8470_v18 }
 0x937   : > { %7799 = vmatprep.mubr.msk.bf16.mxu1 %vm1436_vm3, %v11458_v3  ;;  %8483 = vpow2.f32 %v6829_v52  ;;  %v5682_v19 = vadd.f32 1.0, %v8472_v53  ;;  %v8474_v22 = vpop.eup %8473  ;;  %v5626_v3 = vadd.f32 %v11026_v37, %v11073_v1 }
 0x938   : > { %8485 = vpow2.f32 %v6827_v50  ;;  %v5680_v35 = vadd.f32 1.0, %v8474_v22 }
 0x939   : > { %8487 = vpow2.f32 %v6830_v14  ;;  %v6834_v0 = vmul.f32 -1.442695, %v5626_v3 }
 0x93a   : > { %8489 = vpow2.f32 %v6828_v24 }
 0x93b   : > { %8491 = vrcp.f32 %v5681_v5 }
 0x93c   : > { %8493 = vrcp.f32 %v5679_v15 }
 0x93d   : > { %8495 = vrcp.f32 %v5682_v19 }
 0x93e   : > { %7800 = vmatmul.mubr.msk.bf16.gmra.mrb[120].mxu1 %vm1436_vm3, %v11459_v30  ;;  %v8476_v30 = vpop.eup %8475  ;;  %8497 = vpow2.f32 %v6833_v62 }
 0x93f   : > { %7803 = vmatprep.mubr.msk.bf16.mxu1 %vm1436_vm3, %v11460_v34  ;;  %v5624_v34 = vadd.f32 %v11073_v1, %v11028_v32  ;;  %v8478_v23 = vpop.eup %8477  ;;  %v6326_v8 = vmul.f32 %v10861_v9, %v8476_v30  ;;  %v6342_v26 = vsub.f32 1.0, %v8476_v30 }
 0x940   : > { %v8480_v17 = vpop.eup %8479  ;;  %v6324_v50 = vmul.f32 %v10873_v36, %v8478_v23  ;;  %v6340_v14 = vsub.f32 1.0, %v8478_v23 }
 0x941   : > { %v8482_v16 = vpop.eup %8481  ;;  %v6832_v1 = vmul.f32 -1.442695, %v5624_v34  ;;  %v6343_v58 = vsub.f32 1.0, %v8480_v17  ;;  %v6327_v15 = vmul.f32 %v10865_v55, %v8480_v17 }
 0x942   : > { %v8484_v32 = vpop.eup %8483  ;;  %v6341_v62 = vsub.f32 1.0, %v8482_v16  ;;  %v6325_v36 = vmul.f32 %v10877_v38, %v8482_v16 }
 0x943   : > { %v8486_v46 = vpop.eup %8485  ;;  %v5685_v20 = vadd.f32 1.0, %v8484_v32 }
 0x944   : > { %v8488_v4 = vpop.eup %8487  ;;  %v5683_v33 = vadd.f32 1.0, %v8486_v46 }
 0x945   : > { %v8490_v27 = vpop.eup %8489  ;;  %v5686_v18 = vadd.f32 1.0, %v8488_v4 }
 0x946   : > { %7804 = vmatmul.mubr.msk.bf16.gmra.mrb[124].mxu1 %vm1436_vm3, %v11461_v45  ;;  %v11114_v61 = vpop.eup %8491  ;;  %v5684_v53 = vadd.f32 1.0, %v8490_v27 }
 0x947   : > { %v11117_v13 = vpop.eup %8493 }
 0x948   : > { %v11120_v44 = vpop.eup %8495  ;;  %v6344_v27 = vsub.f32 1.0, %v11117_v13 }
 0x949   : > { %v8498_v41 = vpop.eup %8497 }
 0xa01   : > { %v7793_v48 = vpop.f32.mrb[112].mxu1 }
 0xa02   : > { %v6294_v45 = vadd.f32 %v7793_v48, %v11102_v56  ;;  %v6222_v60 = vpop.f32.mrb[113].mxu1 }
 0xa03   : > { %v6292_v51 = vadd.f32 %v11102_v56, %v6222_v60  ;;  %v7794_v6 = vpop.f32.mrb[114].mxu1 }
 0xa04   : > { %8499 = vtanh.f32 %v6294_v45  ;;  %v6295_v57 = vadd.f32 %v7794_v6, %v11102_v56  ;;  %v6225_v37 = vpop.f32.mrb[115].mxu1 }
 0xa05   : > { %8501 = vtanh.f32 %v6292_v51  ;;  %v6293_v12 = vadd.f32 %v11102_v56, %v6225_v37  ;;  %v6330_v51 = vmul.f32 %v10885_v28, %v11114_v61  ;;  %v6346_v28 = vsub.f32 1.0, %v11114_v61 }
 0xa06   : > { %8503 = vtanh.f32 %v6295_v57  ;;  %v5689_v57 = vadd.f32 1.0, %v8498_v41 }
 0xa07   : > { %8505 = vtanh.f32 %v6293_v12 }
 0xa08   : > { %8507 = vpow2.f32 %v6831_v7 }
 0xa09   : > { %8509 = vpow2.f32 %v6834_v0  ;;  %v7797_v42 = vpop.f32.mrb[116].mxu1 }
 0xa0a   : > { %8511 = vpow2.f32 %v6832_v1  ;;  %v6298_v31 = vadd.f32 %v7797_v42, %v11102_v56  ;;  %v6238_v21 = vpop.f32.mrb[117].mxu1 }
 0xa0b   : > { %8513 = vrcp.f32 %v5680_v35  ;;  %v6296_v54 = vadd.f32 %v11102_v56, %v6238_v21  ;;  %v7798_v11 = vpop.f32.mrb[118].mxu1  ;;  %v6328_v35 = vmul.f32 %v10897_v2, %v11117_v13 }
 0xa0c   : > { %8515 = vtanh.f32 %v6298_v31  ;;  %v6299_v40 = vadd.f32 %v7798_v11, %v11102_v56  ;;  %v6241_v47 = vpop.f32.mrb[119].mxu1  ;;  %v6331_v11 = vmul.f32 %v10889_v59, %v11120_v44 }
 0xa0d   : > { %8517 = vtanh.f32 %v6296_v54  ;;  %v6297_v52 = vadd.f32 %v11102_v56, %v6241_v47  ;;  %v6347_v54 = vsub.f32 1.0, %v11120_v44 }
 0xa0e   : > { %v8500_v39 = vpop.eup %8499  ;;  %8519 = vtanh.f32 %v6299_v40 }
 0xa0f   : > { %v8502_v9 = vpop.eup %8501  ;;  %v6358_v24 = vmul.f32 %v8500_v39, %v6342_v26  ;;  %8521 = vtanh.f32 %v6297_v52 }
 0xa10   : > { %v8504_v5 = vpop.eup %8503  ;;  %8523 = vrcp.f32 %v5685_v20  ;;  %v6356_v19 = vmul.f32 %v8502_v9, %v6340_v14 }
 0xa11   : > { %v8506_v49 = vpop.eup %8505  ;;  %8525 = vrcp.f32 %v5683_v33  ;;  %v6374_v22 = vadd.f32 %v6358_v24, %v6326_v8  ;;  %v6359_v3 = vmul.f32 %v8504_v5, %v6343_v58  ;;  %v7801_v48 = vpop.f32.mrb[120].mxu1 }
 0xa12   : > { %v8508_v30 = vpop.eup %8507  ;;  %8527 = vrcp.f32 %v5686_v18  ;;  %v6372_v34 = vadd.f32 %v6356_v19, %v6324_v50  ;;  %v6357_v45 = vmul.f32 %v8506_v49, %v6341_v62  ;;  %v6302_v60 = vadd.f32 %v7801_v48, %v11102_v56  ;;  %v6254_v23 = vpop.f32.mrb[121].mxu1 }
 0xa13   : > { %v8510_v55 = vpop.eup %8509  ;;  %8529 = vrcp.f32 %v5684_v53  ;;  %6390 = vst.msk [vmem:[%s11128_s6 + $0x10] sm:$0xff] %vm1436_vm3, %v6374_v22  ;;  %v6375_v38 = vadd.f32 %v6359_v3, %v6327_v15  ;;  %v6300_v6 = vadd.f32 %v11102_v56, %v6254_v23  ;;  %v7802_v17 = vpop.f32.mrb[122].mxu1  ;;  %v5687_v32 = vadd.f32 1.0, %v8508_v30 }
 0xa14   : > { %v8512_v7 = vpop.eup %8511  ;;  %6388 = vst.msk [vmem:[%s11128_s6] sm:$0xff] %vm1436_vm3, %v6372_v34  ;;  %v6373_v37 = vadd.f32 %v6357_v45, %v6325_v36  ;;  %8531 = vtanh.f32 %v6302_v60  ;;  %v6303_v16 = vadd.f32 %v7802_v17, %v11102_v56  ;;  %v6257_v0 = vpop.f32.mrb[123].mxu1  ;;  %v5690_v4 = vadd.f32 1.0, %v8510_v55 }
 0xa15   : > { %v8514_v12 = vpop.eup %8513  ;;  %6391 = vst.msk [vmem:[%s11128_s6 + $0x18] sm:$0xff] %vm1436_vm3, %v6375_v38  ;;  %8533 = vtanh.f32 %v6300_v6  ;;  %v6301_v1 = vadd.f32 %v11102_v56, %v6257_v0  ;;  %v5688_v31 = vadd.f32 1.0, %v8512_v7 }
 0xa16   : > { %v8516_v46 = vpop.eup %8515  ;;  %6389 = vst.msk [vmem:[%s11128_s6 + $0x8] sm:$0xff] %vm1436_vm3, %v6373_v37  ;;  %8535 = vtanh.f32 %v6303_v16  ;;  %v6345_v2 = vsub.f32 1.0, %v8514_v12  ;;  %v6329_v40 = vmul.f32 %v10901_v43, %v8514_v12  ;;  %v11463_v12 = vld [vmem:[#allocation73_spill] sm:$0xff] }
 0xa17   : > { %v8518_v42 = vpop.eup %8517  ;;  %v6362_v21 = vmul.f32 %v8516_v46, %v6346_v28  ;;  %8537 = vtanh.f32 %v6301_v1 }
 0xa18   : > { %v8520_v61 = vpop.eup %8519  ;;  %8539 = vrcp.f32 %v5689_v57  ;;  %v6360_v8 = vmul.f32 %v8518_v42, %v6344_v27 }
 0xa19   : > { %v8522_v20 = vpop.eup %8521  ;;  %8541 = vrcp.f32 %v5687_v32  ;;  %v6378_v13 = vadd.f32 %v6362_v21, %v6330_v51  ;;  %v6363_v47 = vmul.f32 %v8520_v61, %v6347_v54  ;;  %v7805_v41 = vpop.f32.mrb[124].mxu1  ;;  %v11465_v21 = vld [vmem:[#allocation76_spill] sm:$0xff] }
 0xa1a   : > { %v8524_v33 = vpop.eup %8523  ;;  %8543 = vrcp.f32 %v5690_v4  ;;  %v6376_v26 = vadd.f32 %v6360_v8, %v6328_v35  ;;  %v6361_v52 = vmul.f32 %v8522_v20, %v6345_v2  ;;  %v6306_v39 = vadd.f32 %v7805_v41, %v11102_v56  ;;  %v6270_v59 = vpop.f32.mrb[125].mxu1  ;;  %v11464_v35 = vld [vmem:[#allocation75_spill] sm:$0xff]  ;;  %v11466_v8 = vld [vmem:[#allocation78_spill] sm:$0xff] }
 0xa1b   : > { %v8526_v44 = vpop.eup %8525  ;;  %8545 = vrcp.f32 %v5688_v31  ;;  %6394 = vst.msk [vmem:[%s11128_s6 + $0x30] sm:$0xff] %vm1436_vm3, %v6378_v13  ;;  %v6379_v50 = vadd.f32 %v6363_v47, %v6331_v11  ;;  %v6304_v43 = vadd.f32 %v11102_v56, %v6270_v59  ;;  %v7806_v18 = vpop.f32.mrb[126].mxu1  ;;  %v6350_v5 = vsub.f32 1.0, %v8524_v33 }
 0xa1c   : > { %v8528_v14 = vpop.eup %8527  ;;  %6392 = vst.msk [vmem:[%s11128_s6 + $0x20] sm:$0xff] %vm1436_vm3, %v6376_v26  ;;  %v6377_v9 = vadd.f32 %v6361_v52, %v6329_v40  ;;  %8547 = vtanh.f32 %v6306_v39  ;;  %v6307_v53 = vadd.f32 %v7806_v18, %v11102_v56  ;;  %v6273_v24 = vpop.f32.mrb[127].mxu1  ;;  %v6348_v62 = vsub.f32 1.0, %v8526_v44 }
 0xa1d   : > { %v8530_v58 = vpop.eup %8529  ;;  %6395 = vst.msk [vmem:[%s11128_s6 + $0x38] sm:$0xff] %vm1436_vm3, %v6379_v50  ;;  %8549 = vtanh.f32 %v6304_v43  ;;  %v6305_v15 = vadd.f32 %v11102_v56, %v6273_v24  ;;  %v6334_v36 = vmul.f32 %v10909_v63, %v8524_v33  ;;  %v6351_v3 = vsub.f32 1.0, %v8528_v14 }
 0xa1e   : > { %v8532_v19 = vpop.eup %8531  ;;  %6393 = vst.msk [vmem:[%s11128_s6 + $0x28] sm:$0xff] %vm1436_vm3, %v6377_v9  ;;  %8551 = vtanh.f32 %v6307_v53  ;;  %v6332_v30 = vmul.f32 %v10917_v25, %v8526_v44  ;;  %v6349_v45 = vsub.f32 1.0, %v8530_v58  ;;  %v6335_v60 = vmul.f32 %v10913_v29, %v8528_v14 }
 0xa1f   : > { %v8534_v49 = vpop.eup %8533  ;;  %v6366_v22 = vmul.f32 %v8532_v19, %v6350_v5  ;;  %8553 = vtanh.f32 %v6305_v15  ;;  %v6333_v63 = vmul.f32 %v10921_v10, %v8530_v58 }
 0xa20   : > { %v8536_v48 = vpop.eup %8535  ;;  %v6364_v34 = vmul.f32 %v8534_v49, %v6348_v62 }
 0xa21   : > { %v8538_v56 = vpop.eup %8537  ;;  %v6382_v23 = vadd.f32 %v6366_v22, %v6334_v36  ;;  %v6367_v55 = vmul.f32 %v8536_v48, %v6351_v3 }
 0xa22   : > { %v8540_v51 = vpop.eup %8539  ;;  %v6380_v38 = vadd.f32 %v6364_v34, %v6332_v30  ;;  %v6365_v6 = vmul.f32 %v8538_v56, %v6349_v45 }
 0xa23   : > { %v8542_v17 = vpop.eup %8541  ;;  %6398 = vst.msk [vmem:[%s11128_s6 + $0x50] sm:$0xff] %vm1436_vm3, %v6382_v23  ;;  %v6383_v7 = vadd.f32 %v6367_v55, %v6335_v60  ;;  %v6354_v29 = vsub.f32 1.0, %v8540_v51  ;;  %v6338_v32 = vmul.f32 %v11463_v12, %v8540_v51 }
 0xa24   : > { %v8544_v57 = vpop.eup %8543  ;;  %6396 = vst.msk [vmem:[%s11128_s6 + $0x40] sm:$0xff] %vm1436_vm3, %v6380_v38  ;;  %v6381_v25 = vadd.f32 %v6365_v6, %v6333_v63  ;;  %v6352_v0 = vsub.f32 1.0, %v8542_v17  ;;  %v6336_v4 = vmul.f32 %v11464_v35, %v8542_v17 }
 0xa25   : > { %v8546_v37 = vpop.eup %8545  ;;  %6399 = vst.msk [vmem:[%s11128_s6 + $0x58] sm:$0xff] %vm1436_vm3, %v6383_v7  ;;  %v6355_v1 = vsub.f32 1.0, %v8544_v57  ;;  %v6339_v54 = vmul.f32 %v11465_v21, %v8544_v57 }
 0xa26   : > { %v8548_v16 = vpop.eup %8547  ;;  %6397 = vst.msk [vmem:[%s11128_s6 + $0x48] sm:$0xff] %vm1436_vm3, %v6381_v25  ;;  %v6353_v42 = vsub.f32 1.0, %v8546_v37  ;;  %v6337_v2 = vmul.f32 %v11466_v8, %v8546_v37 }
 0xa27   : > { %v8550_v10 = vpop.eup %8549  ;;  %v6370_v28 = vmul.f32 %v8548_v16, %v6354_v29 }
 0xa28   : > { %v8552_v46 = vpop.eup %8551  ;;  %v6368_v27 = vmul.f32 %v8550_v10, %v6352_v0 }
 0xa29   : > { %v8554_v31 = vpop.eup %8553  ;;  %v6386_v61 = vadd.f32 %v6370_v28, %v6338_v32  ;;  %v6371_v11 = vmul.f32 %v8552_v46, %v6355_v1 }
 0xa2a   : > { %v6384_v20 = vadd.f32 %v6368_v27, %v6336_v4  ;;  %v6369_v40 = vmul.f32 %v8554_v31, %v6353_v42 }
 0xa2b   : > { %6402 = vst.msk [vmem:[%s11128_s6 + $0x70] sm:$0xff] %vm1436_vm3, %v6386_v61  ;;  %v6387_v13 = vadd.f32 %v6371_v11, %v6339_v54 }
 0xa2c   : > { %6400 = vst.msk [vmem:[%s11128_s6 + $0x60] sm:$0xff] %vm1436_vm3, %v6384_v20  ;;  %v6385_v47 = vadd.f32 %v6369_v40, %v6337_v2 }
 0xa2d   : > { %6403 = vst.msk [vmem:[%s11128_s6 + $0x78] sm:$0xff] %vm1436_vm3, %v6387_v13 }
 0xa2e   : > { %6401 = vst.msk [vmem:[%s11128_s6 + $0x68] sm:$0xff] %vm1436_vm3, %v6385_v47 }
 0xa2f PF: > { %s11467_s21 = sld [smem:[#allocation38_spill]]  ;;  %s11468_s2 = sld [smem:[#allocation39_spill]] }
 0xa30   : > { %p88_p4 = scmp.ge.s32.totalorder %s9092_s22, 4   ;;  %s11469_s28 = smov %s8755_s1 }
 0xa31   : > { %s11471_s7 = smov %s9092_s22 }
 0xa32   :  { %90 = sbr.rel (!%p88_p4) target bundleno = 77 (0x4d), region = 279 }
 0xa35   : > { %s11470_s1 = smov %s11467_s21 }
 0xa39   :  { %6441 = vsyncpa [#allocation3], 1 }
 0xa3a   :  { %6443 = vsyncpa [#allocation3 + $0x1], 1 }
 0xa3b   :  { %6444 = vsyncpa [#allocation5], 1 }
 0xa3c   :  { %6446 = vsyncpa [#allocation5 + $0x1], 1 }
 0xa3d   :  { %6447 = vsyncpa [#allocation8], 1 }

// kernel: tpu_custom_call.1
= control target key start
LH: loop header
LB: loop body
LE: loop exit
PB: predicated region body
PF: predicated region fallthrough
CT: control target
= control target key end

     0   :  { %s8765_s6 = smov 1   ;;  %s8766_s10 = smov 2   ;;  %s11203_s0 = inlined_call_operand.smem [shape: u32[37], index: -1, kind: input, shape index: {}] }
   0x1   :  { %s8815_s5 = sld [smem:[%s11203_s0]]   ;;  %s8767_s14 = smov 3  }
   0x2   :  { %s8820_s9 = sld [smem:[%s11203_s0 + %s8765_s6]]   ;;  %s8768_s18 = smov 4  }
   0x3   :  { %s8825_s13 = sld [smem:[%s11203_s0 + %s8766_s10]]   ;;  %s8769_s22 = smov 5  }
   0x4   :  { %s8830_s17 = sld [smem:[%s11203_s0 + %s8767_s14]]   ;;  %s8770_s26 = smov 6  }
   0x5   :  { %s8835_s21 = sld [smem:[%s11203_s0 + %s8768_s18]]   ;;  %s8771_s30 = smov 7  }
   0x6   :  { %s8840_s25 = sld [smem:[%s11203_s0 + %s8769_s22]]   ;;  %s8772_s4 = smov 8  }
   0x7   :  { %s8845_s29 = sld [smem:[%s11203_s0 + %s8770_s26]]   ;;  %s8773_s10 = smov 9  }
   0x8   :  { %11275 = sst [smem:[#allocation14_spill]] %s8820_s9  ;;  %s8774_s15 = smov 10  }
   0x9   :  { %s8850_s3 = sld [smem:[%s11203_s0 + %s8771_s30]]   ;;  %s8775_s20 = smov 11  }
   0xa   :  { %s8855_s8 = sld [smem:[%s11203_s0 + %s8772_s4]]   ;;  %s8776_s26 = smov 12  }
   0xb   :  { %11276 = sst [smem:[#allocation15_spill]] %s8835_s21  ;;  %s8777_s1 = smov 13  }
   0xc   :  { %s8860_s14 = sld [smem:[%s11203_s0 + %s8773_s10]]   ;;  %s8778_s7 = smov 14  }
   0xd   :  { %s8865_s19 = sld [smem:[%s11203_s0 + %s8774_s15]]   ;;  %s8779_s15 = smov 15  }
   0xe   :  { %s8870_s24 = sld [smem:[%s11203_s0 + %s8775_s20]]   ;;  %s8780_s22 = smov 16  }
   0xf   :  { %s8875_s30 = sld [smem:[%s11203_s0 + %s8776_s26]]   ;;  %s8781_s28 = smov 17  }
  0x10   :  { %11277 = sst [smem:[#allocation16_spill]] %s8855_s8 }
  0x11   :  { %s8880_s6 = sld [smem:[%s11203_s0 + %s8777_s1]]  }
  0x12   :  { %s8885_s12 = sld [smem:[%s11203_s0 + %s8778_s7]]   ;;  %s8782_s7 = smov 18  }
  0x13   :  { %s8890_s20 = sld [smem:[%s11203_s0 + %s8779_s15]]   ;;  %s8783_s15 = smov 19  }
  0x14   :  { %11278 = sst [smem:[#allocation17_spill]] %s8870_s24 }
  0x15   :  { %11279 = sst [smem:[#allocation18_spill]] %s8875_s30 }
  0x16   :  { %s8895_s27 = sld [smem:[%s11203_s0 + %s8780_s22]]   ;;  %s8784_s22 = smov 20  }
  0x17   :  { %11280 = sst [smem:[#allocation19_spill]] %s8880_s6 }
  0x18   :  { %s8900_s4 = sld [smem:[%s11203_s0 + %s8781_s28]]   ;;  %s8785_s28 = smov 21  }
  0x19   :  { %11281 = sst [smem:[#allocation20_spill]] %s8890_s20 }
  0x1a   :  { %s8905_s30 = sld [smem:[%s11203_s0 + %s8782_s7]]   ;;  %s8786_s7 = smov 22  }
  0x1b   :  { %s8910_s24 = sld [smem:[%s11203_s0 + %s8783_s15]]   ;;  %s8787_s15 = smov 23  }
  0x1c   :  { %s8915_s20 = sld [smem:[%s11203_s0 + %s8784_s22]]   ;;  %s8788_s22 = smov 24  }
  0x1e   :  { %11282 = sst [smem:[#allocation21_spill]] %s8900_s4 }
  0x1f   :  { %s8920_s4 = sld [smem:[%s11203_s0 + %s8785_s28]]   ;;  %s8789_s28 = smov 25  }
  0x20   :  { %11283 = sst [smem:[#allocation22_spill]] %s8905_s30 }
  0x21   :  { %11284 = sst [smem:[#allocation23_spill]] %s8910_s24 }
  0x22   :  { %11285 = sst [smem:[#allocation24_spill]] %s8915_s20 }
  0x23   :  { %s8925_s30 = sld [smem:[%s11203_s0 + %s8786_s7]]   ;;  %s8790_s7 = smov 26  }
  0x24   :  { %s8930_s24 = sld [smem:[%s11203_s0 + %s8787_s15]]   ;;  %s8791_s15 = smov 27  }
  0x25   :  { %11286 = sst [smem:[#allocation25_spill]] %s8920_s4 }
  0x26   :  { %s8935_s20 = sld [smem:[%s11203_s0 + %s8788_s22]]   ;;  %s8792_s22 = smov 28  }
  0x27   :  { %s8940_s4 = sld [smem:[%s11203_s0 + %s8789_s28]]   ;;  %s8793_s28 = smov 29  }
  0x29   :  { %11287 = sst [smem:[#allocation26_spill]] %s8925_s30 }
  0x2a   :  { %11288 = sst [smem:[#allocation27_spill]] %s8930_s24 }
  0x2b   :  { %s8945_s30 = sld [smem:[%s11203_s0 + %s8790_s7]]   ;;  %s8794_s7 = smov 30  }
  0x2c   :  { %11289 = sst [smem:[#allocation28_spill]] %s8935_s20 }
  0x2d   :  { %11290 = sst [smem:[#allocation29_spill]] %s8940_s4 }
  0x2e   :  { %s8950_s24 = sld [smem:[%s11203_s0 + %s8791_s15]]   ;;  %s8795_s15 = smov 31  }
  0x2f   :  { %s8955_s20 = sld [smem:[%s11203_s0 + %s8792_s22]]   ;;  %s8796_s22 = smov 32  }
  0x30   :  { %s8960_s4 = sld [smem:[%s11203_s0 + %s8793_s28]]   ;;  %s8797_s28 = smov 33  }
  0x31   :  { %11291 = sst [smem:[#allocation30_spill]] %s8945_s30 }
  0x32   :  { %s8965_s30 = sld [smem:[%s11203_s0 + %s8794_s7]]   ;;  %s8798_s7 = smov 34  }
  0x34   :  { %11292 = sst [smem:[#allocation31_spill]] %s8950_s24 }
  0x35   :  { %11293 = sst [smem:[#allocation32_spill]] %s8955_s20 }
  0x36   :  { %11294 = sst [smem:[#allocation33_spill]] %s8960_s4 }
  0x37   :  { %s8970_s24 = sld [smem:[%s11203_s0 + %s8795_s15]]   ;;  %s8799_s15 = smov 35  }
  0x38   :  { %11295 = sst [smem:[#allocation34_spill]] %s8965_s30 }
  0x39   :  { %s8975_s20 = sld [smem:[%s11203_s0 + %s8796_s22]]   ;;  %s8800_s22 = smov 36  }
  0x3a   :  { %s8980_s4 = sld [smem:[%s11203_s0 + %s8797_s28]]  }
  0x3b   :  { %s8985_s30 = sld [smem:[%s11203_s0 + %s8798_s7]]  }
  0x3d   :  { %11296 = sst [smem:[#allocation35_spill]] %s8970_s24 }
  0x3e   :  { %s8990_s24 = sld [smem:[%s11203_s0 + %s8799_s15]]  }
  0x3f   :  { %11297 = sst [smem:[#allocation36_spill]] %s8975_s20 }
  0x40   :  { %s8995_s20 = sld [smem:[%s11203_s0 + %s8800_s22]]  }
  0x46   :  { %11298 = sst [smem:[#allocation37_spill]] %s8995_s20 }
  0x47   :  { %79 = vsyncpa [#allocation3], 0 }
  0x48   :  { %81 = vsyncpa [#allocation3 + $0x1], 0 }
  0x49   :  { %82 = vsyncpa [#allocation5], 0 }
  0x4a   :  { %84 = vsyncpa [#allocation5 + $0x1], 0 }
  0x4b   :  { %85 = vsyncpa [#allocation8], 0  ;;  %s8997_s28 = smov 0   ;;  %s8999_s1 = smov 0  }
  0x4c   :  { %s9001_s2 = smov 0   ;;  %s9003_s7 = smov 0  }
  0x4d LB: > { %s11299_s9 = sld [smem:[#allocation14_spill]]  ;;  %s11300_s21 = sld [smem:[#allocation15_spill]]  ;;  %s8763_s7 = sphi %s9003_s7, %s11471_s7   ;;  %s8759_s2 = sphi %s9001_s2, %s11468_s2   ;;  %s8755_s1 = sphi %s8999_s1, %s11470_s1   ;;  %s8751_s28 = sphi %s8997_s28, %s11469_s28  }
  0x4e   : > { %s11301_s8 = sld [smem:[#allocation16_spill]]  ;;  %s11302_s6 = sld [smem:[#allocation19_spill]] }
  0x4f   : > { %11303 = sst [smem:[#allocation38_spill]] %s8759_s2  ;;  %s9016_s0 = sadd.s32 4294967295, %s8763_s7  }
  0x50   : > { %p137_p0 = scmp.ne.s32.totalorder %s8755_s1, %s8751_s28  ;;  %p11209_p1 = scmp.eq.s32.totalorder %s9016_s0, 0 }
  0x51   : > { %p6616_p2 = scmp.ge.s32.totalorder %s8763_s7, 1  ;;  %p903_p3 = scmp.lt.s32.totalorder %s8763_s7, 3 }
  0x52   : > { %p9024_p4 = por %p11209_p1, %p137_p0  ;;  %s8801_s15 = smov [#allocation6]  }
  0x53   : > { %p9028_p5 = pnand %p6616_p2, %p903_p3  ;;  %s916_s16 = sshll.u32 %s8801_s15, 4  ;;  %s917_s16 = int_to_ptr.vmem [resolvable:$true] %s916_s16 }
  0x54   : > { %s11304_s10 = scalar_select %p9024_p4, 1, 0 }
  0x55   : > { %s11305_s11 = scalar_select %p9028_p5, 1, 0 }
  0x56   : > { %p7971_p6 = pneg %p9028_p5  ;;  %s8802_s18 = smov [#allocation7]  }
  0x57   : > { %s936_s22 = sshll.u32 %s8802_s18, 4  ;;  %s8803_s26 = smov [#allocation9]   ;;  %s9040_s22 = int_to_ptr.vmem [resolvable:$true] %s936_s22 }
  0x58   : > { %p9036_p7 = pnand %p7971_p6, %p11209_p1  ;;  %s959_s28 = sshll.u32 %s8803_s26, 4  ;;  %s9042_s28 = int_to_ptr.vmem [resolvable:$true] %s959_s28 }
  0x59   : > { %s8573_s20 = scalar_lea.hbm %s11300_s21, 32 }
  0x5a   : > { %p8574_p8 = scmp.ne.s32.totalorder %s11300_s21, %s8573_s20  ;;  %p9048_p9 = pneg %p9036_p7 }
  0x5b   : > { %p8580_p12 = scmp.lt.u32.totalorder %s8573_s20, %s11300_s21 }
  0x5c   : > { %p8576_p10 = pnand %p9048_p9, %p8574_p8 }
  0x5e   : > { %p8577_p11 = pneg %p8576_p10 }
  0x60   : > { %p8582_p13 = pnand %p8580_p12, %p8577_p11 }
  0x62   : > { %8585 = shalt.err (!%p8582_p13)
}
  0x63   : > { %s8586_s18 = scalar_lea.vmem %s917_s16, 32  ;;  %p8594_p6 = scmp.lt.s32.totalorder %s917_s16, %s917_s16 }
  0x64   : > { %p8587_p0 = scmp.ne.s32.totalorder %s917_s16, %s8586_s18  ;;  %p8595_p1 = scmp.lt.s32.totalorder %s8586_s18, %s8586_s18 }
  0x66   : > { %p8589_p2 = pnand %p8587_p0, %p9048_p9  ;;  %p8596_p4 = por %p8595_p1, %p8594_p6 }
  0x68   : > { %p8590_p3 = pneg %p8589_p2 }
  0x6a   : > { %p8597_p5 = pnand %p8596_p4, %p8590_p3 }
  0x6c   : > { %8600 = shalt.err (!%p8597_p5)
}
  0x6d   : > { %7974 = dma.hbm_to_vmem [thread:$0]  (!%p9036_p7), %s11300_s21, 32, %s917_s16, [#allocation5]  }
  0x6e   : > { %s8601_s20 = scalar_lea.hbm %s11301_s8, 16 }
  0x6f   : > { %p8602_p8 = scmp.ne.s32.totalorder %s11301_s8, %s8601_s20  ;;  %p8608_p12 = scmp.lt.u32.totalorder %s8601_s20, %s11301_s8 }
  0x71   : > { %p8604_p10 = pnand %p8602_p8, %p9048_p9 }
  0x73   : > { %p8605_p11 = pneg %p8604_p10 }
  0x75   : > { %p8610_p13 = pnand %p8608_p12, %p8605_p11 }
  0x77   : > { %8613 = shalt.err (!%p8610_p13)
}
  0x78   : > { %s8614_s26 = scalar_lea.vmem %s9040_s22, 16  ;;  %s8621_s18 = scalar_lea.vmem %s9040_s22, 32 }
  0x79   : > { %p8615_p1 = scmp.ne.s32.totalorder %s9040_s22, %s8614_s26  ;;  %p8622_p0 = scmp.lt.s32.totalorder %s9040_s22, %s9040_s22 }
  0x7a   : > { %p8623_p2 = scmp.lt.s32.totalorder %s8621_s18, %s8614_s26 }
  0x7b   : > { %p8617_p4 = pnand %p8615_p1, %p9048_p9 }
  0x7c   : > { %p8624_p3 = por %p8623_p2, %p8622_p0 }
  0x7d   : > { %p8618_p5 = pneg %p8617_p4 }
  0x7f   : > { %p8625_p6 = pnand %p8624_p3, %p8618_p5 }
  0x81   : > { %8628 = shalt.err (!%p8625_p6)
}
  0x82   : > { %7977 = dma.hbm_to_vmem [thread:$0]  (!%p9036_p7), %s11301_s8, 16, %s9040_s22, [#allocation8]  }
  0x83   : > { %s8629_s16 = scalar_lea.hbm %s11302_s6, 32 }
  0x84   : > { %p8630_p8 = scmp.ne.s32.totalorder %s11302_s6, %s8629_s16  ;;  %p8636_p12 = scmp.lt.u32.totalorder %s8629_s16, %s11302_s6 }
  0x86   : > { %p8632_p10 = pnand %p8630_p8, %p9048_p9 }
  0x88   : > { %p8633_p11 = pneg %p8632_p10 }
  0x8a   : > { %p8638_p13 = pnand %p8636_p12, %p8633_p11 }
  0x8c   : > { %8641 = shalt.err (!%p8638_p13)
}
  0x8d   : > { %s8642_s20 = scalar_lea.vmem %s9042_s28, 32  ;;  %p8650_p0 = scmp.lt.s32.totalorder %s9042_s28, %s9042_s28 }
  0x8e   : > { %p8643_p1 = scmp.ne.s32.totalorder %s9042_s28, %s8642_s20  ;;  %p8651_p2 = scmp.lt.s32.totalorder %s8642_s20, %s8642_s20 }
  0x90   : > { %p8645_p4 = pnand %p8643_p1, %p9048_p9  ;;  %p8652_p3 = por %p8651_p2, %p8650_p0 }
  0x92   : > { %p8646_p5 = pneg %p8645_p4 }
  0x94   : > { %p8653_p6 = pnand %p8652_p3, %p8646_p5 }
  0x96   : > { %8656 = shalt.err (!%p8653_p6)
}
  0x97   : > { %7980 = dma.hbm_to_vmem [thread:$0]  (!%p9036_p7), %s11302_s6, 32, %s9042_s28, [#allocation8]  }
  0x98   : > { %s9092_s22 = sadd.s32 1, %s8763_s7   ;;  %s124_s23 = sadd.s32 1, %s8759_s2 }
  0x99   : > { %s121_s15 = ssub.s32 %s8763_s7, %s9092_s22  ;;  %p131_p8 = scmp.ne.s32.totalorder %s8759_s2, %s8755_s1 }
  0x9a   : > { %p122_p9 = scmp.eq.s32.totalorder %s121_s15, 0  ;;  %p132_p10 = scmp.eq.s32.totalorder %s8763_s7, 0 }
  0x9b   : > { %p7991_p11 = scmp.lt.s32.totalorder %s8763_s7, 2  ;;  %s1041_s18 = sand.u32 1, %s8759_s2  }
  0x9c   : > { %s9102_s26 = scalar_select %p122_p9, %s8759_s2, %s124_s23  }
  0x9d   : > { %p133_p12 = por %p132_p10, %p131_p8  ;;  %s9105_s16 = sshll.u32 %s1041_s18, 1 }
  0x9e   : > { %11308 = sst [smem:[#allocation39_spill]] %s9102_s26  ;;  %s6622_s28 = sshll.u32 %s8763_s7, 5 }
  0x9f   : > { %s9109_s20 = scalar_lea.hbm %s11299_s9, %s6622_s28  ;;  %s1045_s6 = scalar_lea.vmem [#allocation2], %s9105_s16 }
  0xa0   : > { %s1052_s15 = sshll.u32 %s1045_s6, 4  ;;  %p9114_p7 = pnand %p7991_p11, %p133_p12  ;;  %s9112_s15 = int_to_ptr.vmem [resolvable:$true] %s1052_s15 }
  0xa1   : > { %s9119_s8 = scalar_lea.hbm %s8825_s13, %s6622_s28  ;;  %s1042_s26 = scalar_lea.sflag [#allocation3], %s1041_s18 }
  0xa2   : > { %s8657_s2 = scalar_lea.hbm %s9109_s20, 32  ;;  %p8659_p1 = pneg %p9114_p7 }
  0xa3   : > { %p8658_p13 = scmp.ne.s32.totalorder %s9109_s20, %s8657_s2  ;;  %s8662_s6 = scalar_lea.hbm %s11299_s9, 64 }
  0xa4   : > { %p8663_p0 = scmp.lt.u32.totalorder %s9109_s20, %s11299_s9  ;;  %p8664_p2 = scmp.lt.u32.totalorder %s8662_s6, %s8657_s2 }
  0xa5   : > { %p8660_p4 = pnand %p8659_p1, %p8658_p13  ;;  %p8666_p6 = scmp.lt.u32.totalorder %s8657_s2, %s9109_s20 }
  0xa6   : > { %p8665_p3 = por %p8664_p2, %p8663_p0 }
  0xa7   : > { %p8661_p5 = pneg %p8660_p4 }
  0xa8   : > { %p8667_p9 = por %p8666_p6, %p8665_p3 }
  0xaa   : > { %p8668_p8 = pnand %p8667_p9, %p8661_p5 }
  0xac   : > { %8671 = shalt.err (!%p8668_p8)
}
  0xad   : > { %s8672_s18 = scalar_lea.vmem %s9112_s15, 32  ;;  %s8804_s28 = smov [#allocation2]  }
  0xae   : > { %p8673_p10 = scmp.ne.s32.totalorder %s9112_s15, %s8672_s18  ;;  %s8677_s21 = sshll.u32 %s8804_s28, 4  ;;  %s8678_s21 = int_to_ptr.vmem [resolvable:$false] %s8677_s21 }
  0xaf   : > { %s8679_s9 = scalar_lea.vmem %s8678_s21, 64  ;;  %p8680_p13 = scmp.lt.s32.totalorder %s9112_s15, %s8678_s21 }
  0xb0   : > { %p8675_p11 = pnand %p8673_p10, %p8659_p1  ;;  %p8681_p4 = scmp.lt.s32.totalorder %s8679_s9, %s8672_s18 }
  0xb2   : > { %p8676_p12 = pneg %p8675_p11  ;;  %p8682_p0 = por %p8681_p4, %p8680_p13 }
  0xb4   : > { %p8683_p2 = pnand %p8682_p0, %p8676_p12 }
  0xb6   : > { %8686 = shalt.err (!%p8683_p2)
}
  0xb7   : > { %7984 = dma.hbm_to_vmem [thread:$0]  (!%p9114_p7), %s9109_s20, 32, %s9112_s15, %s1042_s26  }
  0xb8   : > { %s1063_s2 = scalar_lea.vmem [#allocation4], %s9105_s16  ;;  %s11310_s9 = sand.u32 1, %s8763_s7  }
  0xb9   : > { %s1070_s21 = sshll.u32 %s1063_s2, 4  ;;  %s1060_s6 = scalar_lea.sflag [#allocation5], %s11310_s9  ;;  %s1071_s21 = int_to_ptr.vmem [resolvable:$true] %s1070_s21 }
  0xba   : > { %s8687_s18 = scalar_lea.hbm %s9119_s8, 32  ;;  %s8692_s28 = scalar_lea.hbm %s8825_s13, 64 }
  0xbb   : > { %p8688_p5 = scmp.ne.s32.totalorder %s9119_s8, %s8687_s18  ;;  %p8693_p9 = scmp.lt.u32.totalorder %s9119_s8, %s8825_s13 }
  0xbc   : > { %p8694_p8 = scmp.lt.u32.totalorder %s8692_s28, %s8687_s18  ;;  %p8696_p11 = scmp.lt.u32.totalorder %s8687_s18, %s9119_s8 }
  0xbd   : > { %p8690_p3 = pnand %p8688_p5, %p8659_p1 }
  0xbe   : > { %p8695_p10 = por %p8694_p8, %p8693_p9 }
  0xbf   : > { %p8691_p6 = pneg %p8690_p3 }
  0xc0   : > { %p8697_p12 = por %p8696_p11, %p8695_p10 }
  0xc2   : > { %p8698_p13 = pnand %p8697_p12, %p8691_p6 }
  0xc4   : > { %8701 = shalt.err (!%p8698_p13)
}
  0xc5   : > { %s8702_s26 = scalar_lea.vmem %s1071_s21, 32  ;;  %s8805_s7 = smov [#allocation4]  }
  0xc6   : > { %p8703_p4 = scmp.ne.s32.totalorder %s1071_s21, %s8702_s26  ;;  %s8707_s16 = sshll.u32 %s8805_s7, 4  ;;  %s8708_s16 = int_to_ptr.vmem [resolvable:$false] %s8707_s16 }
  0xc7   : > { %s8709_s20 = scalar_lea.vmem %s8708_s16, 64  ;;  %p8710_p5 = scmp.lt.s32.totalorder %s1071_s21, %s8708_s16 }
  0xc8   : > { %p8705_p0 = pnand %p8703_p4, %p8659_p1  ;;  %p8711_p3 = scmp.lt.s32.totalorder %s8709_s20, %s8702_s26 }
  0xca   : > { %p8706_p2 = pneg %p8705_p0  ;;  %p8712_p8 = por %p8711_p3, %p8710_p5 }
  0xcc   : > { %p8713_p9 = pnand %p8712_p8, %p8706_p2 }
  0xce   : > { %8716 = shalt.err (!%p8713_p9)
}
  0xcf   : > { %7987 = dma.hbm_to_vmem [thread:$0]  (!%p9114_p7), %s9119_s8, 32, %s1071_s21, %s1060_s6  }
  0xd0   : > { %p11311_p6 = scmp.ne.s32.totalorder %s11305_s11, 0 }
  0xd2   : > { %1087 = sbr.rel (%p11311_p6) target bundleno = 2607 (0xa2f), region = 160 }
  0xd9   : > { %s1089_s15 = sand.u32 1, %s8755_s1   ;;  %p11312_p1 = scmp.ne.s32.totalorder %s11304_s10, 0 }
  0xda   : > { %s9164_s2 = sshll.u32 %s1089_s15, 1  ;;  %s1090_s9 = scalar_lea.sflag [#allocation3], %s1089_s15 }
  0xdb   : > { %s1093_s18 = scalar_lea.vmem [#allocation2], %s9164_s2 }
  0xdc   : > { %8734 = dma.done.wait (%p11312_p1), %s1090_s9, 32  }
  0xdd   : > { %8736 = vsyncadd (%p11312_p1), %s1090_s9, 4294967264  ;;  %s1098_s8 = sand.u32 1, %s9016_s0   ;;  %s9173_s11 = scalar_lea.vmem [#allocation4], %s9164_s2 }
  0xde   : > { %s1099_s23 = scalar_lea.sflag [#allocation5], %s1098_s8 }
  0xdf   : > { %8738 = dma.done.wait (%p11312_p1), %s1099_s23, 32  }
  0xe0   : > { %8740 = vsyncadd (%p11312_p1), %s1099_s23, 4294967264  ;;  %p11313_p7 = scmp.eq.s32.totalorder %s9016_s0, 0 }
  0xe2   : > { %8742 = dma.done.wait (%p11313_p7), [#allocation5], 32   ;;  %p11314_p10 = pmov %p11313_p7 }
  0xe3   : > { %p11315_p11 = pmov %p11313_p7 }
  0xe4   : > { %8744 = vsyncadd (%p11314_p10), [#allocation5], 4294967264 }
  0xe5   : > { %8746 = dma.done.wait (%p11315_p11), [#allocation8], 48   ;;  %p11316_p12 = pmov %p11313_p7 }
  0xe6   : > { %p1223_p13 = scmp.lt.s32.totalorder %s9016_s0, 1  ;;  %vm1325_vm0 = vcmask 1041408   ;;  %v1292_v0 = vld [vmem:[#allocation6] sm:$0x3]  ;;  %vm1300_vm1 = vcmask 31744   ;;  %vm1461_vm2 = vcmask 1043456  }
  0xe7   : > { %8748 = vsyncadd (%p11316_p12), [#allocation8], 4294967248  ;;  %7937 = vmatprep.subr.msk.bf16.mxu0 %vm1325_vm0, %v1292_v0  ;;  %v1327_v3 = vsel %vm1325_vm0, %v1292_v0, 0  ;;  %v1435_v15 = vld [vmem:[%s8850_s3] sm:$0xf]  ;;  %vm1436_vm3 = vcmask 64512  }
  0xe8   : > { %s11473_s0 = smov (!%p1223_p13, %s9016_s0), 1  ;;  %7182 = vmatpush3.bf16.msra.mxu0 %v1327_v3  ;;  %7938 = vmatprep.subr.msk.bf16.mxu1 %vm1461_vm2, %v1435_v15  ;;  %v1463_v16 = vsel %vm1461_vm2, %v1435_v15, 0  ;;  %v1434_v52 = vld [vmem:[%s8845_s29] sm:$0xf]  ;;  %s8806_s6 = smov 124   ;;  %vm3263_vm4 = vcmask 7168  }
  0xe9   : > { %s9189_s21 = sshll.u32 %s11473_s0, 7  ;;  %7200 = vmatpush3.bf16.msra.mxu1 %v1463_v16  ;;  %v1587_v53 = vsel %vm1461_vm2, %v1434_v52, 0  ;;  %v9280_v54 = vld [vmem:[%s8860_s14] sm:$0xff]   ;;  %s11349_s28 = sld [smem:[#allocation20_spill]]  ;;  %vm3296_vm5 = vcmask 15368   ;;  %vm4335_vm6 = vcmask 23568  }
  0xea   : > { %s9193_s10 = scalar_lea.vmem %s8815_s5, %s9189_s21  ;;  %s9205_s0 = scalar_lea.vmem %s8830_s17, %s9189_s21  ;;  %7939 = vmatprep.subr.msk.bf16.mxu1 %vm1461_vm2, %v1434_v52  ;;  %v9284_v56 = vld [vmem:[%s8840_s25] ss:$0 sm:$0xff]  ;;  %v8081_v52 = vld [vmem:[%s8865_s19 + $0x30] sm:$0xff]   ;;  %vm4368_vm7 = vcmask 31768  }
  0xeb   : > { %v1244_v1 = vld [vmem:[%s9193_s10] sm:$0xff]  ;;  %v1245_v2 = vld [vmem:[%s9193_s10 + $0x8] sm:$0xff]  ;;  %v1246_v5 = vld [vmem:[%s9193_s10 + $0x10] sm:$0xff]  ;;  %s11350_s26 = sld [smem:[#allocation17_spill]]  ;;  %s11351_s7 = sld [smem:[#allocation18_spill]] }
  0xec   : > { %v1276_v4 = vpack.c.bf16 %v1245_v2, %v1244_v1  ;;  %v1247_v6 = vld [vmem:[%s9193_s10 + $0x18] sm:$0xff]  ;;  %v1248_v7 = vld [vmem:[%s9193_s10 + $0x20] sm:$0xff]  ;;  %v1249_v9 = vld [vmem:[%s9193_s10 + $0x28] sm:$0xff]  ;;  %s10240_s20 = scalar_lea.vmem %s8990_s24, %s9189_s21  ;;  %s11415_s15 = sld [smem:[#allocation21_spill]] }
  0xed   : > { %v1277_v8 = vpack.c.bf16 %v1247_v6, %v1246_v5  ;;  %v1278_v10 = vpack.c.bf16 %v1249_v9, %v1248_v7  ;;  %v1250_v11 = vld [vmem:[%s9193_s10 + $0x30] sm:$0xff]  ;;  %v1251_v12 = vld [vmem:[%s9193_s10 + $0x38] sm:$0xff]  ;;  %v1252_v13 = vld [vmem:[%s9193_s10 + $0x40] sm:$0xff]  ;;  %s11418_s2 = sld [smem:[#allocation27_spill]]  ;;  %s11421_s8 = sld [smem:[#allocation24_spill]] }
  0xee   : > { %7183 = vmatprep.mubr.msk.bf16.mxu0 %vm1300_vm1, %v1276_v4  ;;  %v1253_v14 = vld [vmem:[%s9193_s10 + $0x48] sm:$0xff]  ;;  %v1260_v17 = vld [vmem:[%s9205_s0] sm:$0xff]  ;;  %v1262_v19 = vld [vmem:[%s9205_s0 + $0x10] sm:$0xff]  ;;  %v1279_v26 = vpack.c.bf16 %v1251_v12, %v1250_v11  ;;  %s11427_s23 = sld [smem:[#allocation23_spill]] }
  0xef   : > { %7184 = vmatmul.mubr.msk.bf16.vlgmr.msra.gmra.mrb[0].mxu0 %vm1300_vm1, %v1277_v8  ;;  %v1261_v18 = vld [vmem:[%s9205_s0 + $0x8] sm:$0xff]  ;;  %v1263_v21 = vld [vmem:[%s9205_s0 + $0x18] sm:$0xff]  ;;  %v1264_v22 = vld [vmem:[%s9205_s0 + $0x20] sm:$0xff]  ;;  %v1280_v29 = vpack.c.bf16 %v1253_v14, %v1252_v13 }
  0xf0   : > { %7187 = vmatprep.mubr.msk.bf16.mxu0 %vm1300_vm1, %v1278_v10  ;;  %v9220_v20 = vpack.c.bf16 %v1261_v18, %v1260_v17  ;;  %v1265_v23 = vld [vmem:[%s9205_s0 + $0x28] sm:$0xff]  ;;  %v9225_v24 = vpack.c.bf16 %v1263_v21, %v1262_v19  ;;  %v1266_v27 = vld [vmem:[%s9205_s0 + $0x30] sm:$0xff]  ;;  %v1267_v28 = vld [vmem:[%s9205_s0 + $0x38] sm:$0xff] }
  0xf1   : > { %v9227_v25 = vpack.c.bf16 %v1265_v23, %v1264_v22  ;;  %v1268_v30 = vld [vmem:[%s9205_s0 + $0x40] sm:$0xff]  ;;  %v1269_v31 = vld [vmem:[%s9205_s0 + $0x48] sm:$0xff]  ;;  %v1254_v32 = vld [vmem:[%s9193_s10 + $0x50] sm:$0xff]  ;;  %v9245_v36 = vpack.c.bf16 %v1267_v28, %v1266_v27  ;;  %s11352_s16 = smov %s11351_s7 }
  0xf2   : > { %11317 = vst [vmem:[#allocation40_spill] sm:$0xff] %v9220_v20  ;;  %11318 = vst [vmem:[#allocation41_spill] sm:$0xff] %v9225_v24  ;;  %7201 = vmatprep.mubr.msk.bf16.mxu1 %vm1436_vm3, %v9220_v20  ;;  %v1255_v33 = vld [vmem:[%s9193_s10 + $0x58] sm:$0xff]  ;;  %v1256_v34 = vld [vmem:[%s9193_s10 + $0x60] sm:$0xff]  ;;  %v9247_v37 = vpack.c.bf16 %v1269_v31, %v1268_v30 }
  0xf3   : > { %11319 = vst [vmem:[#allocation42_spill] sm:$0xff] %v9227_v25  ;;  %7202 = vmatmul.mubr.msk.bf16.vlgmr.msra.gmra.mrb[0].mxu1 %vm1436_vm3, %v9225_v24  ;;  %v1257_v35 = vld [vmem:[%s9193_s10 + $0x68] sm:$0xff]  ;;  %11320 = vst [vmem:[#allocation43_spill] sm:$0xff] %v9245_v36  ;;  %v1281_v38 = vpack.c.bf16 %v1255_v33, %v1254_v32  ;;  %v1270_v39 = vld [vmem:[%s9205_s0 + $0x50] sm:$0xff]  ;;  %s11419_s9 = smov %s11418_s2 }
  0xf4   : > { %7205 = vmatprep.mubr.msk.bf16.mxu1 %vm1436_vm3, %v9227_v25  ;;  %11321 = vst [vmem:[#allocation44_spill] sm:$0xff] %v9247_v37  ;;  %v1271_v40 = vld [vmem:[%s9205_s0 + $0x58] sm:$0xff]  ;;  %v1282_v41 = vpack.c.bf16 %v1257_v35, %v1256_v34  ;;  %v1258_v42 = vld [vmem:[%s9193_s10 + $0x70] sm:$0xff]  ;;  %v1272_v46 = vld [vmem:[%s9205_s0 + $0x60] sm:$0xff]  ;;  %7218 = vmatpush3.bf16.msra.mxu1 %v1587_v53 }
  0xf5   : > { %v1259_v43 = vld [vmem:[%s9193_s10 + $0x78] sm:$0xff]  ;;  %v9259_v44 = vpack.c.bf16 %v1271_v40, %v1270_v39  ;;  %v1273_v47 = vld [vmem:[%s9205_s0 + $0x68] sm:$0xff]  ;;  %v1274_v49 = vld [vmem:[%s9205_s0 + $0x70] sm:$0xff]  ;;  %s11440_s10 = sld [smem:[#allocation33_spill]] }
  0xf6   : > { %v1283_v45 = vpack.c.bf16 %v1259_v43, %v1258_v42  ;;  %v9266_v48 = vpack.c.bf16 %v1273_v47, %v1272_v46  ;;  %v1275_v50 = vld [vmem:[%s9205_s0 + $0x78] sm:$0xff]  ;;  %v9358_v35 = vld [vmem:[%s8865_s19] sm:$0xff]   ;;  %v9370_v39 = vld [vmem:[%s8865_s19 + $0x8] sm:$0xff]  }
  0xf7   : > { %7188 = vmatmul.mubr.msk.bf16.gmra.mrb[4].mxu0 %vm1300_vm1, %v1279_v26  ;;  %11322 = vst [vmem:[#allocation45_spill] sm:$0xff] %v9259_v44  ;;  %v9270_v51 = vpack.c.bf16 %v1275_v50, %v1274_v49  ;;  %v8069_v40 = vld [vmem:[%s8860_s14 + $0x10] sm:$0xff]   ;;  %v8070_v42 = vld [vmem:[%s8860_s14 + $0x18] sm:$0xff]   ;;  %v8079_v46 = vld [vmem:[%s8865_s19 + $0x20] sm:$0xff]  }
  0xf8   : > { %7191 = vmatprep.mubr.msk.bf16.mxu0 %vm1300_vm1, %v1280_v29  ;;  %11323 = vst [vmem:[#allocation46_spill] sm:$0xff] %v9266_v48  ;;  %v8078_v43 = vld [vmem:[%s8865_s19 + $0x18] sm:$0xff]   ;;  %v8072_v47 = vld [vmem:[%s8860_s14 + $0x28] sm:$0xff]   ;;  %v8073_v49 = vld [vmem:[%s8860_s14 + $0x30] sm:$0xff]  }
  0xf9   : > { %11324 = vst [vmem:[#allocation47_spill] sm:$0xff] %v9270_v51  ;;  %v8080_v50 = vld [vmem:[%s8865_s19 + $0x28] sm:$0xff]   ;;  %v8074_v53 = vld [vmem:[%s8860_s14 + $0x38] sm:$0xff]  }
  0xfb   : > { %7206 = vmatmul.mubr.msk.bf16.gmra.mrb[4].mxu1 %vm1436_vm3, %v9245_v36 }
  0xfc   : > { %7209 = vmatprep.mubr.msk.bf16.mxu1 %vm1436_vm3, %v9247_v37 }
  0xff   : > { %7192 = vmatmul.mubr.msk.bf16.gmra.mrb[8].mxu0 %vm1300_vm1, %v1281_v38  ;;  %v8068_v38 = vld [vmem:[%s8860_s14 + $0x8] sm:$0xff]  }
 0x100   : > { %7195 = vmatprep.mubr.msk.bf16.mxu0 %vm1300_vm1, %v1282_v41  ;;  %v9377_v41 = vld [vmem:[%s8865_s19 + $0x10] sm:$0xff]  }
 0x103   : > { %7210 = vmatmul.mubr.msk.bf16.gmra.mrb[8].mxu1 %vm1436_vm3, %v9259_v44 }
 0x104   : > { %7213 = vmatprep.mubr.msk.bf16.mxu1 %vm1436_vm3, %v9266_v48 }
 0x107   : > { %7196 = vmatmul.mubr.msk.bf16.gmra.mrb[12].mxu0 %vm1300_vm1, %v1283_v45  ;;  %v8071_v45 = vld [vmem:[%s8860_s14 + $0x20] sm:$0xff]  }
 0x108   : > { %7251 = vmatprep.mubr.bf16.mxu0 %v9280_v54 }
 0x10b   : > { %7214 = vmatmul.mubr.msk.bf16.gmra.mrb[12].mxu1 %vm1436_vm3, %v9270_v51 }
 0x1c2   : > { %v7185_v55 = vpop.f32.mrb[0].mxu0 }
 0x1c3   : > { %v1363_v57 = vpop.f32.mrb[1].mxu0  ;;  %v1372_v59 = vadd.f32 %v7185_v55, %v9284_v56  ;;  %v8082_v55 = vld [vmem:[%s8865_s19 + $0x38] sm:$0xff]  }
 0x1c4   : > { %v7186_v58 = vpop.f32.mrb[2].mxu0  ;;  %v1364_v62 = vadd.f32 %v9284_v56, %v1363_v57  ;;  %v9439_v57 = vld [vmem:[#allocation9] sm:$0x3] }
 0x1c5   : > { %v1375_v60 = vadd.f32 %v7186_v58, %v9284_v56  ;;  %v1366_v61 = vpop.f32.mrb[3].mxu0  ;;  %v9442_v58 = vld [vmem:[%s8895_s27] sm:$0x3] }
 0x1c6   : > { %v1367_v63 = vadd.f32 %v9284_v56, %v1366_v61 }
 0x1c7   : > { %v9290_v0 = vpack.c.bf16 %v1375_v60, %v1372_v59 }
 0x1c8   : > { %v9292_v1 = vpack.c.bf16 %v1367_v63, %v1364_v62 }
 0x1c9   : > { %11325 = vst [vmem:[#allocation48_spill] sm:$0xff] %v9290_v0 }
 0x1ca   : > { %11326 = vst [vmem:[#allocation49_spill] sm:$0xff] %v9292_v1  ;;  %v7189_v2 = vpop.f32.mrb[4].mxu0  ;;  %7219 = vmatprep.mubr.msk.bf16.mxu1 %vm1436_vm3, %v9292_v1  ;;  %7235 = vmatprep.subr.bf16.mxu0 %v9292_v1 }
 0x1cb   : > { %7299 = vmatprep.subr.bf16.mxu1 %v9292_v1  ;;  %v1379_v3 = vpop.f32.mrb[5].mxu0  ;;  %7220 = vmatmul.mubr.msk.bf16.vlgmr.msra.gmra.mrb[0].mxu1 %vm1436_vm3, %v9290_v0  ;;  %v1388_v5 = vadd.f32 %v7189_v2, %v9284_v56 }
 0x1cc   : > { %7236 = vmatpush3.bf16.msra.mxu0 %v9292_v1  ;;  %7300 = vmatpush3.bf16.msra.mxu1 %v9292_v1  ;;  %v7190_v4 = vpop.f32.mrb[6].mxu0  ;;  %v1380_v8 = vadd.f32 %v9284_v56, %v1379_v3 }
 0x1cd   : > { %v1391_v6 = vadd.f32 %v7190_v4, %v9284_v56  ;;  %7237 = vmatprep.subr.bf16.mxu0 %v9290_v0  ;;  %7301 = vmatprep.subr.bf16.mxu1 %v9290_v0  ;;  %v1382_v7 = vpop.f32.mrb[7].mxu0 }
 0x1ce   : > { %v1383_v9 = vadd.f32 %v9284_v56, %v1382_v7 }
 0x1cf   : > { %v9308_v10 = vpack.c.bf16 %v1391_v6, %v1388_v5 }
 0x1d0   : > { %v9310_v11 = vpack.c.bf16 %v1383_v9, %v1380_v8  ;;  %7238 = vmatpush3.bf16.msra.mxu0 %v9290_v0  ;;  %7302 = vmatpush3.bf16.msra.mxu1 %v9290_v0 }
 0x1d1   : > { %11327 = vst [vmem:[#allocation50_spill] sm:$0xff] %v9308_v10 }
 0x1d2   : > { %11328 = vst [vmem:[#allocation51_spill] sm:$0xff] %v9310_v11  ;;  %v7193_v12 = vpop.f32.mrb[8].mxu0  ;;  %7223 = vmatprep.mubr.msk.bf16.mxu1 %vm1436_vm3, %v9310_v11  ;;  %7239 = vmatprep.subr.bf16.mxu0 %v9310_v11 }
 0x1d3   : > { %7303 = vmatprep.subr.bf16.mxu1 %v9310_v11  ;;  %v1395_v13 = vpop.f32.mrb[9].mxu0  ;;  %7224 = vmatmul.mubr.msk.bf16.gmra.mrb[4].mxu1 %vm1436_vm3, %v9308_v10  ;;  %v1404_v15 = vadd.f32 %v7193_v12, %v9284_v56  ;;  %v6664_v12 = vld [vmem:[#allocation7] ss:$0 sm:$0xff] }
 0x1d4   : > { %7240 = vmatpush3.bf16.msra.mxu0 %v9310_v11  ;;  %7304 = vmatpush3.bf16.msra.mxu1 %v9310_v11  ;;  %v7194_v14 = vpop.f32.mrb[10].mxu0  ;;  %v1396_v18 = vadd.f32 %v9284_v56, %v1395_v13 }
 0x1d5   : > { %v1407_v16 = vadd.f32 %v7194_v14, %v9284_v56  ;;  %7241 = vmatprep.subr.bf16.mxu0 %v9308_v10  ;;  %7305 = vmatprep.subr.bf16.mxu1 %v9308_v10  ;;  %v1398_v17 = vpop.f32.mrb[11].mxu0 }
 0x1d6   : > { %v1399_v19 = vadd.f32 %v9284_v56, %v1398_v17 }
 0x1d7   : > { %v9328_v21 = vpack.c.bf16 %v1407_v16, %v1404_v15 }
 0x1d8   : > { %v9330_v22 = vpack.c.bf16 %v1399_v19, %v1396_v18  ;;  %7242 = vmatpush3.bf16.msra.mxu0 %v9308_v10  ;;  %7306 = vmatpush3.bf16.msra.mxu1 %v9308_v10 }
 0x1d9   : > { %11329 = vst [vmem:[#allocation52_spill] sm:$0xff] %v9328_v21 }
 0x1da   : > { %11330 = vst [vmem:[#allocation53_spill] sm:$0xff] %v9330_v22  ;;  %v7197_v23 = vpop.f32.mrb[12].mxu0  ;;  %7227 = vmatprep.mubr.msk.bf16.mxu1 %vm1436_vm3, %v9330_v22  ;;  %7243 = vmatprep.subr.bf16.mxu0 %v9330_v22 }
 0x1db   : > { %7307 = vmatprep.subr.bf16.mxu1 %v9330_v22  ;;  %v1411_v26 = vpop.f32.mrb[13].mxu0  ;;  %7228 = vmatmul.mubr.msk.bf16.gmra.mrb[8].mxu1 %vm1436_vm3, %v9328_v21  ;;  %v1420_v28 = vadd.f32 %v7197_v23, %v9284_v56 }
 0x1dc   : > { %7244 = vmatpush3.bf16.msra.mxu0 %v9330_v22  ;;  %7308 = vmatpush3.bf16.msra.mxu1 %v9330_v22  ;;  %v7198_v27 = vpop.f32.mrb[14].mxu0  ;;  %v1412_v31 = vadd.f32 %v9284_v56, %v1411_v26 }
 0x1dd   : > { %v1423_v29 = vadd.f32 %v7198_v27, %v9284_v56  ;;  %7245 = vmatprep.subr.bf16.mxu0 %v9328_v21  ;;  %7309 = vmatprep.subr.bf16.mxu1 %v9328_v21  ;;  %v1414_v30 = vpop.f32.mrb[15].mxu0 }
 0x1de   : > { %v1415_v32 = vadd.f32 %v9284_v56, %v1414_v30 }
 0x1df   : > { %v9348_v33 = vpack.c.bf16 %v1423_v29, %v1420_v28 }
 0x1e0   : > { %v9350_v34 = vpack.c.bf16 %v1415_v32, %v1412_v31  ;;  %7246 = vmatpush3.bf16.msra.mxu0 %v9328_v21  ;;  %7310 = vmatpush3.bf16.msra.mxu1 %v9328_v21 }
 0x1e1   : > { %11331 = vst [vmem:[#allocation54_spill] sm:$0xff] %v9348_v33 }
 0x1e2   : > { %11332 = vst [vmem:[#allocation55_spill] sm:$0xff] %v9350_v34  ;;  %7231 = vmatprep.mubr.msk.bf16.mxu1 %vm1436_vm3, %v9350_v34  ;;  %7247 = vmatprep.subr.bf16.mxu0 %v9350_v34 }
 0x1e3   : > { %7311 = vmatprep.subr.bf16.mxu1 %v9350_v34  ;;  %7232 = vmatmul.mubr.msk.bf16.gmra.mrb[12].mxu1 %vm1436_vm3, %v9348_v33 }
 0x1e4   : > { %7248 = vmatpush3.bf16.msra.mxu0 %v9350_v34  ;;  %7312 = vmatpush3.bf16.msra.mxu1 %v9350_v34 }
 0x1e5   : > { %7249 = vmatprep.subr.bf16.mxu0 %v9348_v33  ;;  %7313 = vmatprep.subr.bf16.mxu1 %v9348_v33 }
 0x1e6   : > { %7315 = vmatprep.mubr.bf16.mxu1 %v9358_v35 }
 0x1e8   : > { %7250 = vmatpush3.bf16.msra.mxu0 %v9348_v33  ;;  %7314 = vmatpush3.bf16.msra.mxu1 %v9348_v33 }
 0x1e9   : > { %7267 = vmatprep.subr.bf16.mxu0 %v9220_v20 }
 0x1eb   : > { %7252 = vmatmul.mubr.bf16.vlgmr.msra.gmra.mrb[16].mxu0 %v8068_v38  ;;  %7316 = vmatmul.mubr.bf16.vlgmr.msra.gmra.mrb[16].mxu1 %v9370_v39 }
 0x1ec   : > { %7268 = vmatpush3.bf16.msra.mxu0 %v9220_v20  ;;  %7255 = vmatprep.mubr.bf16.mxu0 %v8069_v40 }
 0x1ed   : > { %7269 = vmatprep.subr.bf16.mxu0 %v9225_v24  ;;  %7319 = vmatprep.mubr.bf16.mxu1 %v9377_v41 }
 0x1f0   : > { %7270 = vmatpush3.bf16.msra.mxu0 %v9225_v24 }
 0x1f1   : > { %7271 = vmatprep.subr.bf16.mxu0 %v9227_v25 }
 0x1f3   : > { %7256 = vmatmul.mubr.bf16.gmra.mrb[20].mxu0 %v8070_v42  ;;  %7320 = vmatmul.mubr.bf16.gmra.mrb[20].mxu1 %v8078_v43 }
 0x1f4   : > { %7272 = vmatpush3.bf16.msra.mxu0 %v9227_v25  ;;  %7259 = vmatprep.mubr.bf16.mxu0 %v8071_v45 }
 0x1f5   : > { %7273 = vmatprep.subr.bf16.mxu0 %v9245_v36  ;;  %7323 = vmatprep.mubr.bf16.mxu1 %v8079_v46 }
 0x1f8   : > { %7274 = vmatpush3.bf16.msra.mxu0 %v9245_v36 }
 0x1f9   : > { %7275 = vmatprep.subr.bf16.mxu0 %v9247_v37 }
 0x1fb   : > { %7260 = vmatmul.mubr.bf16.gmra.mrb[24].mxu0 %v8072_v47  ;;  %7324 = vmatmul.mubr.bf16.gmra.mrb[24].mxu1 %v8080_v50 }
 0x1fc   : > { %7276 = vmatpush3.bf16.msra.mxu0 %v9247_v37  ;;  %7263 = vmatprep.mubr.bf16.mxu0 %v8073_v49 }
 0x1fd   : > { %7277 = vmatprep.subr.bf16.mxu0 %v9259_v44  ;;  %7327 = vmatprep.mubr.bf16.mxu1 %v8081_v52 }
 0x200   : > { %7278 = vmatpush3.bf16.msra.mxu0 %v9259_v44 }
 0x201   : > { %7279 = vmatprep.subr.bf16.mxu0 %v9266_v48 }
 0x203   : > { %7264 = vmatmul.mubr.bf16.gmra.mrb[28].mxu0 %v8074_v53  ;;  %7328 = vmatmul.mubr.bf16.gmra.mrb[28].mxu1 %v8082_v55 }
 0x204   : > { %7280 = vmatpush3.bf16.msra.mxu0 %v9266_v48  ;;  %7283 = vmatprep.mubr.bf16.mxu0 %v9280_v54  ;;  %v9427_v54 = vld [vmem:[%s8885_s12] sm:$0x3] }
 0x205   : > { %7281 = vmatprep.subr.bf16.mxu0 %v9270_v51  ;;  %v9433_v56 = vsel %vm1325_vm0, %v9427_v54, 0  ;;  %7941 = vmatprep.subr.msk.bf16.mxu1 %vm1325_vm0, %v9427_v54 }
 0x206   : > { %7808 = vmatpush3.bf16.msra.mxu1 %v9433_v56 }
 0x207   : > { %7942 = vmatprep.subr.msk.bf16.mxu1 %vm1325_vm0, %v9439_v57 }
 0x208   : > { %7282 = vmatpush3.bf16.msra.mxu0 %v9270_v51 }
 0x209   : > { %7331 = vmatprep.subr.bf16.mxu0 %v9220_v20 }
 0x20b   : > { %7284 = vmatmul.mubr.bf16.vlgmr.msra.gmra.mrb[32].mxu0 %v8068_v38 }
 0x20c   : > { %7332 = vmatpush3.bf16.msra.mxu0 %v9220_v20  ;;  %7287 = vmatprep.mubr.bf16.mxu0 %v8069_v40 }
 0x20d   : > { %7333 = vmatprep.subr.bf16.mxu0 %v9225_v24 }
 0x210   : > { %7334 = vmatpush3.bf16.msra.mxu0 %v9225_v24 }
 0x211   : > { %7335 = vmatprep.subr.bf16.mxu0 %v9227_v25 }
 0x213   : > { %7288 = vmatmul.mubr.bf16.gmra.mrb[36].mxu0 %v8070_v42 }
 0x214   : > { %7336 = vmatpush3.bf16.msra.mxu0 %v9227_v25  ;;  %7291 = vmatprep.mubr.bf16.mxu0 %v8071_v45 }
 0x215   : > { %7337 = vmatprep.subr.bf16.mxu0 %v9245_v36 }
 0x218   : > { %7338 = vmatpush3.bf16.msra.mxu0 %v9245_v36 }
 0x219   : > { %7339 = vmatprep.subr.bf16.mxu0 %v9247_v37 }
 0x21b   : > { %7292 = vmatmul.mubr.bf16.gmra.mrb[40].mxu0 %v8072_v47 }
 0x21c   : > { %7340 = vmatpush3.bf16.msra.mxu0 %v9247_v37  ;;  %7295 = vmatprep.mubr.bf16.mxu0 %v8073_v49 }
 0x21d   : > { %7341 = vmatprep.subr.bf16.mxu0 %v9259_v44 }
 0x220   : > { %7342 = vmatpush3.bf16.msra.mxu0 %v9259_v44 }
 0x221   : > { %7343 = vmatprep.subr.bf16.mxu0 %v9266_v48 }
 0x223   : > { %7296 = vmatmul.mubr.bf16.gmra.mrb[44].mxu0 %v8074_v53 }
 0x224   : > { %7344 = vmatpush3.bf16.msra.mxu0 %v9266_v48  ;;  %7347 = vmatprep.mubr.bf16.mxu0 %v9358_v35 }
 0x225   : > { %7345 = vmatprep.subr.bf16.mxu0 %v9270_v51 }
 0x228   : > { %7346 = vmatpush3.bf16.msra.mxu0 %v9270_v51 }
 0x229   : > { %7940 = vmatprep.subr.msk.bf16.mxu0 %vm1325_vm0, %v9427_v54 }
 0x22b   : > { %7348 = vmatmul.mubr.bf16.vlgmr.msra.gmra.mrb[48].mxu0 %v9370_v39 }
 0x22c   : > { %7351 = vmatprep.mubr.bf16.mxu0 %v9377_v41  ;;  %7364 = vmatpush3.bf16.msra.mxu0 %v9433_v56 }
 0x22d   : > { %7943 = vmatprep.subr.msk.bf16.mxu0 %vm1325_vm0, %v9442_v58 }
 0x233   : > { %7352 = vmatmul.mubr.bf16.gmra.mrb[52].mxu0 %v8078_v43 }
 0x234   : > { %7355 = vmatprep.mubr.bf16.mxu0 %v8079_v46 }
 0x23b   : > { %7356 = vmatmul.mubr.bf16.gmra.mrb[56].mxu0 %v8080_v50 }
 0x23c   : > { %7359 = vmatprep.mubr.bf16.mxu0 %v8081_v52 }
 0x243   : > { %7360 = vmatmul.mubr.bf16.gmra.mrb[60].mxu0 %v8082_v55 }
 0x29e   : > { %v9448_v59 = vpop.f32.mrb[0].mxu1 }
 0x29f   : > { %11333 = vst [vmem:[#allocation56_spill] sm:$0xff] %v9448_v59  ;;  %v9450_v60 = vpop.f32.mrb[1].mxu1 }
 0x2a0   : > { %11334 = vst [vmem:[#allocation57_spill] sm:$0xff] %v9450_v60  ;;  %v9452_v61 = vpop.f32.mrb[2].mxu1 }
 0x2a1   : > { %11335 = vst [vmem:[#allocation58_spill] sm:$0xff] %v9452_v61  ;;  %v9454_v62 = vpop.f32.mrb[3].mxu1  ;;  %v9886_v61 = vld [vmem:[%s11352_s16 + $0x60] sm:$0xff] }
 0x2a2   : > { %11336 = vst [vmem:[#allocation59_spill] sm:$0xff] %v9454_v62 }
 0x2a6   : > { %v9456_v63 = vpop.f32.mrb[4].mxu1 }
 0x2a7   : > { %11337 = vst [vmem:[#allocation60_spill] sm:$0xff] %v9456_v63  ;;  %v9458_v2 = vpop.f32.mrb[5].mxu1 }
 0x2a8   : > { %11338 = vst [vmem:[#allocation61_spill] sm:$0xff] %v9458_v2  ;;  %v9460_v3 = vpop.f32.mrb[6].mxu1 }
 0x2a9   : > { %11339 = vst [vmem:[#allocation62_spill] sm:$0xff] %v9460_v3  ;;  %v9462_v4 = vpop.f32.mrb[7].mxu1  ;;  %v9872_v3 = vld [vmem:[%s11352_s16 + $0x70] sm:$0xff] }
 0x2aa   : > { %11340 = vst [vmem:[#allocation63_spill] sm:$0xff] %v9462_v4 }
 0x2ae   : > { %v9464_v5 = vpop.f32.mrb[8].mxu1 }
 0x2af   : > { %11341 = vst [vmem:[#allocation64_spill] sm:$0xff] %v9464_v5  ;;  %v9466_v6 = vpop.f32.mrb[9].mxu1 }
 0x2b0   : > { %11342 = vst [vmem:[#allocation65_spill] sm:$0xff] %v9466_v6  ;;  %v9468_v7 = vpop.f32.mrb[10].mxu1 }
 0x2b1   : > { %11343 = vst [vmem:[#allocation66_spill] sm:$0xff] %v9468_v7  ;;  %v9470_v8 = vpop.f32.mrb[11].mxu1  ;;  %v9858_v7 = vld [vmem:[%s11352_s16 + $0x40] sm:$0xff] }
 0x2b2   : > { %11344 = vst [vmem:[#allocation67_spill] sm:$0xff] %v9470_v8 }
 0x2b6   : > { %v9472_v9 = vpop.f32.mrb[12].mxu1 }
 0x2b7   : > { %11345 = vst [vmem:[#allocation68_spill] sm:$0xff] %v9472_v9  ;;  %v1671_v13 = vpop.f32.mrb[13].mxu1 }
 0x2b8   : > { %v9474_v14 = vadd.f32 %v6664_v12, %v1671_v13  ;;  %v7234_v15 = vpop.f32.mrb[14].mxu1 }
 0x2b9   : > { %v9476_v16 = vadd.f32 %v7234_v15, %v6664_v12  ;;  %v1674_v17 = vpop.f32.mrb[15].mxu1 }
 0x2ba   : > { %11346 = vst [vmem:[#allocation69_spill] sm:$0xff] %v9474_v14  ;;  %v9478_v18 = vadd.f32 %v6664_v12, %v1674_v17 }
 0x2bb   : > { %11347 = vst [vmem:[#allocation70_spill] sm:$0xff] %v9476_v16  ;;  %v9844_v16 = vld [vmem:[%s11352_s16 + $0x50] sm:$0xff] }
 0x2bc   : > { %11348 = vst [vmem:[#allocation71_spill] sm:$0xff] %v9478_v18 }
 0x2be   : > { %v7253_v19 = vpop.f32.mrb[16].mxu0  ;;  %v7317_v23 = vpop.f32.mrb[16].mxu1 }
 0x2bf   : > { %v1839_v26 = vpop.f32.mrb[17].mxu0  ;;  %v2097_v27 = vpop.f32.mrb[17].mxu1 }
 0x2c0   : > { %v7254_v28 = vpop.f32.mrb[18].mxu0  ;;  %v7318_v29 = vpop.f32.mrb[18].mxu1 }
 0x2c1   : > { %v9480_v30 = vpack.c.bf16 %v7254_v28, %v7253_v19  ;;  %v1842_v31 = vpop.f32.mrb[19].mxu0  ;;  %v9482_v32 = vpack.c.bf16 %v7318_v29, %v7317_v23  ;;  %v2100_v35 = vpop.f32.mrb[19].mxu1 }
 0x2c2   : > { %v9484_v38 = vpack.c.bf16 %v1842_v31, %v1839_v26  ;;  %v9486_v39 = vpack.c.bf16 %v2100_v35, %v2097_v27 }
 0x2c4   : > { %3466 = vrot.lane.b32.xlu0 %v9484_v38, %s8806_s6 }
 0x2c6   : > { %v7257_v40 = vpop.f32.mrb[20].mxu0  ;;  %v7321_v41 = vpop.f32.mrb[20].mxu1 }
 0x2c7   : > { %v1855_v42 = vpop.f32.mrb[21].mxu0  ;;  %v2113_v43 = vpop.f32.mrb[21].mxu1 }
 0x2c8   : > { %v7258_v45 = vpop.f32.mrb[22].mxu0  ;;  %v7322_v46 = vpop.f32.mrb[22].mxu1 }
 0x2c9   : > { %v9490_v47 = vpack.c.bf16 %v7258_v45, %v7257_v40  ;;  %v1858_v49 = vpop.f32.mrb[23].mxu0  ;;  %v9492_v50 = vpack.c.bf16 %v7322_v46, %v7321_v41  ;;  %v2116_v52 = vpop.f32.mrb[23].mxu1 }
 0x2ca   : > { %v9494_v53 = vpack.c.bf16 %v1858_v49, %v1855_v42  ;;  %v9496_v55 = vpack.c.bf16 %v2116_v52, %v2113_v43 }
 0x2ce   : > { %v7261_v12 = vpop.f32.mrb[24].mxu0  ;;  %v7325_v13 = vpop.f32.mrb[24].mxu1 }
 0x2cf   : > { %v1871_v15 = vpop.f32.mrb[25].mxu0  ;;  %v2129_v17 = vpop.f32.mrb[25].mxu1 }
 0x2d0   : > { %v7262_v19 = vpop.f32.mrb[26].mxu0  ;;  %v7326_v23 = vpop.f32.mrb[26].mxu1 }
 0x2d1   : > { %v9498_v26 = vpack.c.bf16 %v7262_v19, %v7261_v12  ;;  %v1874_v27 = vpop.f32.mrb[27].mxu0  ;;  %v9500_v28 = vpack.c.bf16 %v7326_v23, %v7325_v13  ;;  %v2132_v29 = vpop.f32.mrb[27].mxu1 }
 0x2d2   : > { %v9502_v31 = vpack.c.bf16 %v1874_v27, %v1871_v15  ;;  %v9504_v35 = vpack.c.bf16 %v2132_v29, %v2129_v17 }
 0x2d6   : > { %v7265_v40 = vpop.f32.mrb[28].mxu0  ;;  %v7329_v41 = vpop.f32.mrb[28].mxu1 }
 0x2d7   : > { %v1887_v42 = vpop.f32.mrb[29].mxu0  ;;  %v2145_v43 = vpop.f32.mrb[29].mxu1 }
 0x2d8   : > { %v7266_v45 = vpop.f32.mrb[30].mxu0  ;;  %v7330_v46 = vpop.f32.mrb[30].mxu1 }
 0x2d9   : > { %v9506_v49 = vpack.c.bf16 %v7266_v45, %v7265_v40  ;;  %v1890_v52 = vpop.f32.mrb[31].mxu0  ;;  %v9508_v12 = vpack.c.bf16 %v7330_v46, %v7329_v41  ;;  %v2148_v19 = vpop.f32.mrb[31].mxu1  ;;  %v9517_v40 = vsel %vm1325_vm0, %v9442_v58, 0  ;;  %v9521_v41 = vld [vmem:[%s11349_s28] sm:$0x3]  ;;  %s11442_s28 = sld [smem:[#allocation31_spill]] }
 0x2da   : > { %v9510_v13 = vpack.c.bf16 %v1890_v52, %v1887_v42  ;;  %v9512_v23 = vpack.c.bf16 %v2148_v19, %v2145_v43 }
 0x2de   : > { %v7285_v15 = vpop.f32.mrb[32].mxu0 }
 0x2df   : > { %v1936_v17 = vpop.f32.mrb[33].mxu0 }
 0x2e0   : > { %v7286_v27 = vpop.f32.mrb[34].mxu0 }
 0x2e1   : > { %v2302_v29 = vpack.c.bf16 %v7286_v27, %v7285_v15  ;;  %v1939_v33 = vpop.f32.mrb[35].mxu0 }
 0x2e2   : > { %v2301_v34 = vpack.c.bf16 %v1939_v33, %v1936_v17 }
 0x2e3   : > { %3323 = vrot.lane.b32.xlu0 %v2302_v29, %s8806_s6 }
 0x2e4   : > { %7365 = vmatprep.mubr.msk.bf16.mxu0 %vm1300_vm1, %v2301_v34 }
 0x2e5   : > { %7366 = vmatmul.mubr.msk.bf16.vlgmr.msra.gmra.mrb[64].mxu0 %vm1300_vm1, %v2302_v29 }
 0x2e6   : > { %v7289_v42 = vpop.f32.mrb[36].mxu0  ;;  %7400 = vmatpush3.bf16.msra.mxu0 %v9517_v40 }
 0x2e7   : > { %3321 = vrot.lane.b32.xlu0 %v2301_v34, %s8806_s6  ;;  %v1952_v43 = vpop.f32.mrb[37].mxu0  ;;  %7944 = vmatprep.subr.msk.bf16.mxu0 %vm1325_vm0, %v9521_v41 }
 0x2e8   : > { %v7290_v33 = vpop.f32.mrb[38].mxu0 }
 0x2e9   : > { %v2304_v45 = vpack.c.bf16 %v7290_v33, %v7289_v42  ;;  %v1955_v46 = vpop.f32.mrb[39].mxu0  ;;  %v9535_v42 = vsel %vm1325_vm0, %v9439_v57, 0 }
 0x2ea   : > { %v2303_v52 = vpack.c.bf16 %v1955_v46, %v1952_v43 }
 0x2eb   : > { %3327 = vrot.lane.b32.xlu1 %v2304_v45, %s8806_s6 }
 0x2ec   : > { %3325 = vrot.lane.b32.xlu0 %v2303_v52, %s8806_s6  ;;  %7369 = vmatprep.mubr.msk.bf16.mxu0 %vm1300_vm1, %v2303_v52 }
 0x2ed   : > { %7370 = vmatmul.mubr.msk.bf16.gmra.mrb[68].mxu0 %vm1300_vm1, %v2304_v45 }
 0x2ee   : > { %v7293_v19 = vpop.f32.mrb[40].mxu0 }
 0x2ef   : > { %v1968_v15 = vpop.f32.mrb[41].mxu0 }
 0x2f0   : > { %v7294_v17 = vpop.f32.mrb[42].mxu0 }
 0x2f1   : > { %v2306_v34 = vpack.c.bf16 %v7294_v17, %v7293_v19  ;;  %v1971_v27 = vpop.f32.mrb[43].mxu0 }
 0x2f2   : > { %v2305_v29 = vpack.c.bf16 %v1971_v27, %v1968_v15 }
 0x2f3   : > { %3331 = vrot.lane.b32.xlu1 %v2306_v34, %s8806_s6 }
 0x2f4   : > { %3329 = vrot.lane.b32.xlu0 %v2305_v29, %s8806_s6  ;;  %7373 = vmatprep.mubr.msk.bf16.mxu1 %vm1300_vm1, %v2305_v29 }
 0x2f5   : > { %7374 = vmatmul.mubr.msk.bf16.vlgmr.msra.gmra.mrb[32].mxu1 %vm1300_vm1, %v2306_v34 }
 0x2f6   : > { %v7297_v43 = vpop.f32.mrb[44].mxu0  ;;  %7382 = vmatpush3.bf16.msra.mxu1 %v9535_v42 }
 0x2f7   : > { %v1984_v33 = vpop.f32.mrb[45].mxu0  ;;  %7945 = vmatprep.subr.msk.bf16.mxu1 %vm1325_vm0, %v9427_v54 }
 0x2f8   : > { %v7298_v45 = vpop.f32.mrb[46].mxu0 }
 0x2f9   : > { %v2308_v46 = vpack.c.bf16 %v7298_v45, %v7297_v43  ;;  %v1987_v52 = vpop.f32.mrb[47].mxu0  ;;  %v9554_v43 = vsel %vm1325_vm0, %v9521_v41, 0 }
 0x2fa   : > { %v2307_v19 = vpack.c.bf16 %v1987_v52, %v1984_v33 }
 0x2fb   : > { %3335 = vrot.lane.b32.xlu1 %v2308_v46, %s8806_s6 }
 0x2fc   : > { %3333 = vrot.lane.b32.xlu0 %v2307_v19, %s8806_s6  ;;  %7377 = vmatprep.mubr.msk.bf16.mxu1 %vm1300_vm1, %v2307_v19 }
 0x2fd   : > { %7378 = vmatmul.mubr.msk.bf16.gmra.mrb[36].mxu1 %vm1300_vm1, %v2308_v46 }
 0x2fe   : > { %v7349_v15 = vpop.f32.mrb[48].mxu0  ;;  %7383 = vmatprep.mubr.msk.bf16.mxu1 %vm1300_vm1, %v9484_v38 }
 0x2ff   : > { %v2194_v17 = vpop.f32.mrb[49].mxu0 }
 0x300   : > { %v7350_v34 = vpop.f32.mrb[50].mxu0  ;;  %3772 = vrot.lane.b32.xlu0 %v9486_v39, %s8806_s6 }
 0x301   : > { %v2582_v54 = vpack.c.bf16 %v7350_v34, %v7349_v15  ;;  %v2197_v27 = vpop.f32.mrb[51].mxu0 }
 0x302   : > { %v2581_v29 = vpack.c.bf16 %v2197_v27, %v2194_v17 }
 0x303   : > { %3629 = vrot.lane.b32.xlu1 %v2582_v54, %s8806_s6 }
 0x304   : > { %7401 = vmatprep.mubr.msk.bf16.mxu0 %vm1300_vm1, %v2581_v29  ;;  %3470 = vrot.lane.b32.xlu0 %v9494_v53, %s8806_s6 }
 0x305   : > { %7384 = vmatmul.mubr.msk.bf16.vlgmr.msra.gmra.mrb[40].mxu1 %vm1300_vm1, %v9480_v30  ;;  %7402 = vmatmul.mubr.msk.bf16.vlgmr.msra.gmra.mrb[72].mxu0 %vm1300_vm1, %v2582_v54 }
 0x306   : > { %v7353_v38 = vpop.f32.mrb[52].mxu0  ;;  %7387 = vmatprep.mubr.msk.bf16.mxu1 %vm1300_vm1, %v9494_v53  ;;  %7418 = vmatpush3.bf16.msra.mxu0 %v9554_v43 }
 0x307   : > { %3627 = vrot.lane.b32.xlu1 %v2581_v29, %s8806_s6  ;;  %v2210_v33 = vpop.f32.mrb[53].mxu0  ;;  %7436 = vmatpush3.bf16.msra.mxu1 %v9433_v56 }
 0x308   : > { %v7354_v45 = vpop.f32.mrb[54].mxu0  ;;  %3776 = vrot.lane.b32.xlu0 %v9496_v55, %s8806_s6  ;;  %7946 = vmatprep.subr.msk.bf16.mxu1 %vm1325_vm0, %v9439_v57 }
 0x309   : > { %v2584_v46 = vpack.c.bf16 %v7354_v45, %v7353_v38  ;;  %v2213_v52 = vpop.f32.mrb[55].mxu0  ;;  %7947 = vmatprep.subr.msk.bf16.mxu0 %vm1325_vm0, %v9442_v58 }
 0x30a   : > { %v2583_v53 = vpack.c.bf16 %v2213_v52, %v2210_v33 }
 0x30b   : > { %3468 = vrot.lane.b32.xlu1 %v9480_v30, %s8806_s6 }
 0x30c   : > { %7405 = vmatprep.mubr.msk.bf16.mxu0 %vm1300_vm1, %v2583_v53  ;;  %3631 = vrot.lane.b32.xlu0 %v2583_v53, %s8806_s6 }
 0x30d   : > { %7388 = vmatmul.mubr.msk.bf16.gmra.mrb[44].mxu1 %vm1300_vm1, %v9490_v47  ;;  %7406 = vmatmul.mubr.msk.bf16.gmra.mrb[76].mxu0 %vm1300_vm1, %v2584_v46 }
 0x30e   : > { %v7357_v56 = vpop.f32.mrb[56].mxu0  ;;  %7391 = vmatprep.mubr.msk.bf16.mxu1 %vm1300_vm1, %v9502_v31 }
 0x30f   : > { %v2226_v57 = vpop.f32.mrb[57].mxu0  ;;  %3774 = vrot.lane.b32.xlu1 %v9482_v32, %s8806_s6 }
 0x310   : > { %v7358_v58 = vpop.f32.mrb[58].mxu0  ;;  %3474 = vrot.lane.b32.xlu0 %v9502_v31, %s8806_s6 }
 0x311   : > { %v2586_v30 = vpack.c.bf16 %v7358_v58, %v7357_v56  ;;  %v2229_v19 = vpop.f32.mrb[59].mxu0 }
 0x312   : > { %v2585_v15 = vpack.c.bf16 %v2229_v19, %v2226_v57 }
 0x313   : > { %3633 = vrot.lane.b32.xlu1 %v2584_v46, %s8806_s6 }
 0x314   : > { %7409 = vmatprep.mubr.msk.bf16.mxu0 %vm1300_vm1, %v2585_v15  ;;  %3635 = vrot.lane.b32.xlu0 %v2585_v15, %s8806_s6 }
 0x315   : > { %7392 = vmatmul.mubr.msk.bf16.gmra.mrb[32].mxu1 %vm1300_vm1, %v9498_v26  ;;  %7410 = vmatmul.mubr.msk.bf16.gmra.mrb[80].mxu0 %vm1300_vm1, %v2586_v30 }
 0x316   : > { %v7361_v17 = vpop.f32.mrb[60].mxu0  ;;  %7395 = vmatprep.mubr.msk.bf16.mxu1 %vm1300_vm1, %v9510_v13 }
 0x317   : > { %v2242_v34 = vpop.f32.mrb[61].mxu0  ;;  %3472 = vrot.lane.b32.xlu1 %v9490_v47, %s8806_s6 }
 0x318   : > { %v7362_v31 = vpop.f32.mrb[62].mxu0  ;;  %3780 = vrot.lane.b32.xlu0 %v9504_v35, %s8806_s6 }
 0x319   : > { %v2588_v54 = vpack.c.bf16 %v7362_v31, %v7361_v17  ;;  %v2245_v27 = vpop.f32.mrb[63].mxu0 }
 0x31a   : > { %v2587_v29 = vpack.c.bf16 %v2245_v27, %v2242_v34 }
 0x31b   : > { %3637 = vrot.lane.b32.xlu1 %v2586_v30, %s8806_s6 }
 0x31c   : > { %7413 = vmatprep.mubr.msk.bf16.mxu0 %vm1300_vm1, %v2587_v29  ;;  %3478 = vrot.lane.b32.xlu0 %v9510_v13, %s8806_s6 }
 0x31d   : > { %7396 = vmatmul.mubr.msk.bf16.gmra.mrb[36].mxu1 %vm1300_vm1, %v9506_v49  ;;  %7414 = vmatmul.mubr.msk.bf16.gmra.mrb[84].mxu0 %vm1300_vm1, %v2588_v54 }
 0x31e   : > { %7419 = vmatprep.mubr.msk.bf16.mxu0 %vm1300_vm1, %v9486_v39 }
 0x31f   : > { %3778 = vrot.lane.b32.xlu1 %v9492_v50, %s8806_s6 }
 0x320   : > { %3639 = vrot.lane.b32.xlu0 %v2587_v29, %s8806_s6 }
 0x323   : > { %3641 = vrot.lane.b32.xlu1 %v2588_v54, %s8806_s6 }
 0x324   : > { %3784 = vrot.lane.b32.xlu0 %v9512_v23, %s8806_s6 }
 0x325   : > { %7420 = vmatmul.mubr.msk.bf16.vlgmr.msra.gmra.mrb[72].mxu0 %vm1300_vm1, %v9482_v32 }
 0x326   : > { %7423 = vmatprep.mubr.msk.bf16.mxu0 %vm1300_vm1, %v9496_v55  ;;  %7472 = vmatpush3.bf16.msra.mxu0 %v9517_v40 }
 0x327   : > { %3476 = vrot.lane.b32.xlu1 %v9498_v26, %s8806_s6  ;;  %7948 = vmatprep.subr.msk.bf16.mxu0 %vm1325_vm0, %v9521_v41 }
 0x32b   : > { %3782 = vrot.lane.b32.xlu1 %v9500_v28, %s8806_s6 }
 0x32d   : > { %7424 = vmatmul.mubr.msk.bf16.gmra.mrb[76].mxu0 %vm1300_vm1, %v9492_v50 }
 0x32e   : > { %7427 = vmatprep.mubr.msk.bf16.mxu0 %vm1300_vm1, %v9504_v35 }
 0x32f   : > { %3480 = vrot.lane.b32.xlu1 %v9506_v49, %s8806_s6 }
 0x333   : > { %3786 = vrot.lane.b32.xlu1 %v9508_v12, %s8806_s6  ;;  %s11441_s6 = sld [smem:[#allocation28_spill]] }
 0x335   : > { %7428 = vmatmul.mubr.msk.bf16.gmra.mrb[80].mxu0 %vm1300_vm1, %v9500_v28 }
 0x336   : > { %7431 = vmatprep.mubr.msk.bf16.mxu0 %vm1300_vm1, %v9512_v23  ;;  %v3467_v32 = vpop.permute.xlu0 %3466 }
 0x33d   : > { %7432 = vmatmul.mubr.msk.bf16.gmra.mrb[84].mxu0 %vm1300_vm1, %v9508_v12 }
 0x355   : > { %v3324_v39 = vpop.permute.xlu0 %3323 }
 0x359   : > { %v3322_v47 = vpop.permute.xlu0 %3321 }
 0x35a   : > { %7437 = vmatprep.mubr.msk.bf16.mxu1 %vm1300_vm1, %v3322_v47 }
 0x35b   : > { %7438 = vmatmul.mubr.msk.bf16.vlgmr.msra.gmra.mrb[48].mxu1 %vm1300_vm1, %v3324_v39 }
 0x35c   : > { %7454 = vmatpush3.bf16.msra.mxu1 %v9535_v42 }
 0x35d   : > { %v3328_v55 = vpop.permute.xlu1 %3327 }
 0x35e   : > { %v3326_v50 = vpop.permute.xlu0 %3325 }
 0x35f   : > { %7441 = vmatprep.mubr.msk.bf16.mxu1 %vm1300_vm1, %v3326_v50 }
 0x363   : > { %7442 = vmatmul.mubr.msk.bf16.gmra.mrb[52].mxu1 %vm1300_vm1, %v3328_v55 }
 0x365   : > { %v3332_v28 = vpop.permute.xlu1 %3331 }
 0x366   : > { %v3330_v26 = vpop.permute.xlu0 %3329 }
 0x367   : > { %7445 = vmatprep.mubr.msk.bf16.mxu1 %vm1300_vm1, %v3330_v26 }
 0x36b   : > { %7446 = vmatmul.mubr.msk.bf16.gmra.mrb[56].mxu1 %vm1300_vm1, %v3332_v28 }
 0x36d   : > { %v3336_v49 = vpop.permute.xlu1 %3335 }
 0x36e   : > { %v3334_v35 = vpop.permute.xlu0 %3333 }
 0x36f   : > { %7449 = vmatprep.mubr.msk.bf16.mxu1 %vm1300_vm1, %v3334_v35  ;;  %v9689_v35 = vld [vmem:[%s11350_s26 + $0x10] sm:$0xff] }
 0x372   : > { %v3773_v12 = vpop.permute.xlu0 %3772 }
 0x373   : > { %7450 = vmatmul.mubr.msk.bf16.gmra.mrb[60].mxu1 %vm1300_vm1, %v3336_v49 }
 0x374   : > { %7455 = vmatprep.mubr.msk.bf16.mxu1 %vm1300_vm1, %v3467_v32 }
 0x375   : > { %v3630_v13 = vpop.permute.xlu1 %3629 }
 0x376   : > { %v3471_v23 = vpop.permute.xlu0 %3470 }
 0x379   : > { %v3628_v40 = vpop.permute.xlu1 %3627 }
 0x37a   : > { %v3777_v41 = vpop.permute.xlu0 %3776  ;;  %7473 = vmatprep.mubr.msk.bf16.mxu0 %vm1300_vm1, %v3628_v40 }
 0x37b   : > { %7474 = vmatmul.mubr.msk.bf16.vlgmr.msra.gmra.mrb[88].mxu0 %vm1300_vm1, %v3630_v13  ;;  %v9692_v13 = vld [vmem:[%s11350_s26] sm:$0xff] }
 0x37c   : > { %7490 = vmatpush3.bf16.msra.mxu0 %v9554_v43 }
 0x37d   : > { %v3469_v42 = vpop.permute.xlu1 %3468  ;;  %7539 = vmatprep.subr.bf16.mxu0 %v9220_v20 }
 0x37e   : > { %7456 = vmatmul.mubr.msk.bf16.vlgmr.msra.gmra.mrb[48].mxu1 %vm1300_vm1, %v3469_v42  ;;  %v3632_v38 = vpop.permute.xlu0 %3631 }
 0x37f   : > { %7459 = vmatprep.mubr.msk.bf16.mxu1 %vm1300_vm1, %v3471_v23  ;;  %7477 = vmatprep.mubr.msk.bf16.mxu0 %vm1300_vm1, %v3632_v38 }
 0x381   : > { %v3775_v33 = vpop.permute.xlu1 %3774 }
 0x382   : > { %v3475_v45 = vpop.permute.xlu0 %3474 }
 0x385   : > { %v3634_v46 = vpop.permute.xlu1 %3633 }
 0x386   : > { %v3636_v52 = vpop.permute.xlu0 %3635  ;;  %7478 = vmatmul.mubr.msk.bf16.gmra.mrb[92].mxu0 %vm1300_vm1, %v3634_v46 }
 0x387   : > { %7481 = vmatprep.mubr.msk.bf16.mxu0 %vm1300_vm1, %v3636_v52  ;;  %v9705_v52 = vld [vmem:[%s11350_s26 + $0x18] sm:$0xff] }
 0x389   : > { %v3473_v53 = vpop.permute.xlu1 %3472 }
 0x38a   : > { %7460 = vmatmul.mubr.msk.bf16.gmra.mrb[52].mxu1 %vm1300_vm1, %v3473_v53  ;;  %v3781_v43 = vpop.permute.xlu0 %3780 }
 0x38b   : > { %7463 = vmatprep.mubr.msk.bf16.mxu1 %vm1300_vm1, %v3475_v45 }
 0x38d   : > { %v3638_v56 = vpop.permute.xlu1 %3637 }
 0x38e   : > { %v3479_v57 = vpop.permute.xlu0 %3478  ;;  %7482 = vmatmul.mubr.msk.bf16.gmra.mrb[96].mxu0 %vm1300_vm1, %v3638_v56 }
 0x391   : > { %v3779_v58 = vpop.permute.xlu1 %3778 }
 0x392   : > { %v3640_v30 = vpop.permute.xlu0 %3639 }
 0x393   : > { %7485 = vmatprep.mubr.msk.bf16.mxu0 %vm1300_vm1, %v3640_v30 }
 0x395   : > { %v3642_v19 = vpop.permute.xlu1 %3641 }
 0x396   : > { %7486 = vmatmul.mubr.msk.bf16.gmra.mrb[100].mxu0 %vm1300_vm1, %v3642_v19  ;;  %v3785_v31 = vpop.permute.xlu0 %3784 }
 0x397   : > { %7491 = vmatprep.mubr.msk.bf16.mxu0 %vm1300_vm1, %v3773_v12 }
 0x399   : > { %v3477_v15 = vpop.permute.xlu1 %3476 }
 0x39a   : > { %7464 = vmatmul.mubr.msk.bf16.gmra.mrb[56].mxu1 %vm1300_vm1, %v3477_v15 }
 0x39b   : > { %7467 = vmatprep.mubr.msk.bf16.mxu1 %vm1300_vm1, %v3479_v57  ;;  %v9715_v57 = vld [vmem:[%s11350_s26 + $0x30] sm:$0xff] }
 0x39d   : > { %v3783_v17 = vpop.permute.xlu1 %3782 }
 0x39e   : > { %7492 = vmatmul.mubr.msk.bf16.vlgmr.msra.gmra.mrb[88].mxu0 %vm1300_vm1, %v3775_v33  ;;  %v9698_v33 = vld [vmem:[%s11350_s26 + $0x8] sm:$0xff] }
 0x39f   : > { %7495 = vmatprep.mubr.msk.bf16.mxu0 %vm1300_vm1, %v3777_v41  ;;  %7540 = vmatpush3.bf16.msra.mxu0 %v9220_v20 }
 0x3a0   : > { %7541 = vmatprep.subr.bf16.mxu0 %v9225_v24 }
 0x3a1   : > { %v3481_v34 = vpop.permute.xlu1 %3480 }
 0x3a2   : > { %7468 = vmatmul.mubr.msk.bf16.gmra.mrb[60].mxu1 %vm1300_vm1, %v3481_v34 }
 0x3a3   : > { %7542 = vmatpush3.bf16.msra.mxu0 %v9225_v24 }
 0x3a4   : > { %7543 = vmatprep.subr.bf16.mxu0 %v9227_v25 }
 0x3a5   : > { %v3787_v54 = vpop.permute.xlu1 %3786 }
 0x3a6   : > { %7496 = vmatmul.mubr.msk.bf16.gmra.mrb[92].mxu0 %vm1300_vm1, %v3779_v58 }
 0x3a7   : > { %7499 = vmatprep.mubr.msk.bf16.mxu0 %vm1300_vm1, %v3781_v43  ;;  %7544 = vmatpush3.bf16.msra.mxu0 %v9227_v25  ;;  %v9830_v25 = vld [vmem:[%s11352_s16 + $0x20] sm:$0xff] }
 0x3a8   : > { %7545 = vmatprep.subr.bf16.mxu0 %v9245_v36 }
 0x3ab   : > { %7546 = vmatpush3.bf16.msra.mxu0 %v9245_v36 }
 0x3ac   : > { %7547 = vmatprep.subr.bf16.mxu0 %v9247_v37 }
 0x3ae   : > { %7500 = vmatmul.mubr.msk.bf16.gmra.mrb[96].mxu0 %vm1300_vm1, %v3783_v17  ;;  %v9720_v17 = vld [vmem:[%s11350_s26 + $0x38] sm:$0xff] }
 0x3af   : > { %7503 = vmatprep.mubr.msk.bf16.mxu0 %vm1300_vm1, %v3785_v31  ;;  %7548 = vmatpush3.bf16.msra.mxu0 %v9247_v37 }
 0x3b0   : > { %7549 = vmatprep.subr.bf16.mxu0 %v9259_v44 }
 0x3b3   : > { %7550 = vmatpush3.bf16.msra.mxu0 %v9259_v44 }
 0x3b4   : > { %7551 = vmatprep.subr.bf16.mxu0 %v9266_v48 }
 0x3b6   : > { %7504 = vmatmul.mubr.msk.bf16.gmra.mrb[100].mxu0 %vm1300_vm1, %v3787_v54 }
 0x3b7   : > { %7552 = vmatpush3.bf16.msra.mxu0 %v9266_v48  ;;  %v9817_v48 = vld [vmem:[%s11352_s16 + $0x30] sm:$0xff] }
 0x3b8   : > { %v7367_v27 = vpop.f32.mrb[64].mxu0  ;;  %7553 = vmatprep.subr.bf16.mxu0 %v9270_v51 }
 0x3b9   : > { %v2370_v29 = vpop.f32.mrb[65].mxu0 }
 0x3ba   : > { %v7368_v32 = vpop.f32.mrb[66].mxu0 }
 0x3bb   : > { %v2373_v39 = vpop.f32.mrb[67].mxu0  ;;  %7554 = vmatpush3.bf16.msra.mxu0 %v9270_v51 }
 0x3c0   : > { %v7371_v47 = vpop.f32.mrb[68].mxu0 }
 0x3c1   : > { %v2386_v50 = vpop.f32.mrb[69].mxu0 }
 0x3c2   : > { %v7372_v55 = vpop.f32.mrb[70].mxu0 }
 0x3c3   : > { %v2389_v26 = vpop.f32.mrb[71].mxu0 }
 0x3d8   : > { %v7385_v28 = vpop.f32.mrb[40].mxu1 }
 0x3d9   : > { %v2503_v49 = vadd.f32 %v7385_v28, %v7367_v27  ;;  %v2494_v12 = vpop.f32.mrb[41].mxu1 }
 0x3da   : > { %v2495_v23 = vadd.f32 %v2494_v12, %v2370_v29  ;;  %v7386_v40 = vpop.f32.mrb[42].mxu1  ;;  %v9726_v29 = vld [vmem:[%s11350_s26 + $0x20] sm:$0xff] }
 0x3db   : > { %v2506_v41 = vadd.f32 %v7386_v40, %v7368_v32  ;;  %v2497_v42 = vpop.f32.mrb[43].mxu1  ;;  %v9695_v38 = vadd.f32 %v2503_v49, %v9689_v35  ;;  %v9747_v49 = vld [vmem:[%s11350_s26 + $0x58] sm:$0xff] }
 0x3dc   : > { %v2498_v45 = vadd.f32 %v2497_v42, %v2373_v39  ;;  %v9701_v46 = vadd.f32 %v2495_v23, %v9692_v13  ;;  %v9733_v39 = vld [vmem:[%s11350_s26 + $0x28] sm:$0xff] }
 0x3dd   : > { %2857 = vmax.xlane.f32.xlu1 %v9695_v38  ;;  %v9712_v56 = vadd.f32 %v2506_v41, %v9705_v52  ;;  %v9754_v41 = vld [vmem:[%s11350_s26 + $0x40] sm:$0xff] }
 0x3de   : > { %2853 = vmax.xlane.f32.xlu0 %v9701_v46  ;;  %v9709_v53 = vadd.f32 %v2498_v45, %v9698_v33  ;;  %v9761_v45 = vld [vmem:[%s11350_s26 + $0x48] sm:$0xff] }
 0x3e0   : > { %v7389_v43 = vpop.f32.mrb[44].mxu1 }
 0x3e1   : > { %v2519_v58 = vadd.f32 %v7389_v43, %v7371_v47  ;;  %v2510_v30 = vpop.f32.mrb[45].mxu1  ;;  %2855 = vmax.xlane.f32.xlu1 %v9709_v53 }
 0x3e2   : > { %v2511_v19 = vadd.f32 %v2510_v30, %v2386_v50  ;;  %v7390_v15 = vpop.f32.mrb[46].mxu1  ;;  %2859 = vmax.xlane.f32.xlu0 %v9712_v56  ;;  %v9740_v50 = vld [vmem:[%s11350_s26 + $0x50] sm:$0xff] }
 0x3e3   : > { %v2522_v34 = vadd.f32 %v7390_v15, %v7372_v55  ;;  %v2513_v31 = vpop.f32.mrb[47].mxu1  ;;  %v9723_v54 = vadd.f32 %v2519_v58, %v9715_v57  ;;  %v9768_v58 = vld [vmem:[%s11350_s26 + $0x70] sm:$0xff] }
 0x3e4   : > { %v2514_v27 = vadd.f32 %v2513_v31, %v2389_v26  ;;  %v9737_v47 = vadd.f32 %v2511_v19, %v9726_v29 }
 0x3e5   : > { %2865 = vmax.xlane.f32.xlu1 %v9723_v54  ;;  %v9730_v32 = vadd.f32 %v2522_v34, %v9720_v17  ;;  %v9775_v34 = vld [vmem:[%s11350_s26 + $0x78] sm:$0xff] }
 0x3e6   : > { %v9744_v28 = vadd.f32 %v2514_v27, %v9733_v39 }
 0x3e7   : > { %2867 = vmax.xlane.f32.xlu0 %v9730_v32 }
 0x3e8   : > { %v7393_v55 = vpop.f32.mrb[32].mxu1 }
 0x3e9   : > { %v2526_v26 = vpop.f32.mrb[33].mxu1  ;;  %2861 = vmax.xlane.f32.xlu1 %v9737_v47  ;;  %v9750_v23 = vadd.f32 %v7393_v55, %v9740_v50 }
 0x3ea   : > { %v7394_v12 = vpop.f32.mrb[34].mxu1  ;;  %v9764_v43 = vadd.f32 %v2526_v26, %v9754_v41  ;;  %v9782_v26 = vld [vmem:[%s11350_s26 + $0x60] sm:$0xff] }
 0x3eb   : > { %v2529_v40 = vpop.f32.mrb[35].mxu1  ;;  %2863 = vmax.xlane.f32.xlu0 %v9744_v28  ;;  %v9757_v42 = vadd.f32 %v7394_v12, %v9747_v49 }
 0x3ec   : > { %v9771_v19 = vadd.f32 %v2529_v40, %v9761_v45  ;;  %v9789_v40 = vld [vmem:[%s11350_s26 + $0x68] sm:$0xff] }
 0x3ed   : > { %2873 = vmax.xlane.f32.xlu1 %v9750_v23 }
 0x3ef   : > { %2875 = vmax.xlane.f32.xlu0 %v9757_v42 }
 0x3f0   : > { %v7397_v30 = vpop.f32.mrb[36].mxu1 }
 0x3f1   : > { %v2542_v15 = vpop.f32.mrb[37].mxu1  ;;  %2869 = vmax.xlane.f32.xlu1 %v9764_v43  ;;  %v9778_v27 = vadd.f32 %v7397_v30, %v9768_v58  ;;  %v9796_v30 = vld [vmem:[%s11351_s7 + $0x10] sm:$0xff]  ;;  %s11443_s7 = sld [smem:[#allocation30_spill]] }
 0x3f2   : > { %v7398_v31 = vpop.f32.mrb[38].mxu1  ;;  %v9792_v21 = vadd.f32 %v2542_v15, %v9782_v26 }
 0x3f3   : > { %v2545_v55 = vpop.f32.mrb[39].mxu1  ;;  %2871 = vmax.xlane.f32.xlu0 %v9771_v19  ;;  %v9785_v12 = vadd.f32 %v7398_v31, %v9775_v34  ;;  %v9803_v31 = vld [vmem:[%s11352_s16] sm:$0xff] }
 0x3f4   : > { %v9799_v10 = vadd.f32 %v2545_v55, %v9789_v40  ;;  %v9814_v55 = vld [vmem:[%s11352_s16 + $0x18] sm:$0xff] }
 0x3f5   : > { %2881 = vmax.xlane.f32.xlu1 %v9778_v27 }
 0x3f7   : > { %2883 = vmax.xlane.f32.xlu0 %v9785_v12 }
 0x3f8   : > { %v7421_v22 = vpop.f32.mrb[72].mxu0 }
 0x3f9   : > { %v2774_v11 = vpop.f32.mrb[73].mxu0  ;;  %2877 = vmax.xlane.f32.xlu1 %v9792_v21  ;;  %v9806_v1 = vadd.f32 %v7421_v22, %v9796_v30 }
 0x3fa   : > { %v7422_v0 = vpop.f32.mrb[74].mxu0  ;;  %v9810_v51 = vadd.f32 %v2774_v11, %v9803_v31  ;;  %v9827_v11 = vld [vmem:[%s11352_s16 + $0x8] sm:$0xff] }
 0x3fb   : > { %v2777_v15 = vpop.f32.mrb[75].mxu0  ;;  %2879 = vmax.xlane.f32.xlu0 %v9799_v10  ;;  %v9821_v22 = vadd.f32 %v7422_v0, %v9814_v55 }
 0x3fc   : > { %v9835_v18 = vadd.f32 %v2777_v15, %v9827_v11 }
 0x3fd   : > { %2969 = vmax.xlane.f32.xlu1 %v9806_v1 }
 0x3ff   : > { %2965 = vmax.xlane.f32.xlu0 %v9810_v51 }
 0x400   : > { %v7425_v44 = vpop.f32.mrb[76].mxu0 }
 0x401   : > { %v9824_v37 = vadd.f32 %v7425_v44, %v9817_v48  ;;  %v2790_v36 = vpop.f32.mrb[77].mxu0  ;;  %v9841_v44 = vld [vmem:[%s11352_s16 + $0x38] sm:$0xff] }
 0x402   : > { %v7426_v24 = vpop.f32.mrb[78].mxu0  ;;  %v9838_v0 = vadd.f32 %v2790_v36, %v9830_v25  ;;  %v9855_v36 = vld [vmem:[%s11352_s16 + $0x28] sm:$0xff] }
 0x403   : > { %v2793_v20 = vpop.f32.mrb[79].mxu0  ;;  %2977 = vmax.xlane.f32.xlu1 %v9824_v37  ;;  %2971 = vmax.xlane.f32.xlu0 %v9821_v22  ;;  %v9849_v9 = vadd.f32 %v7426_v24, %v9841_v44 }
 0x404   : > { %11353 = vst [vmem:[#allocation72_spill] sm:$0xff] %v9838_v0  ;;  %v9863_v4 = vadd.f32 %v2793_v20, %v9855_v36 }
 0x406   : > { %11355 = vst [vmem:[#allocation74_spill] sm:$0xff] %v9863_v4 }
 0x407   : > { %2973 = vmax.xlane.f32.xlu1 %v9838_v0  ;;  %2967 = vmax.xlane.f32.xlu0 %v9835_v18 }
 0x408   : > { %v7429_v14 = vpop.f32.mrb[80].mxu0 }
 0x409   : > { %v9852_v15 = vadd.f32 %v7429_v14, %v9844_v16  ;;  %v2806_v8 = vpop.f32.mrb[81].mxu0  ;;  %v9869_v14 = vld [vmem:[%s11352_s16 + $0x58] sm:$0xff] }
 0x40a   : > { %v7430_v6 = vpop.f32.mrb[82].mxu0  ;;  %v9866_v24 = vadd.f32 %v2806_v8, %v9858_v7  ;;  %v9883_v8 = vld [vmem:[%s11352_s16 + $0x48] sm:$0xff] }
 0x40b   : > { %11354 = vst [vmem:[#allocation73_spill] sm:$0xff] %v9852_v15  ;;  %v2809_v5 = vpop.f32.mrb[83].mxu0  ;;  %2985 = vmax.xlane.f32.xlu1 %v9852_v15  ;;  %2979 = vmax.xlane.f32.xlu0 %v9849_v9  ;;  %v9877_v63 = vadd.f32 %v7430_v6, %v9869_v14  ;;  %v9897_v15 = vld [vmem:[%s11352_s16 + $0x78] sm:$0xff] }
 0x40c   : > { %11356 = vst [vmem:[#allocation75_spill] sm:$0xff] %v9866_v24 }
 0x40d   : > { %11357 = vst [vmem:[#allocation76_spill] sm:$0xff] %v9877_v63 }
 0x40f   : > { %2981 = vmax.xlane.f32.xlu1 %v9866_v24  ;;  %2975 = vmax.xlane.f32.xlu0 %v9863_v4  ;;  %v9891_v24 = vadd.f32 %v2809_v5, %v9883_v8  ;;  %v9905_v4 = vld [vmem:[%s11352_s16 + $0x68] sm:$0xff] }
 0x410   : > { %v7433_v2 = vpop.f32.mrb[84].mxu0 }
 0x411   : > { %v9880_v20 = vadd.f32 %v7433_v2, %v9872_v3  ;;  %v2822_v62 = vpop.f32.mrb[85].mxu0  ;;  %11359 = vst [vmem:[#allocation78_spill] sm:$0xff] %v9891_v24 }
 0x412   : > { %v7434_v60 = vpop.f32.mrb[86].mxu0  ;;  %v9894_v6 = vadd.f32 %v2822_v62, %v9886_v61 }
 0x413   : > { %11358 = vst [vmem:[#allocation77_spill] sm:$0xff] %v9880_v20  ;;  %v2825_v59 = vpop.f32.mrb[87].mxu0  ;;  %2993 = vmax.xlane.f32.xlu1 %v9880_v20  ;;  %2987 = vmax.xlane.f32.xlu0 %v9877_v63  ;;  %v9902_v2 = vadd.f32 %v7434_v60, %v9897_v15 }
 0x414   : > { %11360 = vst [vmem:[#allocation79_spill] sm:$0xff] %v9894_v6  ;;  %v9909_v20 = vadd.f32 %v2825_v59, %v9905_v4 }
 0x417   : > { %2989 = vmax.xlane.f32.xlu1 %v9894_v6  ;;  %2983 = vmax.xlane.f32.xlu0 %v9891_v24 }
 0x41b   : > { %2995 = vmax.xlane.f32.xlu0 %v9902_v2 }
 0x41f   : > { %2991 = vmax.xlane.f32.xlu0 %v9909_v20 }
 0x451   : > { %v7457_v62 = vpop.f32.mrb[48].mxu1 }
 0x452   : > { %v9913_v5 = vadd.f32 %v7457_v62, %v9689_v35  ;;  %v3540_v63 = vpop.f32.mrb[49].mxu1 }
 0x453   : > { %v7458_v6 = vpop.f32.mrb[50].mxu1  ;;  %v9920_v0 = vadd.f32 %v3540_v63, %v9692_v13 }
 0x454   : > { %11361 = vst [vmem:[#allocation80_spill] sm:$0xff] %v9913_v5  ;;  %v9916_v24 = vadd.f32 %v7458_v6, %v9705_v52  ;;  %v3543_v60 = vpop.f32.mrb[51].mxu1  ;;  %3929 = vmax.xlane.f32.xlu1 %v9913_v5 }
 0x455   : > { %11362 = vst [vmem:[#allocation81_spill] sm:$0xff] %v9920_v0  ;;  %v9924_v59 = vadd.f32 %v3543_v60, %v9698_v33 }
 0x456   : > { %3931 = vmax.xlane.f32.xlu0 %v9916_v24 }
 0x457   : > { %11363 = vst [vmem:[#allocation82_spill] sm:$0xff] %v9924_v59 }
 0x458   : > { %3925 = vmax.xlane.f32.xlu1 %v9920_v0 }
 0x45a   : > { %3927 = vmax.xlane.f32.xlu0 %v9924_v59 }
 0x45d   : > { %v7461_v35 = vpop.f32.mrb[52].mxu1 }
 0x45e   : > { %v9929_v62 = vadd.f32 %v7461_v35, %v9715_v57  ;;  %v3556_v52 = vpop.f32.mrb[53].mxu1 }
 0x45f   : > { %v7462_v6 = vpop.f32.mrb[54].mxu1  ;;  %v9936_v13 = vadd.f32 %v3556_v52, %v9726_v29 }
 0x460   : > { %11364 = vst [vmem:[#allocation83_spill] sm:$0xff] %v9929_v62  ;;  %v9932_v5 = vadd.f32 %v7462_v6, %v9720_v17  ;;  %v3559_v63 = vpop.f32.mrb[55].mxu1  ;;  %3937 = vmax.xlane.f32.xlu1 %v9929_v62 }
 0x461   : > { %11366 = vst [vmem:[#allocation85_spill] sm:$0xff] %v9936_v13  ;;  %v9940_v33 = vadd.f32 %v3559_v63, %v9733_v39 }
 0x462   : > { %11365 = vst [vmem:[#allocation84_spill] sm:$0xff] %v9932_v5  ;;  %3939 = vmax.xlane.f32.xlu0 %v9932_v5 }
 0x463   : > { %11367 = vst [vmem:[#allocation86_spill] sm:$0xff] %v9940_v33 }
 0x464   : > { %3933 = vmax.xlane.f32.xlu1 %v9936_v13 }
 0x466   : > { %3935 = vmax.xlane.f32.xlu0 %v9940_v33 }
 0x46d   : > { %v7465_v57 = vpop.f32.mrb[56].mxu1 }
 0x46e   : > { %v9945_v60 = vadd.f32 %v7465_v57, %v9740_v50  ;;  %v3572_v17 = vpop.f32.mrb[57].mxu1 }
 0x46f   : > { %v7466_v35 = vpop.f32.mrb[58].mxu1  ;;  %v9952_v39 = vadd.f32 %v3572_v17, %v9754_v41 }
 0x470   : > { %11368 = vst [vmem:[#allocation87_spill] sm:$0xff] %v9945_v60  ;;  %v9948_v6 = vadd.f32 %v7466_v35, %v9747_v49  ;;  %v3575_v29 = vpop.f32.mrb[59].mxu1  ;;  %3945 = vmax.xlane.f32.xlu1 %v9945_v60  ;;  %v2854_v49 = vpop.xlane.xlu0 %2853 }
 0x471   : > { %v7493_v52 = vpop.f32.mrb[88].mxu0  ;;  %11370 = vst [vmem:[#allocation89_spill] sm:$0xff] %v9952_v39  ;;  %v9956_v13 = vadd.f32 %v3575_v29, %v9761_v45  ;;  %v2858_v29 = vpop.xlane.xlu1 %2857 }
 0x472   : > { %11369 = vst [vmem:[#allocation88_spill] sm:$0xff] %v9948_v6  ;;  %v3846_v63 = vpop.f32.mrb[89].mxu0  ;;  %3947 = vmax.xlane.f32.xlu0 %v9948_v6 }
 0x473   : > { %v7494_v33 = vpop.f32.mrb[90].mxu0  ;;  %11371 = vst [vmem:[#allocation90_spill] sm:$0xff] %v9956_v13 }
 0x474   : > { %v3849_v50 = vpop.f32.mrb[91].mxu0  ;;  %3941 = vmax.xlane.f32.xlu1 %v9952_v39  ;;  %v9982_v59 = vadd.f32 %v7494_v33, %v9814_v55 }
 0x475   : > { %v7469_v57 = vpop.f32.mrb[60].mxu1  ;;  %v9994_v55 = vadd.f32 %v3849_v50, %v9827_v11 }
 0x476   : > { %v9960_v35 = vadd.f32 %v7469_v57, %v9768_v58  ;;  %v3588_v60 = vpop.f32.mrb[61].mxu1  ;;  %3943 = vmax.xlane.f32.xlu0 %v9956_v13  ;;  %v2860_v57 = vpop.xlane.xlu0 %2859 }
 0x477   : > { %v7470_v41 = vpop.f32.mrb[62].mxu1  ;;  %v9968_v5 = vadd.f32 %v3588_v60, %v9782_v26  ;;  %v2888_v26 = vsub.f32 %v9712_v56, %v2860_v57  ;;  %v2856_v60 = vpop.xlane.xlu1 %2855 }
 0x478   : > { %v9964_v17 = vadd.f32 %v7470_v41, %v9775_v34  ;;  %v3591_v6 = vpop.f32.mrb[63].mxu1  ;;  %3953 = vmax.xlane.f32.xlu1 %v9960_v35  ;;  %v2887_v34 = vsub.f32 %v9695_v38, %v2858_v29  ;;  %v9977_v41 = vadd.f32 %v7493_v52, %v9796_v30  ;;  %v2886_v30 = vsub.f32 %v9709_v53, %v2856_v60 }
 0x479   : > { %v7497_v45 = vpop.f32.mrb[92].mxu0  ;;  %11372 = vst [vmem:[#allocation91_spill] sm:$0xff] %v9968_v5  ;;  %v9972_v62 = vadd.f32 %v3591_v6, %v9789_v40  ;;  %v2885_v6 = vsub.f32 %v9701_v46, %v2854_v49  ;;  %v2907_v56 = vmul.f32 1.442695, %v2888_v26 }
 0x47a   : > { %v3862_v39 = vpop.f32.mrb[93].mxu0  ;;  %3955 = vmax.xlane.f32.xlu0 %v9964_v17  ;;  %v2905_v40 = vmul.f32 1.442695, %v2887_v34  ;;  %v9998_v49 = vadd.f32 %v7497_v45, %v9817_v48  ;;  %v10024_v34 = vld [vmem:[%s1093_s18] ss:$0 sm:$0xff] }
 0x47b   : > { %v7498_v58 = vpop.f32.mrb[94].mxu0  ;;  %v2901_v46 = vmul.f32 1.442695, %v2885_v6  ;;  %v10008_v11 = vadd.f32 %v3862_v39, %v9830_v25  ;;  %v2866_v25 = vpop.xlane.xlu1 %2865 }
 0x47c   : > { %v3865_v13 = vpop.f32.mrb[95].mxu0  ;;  %3949 = vmax.xlane.f32.xlu1 %v9968_v5  ;;  %v9987_v5 = vadd.f32 %v3846_v63, %v9803_v31  ;;  %8107 = vpow2.f32 %v2905_v40  ;;  %v2903_v31 = vmul.f32 1.442695, %v2886_v30  ;;  %v10002_v63 = vadd.f32 %v7498_v58, %v9841_v44  ;;  %v2868_v58 = vpop.xlane.xlu0 %2867 }
 0x47d   : > { %8109 = vpow2.f32 %v2907_v56  ;;  %11373 = vst [vmem:[#allocation92_spill] sm:$0xff] %v10008_v11  ;;  %v10016_v45 = vadd.f32 %v3865_v13, %v9855_v36  ;;  %v2891_v36 = vsub.f32 %v9723_v54, %v2866_v25  ;;  %v2892_v40 = vsub.f32 %v9730_v32, %v2868_v58 }
 0x47e   : > { %3951 = vmax.xlane.f32.xlu0 %v9972_v62  ;;  %8111 = vpow2.f32 %v2901_v46 }
 0x47f   : > { %8113 = vpow2.f32 %v2903_v31  ;;  %11374 = vst [vmem:[#allocation93_spill] sm:$0xff] %v10016_v45  ;;  %v2862_v13 = vpop.xlane.xlu1 %2861  ;;  %v2913_v56 = vmul.f32 1.442695, %v2891_v36 }
 0x480   : > { %4041 = vmax.xlane.f32.xlu1 %v9977_v41  ;;  %v2864_v6 = vpop.xlane.xlu0 %2863  ;;  %v2889_v46 = vsub.f32 %v9737_v47, %v2862_v13 }
 0x481   : > { %v7501_v0 = vpop.f32.mrb[96].mxu0  ;;  %8115 = vpow2.f32 %v2913_v56 }
 0x482   : > { %v9989_v38 = vpop.f32.mrb[97].mxu0  ;;  %4043 = vmax.xlane.f32.xlu0 %v9982_v59  ;;  %v10035_v32 = vadd.f32 %v7501_v0, %v9844_v16 }
 0x483   : > { %v7502_v52 = vpop.f32.mrb[98].mxu0 }
 0x484   : > { %v3881_v33 = vpop.f32.mrb[99].mxu0  ;;  %4037 = vmax.xlane.f32.xlu1 %v9987_v5  ;;  %v10038_v47 = vadd.f32 %v7502_v52, %v9869_v14  ;;  %v2874_v52 = vpop.xlane.xlu1 %2873 }
 0x485   : > { %v10047_v16 = vadd.f32 %v3881_v33, %v9883_v8 }
 0x486   : > { %4039 = vmax.xlane.f32.xlu0 %v9994_v55  ;;  %v8108_v29 = vpop.eup %8107 }
 0x487   : > { %v8110_v39 = vpop.eup %8109  ;;  %v3085_v60 = vmul.f32 %v8108_v29, %v10024_v34 }
 0x488   : > { %4049 = vmax.xlane.f32.xlu1 %v9998_v49  ;;  %v8112_v57 = vpop.eup %8111  ;;  %v3086_v30 = vmul.f32 %v8110_v39, %v10024_v34 }
 0x489   : > { %v10005_v53 = vpop.f32.mrb[100].mxu0  ;;  %v8114_v26 = vpop.eup %8113  ;;  %v3083_v31 = vmul.f32 %v8112_v57, %v10024_v34 }
 0x48a   : > { %v10010_v50 = vpop.f32.mrb[101].mxu0  ;;  %4051 = vmax.xlane.f32.xlu0 %v10002_v63  ;;  %v3084_v54 = vmul.f32 %v8114_v26, %v10024_v34 }
 0x48b   : > { %v10013_v48 = vpop.f32.mrb[102].mxu0  ;;  %v8116_v14 = vpop.eup %8115 }
 0x48c   : > { %v10018_v44 = vpop.f32.mrb[103].mxu0  ;;  %4045 = vmax.xlane.f32.xlu1 %v10008_v11  ;;  %v2890_v11 = vsub.f32 %v9744_v28, %v2864_v6  ;;  %v10043_v28 = vadd.f32 %v9989_v38, %v9858_v7  ;;  %v2895_v38 = vsub.f32 %v9750_v23, %v2874_v52  ;;  %v3089_v8 = vmul.f32 %v8116_v14, %v10024_v34 }
 0x48e   : > { %4047 = vmax.xlane.f32.xlu0 %v10016_v45  ;;  %v2915_v45 = vmul.f32 1.442695, %v2892_v40  ;;  %v2911_v25 = vmul.f32 1.442695, %v2890_v11  ;;  %v2921_v36 = vmul.f32 1.442695, %v2895_v38 }
 0x490   : > { %2937 = vadd.xlane.f32.xlu1 %v8108_v29  ;;  %v2909_v29 = vmul.f32 1.442695, %v2889_v46  ;;  %8117 = vpow2.f32 %v2915_v45 }
 0x492   : > { %2939 = vadd.xlane.f32.xlu0 %v8110_v39  ;;  %v2876_v39 = vpop.xlane.xlu0 %2875  ;;  %8119 = vpow2.f32 %v2909_v29 }
 0x493   : > { %8121 = vpow2.f32 %v2911_v25  ;;  %v2896_v33 = vsub.f32 %v9757_v42, %v2876_v39  ;;  %v10061_v42 = vadd.f32 %v10005_v53, %v9872_v3  ;;  %v10075_v3 = vadd.f32 %v10018_v44, %v9905_v4 }
 0x494   : > { %2933 = vadd.xlane.f32.xlu1 %v8112_v57  ;;  %v2870_v57 = vpop.xlane.xlu1 %2869  ;;  %8123 = vpow2.f32 %v2921_v36 }
 0x495   : > { %v2893_v13 = vsub.f32 %v9764_v43, %v2870_v57  ;;  %v2923_v6 = vmul.f32 1.442695, %v2896_v33 }
 0x496   : > { %2935 = vadd.xlane.f32.xlu0 %v8114_v26  ;;  %v2872_v0 = vpop.xlane.xlu0 %2871 }
 0x497   : > { %v2917_v56 = vmul.f32 1.442695, %v2893_v13  ;;  %8125 = vpow2.f32 %v2923_v6 }
 0x498   : > { %3103 = vadd.xlane.f32.xlu1 %v3085_v60  ;;  %v2882_v43 = vpop.xlane.xlu1 %2881 }
 0x499   : > { %8127 = vpow2.f32 %v2917_v56  ;;  %v2899_v53 = vsub.f32 %v9778_v27, %v2882_v43 }
 0x49a   : > { %3105 = vadd.xlane.f32.xlu0 %v3086_v30  ;;  %v8118_v11 = vpop.eup %8117  ;;  %v2884_v58 = vpop.xlane.xlu0 %2883  ;;  %v2894_v30 = vsub.f32 %v9771_v19, %v2872_v0  ;;  %v10070_v19 = vadd.f32 %v10010_v50, %v9886_v61 }
 0x49b   : > { %v3090_v26 = vmul.f32 %v8118_v11, %v10024_v34  ;;  %v2900_v25 = vsub.f32 %v9785_v12, %v2884_v58  ;;  %v2929_v50 = vmul.f32 1.442695, %v2899_v53 }
 0x49c   : > { %3099 = vadd.xlane.f32.xlu1 %v3083_v31  ;;  %v8120_v45 = vpop.eup %8119  ;;  %v2919_v46 = vmul.f32 1.442695, %v2894_v30 }
 0x49d   : > { %v8122_v7 = vpop.eup %8121  ;;  %v3087_v40 = vmul.f32 %v8120_v45, %v10024_v34  ;;  %v2931_v4 = vmul.f32 1.442695, %v2900_v25 }
 0x49e   : > { %3101 = vadd.xlane.f32.xlu0 %v3084_v54  ;;  %v2880_v60 = vpop.xlane.xlu0 %2879  ;;  %v3088_v23 = vmul.f32 %v8122_v7, %v10024_v34  ;;  %v10065_v54 = vadd.f32 %v10013_v48, %v9897_v15  ;;  %8129 = vpow2.f32 %v2919_v46  ;;  %v2878_v15 = vpop.xlane.xlu1 %2877 }
 0x49f   : > { %v8124_v29 = vpop.eup %8123  ;;  %v2897_v39 = vsub.f32 %v9792_v21, %v2878_v15  ;;  %v2898_v44 = vsub.f32 %v9799_v10, %v2880_v60  ;;  %8131 = vpow2.f32 %v2929_v50 }
 0x4a0   : > { %4057 = vmax.xlane.f32.xlu1 %v10035_v32  ;;  %8133 = vpow2.f32 %v2931_v4  ;;  %v11375_v4 = vld [vmem:[#allocation72_spill] sm:$0xff] }
 0x4a1   : > { %v8126_v61 = vpop.eup %8125  ;;  %v2927_v12 = vmul.f32 1.442695, %v2898_v44 }
 0x4a2   : > { %4059 = vmax.xlane.f32.xlu0 %v10038_v47  ;;  %v2966_v31 = vpop.xlane.xlu0 %2965  ;;  %v3094_v21 = vmul.f32 %v8126_v61, %v10024_v34 }
 0x4a3   : > { %v8128_v0 = vpop.eup %8127 }
 0x4a4   : > { %4053 = vmax.xlane.f32.xlu1 %v10043_v28  ;;  %v3091_v10 = vmul.f32 %v8128_v0, %v10024_v34 }
 0x4a6   : > { %4055 = vmax.xlane.f32.xlu0 %v10047_v16  ;;  %v2972_v48 = vpop.xlane.xlu0 %2971 }
 0x4a8   : > { %2945 = vadd.xlane.f32.xlu1 %v8116_v14  ;;  %v2970_v14 = vpop.xlane.xlu1 %2969  ;;  %v8130_v27 = vpop.eup %8129 }
 0x4a9   : > { %v3092_v38 = vmul.f32 %v8130_v27, %v10024_v34  ;;  %v2999_v57 = vsub.f32 %v9806_v1, %v2970_v14  ;;  %v8132_v33 = vpop.eup %8131 }
 0x4aa   : > { %2947 = vadd.xlane.f32.xlu0 %v8118_v11  ;;  %v2968_v52 = vpop.xlane.xlu0 %2967  ;;  %v2925_v11 = vmul.f32 1.442695, %v2897_v39  ;;  %v8134_v13 = vpop.eup %8133 }
 0x4ab   : > { %v3017_v60 = vmul.f32 1.442695, %v2999_v57  ;;  %v3098_v15 = vmul.f32 %v8134_v13, %v10024_v34 }
 0x4ac   : > { %2941 = vadd.xlane.f32.xlu1 %v8120_v45  ;;  %v3093_v45 = vmul.f32 %v8124_v29, %v10024_v34  ;;  %v2978_v58 = vpop.xlane.xlu1 %2977  ;;  %8135 = vpow2.f32 %v2925_v11  ;;  %v11376_v11 = vld [vmem:[#allocation74_spill] sm:$0xff] }
 0x4ad   : > { %8137 = vpow2.f32 %v2927_v12 }
 0x4ae   : > { %2943 = vadd.xlane.f32.xlu0 %v8122_v7  ;;  %v2980_v7 = vpop.xlane.xlu0 %2979  ;;  %8139 = vpow2.f32 %v3017_v60  ;;  %v11378_v60 = vld [vmem:[#allocation76_spill] sm:$0xff] }
 0x4b0   : > { %3111 = vadd.xlane.f32.xlu1 %v3089_v8  ;;  %v2974_v8 = vpop.xlane.xlu1 %2973 }
 0x4b1   : > { %v3001_v44 = vsub.f32 %v11375_v4, %v2974_v8 }
 0x4b2   : > { %3113 = vadd.xlane.f32.xlu0 %v3090_v26  ;;  %v3000_v26 = vsub.f32 %v9821_v22, %v2972_v48  ;;  %v2976_v36 = vpop.xlane.xlu0 %2975  ;;  %v3097_v22 = vmul.f32 %v8132_v33, %v10024_v34 }
 0x4b4   : > { %3107 = vadd.xlane.f32.xlu1 %v3087_v40  ;;  %v2997_v40 = vsub.f32 %v9810_v51, %v2966_v31  ;;  %v3019_v30 = vmul.f32 1.442695, %v3000_v26  ;;  %v2986_v56 = vpop.xlane.xlu1 %2985  ;;  %v11377_v26 = vld [vmem:[#allocation73_spill] sm:$0xff] }
 0x4b6   : > { %3109 = vadd.xlane.f32.xlu0 %v3088_v23  ;;  %v8136_v6 = vpop.eup %8135  ;;  %v2998_v23 = vsub.f32 %v9835_v18, %v2968_v52  ;;  %v3013_v1 = vmul.f32 1.442695, %v2997_v40  ;;  %v2988_v43 = vpop.xlane.xlu0 %2987  ;;  %8141 = vpow2.f32 %v3019_v30 }
 0x4b7   : > { %v8138_v46 = vpop.eup %8137  ;;  %v3095_v31 = vmul.f32 %v8136_v6, %v10024_v34  ;;  %v3008_v40 = vsub.f32 %v11378_v60, %v2988_v43 }
 0x4b8   : > { %4065 = vmax.xlane.f32.xlu1 %v10061_v42  ;;  %v3015_v53 = vmul.f32 1.442695, %v2998_v23  ;;  %8143 = vpow2.f32 %v3013_v1  ;;  %v2982_v51 = vpop.xlane.xlu1 %2981  ;;  %v3096_v48 = vmul.f32 %v8138_v46, %v10024_v34  ;;  %v8140_v25 = vpop.eup %8139  ;;  %v3002_v34 = vsub.f32 %v11376_v11, %v2976_v36 }
 0x4b9   : > { %v3007_v36 = vsub.f32 %v11377_v26, %v2986_v56 }
 0x4ba   : > { %4067 = vmax.xlane.f32.xlu0 %v10065_v54  ;;  %8145 = vpow2.f32 %v3015_v53  ;;  %v2984_v18 = vpop.xlane.xlu0 %2983 }
 0x4bb   : > { %v3033_v23 = vmul.f32 1.442695, %v3007_v36 }
 0x4bc   : > { %4061 = vmax.xlane.f32.xlu1 %v10070_v19  ;;  %v10097_v50 = vpop.xlane.xlu1 %2993 }
 0x4be   : > { %4063 = vmax.xlane.f32.xlu0 %v10075_v3  ;;  %v10100_v14 = vpop.xlane.xlu0 %2995 }
 0x4c0   : > { %2953 = vadd.xlane.f32.xlu1 %v8124_v29  ;;  %v3003_v29 = vsub.f32 %v9824_v37, %v2978_v58  ;;  %v8142_v39 = vpop.eup %8141  ;;  %v10106_v12 = vpop.xlane.xlu1 %2989 }
 0x4c2   : > { %2955 = vadd.xlane.f32.xlu0 %v8126_v61  ;;  %v3004_v61 = vsub.f32 %v9849_v9, %v2980_v7  ;;  %v8144_v52 = vpop.eup %8143  ;;  %v3021_v9 = vmul.f32 1.442695, %v3001_v44  ;;  %v10109_v7 = vpop.xlane.xlu0 %2991 }
 0x4c3   : > { %v3010_v36 = vsub.f32 %v9909_v20, %v10109_v7  ;;  %v11383_v7 = vld [vmem:[#allocation80_spill] sm:$0xff] }
 0x4c4   : > { %2949 = vadd.xlane.f32.xlu1 %v8128_v0  ;;  %v3025_v0 = vmul.f32 1.442695, %v3003_v29  ;;  %v8146_v37 = vpop.eup %8145 }
 0x4c6   : > { %2951 = vadd.xlane.f32.xlu0 %v8130_v27  ;;  %v3027_v27 = vmul.f32 1.442695, %v3004_v61  ;;  %8147 = vpow2.f32 %v3025_v0 }
 0x4c8   : > { %3119 = vadd.xlane.f32.xlu1 %v3093_v45  ;;  %v10104_v45 = vld [vmem:[%s9173_s11] ss:$0 sm:$0xff]  ;;  %8149 = vpow2.f32 %v3027_v27 }
 0x4c9   : > { %v3169_v58 = vmul.f32 %v8140_v25, %v10104_v45  ;;  %8151 = vpow2.f32 %v3021_v9  ;;  %v3167_v57 = vmul.f32 %v8144_v52, %v10104_v45 }
 0x4ca   : > { %3121 = vadd.xlane.f32.xlu0 %v3094_v21  ;;  %v3023_v21 = vmul.f32 1.442695, %v3002_v34 }
 0x4cc   : > { %3115 = vadd.xlane.f32.xlu1 %v3091_v10  ;;  %v3170_v10 = vmul.f32 %v8142_v39, %v10104_v45  ;;  %8153 = vpow2.f32 %v3023_v21 }
 0x4cd   : > { %8155 = vpow2.f32 %v3033_v23 }
 0x4ce   : > { %3117 = vadd.xlane.f32.xlu0 %v3092_v38 }
 0x4d0   : > { %2961 = vadd.xlane.f32.xlu1 %v8132_v33  ;;  %v3168_v33 = vmul.f32 %v8146_v37, %v10104_v45 }
 0x4d2   : > { %2963 = vadd.xlane.f32.xlu0 %v8134_v13  ;;  %v8148_v13 = vpop.eup %8147 }
 0x4d3   : > { %v8150_v30 = vpop.eup %8149  ;;  %v3173_v61 = vmul.f32 %v8148_v13, %v10104_v45 }
 0x4d4   : > { %2957 = vadd.xlane.f32.xlu1 %v8136_v6  ;;  %v8152_v53 = vpop.eup %8151 }
 0x4d6   : > { %2959 = vadd.xlane.f32.xlu0 %v8138_v46  ;;  %v11379_v46 = vld [vmem:[#allocation75_spill] sm:$0xff]  ;;  %v8154_v56 = vpop.eup %8153 }
 0x4d7   : > { %v3005_v1 = vsub.f32 %v11379_v46, %v2982_v51  ;;  %v3172_v44 = vmul.f32 %v8154_v56, %v10104_v45  ;;  %v8156_v34 = vpop.eup %8155 }
 0x4d8   : > { %3127 = vadd.xlane.f32.xlu1 %v3097_v22 }
 0x4d9   : > { %v3029_v43 = vmul.f32 1.442695, %v3005_v1 }
 0x4da   : > { %3129 = vadd.xlane.f32.xlu0 %v3098_v15  ;;  %v3035_v15 = vmul.f32 1.442695, %v3008_v40 }
 0x4dc   : > { %3123 = vadd.xlane.f32.xlu1 %v3095_v31  ;;  %v11380_v31 = vld [vmem:[#allocation78_spill] sm:$0xff]  ;;  %8157 = vpow2.f32 %v3035_v15 }
 0x4dd   : > { %8159 = vpow2.f32 %v3029_v43 }
 0x4de   : > { %3125 = vadd.xlane.f32.xlu0 %v3096_v48  ;;  %v3006_v48 = vsub.f32 %v11380_v31, %v2984_v18  ;;  %v3171_v18 = vmul.f32 %v8152_v53, %v10104_v45 }
 0x4e0   : > { %3049 = vadd.xlane.f32.xlu1 %v8140_v25  ;;  %v3031_v51 = vmul.f32 1.442695, %v3006_v48 }
 0x4e1   : > { %v10112_v38 = vpop.xlane.xlu1 %3929 }
 0x4e2   : > { %3051 = vadd.xlane.f32.xlu0 %v8142_v39  ;;  %v3174_v39 = vmul.f32 %v8150_v30, %v10104_v45  ;;  %8161 = vpow2.f32 %v3031_v51 }
 0x4e3   : > { %v10115_v8 = vpop.xlane.xlu0 %3931 }
 0x4e4   : > { %3045 = vadd.xlane.f32.xlu1 %v8144_v52  ;;  %v11381_v52 = vld [vmem:[#allocation77_spill] sm:$0xff]  ;;  %v3960_v48 = vsub.f32 %v9916_v24, %v10115_v8 }
 0x4e5   : > { %v10120_v6 = vpop.xlane.xlu1 %3925  ;;  %v3011_v27 = vsub.f32 %v11381_v52, %v10097_v50 }
 0x4e6   : > { %3047 = vadd.xlane.f32.xlu0 %v8146_v37  ;;  %v3012_v37 = vsub.f32 %v9902_v2, %v10100_v14 }
 0x4e7   : > { %v10123_v22 = vpop.xlane.xlu0 %3927  ;;  %v3041_v21 = vmul.f32 1.442695, %v3011_v27 }
 0x4e8   : > { %3187 = vadd.xlane.f32.xlu1 %v3169_v58  ;;  %v8158_v58 = vpop.eup %8157  ;;  %v3043_v50 = vmul.f32 1.442695, %v3012_v37 }
 0x4e9   : > { %v8160_v26 = vpop.eup %8159  ;;  %8163 = vpow2.f32 %v3041_v21  ;;  %v3178_v20 = vmul.f32 %v8158_v58, %v10104_v45 }
 0x4ea   : > { %3189 = vadd.xlane.f32.xlu0 %v3170_v10  ;;  %v11382_v10 = vld [vmem:[#allocation79_spill] sm:$0xff]  ;;  %8165 = vpow2.f32 %v3043_v50  ;;  %v3175_v31 = vmul.f32 %v8160_v26, %v10104_v45 }
 0x4ec   : > { %3183 = vadd.xlane.f32.xlu1 %v3167_v57  ;;  %v3009_v57 = vsub.f32 %v11382_v10, %v10106_v12  ;;  %v8162_v2 = vpop.eup %8161  ;;  %v3177_v12 = vmul.f32 %v8156_v34, %v10104_v45 }
 0x4ed   : > { %v10126_v29 = vpop.xlane.xlu1 %3937 }
 0x4ee   : > { %3185 = vadd.xlane.f32.xlu0 %v3168_v33  ;;  %v3037_v14 = vmul.f32 1.442695, %v3009_v57 }
 0x4ef   : > { %v10128_v25 = vpop.xlane.xlu0 %3939 }
 0x4f0   : > { %3057 = vadd.xlane.f32.xlu1 %v8148_v13  ;;  %8167 = vpow2.f32 %v3037_v14  ;;  %v11387_v14 = vld [vmem:[#allocation56_spill] sm:$0xff] }
 0x4f1   : > { %v10132_v0 = vpop.xlane.xlu1 %3933 }
 0x4f2   : > { %3059 = vadd.xlane.f32.xlu0 %v8150_v30  ;;  %v3039_v30 = vmul.f32 1.442695, %v3010_v36 }
 0x4f3   : > { %v10135_v4 = vpop.xlane.xlu0 %3935 }
 0x4f4   : > { %3053 = vadd.xlane.f32.xlu1 %v8152_v53  ;;  %v3959_v53 = vsub.f32 %v11383_v7, %v10112_v38  ;;  %v11384_v38 = vld [vmem:[#allocation81_spill] sm:$0xff]  ;;  %v11391_v7 = vld [vmem:[#allocation58_spill] sm:$0xff] }
 0x4f6   : > { %3055 = vadd.xlane.f32.xlu0 %v8154_v56  ;;  %v3977_v43 = vmul.f32 1.442695, %v3959_v53 }
 0x4f8   : > { %3195 = vadd.xlane.f32.xlu1 %v3173_v61  ;;  %v3957_v61 = vsub.f32 %v11384_v38, %v10120_v6 }
 0x4fa   : > { %3197 = vadd.xlane.f32.xlu0 %v3174_v39  ;;  %v10172_v39 = vpop.eup %8163  ;;  %v3973_v27 = vmul.f32 1.442695, %v3957_v61 }
 0x4fb   : > { %v10179_v52 = vpop.eup %8165 }
 0x4fc   : > { %3191 = vadd.xlane.f32.xlu1 %v3171_v18  ;;  %v3979_v18 = vmul.f32 1.442695, %v3960_v48  ;;  %v8168_v6 = vpop.eup %8167 }
 0x4fd   : > { %v10140_v11 = vpop.xlane.xlu1 %3945  ;;  %v3179_v36 = vmul.f32 %v8168_v6, %v10104_v45 }
 0x4fe   : > { %3193 = vadd.xlane.f32.xlu0 %v3172_v44  ;;  %v11385_v44 = vld [vmem:[#allocation82_spill] sm:$0xff] }
 0x4ff   : > { %v10144_v9 = vpop.xlane.xlu0 %3947  ;;  %v3958_v24 = vsub.f32 %v11385_v44, %v10123_v22  ;;  %v10190_v22 = vld [vmem:[%s1093_s18 + $0x1] ss:$0 sm:$0xff]  ;;  %s11420_s18 = sld [smem:[#allocation25_spill]] }
 0x500   : > { %3065 = vadd.xlane.f32.xlu1 %v8156_v34 }
 0x501   : > { %v10148_v33 = vpop.xlane.xlu1 %3941  ;;  %v3975_v37 = vmul.f32 1.442695, %v3958_v24 }
 0x502   : > { %3067 = vadd.xlane.f32.xlu0 %v8158_v58 }
 0x503   : > { %v10152_v13 = vpop.xlane.xlu0 %3943 }
 0x504   : > { %3061 = vadd.xlane.f32.xlu1 %v8160_v26 }
 0x505   : > { %v3954_v60 = vpop.xlane.xlu1 %3953 }
 0x506   : > { %v3971_v40 = vsub.f32 %v9960_v35, %v3954_v60  ;;  %3063 = vadd.xlane.f32.xlu0 %v8162_v2 }
 0x507   : > { %v3956_v23 = vpop.xlane.xlu0 %3955 }
 0x508   : > { %v4001_v46 = vmul.f32 1.442695, %v3971_v40  ;;  %v3972_v1 = vsub.f32 %v9964_v17, %v3956_v23  ;;  %3203 = vadd.xlane.f32.xlu1 %v3177_v12  ;;  %v3176_v17 = vmul.f32 %v8162_v2, %v10104_v45  ;;  %v10201_v2 = vld [vmem:[#allocation7] ss:$0 sm:$0xff] }
 0x509   : > { %v10160_v15 = vpop.xlane.xlu1 %3949  ;;  %v1695_v60 = vadd.f32 %v10201_v2, %v11387_v14  ;;  %v1696_v53 = vadd.f32 %v10201_v2, %v11391_v7 }
 0x50a   : > { %8169 = vpow2.f32 %v4001_v46  ;;  %v4003_v35 = vmul.f32 1.442695, %v3972_v1  ;;  %3205 = vadd.xlane.f32.xlu0 %v3178_v20  ;;  %v11390_v46 = vld [vmem:[#allocation83_spill] sm:$0xff] }
 0x50b   : > { %8171 = vpow2.f32 %v3039_v30  ;;  %v10165_v56 = vpop.xlane.xlu0 %3951  ;;  %v11389_v30 = vld [vmem:[#allocation57_spill] sm:$0xff]  ;;  %v3963_v1 = vsub.f32 %v11390_v46, %v10126_v29 }
 0x50c   : > { %8173 = vpow2.f32 %v4003_v35  ;;  %3199 = vadd.xlane.f32.xlu1 %v3175_v31  ;;  %v1693_v23 = vadd.f32 %v10201_v2, %v11389_v30  ;;  %v11392_v31 = vld [vmem:[#allocation59_spill] sm:$0xff] }
 0x50d   : > { %v10170_v51 = vpop.xlane.xlu1 %4041  ;;  %8175 = vpow2.f32 %v3977_v43  ;;  %v1694_v48 = vadd.f32 %v10201_v2, %v11392_v31  ;;  %v11393_v43 = vld [vmem:[#allocation84_spill] sm:$0xff]  ;;  %v3985_v29 = vmul.f32 1.442695, %v3963_v1 }
 0x50e   : > { %3201 = vadd.xlane.f32.xlu0 %v3176_v17  ;;  %8177 = vpow2.f32 %v3979_v18  ;;  %v3964_v38 = vsub.f32 %v11393_v43, %v10128_v25  ;;  %v11394_v18 = vld [vmem:[#allocation85_spill] sm:$0xff] }
 0x50f   : > { %v10176_v8 = vpop.xlane.xlu0 %4043  ;;  %8179 = vpow2.f32 %v3973_v27  ;;  %v3961_v44 = vsub.f32 %v11394_v18, %v10132_v0 }
 0x510   : > { %3073 = vadd.xlane.f32.xlu1 %v10172_v39  ;;  %8181 = vpow2.f32 %v3975_v37  ;;  %v11395_v37 = vld [vmem:[#allocation86_spill] sm:$0xff] }
 0x511   : > { %v10181_v34 = vpop.xlane.xlu1 %4037  ;;  %8183 = vtanh.f32 %v1695_v60  ;;  %v3981_v14 = vmul.f32 1.442695, %v3961_v44 }
 0x512   : > { %3075 = vadd.xlane.f32.xlu0 %v10179_v52  ;;  %8185 = vtanh.f32 %v1693_v23 }
 0x513   : > { %v10184_v58 = vpop.xlane.xlu0 %4039  ;;  %8187 = vtanh.f32 %v1696_v53 }
 0x514   : > { %v10186_v21 = vpop.eup %8169  ;;  %3069 = vadd.xlane.f32.xlu1 %v8168_v6  ;;  %8189 = vtanh.f32 %v1694_v48  ;;  %v3987_v6 = vmul.f32 1.442695, %v3964_v38  ;;  %v11396_v38 = vld [vmem:[#allocation87_spill] sm:$0xff] }
 0x515   : > { %v8172_v10 = vpop.eup %8171  ;;  %v10192_v57 = vpop.xlane.xlu1 %4049  ;;  %v10196_v26 = vmul.f32 %v10186_v21, %v10190_v22 }
 0x516   : > { %v10198_v50 = vpop.eup %8173  ;;  %3071 = vadd.xlane.f32.xlu0 %v8172_v10  ;;  %v3180_v20 = vmul.f32 %v8172_v10, %v10104_v45  ;;  %v3962_v10 = vsub.f32 %v11395_v37, %v10135_v4 }
 0x517   : > { %11386 = vst [vmem:[#allocation72_spill] sm:$0xff] %v10196_v26  ;;  %v10205_v40 = vpop.xlane.xlu0 %4051  ;;  %v10209_v12 = vmul.f32 %v10198_v50, %v10190_v22  ;;  %v8176_v17 = vpop.eup %8175  ;;  %v11407_v26 = vld [vmem:[#allocation66_spill] sm:$0xff] }
 0x518   : > { %3207 = vadd.xlane.f32.xlu1 %v3179_v36  ;;  %v8178_v45 = vpop.eup %8177  ;;  %v4157_v0 = vmul.f32 %v8176_v17, %v10190_v22  ;;  %v3983_v30 = vmul.f32 1.442695, %v3962_v10 }
 0x519   : > { %11388 = vst [vmem:[#allocation74_spill] sm:$0xff] %v10209_v12  ;;  %v10218_v35 = vpop.xlane.xlu1 %4045  ;;  %v8180_v27 = vpop.eup %8179  ;;  %v4158_v46 = vmul.f32 %v8178_v45, %v10190_v22 }
 0x51a   : > { %3209 = vadd.xlane.f32.xlu0 %v3180_v20  ;;  %v8182_v36 = vpop.eup %8181  ;;  %v4155_v7 = vmul.f32 %v8180_v27, %v10190_v22 }
 0x51b   : > { %v10224_v61 = vpop.xlane.xlu0 %4047  ;;  %v8184_v4 = vpop.eup %8183 }
 0x51c   : > { %4009 = vadd.xlane.f32.xlu1 %v8176_v17  ;;  %v8186_v20 = vpop.eup %8185  ;;  %v4156_v17 = vmul.f32 %v8182_v36, %v10190_v22  ;;  %v10236_v44 = vmul.f32 0.5, %v8184_v4  ;;  %v11399_v4 = vld [vmem:[#allocation89_spill] sm:$0xff] }
 0x51d   : > { %v2938_v24 = vpop.xlane.xlu1 %2937  ;;  %v8188_v53 = vpop.eup %8187 }
 0x51e   : > { %4011 = vadd.xlane.f32.xlu0 %v8178_v45  ;;  %8191 = vrcp.f32 %v2938_v24  ;;  %v8190_v48 = vpop.eup %8189 }
 0x51f   : > { %v2940_v25 = vpop.xlane.xlu0 %2939  ;;  %8193 = vpow2.f32 %v3985_v29  ;;  %v3967_v29 = vsub.f32 %v11396_v38, %v10140_v11  ;;  %v11401_v38 = vld [vmem:[#allocation90_spill] sm:$0xff] }
 0x520   : > { %4005 = vadd.xlane.f32.xlu1 %v8180_v27  ;;  %8195 = vrcp.f32 %v2940_v25  ;;  %v11397_v27 = vld [vmem:[#allocation88_spill] sm:$0xff] }
 0x521   : > { %v2934_v60 = vpop.xlane.xlu1 %2933  ;;  %v3968_v37 = vsub.f32 %v11397_v27, %v10144_v9  ;;  %v3965_v9 = vsub.f32 %v11399_v4, %v10148_v33  ;;  %v11403_v4 = vld [vmem:[#allocation63_spill] sm:$0xff] }
 0x522   : > { %8197 = vrcp.f32 %v2934_v60  ;;  %4007 = vadd.xlane.f32.xlu0 %v8182_v36  ;;  %v10244_v36 = vmul.f32 0.5, %v8188_v53 }
 0x523   : > { %8199 = vpow2.f32 %v3987_v6  ;;  %v2936_v23 = vpop.xlane.xlu0 %2935  ;;  %v3995_v33 = vmul.f32 1.442695, %v3968_v37 }
 0x524   : > { %8201 = vrcp.f32 %v2936_v23  ;;  %4175 = vadd.xlane.f32.xlu1 %v4157_v0  ;;  %v10249_v23 = vmul.f32 0.5, %v8186_v20 }
 0x525   : > { %8203 = vpow2.f32 %v3981_v14  ;;  %v3104_v1 = vpop.xlane.xlu1 %3103  ;;  %v11398_v14 = vld [vmem:[#allocation60_spill] sm:$0xff] }
 0x526   : > { %4177 = vadd.xlane.f32.xlu0 %v4158_v46  ;;  %8205 = vpow2.f32 %v3983_v30  ;;  %v1699_v11 = vadd.f32 %v10201_v2, %v11398_v14  ;;  %v3993_v46 = vmul.f32 1.442695, %v3967_v29  ;;  %v10262_v29 = vmul.f32 0.5, %v8190_v48 }
 0x527   : > { %v3106_v31 = vpop.xlane.xlu0 %3105 }
 0x528   : > { %4171 = vadd.xlane.f32.xlu1 %v4155_v7  ;;  %v8192_v43 = vpop.eup %8191  ;;  %8207 = vtanh.f32 %v1699_v11 }
 0x529   : > { %v3100_v45 = vpop.xlane.xlu1 %3099  ;;  %v8194_v18 = vpop.eup %8193  ;;  %v3149_v24 = vmul.f32 %v8192_v43, %v3104_v1  ;;  %8209 = vpow2.f32 %v3993_v46  ;;  %v1698_v46 = vadd.f32 %v10201_v2, %v11403_v4 }
 0x52a   : > { %4173 = vadd.xlane.f32.xlu0 %v4156_v17  ;;  %v8196_v6 = vpop.eup %8195  ;;  %v11400_v17 = vld [vmem:[#allocation61_spill] sm:$0xff]  ;;  %v4161_v11 = vmul.f32 %v8194_v18, %v10190_v22 }
 0x52b   : > { %v3102_v10 = vpop.xlane.xlu0 %3101  ;;  %v3249_v60 = vadd.f32 %v3149_v24, %v10236_v44  ;;  %v3150_v0 = vmul.f32 %v8196_v6, %v3106_v31  ;;  %v1697_v43 = vadd.f32 %v10201_v2, %v11400_v17  ;;  %v3966_v24 = vsub.f32 %v11401_v38, %v10152_v13 }
 0x52c   : > { %v8198_v25 = vpop.eup %8197  ;;  %4017 = vadd.xlane.f32.xlu1 %v8194_v18 }
 0x52d   : > { %v8200_v30 = vpop.eup %8199  ;;  %v3147_v1 = vmul.f32 %v8198_v25, %v3100_v45  ;;  %v10253_v7 = vpop.xlane.xlu1 %4057  ;;  %3266 = vst.msk [vmem:[%s10240_s20 + $0x10] sm:$0xff] %vm3263_vm4, %v3249_v60  ;;  %v3250_v20 = vadd.f32 %v3150_v0, %v10244_v36  ;;  %v11402_v25 = vld [vmem:[#allocation62_spill] sm:$0xff]  ;;  %v3989_v60 = vmul.f32 1.442695, %v3965_v9  ;;  %8211 = vtanh.f32 %v1697_v43 }
 0x52e   : > { %v8202_v53 = vpop.eup %8201  ;;  %4019 = vadd.xlane.f32.xlu0 %v8200_v30  ;;  %v1700_v13 = vadd.f32 %v10201_v2, %v11402_v25  ;;  %8213 = vpow2.f32 %v3995_v33  ;;  %v4162_v9 = vmul.f32 %v8200_v30, %v10190_v22 }
 0x52f   : > { %v8204_v31 = vpop.eup %8203  ;;  %v3247_v45 = vadd.f32 %v3147_v1, %v10249_v23  ;;  %v3148_v6 = vmul.f32 %v8202_v53, %v3102_v10  ;;  %v10265_v27 = vpop.xlane.xlu0 %4059  ;;  %3267 = vst.msk [vmem:[%s10240_s20 + $0x18] sm:$0xff] %vm3263_vm4, %v3250_v20  ;;  %v3991_v10 = vmul.f32 1.442695, %v3966_v24 }
 0x530   : > { %4013 = vadd.xlane.f32.xlu1 %v8204_v31  ;;  %v8206_v14 = vpop.eup %8205  ;;  %8215 = vtanh.f32 %v1700_v13  ;;  %v4159_v53 = vmul.f32 %v8204_v31, %v10190_v22 }
 0x531   : > { %3264 = vst.msk [vmem:[%s10240_s20] sm:$0xff] %vm3263_vm4, %v3247_v45  ;;  %v3248_v48 = vadd.f32 %v3148_v6, %v10262_v29  ;;  %v10274_v37 = vpop.xlane.xlu1 %4053  ;;  %8217 = vpow2.f32 %v3989_v60  ;;  %v4160_v17 = vmul.f32 %v8206_v14, %v10190_v22  ;;  %v11404_v45 = vld [vmem:[#allocation91_spill] sm:$0xff] }
 0x532   : > { %4015 = vadd.xlane.f32.xlu0 %v8206_v14  ;;  %8219 = vpow2.f32 %v3991_v10  ;;  %v8208_v38 = vpop.eup %8207  ;;  %v3969_v31 = vsub.f32 %v11404_v45, %v10160_v15  ;;  %v3970_v14 = vsub.f32 %v9972_v62, %v10165_v56 }
 0x533   : > { %3265 = vst.msk [vmem:[%s10240_s20 + $0x8] sm:$0xff] %vm3263_vm4, %v3248_v48  ;;  %v10279_v0 = vpop.xlane.xlu0 %4055  ;;  %v8210_v24 = vpop.eup %8209 }
 0x534   : > { %4183 = vadd.xlane.f32.xlu1 %v4161_v11  ;;  %v3997_v11 = vmul.f32 1.442695, %v3969_v31  ;;  %v4165_v15 = vmul.f32 %v8210_v24, %v10190_v22  ;;  %v3999_v56 = vmul.f32 1.442695, %v3970_v14 }
 0x535   : > { %v2946_v1 = vpop.xlane.xlu1 %2945 }
 0x536   : > { %4185 = vadd.xlane.f32.xlu0 %v4162_v9  ;;  %8221 = vrcp.f32 %v2946_v1  ;;  %v10290_v9 = vmul.f32 0.5, %v8208_v38 }
 0x537   : > { %v2948_v18 = vpop.xlane.xlu0 %2947  ;;  %8223 = vtanh.f32 %v1698_v46  ;;  %v8212_v30 = vpop.eup %8211 }
 0x538   : > { %4179 = vadd.xlane.f32.xlu1 %v4159_v53  ;;  %8225 = vrcp.f32 %v2948_v18  ;;  %v8214_v33 = vpop.eup %8213  ;;  %v11405_v18 = vld [vmem:[#allocation64_spill] sm:$0xff] }
 0x539   : > { %v2942_v43 = vpop.xlane.xlu1 %2941 }
 0x53a   : > { %8227 = vrcp.f32 %v2942_v43  ;;  %4181 = vadd.xlane.f32.xlu0 %v4160_v17  ;;  %v8216_v25 = vpop.eup %8215  ;;  %v1703_v17 = vadd.f32 %v10201_v2, %v11405_v18  ;;  %v11406_v43 = vld [vmem:[#allocation65_spill] sm:$0xff] }
 0x53b   : > { %v2944_v20 = vpop.xlane.xlu0 %2943  ;;  %v8218_v13 = vpop.eup %8217  ;;  %v1701_v62 = vadd.f32 %v10201_v2, %v11406_v43  ;;  %v10297_v31 = vmul.f32 0.5, %v8216_v25  ;;  %v1704_v25 = vadd.f32 %v10201_v2, %v11407_v26  ;;  %v11408_v26 = vld [vmem:[#allocation67_spill] sm:$0xff] }
 0x53c   : > { %8229 = vrcp.f32 %v2944_v20  ;;  %4025 = vadd.xlane.f32.xlu1 %v8210_v24  ;;  %v8220_v48 = vpop.eup %8219  ;;  %v10301_v24 = vmul.f32 0.5, %v8212_v30 }
 0x53d   : > { %v3112_v6 = vpop.xlane.xlu1 %3111  ;;  %8231 = vpow2.f32 %v3997_v11 }
 0x53e   : > { %4027 = vadd.xlane.f32.xlu0 %v8214_v33  ;;  %8233 = vpow2.f32 %v3999_v56 }
 0x53f   : > { %v3114_v60 = vpop.xlane.xlu0 %3113  ;;  %8235 = vtanh.f32 %v1703_v17 }
 0x540   : > { %4021 = vadd.xlane.f32.xlu1 %v8218_v13  ;;  %v8222_v10 = vpop.eup %8221  ;;  %8237 = vtanh.f32 %v1701_v62 }
 0x541   : > { %v3108_v4 = vpop.xlane.xlu1 %3107  ;;  %v8224_v46 = vpop.eup %8223  ;;  %v3153_v1 = vmul.f32 %v8222_v10, %v3112_v6  ;;  %v4166_v6 = vmul.f32 %v8214_v33, %v10190_v22  ;;  %v4071_v10 = vsub.f32 %v9977_v41, %v10170_v51  ;;  %v4163_v33 = vmul.f32 %v8218_v13, %v10190_v22 }
 0x542   : > { %4023 = vadd.xlane.f32.xlu0 %v8220_v48  ;;  %v8226_v53 = vpop.eup %8225  ;;  %v10315_v41 = vmul.f32 0.5, %v8224_v46  ;;  %8239 = vtanh.f32 %v1704_v25 }
 0x543   : > { %v3110_v20 = vpop.xlane.xlu0 %3109  ;;  %v3253_v38 = vadd.f32 %v3153_v1, %v10290_v9  ;;  %v3154_v12 = vmul.f32 %v8226_v53, %v3114_v60  ;;  %v4072_v60 = vsub.f32 %v9982_v59, %v10176_v8  ;;  %v1702_v59 = vadd.f32 %v10201_v2, %v11408_v26 }
 0x544   : > { %v8228_v45 = vpop.eup %8227  ;;  %4191 = vadd.xlane.f32.xlu1 %v4165_v15  ;;  %v4069_v8 = vsub.f32 %v9987_v5, %v10181_v34  ;;  %v4089_v13 = vmul.f32 1.442695, %v4071_v10  ;;  %v4070_v5 = vsub.f32 %v9994_v55, %v10184_v58  ;;  %v11409_v10 = vld [vmem:[#allocation68_spill] sm:$0xff] }
 0x545   : > { %v3151_v18 = vmul.f32 %v8228_v45, %v3108_v4  ;;  %v10305_v14 = vpop.xlane.xlu1 %4065  ;;  %3270 = vst.msk [vmem:[%s10240_s20 + $0x30] sm:$0xff] %vm3263_vm4, %v3253_v38  ;;  %v3254_v30 = vadd.f32 %v3154_v12, %v10297_v31  ;;  %v4164_v12 = vmul.f32 %v8220_v48, %v10190_v22  ;;  %v4091_v15 = vmul.f32 1.442695, %v4072_v60 }
 0x546   : > { %v8230_v43 = vpop.eup %8229  ;;  %4193 = vadd.xlane.f32.xlu0 %v4166_v6  ;;  %8241 = vtanh.f32 %v1702_v59  ;;  %v4085_v48 = vmul.f32 1.442695, %v4069_v8  ;;  %v4087_v62 = vmul.f32 1.442695, %v4070_v5  ;;  %v11410_v59 = vld [vmem:[#allocation92_spill] sm:$0xff] }
 0x547   : > { %v3251_v51 = vadd.f32 %v3151_v18, %v10301_v24  ;;  %v3152_v11 = vmul.f32 %v8230_v43, %v3110_v20  ;;  %v10318_v4 = vpop.xlane.xlu0 %4067  ;;  %3271 = vst.msk [vmem:[%s10240_s20 + $0x38] sm:$0xff] %vm3263_vm4, %v3254_v30  ;;  %8243 = vpow2.f32 %v4089_v13  ;;  %v8232_v17 = vpop.eup %8231  ;;  %v1707_v18 = vadd.f32 %v10201_v2, %v11409_v10 }
 0x548   : > { %4187 = vadd.xlane.f32.xlu1 %v4163_v33  ;;  %8245 = vpow2.f32 %v4091_v15  ;;  %v8234_v55 = vpop.eup %8233  ;;  %v4167_v20 = vmul.f32 %v8232_v17, %v10190_v22  ;;  %v4075_v43 = vsub.f32 %v9998_v49, %v10192_v57  ;;  %v4076_v33 = vsub.f32 %v10002_v63, %v10205_v40  ;;  %v11411_v57 = vld [vmem:[#allocation69_spill] sm:$0xff]  ;;  %v11412_v63 = vld [vmem:[#allocation70_spill] sm:$0xff] }
 0x549   : > { %3268 = vst.msk [vmem:[%s10240_s20 + $0x20] sm:$0xff] %vm3263_vm4, %v3251_v51  ;;  %v3252_v46 = vadd.f32 %v3152_v11, %v10315_v41  ;;  %v10330_v1 = vpop.xlane.xlu1 %4061  ;;  %v8236_v45 = vpop.eup %8235  ;;  %v4073_v2 = vsub.f32 %v11410_v59, %v10218_v35  ;;  %v11413_v15 = vld [vmem:[#allocation93_spill] sm:$0xff] }
 0x54a   : > { %4189 = vadd.xlane.f32.xlu0 %v4164_v12  ;;  %v8238_v38 = vpop.eup %8237  ;;  %v10350_v49 = vmul.f32 0.5, %v8236_v45  ;;  %v4099_v40 = vmul.f32 1.442695, %v4076_v33  ;;  %v4074_v5 = vsub.f32 %v11413_v15, %v10224_v61 }
 0x54b   : > { %3269 = vst.msk [vmem:[%s10240_s20 + $0x28] sm:$0xff] %vm3263_vm4, %v3252_v46  ;;  %v10336_v34 = vpop.xlane.xlu0 %4063  ;;  %v4093_v45 = vmul.f32 1.442695, %v4073_v2 }
 0x54c   : > { %4033 = vadd.xlane.f32.xlu1 %v10186_v21  ;;  %v8240_v6 = vpop.eup %8239 }
 0x54d   : > { %v2954_v53 = vpop.xlane.xlu1 %2953 }
 0x54e   : > { %4035 = vadd.xlane.f32.xlu0 %v10198_v50  ;;  %8247 = vrcp.f32 %v2954_v53  ;;  %v4168_v50 = vmul.f32 %v8234_v55, %v10190_v22  ;;  %v4097_v22 = vmul.f32 1.442695, %v4075_v43  ;;  %v10357_v53 = vld [vmem:[%s9173_s11 + $0x1] ss:$0 sm:$0xff] }
 0x54f   : > { %v2956_v56 = vpop.xlane.xlu0 %2955  ;;  %8249 = vpow2.f32 %v4085_v48 }
 0x550   : > { %4029 = vadd.xlane.f32.xlu1 %v8232_v17  ;;  %8251 = vrcp.f32 %v2956_v56  ;;  %v8242_v60 = vpop.eup %8241  ;;  %v10359_v17 = vmul.f32 0.5, %v8240_v6 }
 0x551   : > { %v2950_v58 = vpop.xlane.xlu1 %2949  ;;  %v8244_v30 = vpop.eup %8243  ;;  %v10365_v10 = vmul.f32 0.5, %v8242_v60 }
 0x552   : > { %8253 = vrcp.f32 %v2950_v58  ;;  %4031 = vadd.xlane.f32.xlu0 %v8234_v55  ;;  %v8246_v11 = vpop.eup %8245 }
 0x553   : > { %8255 = vpow2.f32 %v4087_v62  ;;  %v2952_v21 = vpop.xlane.xlu0 %2951  ;;  %v11414_v62 = vld [vmem:[#allocation71_spill] sm:$0xff]  ;;  %v4242_v60 = vmul.f32 %v8246_v11, %v10357_v53 }
 0x554   : > { %8257 = vrcp.f32 %v2952_v21  ;;  %4195 = vadd.xlane.f32.xlu1 %v4167_v20  ;;  %v10363_v20 = vmul.f32 0.5, %v8238_v38  ;;  %v4095_v38 = vmul.f32 1.442695, %v4074_v5 }
 0x555   : > { %v3120_v25 = vpop.xlane.xlu1 %3119  ;;  %8259 = vtanh.f32 %v1707_v18  ;;  %v4241_v18 = vmul.f32 %v8244_v30, %v10357_v53 }
 0x556   : > { %4197 = vadd.xlane.f32.xlu0 %v4168_v50  ;;  %8261 = vtanh.f32 %v11411_v57  ;;  %v4079_v57 = vsub.f32 %v10035_v32, %v10253_v7 }
 0x557   : > { %v3122_v51 = vpop.xlane.xlu0 %3121  ;;  %8263 = vtanh.f32 %v11412_v63 }
 0x558   : > { %4121 = vadd.xlane.f32.xlu1 %v8244_v30  ;;  %v8248_v26 = vpop.eup %8247  ;;  %8265 = vtanh.f32 %v11414_v62  ;;  %v4077_v62 = vsub.f32 %v10043_v28, %v10274_v37 }
 0x559   : > { %v3116_v8 = vpop.xlane.xlu1 %3115  ;;  %v8250_v12 = vpop.eup %8249  ;;  %v3157_v13 = vmul.f32 %v8248_v26, %v3120_v25  ;;  %8267 = vpow2.f32 %v4097_v22 }
 0x55a   : > { %4123 = vadd.xlane.f32.xlu0 %v8246_v11  ;;  %v8252_v46 = vpop.eup %8251  ;;  %v4239_v30 = vmul.f32 %v8250_v12, %v10357_v53  ;;  %v4101_v37 = vmul.f32 1.442695, %v4077_v62 }
 0x55b   : > { %v3118_v48 = vpop.xlane.xlu0 %3117  ;;  %v3257_v56 = vadd.f32 %v3157_v13, %v10350_v49  ;;  %v3158_v55 = vmul.f32 %v8252_v46, %v3122_v51 }
 0x55c   : > { %v8254_v35 = vpop.eup %8253  ;;  %4117 = vadd.xlane.f32.xlu1 %v8250_v12  ;;  %v4080_v12 = vsub.f32 %v10038_v47, %v10265_v27  ;;  %v4078_v47 = vsub.f32 %v10047_v16, %v10279_v0 }
 0x55d   : > { %v8256_v58 = vpop.eup %8255  ;;  %v3155_v61 = vmul.f32 %v8254_v35, %v3116_v8  ;;  %v2962_v21 = vpop.xlane.xlu1 %2961  ;;  %3274 = vst.msk [vmem:[%s10240_s20 + $0x50] sm:$0xff] %vm3263_vm4, %v3257_v56  ;;  %v3258_v6 = vadd.f32 %v3158_v55, %v10359_v17  ;;  %v4105_v35 = vmul.f32 1.442695, %v4079_v57  ;;  %v4083_v57 = vsub.f32 %v10061_v42, %v10305_v14 }
 0x55e   : > { %v8258_v50 = vpop.eup %8257  ;;  %8269 = vrcp.f32 %v2962_v21  ;;  %4119 = vadd.xlane.f32.xlu0 %v8256_v58  ;;  %v4240_v11 = vmul.f32 %v8256_v58, %v10357_v53 }
 0x55f   : > { %8271 = vpow2.f32 %v4099_v40  ;;  %v3255_v43 = vadd.f32 %v3155_v61, %v10363_v20  ;;  %v3156_v25 = vmul.f32 %v8258_v50, %v3118_v48  ;;  %v2964_v33 = vpop.xlane.xlu0 %2963  ;;  %3275 = vst.msk [vmem:[%s10240_s20 + $0x58] sm:$0xff] %vm3263_vm4, %v3258_v6  ;;  %v8260_v22 = vpop.eup %8259 }
 0x560   : > { %8273 = vrcp.f32 %v2964_v33  ;;  %4259 = vadd.xlane.f32.xlu1 %v4241_v18  ;;  %v8262_v2 = vpop.eup %8261  ;;  %v10386_v48 = vmul.f32 0.5, %v8260_v22  ;;  %v4103_v33 = vmul.f32 1.442695, %v4078_v47 }
 0x561   : > { %8275 = vpow2.f32 %v4093_v45  ;;  %3272 = vst.msk [vmem:[%s10240_s20 + $0x40] sm:$0xff] %vm3263_vm4, %v3255_v43  ;;  %v3256_v51 = vadd.f32 %v3156_v25, %v10365_v10  ;;  %v2958_v26 = vpop.xlane.xlu1 %2957  ;;  %v8264_v8 = vpop.eup %8263  ;;  %v4107_v45 = vmul.f32 1.442695, %v4080_v12  ;;  %v10395_v6 = vmul.f32 0.5, %v8262_v2 }
 0x562   : > { %8277 = vrcp.f32 %v2958_v26  ;;  %4261 = vadd.xlane.f32.xlu0 %v4242_v60  ;;  %v8266_v46 = vpop.eup %8265  ;;  %v10390_v7 = vmul.f32 0.5, %v8264_v8 }
 0x563   : > { %8279 = vpow2.f32 %v4095_v38  ;;  %3273 = vst.msk [vmem:[%s10240_s20 + $0x48] sm:$0xff] %vm3263_vm4, %v3256_v51  ;;  %v2960_v59 = vpop.xlane.xlu0 %2959  ;;  %v8268_v63 = vpop.eup %8267  ;;  %v10400_v0 = vmul.f32 0.5, %v8266_v46 }
 0x564   : > { %8281 = vrcp.f32 %v2960_v59  ;;  %4255 = vadd.xlane.f32.xlu1 %v4239_v30  ;;  %v4245_v25 = vmul.f32 %v8268_v63, %v10357_v53 }
 0x565   : > { %v3128_v13 = vpop.xlane.xlu1 %3127  ;;  %8283 = vpow2.f32 %v4105_v35  ;;  %v4081_v35 = vsub.f32 %v10070_v19, %v10330_v1 }
 0x566   : > { %4257 = vadd.xlane.f32.xlu0 %v4240_v11 }
 0x567   : > { %v3130_v40 = vpop.xlane.xlu0 %3129  ;;  %v4109_v19 = vmul.f32 1.442695, %v4081_v35 }
 0x568   : > { %v8270_v15 = vpop.eup %8269  ;;  %4129 = vadd.xlane.f32.xlu1 %v8268_v63  ;;  %v4084_v63 = vsub.f32 %v10065_v54, %v10318_v4 }
 0x569   : > { %v8272_v5 = vpop.eup %8271  ;;  %v3161_v56 = vmul.f32 %v8270_v15, %v3128_v13  ;;  %v3124_v55 = vpop.xlane.xlu1 %3123 }
 0x56a   : > { %v8274_v32 = vpop.eup %8273  ;;  %4131 = vadd.xlane.f32.xlu0 %v8272_v5  ;;  %v4246_v30 = vmul.f32 %v8272_v5, %v10357_v53  ;;  %v4113_v5 = vmul.f32 1.442695, %v4083_v57  ;;  %v4115_v14 = vmul.f32 1.442695, %v4084_v63 }
 0x56b   : > { %v8276_v58 = vpop.eup %8275  ;;  %v3261_v27 = vadd.f32 %v3161_v56, %v10386_v48  ;;  %v3162_v61 = vmul.f32 %v8274_v32, %v3130_v40  ;;  %v3126_v21 = vpop.xlane.xlu0 %3125  ;;  %v4082_v32 = vsub.f32 %v10075_v3, %v10336_v34 }
 0x56c   : > { %v8278_v50 = vpop.eup %8277  ;;  %4125 = vadd.xlane.f32.xlu1 %v8276_v58  ;;  %v4243_v2 = vmul.f32 %v8276_v58, %v10357_v53 }
 0x56d   : > { %v8280_v28 = vpop.eup %8279  ;;  %3278 = vst.msk [vmem:[%s10240_s20 + $0x70] sm:$0xff] %vm3263_vm4, %v3261_v27  ;;  %v3262_v18 = vadd.f32 %v3162_v61, %v10390_v7  ;;  %v3159_v38 = vmul.f32 %v8278_v50, %v3124_v55  ;;  %v3050_v43 = vpop.xlane.xlu1 %3049  ;;  %v4111_v34 = vmul.f32 1.442695, %v4082_v32 }
 0x56e   : > { %v8282_v16 = vpop.eup %8281  ;;  %8285 = vrcp.f32 %v3050_v43  ;;  %4127 = vadd.xlane.f32.xlu0 %v8280_v28  ;;  %v4244_v8 = vmul.f32 %v8280_v28, %v10357_v53 }
 0x56f   : > { %8287 = vpow2.f32 %v4107_v45  ;;  %3279 = vst.msk [vmem:[%s10240_s20 + $0x78] sm:$0xff] %vm3263_vm4, %v3262_v18  ;;  %v3259_v60 = vadd.f32 %v3159_v38, %v10395_v6  ;;  %v3160_v51 = vmul.f32 %v8282_v16, %v3126_v21  ;;  %v3052_v26 = vpop.xlane.xlu0 %3051  ;;  %v8284_v46 = vpop.eup %8283 }
 0x570   : > { %8289 = vrcp.f32 %v3052_v26  ;;  %4267 = vadd.xlane.f32.xlu1 %v4245_v25  ;;  %v4249_v3 = vmul.f32 %v8284_v46, %v10357_v53  ;;  %v10440_v26 = vld [vmem:[%s11415_s15 + $0x8] sm:$0xff]  }
 0x571   : > { %8291 = vpow2.f32 %v4101_v37  ;;  %3276 = vst.msk [vmem:[%s10240_s20 + $0x60] sm:$0xff] %vm3263_vm4, %v3259_v60  ;;  %v3260_v22 = vadd.f32 %v3160_v51, %v10400_v0  ;;  %v3046_v59 = vpop.xlane.xlu1 %3045  ;;  %v8083_v60 = vld [vmem:[%s11415_s15] sm:$0xff]  }
 0x572   : > { %8293 = vrcp.f32 %v3046_v59  ;;  %4269 = vadd.xlane.f32.xlu0 %v4246_v30  ;;  %7555 = vmatprep.mubr.bf16.mxu0 %v8083_v60 }
 0x573   : > { %8295 = vpow2.f32 %v4103_v33  ;;  %3277 = vst.msk [vmem:[%s10240_s20 + $0x68] sm:$0xff] %vm3263_vm4, %v3260_v22  ;;  %v3048_v11 = vpop.xlane.xlu0 %3047  ;;  %7556 = vmatmul.mubr.bf16.vlgmr.msra.gmra.mrb[104].mxu0 %v10440_v26  ;;  %7523 = vmatprep.mubr.bf16.mxu1 %v8083_v60 }
 0x574   : > { %8297 = vrcp.f32 %v3048_v11  ;;  %4263 = vadd.xlane.f32.xlu1 %v4243_v2 }
 0x575   : > { %v3188_v13 = vpop.xlane.xlu1 %3187  ;;  %8299 = vpow2.f32 %v4113_v5 }
 0x576   : > { %4265 = vadd.xlane.f32.xlu0 %v4244_v8 }
 0x577   : > { %v3190_v12 = vpop.xlane.xlu0 %3189 }
 0x578   : > { %v8286_v40 = vpop.eup %8285  ;;  %4137 = vadd.xlane.f32.xlu1 %v8284_v46 }
 0x579   : > { %v8288_v15 = vpop.eup %8287  ;;  %v3233_v62 = vmul.f32 %v8286_v40, %v3188_v13  ;;  %v3184_v56 = vpop.xlane.xlu1 %3183 }
 0x57a   : > { %v8290_v55 = vpop.eup %8289  ;;  %4139 = vadd.xlane.f32.xlu0 %v8288_v15  ;;  %v4250_v18 = vmul.f32 %v8288_v15, %v10357_v53 }
 0x57b   : > { %v8292_v42 = vpop.eup %8291  ;;  %v3282_v54 = vadd.f32 %v3233_v62, %v10236_v44  ;;  %v3234_v4 = vmul.f32 %v8290_v55, %v3190_v12  ;;  %v3186_v58 = vpop.xlane.xlu0 %3185  ;;  %v8556_v55 = vld [vmem:[%s9173_s11] ss:$0 sm:$0xff]  ;;  %s11439_s11 = sld [smem:[#allocation22_spill]] }
 0x57c   : > { %v8294_v45 = vpop.eup %8293  ;;  %4133 = vadd.xlane.f32.xlu1 %v8292_v42  ;;  %v4247_v16 = vmul.f32 %v8292_v42, %v10357_v53  ;;  %v3181_v42 = vmul.f32 %v8556_v55, %v10172_v39 }
 0x57d   : > { %v8296_v47 = vpop.eup %8295  ;;  %3299 = vst.msk [vmem:[%s10240_s20 + $0x10] sm:$0xff] %vm3296_vm5, %v3282_v54  ;;  %v3283_v1 = vadd.f32 %v3234_v4, %v10244_v36  ;;  %v3231_v27 = vmul.f32 %v8294_v45, %v3184_v56  ;;  %v3058_v61 = vpop.xlane.xlu1 %3057  ;;  %v3182_v4 = vmul.f32 %v8556_v55, %v10179_v52 }
 0x57e   : > { %v8298_v21 = vpop.eup %8297  ;;  %8301 = vrcp.f32 %v3058_v61  ;;  %4135 = vadd.xlane.f32.xlu0 %v8296_v47  ;;  %v4248_v33 = vmul.f32 %v8296_v47, %v10357_v53  ;;  %v11416_v47 = vld [vmem:[#allocation72_spill] sm:$0xff] }
 0x57f   : > { %8303 = vpow2.f32 %v4115_v14  ;;  %3300 = vst.msk [vmem:[%s10240_s20 + $0x18] sm:$0xff] %vm3296_vm5, %v3283_v1  ;;  %v3280_v50 = vadd.f32 %v3231_v27, %v10249_v23  ;;  %v3232_v28 = vmul.f32 %v8298_v21, %v3186_v58  ;;  %v3060_v37 = vpop.xlane.xlu0 %3059  ;;  %v8300_v30 = vpop.eup %8299  ;;  %v11417_v1 = vld [vmem:[#allocation74_spill] sm:$0xff] }
 0x580   : > { %8305 = vrcp.f32 %v3060_v37  ;;  %4275 = vadd.xlane.f32.xlu1 %v4249_v3 }
 0x581   : > { %8307 = vpow2.f32 %v4109_v19  ;;  %3297 = vst.msk [vmem:[%s10240_s20] sm:$0xff] %vm3296_vm5, %v3280_v50  ;;  %v3281_v38 = vadd.f32 %v3232_v28, %v10262_v29  ;;  %v3054_v43 = vpop.xlane.xlu1 %3053  ;;  %v4253_v28 = vmul.f32 %v8300_v30, %v10357_v53 }
 0x582   : > { %8309 = vrcp.f32 %v3054_v43  ;;  %4277 = vadd.xlane.f32.xlu0 %v4250_v18 }
 0x583   : > { %8311 = vpow2.f32 %v4111_v34  ;;  %3298 = vst.msk [vmem:[%s10240_s20 + $0x8] sm:$0xff] %vm3296_vm5, %v3281_v38  ;;  %v3056_v25 = vpop.xlane.xlu0 %3055 }
 0x584   : > { %8313 = vrcp.f32 %v3056_v25  ;;  %4271 = vadd.xlane.f32.xlu1 %v4247_v16 }
 0x585   : > { %v3196_v51 = vpop.xlane.xlu1 %3195 }
 0x586   : > { %4273 = vadd.xlane.f32.xlu0 %v4248_v33 }
 0x587   : > { %v3198_v22 = vpop.xlane.xlu0 %3197 }
 0x588   : > { %v8302_v59 = vpop.eup %8301  ;;  %4145 = vadd.xlane.f32.xlu1 %v8300_v30 }
 0x589   : > { %v8304_v2 = vpop.eup %8303  ;;  %v3237_v11 = vmul.f32 %v8302_v59, %v3196_v51  ;;  %v3192_v8 = vpop.xlane.xlu1 %3191 }
 0x58a   : > { %v8306_v57 = vpop.eup %8305  ;;  %4147 = vadd.xlane.f32.xlu0 %v8304_v2  ;;  %v4254_v16 = vmul.f32 %v8304_v2, %v10357_v53 }
 0x58b   : > { %v8308_v13 = vpop.eup %8307  ;;  %v3286_v46 = vadd.f32 %v3237_v11, %v10290_v9  ;;  %v3238_v63 = vmul.f32 %v8306_v57, %v3198_v22  ;;  %v3194_v12 = vpop.xlane.xlu0 %3193 }
 0x58c   : > { %v8310_v40 = vpop.eup %8309  ;;  %4141 = vadd.xlane.f32.xlu1 %v8308_v13  ;;  %v4251_v27 = vmul.f32 %v8308_v13, %v10357_v53 }
 0x58d   : > { %v8312_v15 = vpop.eup %8311  ;;  %3303 = vst.msk [vmem:[%s10240_s20 + $0x30] sm:$0xff] %vm3296_vm5, %v3286_v46  ;;  %v3287_v5 = vadd.f32 %v3238_v63, %v10297_v31  ;;  %v3235_v35 = vmul.f32 %v8310_v40, %v3192_v8  ;;  %v3066_v62 = vpop.xlane.xlu1 %3065  ;;  %v10482_v8 = vld [vmem:[%s11415_s15 + $0x18] sm:$0xff]   ;;  %v10489_v63 = vld [vmem:[%s11415_s15 + $0x20] sm:$0xff]   ;;  %v10492_v40 = vld [vmem:[%s11415_s15 + $0x28] sm:$0xff]  }
 0x58e   : > { %v8314_v56 = vpop.eup %8313  ;;  %8315 = vrcp.f32 %v3066_v62  ;;  %4143 = vadd.xlane.f32.xlu0 %v8312_v15  ;;  %v4252_v21 = vmul.f32 %v8312_v15, %v10357_v53  ;;  %v10476_v53 = vld [vmem:[%s11415_s15 + $0x10] sm:$0xff]  }
 0x58f   : > { %3304 = vst.msk [vmem:[%s10240_s20 + $0x38] sm:$0xff] %vm3296_vm5, %v3287_v5  ;;  %v3284_v14 = vadd.f32 %v3235_v35, %v10301_v24  ;;  %v3236_v32 = vmul.f32 %v8314_v56, %v3194_v12  ;;  %v3068_v54 = vpop.xlane.xlu0 %3067  ;;  %7559 = vmatprep.mubr.bf16.mxu0 %v10476_v53 }
 0x590   : > { %8317 = vrcp.f32 %v3068_v54  ;;  %3211 = vadd.xlane.f32.xlu1 %v3181_v42  ;;  %7560 = vmatmul.mubr.bf16.gmra.mrb[108].mxu0 %v10482_v8  ;;  %v10501_v54 = vld [vmem:[%s11415_s15 + $0x38] sm:$0xff]  }
 0x591   : > { %3301 = vst.msk [vmem:[%s10240_s20 + $0x20] sm:$0xff] %vm3296_vm5, %v3284_v14  ;;  %v3285_v58 = vadd.f32 %v3236_v32, %v10315_v41  ;;  %v3062_v45 = vpop.xlane.xlu1 %3061  ;;  %7563 = vmatprep.mubr.bf16.mxu0 %v10489_v63  ;;  %v10498_v32 = vld [vmem:[%s11415_s15 + $0x30] sm:$0xff]  }
 0x592   : > { %8319 = vrcp.f32 %v3062_v45  ;;  %3213 = vadd.xlane.f32.xlu0 %v3182_v4 }
 0x593   : > { %3302 = vst.msk [vmem:[%s10240_s20 + $0x28] sm:$0xff] %vm3296_vm5, %v3285_v58  ;;  %v3064_v39 = vpop.xlane.xlu0 %3063 }
 0x594   : > { %8321 = vrcp.f32 %v3064_v39  ;;  %4199 = vadd.xlane.f32.xlu1 %v11416_v47 }
 0x595   : > { %v3204_v19 = vpop.xlane.xlu1 %3203 }
 0x596   : > { %4201 = vadd.xlane.f32.xlu0 %v11417_v1 }
 0x597   : > { %v3206_v52 = vpop.xlane.xlu0 %3205 }
 0x598   : > { %v8316_v61 = vpop.eup %8315  ;;  %4279 = vadd.xlane.f32.xlu1 %v4251_v27  ;;  %7564 = vmatmul.mubr.bf16.gmra.mrb[112].mxu0 %v10492_v40 }
 0x599   : > { %v3241_v3 = vmul.f32 %v8316_v61, %v3204_v19  ;;  %v3200_v34 = vpop.xlane.xlu1 %3199  ;;  %7567 = vmatprep.mubr.bf16.mxu0 %v10498_v32 }
 0x59a   : > { %v8318_v50 = vpop.eup %8317  ;;  %4281 = vadd.xlane.f32.xlu0 %v4252_v21 }
 0x59b   : > { %v3290_v37 = vadd.f32 %v3241_v3, %v10350_v49  ;;  %v3242_v18 = vmul.f32 %v8318_v50, %v3206_v52  ;;  %v3202_v38 = vpop.xlane.xlu0 %3201 }
 0x59c   : > { %v8320_v43 = vpop.eup %8319  ;;  %4283 = vadd.xlane.f32.xlu1 %v4253_v28 }
 0x59d   : > { %3307 = vst.msk [vmem:[%s10240_s20 + $0x50] sm:$0xff] %vm3296_vm5, %v3290_v37  ;;  %v3291_v25 = vadd.f32 %v3242_v18, %v10359_v17  ;;  %v3239_v33 = vmul.f32 %v8320_v43, %v3200_v34  ;;  %v10468_v60 = vpop.xlane.xlu1 %3073 }
 0x59e   : > { %v8322_v51 = vpop.eup %8321  ;;  %4285 = vadd.xlane.f32.xlu0 %v4254_v16 }
 0x59f   : > { %3308 = vst.msk [vmem:[%s10240_s20 + $0x58] sm:$0xff] %vm3296_vm5, %v3291_v25  ;;  %v3288_v30 = vadd.f32 %v3239_v33, %v10363_v20  ;;  %v3240_v22 = vmul.f32 %v8322_v51, %v3202_v38  ;;  %v10473_v59 = vpop.xlane.xlu0 %3075  ;;  %v10521_v25 = vld [vmem:[%s11418_s2] sm:$0xff]   ;;  %s11445_s2 = sld [smem:[#allocation26_spill]] }
 0x5a0   : > { %7568 = vmatmul.mubr.bf16.gmra.mrb[116].mxu0 %v10501_v54 }
 0x5a1   : > { %3305 = vst.msk [vmem:[%s10240_s20 + $0x40] sm:$0xff] %vm3296_vm5, %v3288_v30  ;;  %v3289_v2 = vadd.f32 %v3240_v22, %v10365_v10  ;;  %v3070_v11 = vpop.xlane.xlu1 %3069  ;;  %7623 = vmatprep.mubr.bf16.mxu0 %v10521_v25 }
 0x5a2   : > { %8323 = vrcp.f32 %v3070_v11 }
 0x5a3   : > { %3306 = vst.msk [vmem:[%s10240_s20 + $0x48] sm:$0xff] %vm3296_vm5, %v3289_v2  ;;  %v3072_v57 = vpop.xlane.xlu0 %3071 }
 0x5a4   : > { %8325 = vrcp.f32 %v3072_v57 }
 0x5a5   : > { %v3208_v13 = vpop.xlane.xlu1 %3207 }
 0x5a7   : > { %v3210_v46 = vpop.xlane.xlu0 %3209 }
 0x5a9   : > { %v4010_v12 = vpop.xlane.xlu1 %4009 }
 0x5aa   : > { %8327 = vrcp.f32 %v4010_v12 }
 0x5ab   : > { %v4012_v15 = vpop.xlane.xlu0 %4011 }
 0x5ac   : > { %v8324_v5 = vpop.eup %8323  ;;  %8329 = vrcp.f32 %v4012_v15 }
 0x5ad   : > { %v3243_v35 = vmul.f32 %v8324_v5, %v3208_v13  ;;  %v4006_v62 = vpop.xlane.xlu1 %4005 }
 0x5ae   : > { %v8326_v56 = vpop.eup %8325  ;;  %8331 = vrcp.f32 %v4006_v62 }
 0x5af   : > { %v3292_v55 = vadd.f32 %v3243_v35, %v10395_v6  ;;  %v3244_v42 = vmul.f32 %v8326_v56, %v3210_v46  ;;  %v4008_v14 = vpop.xlane.xlu0 %4007 }
 0x5b0   : > { %8333 = vrcp.f32 %v4008_v14 }
 0x5b1   : > { %3309 = vst.msk [vmem:[%s10240_s20 + $0x60] sm:$0xff] %vm3296_vm5, %v3292_v55  ;;  %v3293_v4 = vadd.f32 %v3244_v42, %v10400_v0  ;;  %v4176_v58 = vpop.xlane.xlu1 %4175 }
 0x5b3   : > { %3310 = vst.msk [vmem:[%s10240_s20 + $0x68] sm:$0xff] %vm3296_vm5, %v3293_v4  ;;  %v4178_v45 = vpop.xlane.xlu0 %4177 }
 0x5b4   : > { %v8328_v39 = vpop.eup %8327 }
 0x5b5   : > { %v4221_v47 = vmul.f32 %v8328_v39, %v4176_v58  ;;  %v4172_v19 = vpop.xlane.xlu1 %4171 }
 0x5b6   : > { %v8330_v1 = vpop.eup %8329 }
 0x5b7   : > { %v4321_v27 = vadd.f32 %v4221_v47, %v10236_v44  ;;  %v4222_v52 = vmul.f32 %v8330_v1, %v4178_v45  ;;  %v4174_v61 = vpop.xlane.xlu0 %4173 }
 0x5b8   : > { %v8332_v21 = vpop.eup %8331 }
 0x5b9   : > { %4338 = vst.msk [vmem:[%s10240_s20 + $0x10] sm:$0xff] %vm4335_vm6, %v4321_v27  ;;  %v4322_v3 = vadd.f32 %v4222_v52, %v10244_v36  ;;  %v4219_v34 = vmul.f32 %v8332_v21, %v4172_v19  ;;  %v4018_v50 = vpop.xlane.xlu1 %4017 }
 0x5ba   : > { %v8334_v28 = vpop.eup %8333  ;;  %8335 = vrcp.f32 %v4018_v50 }
 0x5bb   : > { %4339 = vst.msk [vmem:[%s10240_s20 + $0x18] sm:$0xff] %vm4335_vm6, %v4322_v3  ;;  %v4319_v37 = vadd.f32 %v4219_v34, %v10249_v23  ;;  %v4220_v18 = vmul.f32 %v8334_v28, %v4174_v61  ;;  %v4020_v38 = vpop.xlane.xlu0 %4019 }
 0x5bc   : > { %8337 = vrcp.f32 %v4020_v38 }
 0x5bd   : > { %4336 = vst.msk [vmem:[%s10240_s20] sm:$0xff] %vm4335_vm6, %v4319_v37  ;;  %v4320_v43 = vadd.f32 %v4220_v18, %v10262_v29  ;;  %v4014_v16 = vpop.xlane.xlu1 %4013 }
 0x5be   : > { %8339 = vrcp.f32 %v4014_v16 }
 0x5bf   : > { %4337 = vst.msk [vmem:[%s10240_s20 + $0x8] sm:$0xff] %vm4335_vm6, %v4320_v43  ;;  %v4016_v33 = vpop.xlane.xlu0 %4015 }
 0x5c0   : > { %8341 = vrcp.f32 %v4016_v33 }
 0x5c1   : > { %v4184_v51 = vpop.xlane.xlu1 %4183 }
 0x5c3   : > { %v4186_v30 = vpop.xlane.xlu0 %4185 }
 0x5c4   : > { %v8336_v22 = vpop.eup %8335 }
 0x5c5   : > { %v4225_v2 = vmul.f32 %v8336_v22, %v4184_v51  ;;  %v4180_v11 = vpop.xlane.xlu1 %4179 }
 0x5c6   : > { %v8338_v57 = vpop.eup %8337 }
 0x5c7   : > { %v4325_v13 = vadd.f32 %v4225_v2, %v10290_v9  ;;  %v4226_v46 = vmul.f32 %v8338_v57, %v4186_v30  ;;  %v4182_v12 = vpop.xlane.xlu0 %4181 }
 0x5c8   : > { %v8340_v15 = vpop.eup %8339 }
 0x5c9   : > { %4342 = vst.msk [vmem:[%s10240_s20 + $0x30] sm:$0xff] %vm4335_vm6, %v4325_v13  ;;  %v4326_v5 = vadd.f32 %v4226_v46, %v10297_v31  ;;  %v4223_v35 = vmul.f32 %v8340_v15, %v4180_v11  ;;  %v4026_v62 = vpop.xlane.xlu1 %4025 }
 0x5ca   : > { %v8342_v56 = vpop.eup %8341  ;;  %8343 = vrcp.f32 %v4026_v62 }
 0x5cb   : > { %4343 = vst.msk [vmem:[%s10240_s20 + $0x38] sm:$0xff] %vm4335_vm6, %v4326_v5  ;;  %v4323_v55 = vadd.f32 %v4223_v35, %v10301_v24  ;;  %v4224_v42 = vmul.f32 %v8342_v56, %v4182_v12  ;;  %v4028_v14 = vpop.xlane.xlu0 %4027 }
 0x5cc   : > { %8345 = vrcp.f32 %v4028_v14 }
 0x5cd   : > { %4340 = vst.msk [vmem:[%s10240_s20 + $0x20] sm:$0xff] %vm4335_vm6, %v4323_v55  ;;  %v4324_v4 = vadd.f32 %v4224_v42, %v10315_v41  ;;  %v4022_v58 = vpop.xlane.xlu1 %4021 }
 0x5ce   : > { %8347 = vrcp.f32 %v4022_v58 }
 0x5cf   : > { %4341 = vst.msk [vmem:[%s10240_s20 + $0x28] sm:$0xff] %vm4335_vm6, %v4324_v4  ;;  %v4024_v45 = vpop.xlane.xlu0 %4023 }
 0x5d0   : > { %8349 = vrcp.f32 %v4024_v45 }
 0x5d1   : > { %v4192_v39 = vpop.xlane.xlu1 %4191 }
 0x5d3   : > { %v4194_v47 = vpop.xlane.xlu0 %4193 }
 0x5d4   : > { %v8344_v19 = vpop.eup %8343 }
 0x5d5   : > { %v4229_v1 = vmul.f32 %v8344_v19, %v4192_v39  ;;  %v4188_v27 = vpop.xlane.xlu1 %4187 }
 0x5d6   : > { %v8346_v52 = vpop.eup %8345 }
 0x5d7   : > { %v4329_v61 = vadd.f32 %v4229_v1, %v10350_v49  ;;  %v4230_v21 = vmul.f32 %v8346_v52, %v4194_v47  ;;  %v4190_v3 = vpop.xlane.xlu0 %4189 }
 0x5d8   : > { %v8348_v34 = vpop.eup %8347 }
 0x5d9   : > { %4346 = vst.msk [vmem:[%s10240_s20 + $0x50] sm:$0xff] %vm4335_vm6, %v4329_v61  ;;  %v4330_v50 = vadd.f32 %v4230_v21, %v10359_v17  ;;  %v4227_v28 = vmul.f32 %v8348_v34, %v4188_v27  ;;  %v10542_v37 = vpop.xlane.xlu1 %4033 }
 0x5da   : > { %v8350_v18 = vpop.eup %8349 }
 0x5db   : > { %4347 = vst.msk [vmem:[%s10240_s20 + $0x58] sm:$0xff] %vm4335_vm6, %v4330_v50  ;;  %v4327_v38 = vadd.f32 %v4227_v28, %v10363_v20  ;;  %v4228_v43 = vmul.f32 %v8350_v18, %v4190_v3  ;;  %v10547_v16 = vpop.xlane.xlu0 %4035 }
 0x5dd   : > { %4344 = vst.msk [vmem:[%s10240_s20 + $0x40] sm:$0xff] %vm4335_vm6, %v4327_v38  ;;  %v4328_v33 = vadd.f32 %v4228_v43, %v10365_v10  ;;  %v4030_v51 = vpop.xlane.xlu1 %4029 }
 0x5de   : > { %8351 = vrcp.f32 %v4030_v51 }
 0x5df   : > { %4345 = vst.msk [vmem:[%s10240_s20 + $0x48] sm:$0xff] %vm4335_vm6, %v4328_v33  ;;  %v4032_v30 = vpop.xlane.xlu0 %4031 }
 0x5e0   : > { %8353 = vrcp.f32 %v4032_v30 }
 0x5e1   : > { %v4196_v22 = vpop.xlane.xlu1 %4195 }
 0x5e3   : > { %v4198_v2 = vpop.xlane.xlu0 %4197 }
 0x5e5   : > { %v4122_v11 = vpop.xlane.xlu1 %4121 }
 0x5e6   : > { %8355 = vrcp.f32 %v4122_v11 }
 0x5e7   : > { %v4124_v57 = vpop.xlane.xlu0 %4123 }
 0x5e8   : > { %v8352_v13 = vpop.eup %8351  ;;  %8357 = vrcp.f32 %v4124_v57 }
 0x5e9   : > { %v4231_v46 = vmul.f32 %v8352_v13, %v4196_v22  ;;  %v4118_v12 = vpop.xlane.xlu1 %4117 }
 0x5ea   : > { %v8354_v15 = vpop.eup %8353  ;;  %8359 = vrcp.f32 %v4118_v12 }
 0x5eb   : > { %v4331_v5 = vadd.f32 %v4231_v46, %v10395_v6  ;;  %v4232_v35 = vmul.f32 %v8354_v15, %v4198_v2  ;;  %v4120_v62 = vpop.xlane.xlu0 %4119 }
 0x5ec   : > { %8361 = vrcp.f32 %v4120_v62 }
 0x5ed   : > { %4348 = vst.msk [vmem:[%s10240_s20 + $0x60] sm:$0xff] %vm4335_vm6, %v4331_v5  ;;  %v4332_v56 = vadd.f32 %v4232_v35, %v10400_v0  ;;  %v4260_v55 = vpop.xlane.xlu1 %4259 }
 0x5ef   : > { %4349 = vst.msk [vmem:[%s10240_s20 + $0x68] sm:$0xff] %vm4335_vm6, %v4332_v56  ;;  %v4262_v42 = vpop.xlane.xlu0 %4261 }
 0x5f0   : > { %v8356_v14 = vpop.eup %8355 }
 0x5f1   : > { %v4305_v4 = vmul.f32 %v8356_v14, %v4260_v55  ;;  %v4256_v58 = vpop.xlane.xlu1 %4255 }
 0x5f2   : > { %v8358_v45 = vpop.eup %8357 }
 0x5f3   : > { %v4354_v39 = vadd.f32 %v4305_v4, %v10236_v44  ;;  %v4306_v47 = vmul.f32 %v8358_v45, %v4262_v42  ;;  %v4258_v19 = vpop.xlane.xlu0 %4257 }
 0x5f4   : > { %v8360_v1 = vpop.eup %8359 }
 0x5f5   : > { %4371 = vst.msk [vmem:[%s10240_s20 + $0x10] sm:$0xff] %vm4368_vm7, %v4354_v39  ;;  %v4355_v27 = vadd.f32 %v4306_v47, %v10244_v36  ;;  %v4303_v52 = vmul.f32 %v8360_v1, %v4256_v58  ;;  %v4130_v61 = vpop.xlane.xlu1 %4129 }
 0x5f6   : > { %v8362_v21 = vpop.eup %8361  ;;  %8363 = vrcp.f32 %v4130_v61 }
 0x5f7   : > { %4372 = vst.msk [vmem:[%s10240_s20 + $0x18] sm:$0xff] %vm4368_vm7, %v4355_v27  ;;  %v4352_v3 = vadd.f32 %v4303_v52, %v10249_v23  ;;  %v4304_v34 = vmul.f32 %v8362_v21, %v4258_v19  ;;  %v4132_v50 = vpop.xlane.xlu0 %4131 }
 0x5f8   : > { %8365 = vrcp.f32 %v4132_v50 }
 0x5f9   : > { %4369 = vst.msk [vmem:[%s10240_s20] sm:$0xff] %vm4368_vm7, %v4352_v3  ;;  %v4353_v44 = vadd.f32 %v4304_v34, %v10262_v29  ;;  %v4126_v28 = vpop.xlane.xlu1 %4125 }
 0x5fa   : > { %8367 = vrcp.f32 %v4126_v28 }
 0x5fb   : > { %4370 = vst.msk [vmem:[%s10240_s20 + $0x8] sm:$0xff] %vm4368_vm7, %v4353_v44  ;;  %v4128_v36 = vpop.xlane.xlu0 %4127 }
 0x5fc   : > { %8369 = vrcp.f32 %v4128_v36  ;;  %v4387_v12 = vld [vmem:[%s10240_s20 + $0x10] sm:$0xff] }
 0x5fd   : > { %v4268_v18 = vpop.xlane.xlu1 %4267 }
 0x5fe   : > { %v4388_v2 = vld [vmem:[%s10240_s20 + $0x18] sm:$0xff] }
 0x5ff   : > { %v4270_v23 = vpop.xlane.xlu0 %4269  ;;  %v4402_v62 = vpack.c.bf16 %v4388_v2, %v4387_v12 }
 0x600   : > { %v8364_v38 = vpop.eup %8363  ;;  %v4385_v30 = vld [vmem:[%s10240_s20] sm:$0xff] }
 0x601   : > { %v4309_v43 = vmul.f32 %v8364_v38, %v4268_v18  ;;  %v4264_v33 = vpop.xlane.xlu1 %4263 }
 0x602   : > { %v8366_v51 = vpop.eup %8365  ;;  %v4386_v22 = vld [vmem:[%s10240_s20 + $0x8] sm:$0xff] }
 0x603   : > { %v4358_v11 = vadd.f32 %v4309_v43, %v10290_v9  ;;  %v4310_v29 = vmul.f32 %v8366_v51, %v4270_v23  ;;  %v4266_v57 = vpop.xlane.xlu0 %4265  ;;  %v4401_v13 = vpack.c.bf16 %v4386_v22, %v4385_v30 }
 0x604   : > { %v8368_v46 = vpop.eup %8367 }
 0x605   : > { %4375 = vst.msk [vmem:[%s10240_s20 + $0x30] sm:$0xff] %vm4368_vm7, %v4358_v11  ;;  %v4359_v15 = vadd.f32 %v4310_v29, %v10297_v31  ;;  %v4307_v5 = vmul.f32 %v8368_v46, %v4264_v33  ;;  %v4138_v35 = vpop.xlane.xlu1 %4137  ;;  %7507 = vmatprep.subr.bf16.mxu1 %v4401_v13  ;;  %7607 = vmatprep.subr.bf16.mxu0 %v4401_v13 }
 0x606   : > { %v8370_v56 = vpop.eup %8369  ;;  %8371 = vrcp.f32 %v4138_v35  ;;  %7508 = vmatpush3.bf16.msra.mxu1 %v4401_v13  ;;  %7608 = vmatpush3.bf16.msra.mxu0 %v4401_v13 }
 0x607   : > { %4376 = vst.msk [vmem:[%s10240_s20 + $0x38] sm:$0xff] %vm4368_vm7, %v4359_v15  ;;  %v4356_v9 = vadd.f32 %v4307_v5, %v10301_v24  ;;  %v4308_v55 = vmul.f32 %v8370_v56, %v4266_v57  ;;  %7509 = vmatprep.subr.bf16.mxu1 %v4402_v62  ;;  %7609 = vmatprep.subr.bf16.mxu0 %v4402_v62  ;;  %v4140_v42 = vpop.xlane.xlu0 %4139 }
 0x608   : > { %8373 = vrcp.f32 %v4140_v42 }
 0x609   : > { %4373 = vst.msk [vmem:[%s10240_s20 + $0x20] sm:$0xff] %vm4368_vm7, %v4356_v9  ;;  %v4357_v31 = vadd.f32 %v4308_v55, %v10315_v41  ;;  %v4134_v14 = vpop.xlane.xlu1 %4133 }
 0x60a   : > { %8375 = vrcp.f32 %v4134_v14  ;;  %7510 = vmatpush3.bf16.msra.mxu1 %v4402_v62  ;;  %7610 = vmatpush3.bf16.msra.mxu0 %v4402_v62 }
 0x60b   : > { %4374 = vst.msk [vmem:[%s10240_s20 + $0x28] sm:$0xff] %vm4368_vm7, %v4357_v31  ;;  %v4136_v4 = vpop.xlane.xlu0 %4135 }
 0x60c   : > { %8377 = vrcp.f32 %v4136_v4  ;;  %v4391_v50 = vld [vmem:[%s10240_s20 + $0x30] sm:$0xff] }
 0x60d   : > { %v4276_v24 = vpop.xlane.xlu1 %4275  ;;  %8379 = vrcp.f32 %v10468_v60 }
 0x60e   : > { %v4392_v41 = vld [vmem:[%s10240_s20 + $0x38] sm:$0xff]  ;;  %8381 = vrcp.f32 %v10473_v59 }
 0x60f   : > { %v4278_v58 = vpop.xlane.xlu0 %4277  ;;  %v4404_v60 = vpack.c.bf16 %v4392_v41, %v4391_v50  ;;  %8383 = vrcp.f32 %v10542_v37 }
 0x610   : > { %v8372_v45 = vpop.eup %8371  ;;  %v4389_v1 = vld [vmem:[%s10240_s20 + $0x20] sm:$0xff]  ;;  %8385 = vrcp.f32 %v10547_v16 }
 0x611   : > { %v4313_v39 = vmul.f32 %v8372_v45, %v4276_v24  ;;  %v4272_v47 = vpop.xlane.xlu1 %4271 }
 0x612   : > { %v8374_v19 = vpop.eup %8373  ;;  %v4390_v27 = vld [vmem:[%s10240_s20 + $0x28] sm:$0xff] }
 0x613   : > { %v4362_v52 = vadd.f32 %v4313_v39, %v10350_v49  ;;  %v4314_v61 = vmul.f32 %v8374_v19, %v4278_v58  ;;  %v4274_v21 = vpop.xlane.xlu0 %4273  ;;  %v4403_v3 = vpack.c.bf16 %v4390_v27, %v4389_v1 }
 0x614   : > { %v8376_v34 = vpop.eup %8375 }
 0x615   : > { %4379 = vst.msk [vmem:[%s10240_s20 + $0x50] sm:$0xff] %vm4368_vm7, %v4362_v52  ;;  %v4363_v44 = vadd.f32 %v4314_v61, %v10359_v17  ;;  %v4311_v28 = vmul.f32 %v8376_v34, %v4272_v47  ;;  %v4146_v36 = vpop.xlane.xlu1 %4145  ;;  %7511 = vmatprep.subr.bf16.mxu1 %v4403_v3  ;;  %7611 = vmatprep.subr.bf16.mxu0 %v4403_v3 }
 0x616   : > { %v8378_v18 = vpop.eup %8377  ;;  %7512 = vmatpush3.bf16.msra.mxu1 %v4403_v3  ;;  %7612 = vmatpush3.bf16.msra.mxu0 %v4403_v3 }
 0x617   : > { %4380 = vst.msk [vmem:[%s10240_s20 + $0x58] sm:$0xff] %vm4368_vm7, %v4363_v44  ;;  %v4360_v49 = vadd.f32 %v4311_v28, %v10363_v20  ;;  %v4312_v59 = vmul.f32 %v8378_v18, %v4274_v21  ;;  %7513 = vmatprep.subr.bf16.mxu1 %v4404_v60  ;;  %7613 = vmatprep.subr.bf16.mxu0 %v4404_v60  ;;  %v4148_v17 = vpop.xlane.xlu0 %4147  ;;  %v8380_v20 = vpop.eup %8379  ;;  %v4698_v44 = vld [vmem:[%s11420_s18] sm:$0xf]  ;;  %v8092_v28 = vld [vmem:[%s11419_s9 + $0x8] sm:$0xff]   ;;  %s11450_s18 = sld [smem:[#allocation34_spill]] }
 0x618   : > { %v8382_v16 = vpop.eup %8381  ;;  %v4697_v18 = vld [vmem:[%s11421_s8] sm:$0x3]  ;;  %s11452_s8 = sld [smem:[#allocation35_spill]] }
 0x619   : > { %4377 = vst.msk [vmem:[%s10240_s20 + $0x40] sm:$0xff] %vm4368_vm7, %v4360_v49  ;;  %v4361_v23 = vadd.f32 %v4312_v59, %v10365_v10  ;;  %v4142_v38 = vpop.xlane.xlu1 %4141  ;;  %v8384_v22 = vpop.eup %8383  ;;  %v11423_v49 = vld [vmem:[#allocation41_spill] sm:$0xff] }
 0x61a   : > { %8387 = vrcp.f32 %v4142_v38  ;;  %7514 = vmatpush3.bf16.msra.mxu1 %v4404_v60  ;;  %7614 = vmatpush3.bf16.msra.mxu0 %v4404_v60  ;;  %v8386_v12 = vpop.eup %8385  ;;  %v4724_v60 = vsel %vm1461_vm2, %v4698_v44, 0  ;;  %v8094_v59 = vld [vmem:[%s11419_s9 + $0x18] sm:$0xff]   ;;  %v11426_v38 = vld [vmem:[#allocation44_spill] sm:$0xff] }
 0x61b   : > { %4378 = vst.msk [vmem:[%s10240_s20 + $0x48] sm:$0xff] %vm4368_vm7, %v4361_v23  ;;  %v4144_v37 = vpop.xlane.xlu0 %4143  ;;  %v8096_v23 = vld [vmem:[%s11419_s9 + $0x28] sm:$0xff]  }
 0x61c   : > { %8389 = vrcp.f32 %v4144_v37  ;;  %v4395_v9 = vld [vmem:[%s10240_s20 + $0x50] sm:$0xff] }
 0x61d   : > { %v3212_v43 = vpop.xlane.xlu1 %3211  ;;  %8391 = vrcp.f32 %v4146_v36  ;;  %v8093_v36 = vld [vmem:[%s11419_s9 + $0x10] sm:$0xff]  }
 0x61e   : > { %v3245_v33 = vmul.f32 %v8380_v20, %v3212_v43  ;;  %8393 = vrcp.f32 %v4148_v17  ;;  %v4396_v46 = vld [vmem:[%s10240_s20 + $0x58] sm:$0xff]  ;;  %v8095_v17 = vld [vmem:[%s11419_s9 + $0x20] sm:$0xff]   ;;  %v8097_v37 = vld [vmem:[%s11419_s9 + $0x30] sm:$0xff]  }
 0x61f   : > { %v3214_v51 = vpop.xlane.xlu0 %3213  ;;  %v4406_v42 = vpack.c.bf16 %v4396_v46, %v4395_v9  ;;  %v11429_v20 = vld [vmem:[#allocation46_spill] sm:$0xff] }
 0x620   : > { %v3294_v10 = vadd.f32 %v3245_v33, %v10386_v48  ;;  %v3246_v30 = vmul.f32 %v8382_v16, %v3214_v51  ;;  %v4393_v57 = vld [vmem:[%s10240_s20 + $0x40] sm:$0xff]  ;;  %v11431_v51 = vld [vmem:[#allocation49_spill] sm:$0xff] }
 0x621   : > { %v4200_v2 = vpop.xlane.xlu1 %4199  ;;  %v10676_v43 = vld [vmem:[%s11427_s23] ss:$0 sm:$0xff]  ;;  %s11453_s23 = sld [smem:[#allocation32_spill]] }
 0x622   : > { %3311 = vst.msk [vmem:[%s10240_s20 + $0x70] sm:$0xff] %vm3296_vm5, %v3294_v10  ;;  %v3295_v11 = vadd.f32 %v3246_v30, %v10390_v7  ;;  %v4233_v29 = vmul.f32 %v8384_v22, %v4200_v2  ;;  %v4394_v13 = vld [vmem:[%s10240_s20 + $0x48] sm:$0xff]  ;;  %v11434_v46 = vld [vmem:[#allocation50_spill] sm:$0xff] }
 0x623   : > { %v4202_v15 = vpop.xlane.xlu0 %4201  ;;  %v4405_v5 = vpack.c.bf16 %v4394_v13, %v4393_v57  ;;  %v4848_v57 = vsel %vm1325_vm0, %v4697_v18, 0  ;;  %v11433_v13 = vld [vmem:[#allocation51_spill] sm:$0xff]  ;;  %v11438_v9 = vld [vmem:[#allocation54_spill] sm:$0xff] }
 0x624   : > { %v8388_v35 = vpop.eup %8387  ;;  %3312 = vst.msk [vmem:[%s10240_s20 + $0x78] sm:$0xff] %vm3296_vm5, %v3295_v11  ;;  %v4333_v62 = vadd.f32 %v4233_v29, %v10386_v48  ;;  %v4234_v56 = vmul.f32 %v8386_v12, %v4202_v15  ;;  %v11432_v11 = vld [vmem:[#allocation48_spill] sm:$0xff]  ;;  %v11435_v12 = vld [vmem:[#allocation53_spill] sm:$0xff] }
 0x625   : > { %v4280_v55 = vpop.xlane.xlu1 %4279  ;;  %7515 = vmatprep.subr.bf16.mxu1 %v4405_v5  ;;  %7615 = vmatprep.subr.bf16.mxu0 %v4405_v5  ;;  %v11436_v15 = vld [vmem:[#allocation52_spill] sm:$0xff] }
 0x626   : > { %v8390_v31 = vpop.eup %8389  ;;  %4350 = vst.msk [vmem:[%s10240_s20 + $0x70] sm:$0xff] %vm4335_vm6, %v4333_v62  ;;  %v4334_v14 = vadd.f32 %v4234_v56, %v10390_v7  ;;  %v4315_v4 = vmul.f32 %v8388_v35, %v4280_v55  ;;  %7516 = vmatpush3.bf16.msra.mxu1 %v4405_v5  ;;  %7616 = vmatpush3.bf16.msra.mxu0 %v4405_v5  ;;  %v11437_v5 = vld [vmem:[#allocation55_spill] sm:$0xff] }
 0x627   : > { %7517 = vmatprep.subr.bf16.mxu1 %v4406_v42  ;;  %7617 = vmatprep.subr.bf16.mxu0 %v4406_v42  ;;  %v4282_v24 = vpop.xlane.xlu0 %4281  ;;  %v8392_v39 = vpop.eup %8391 }
 0x628   : > { %4351 = vst.msk [vmem:[%s10240_s20 + $0x78] sm:$0xff] %vm4335_vm6, %v4334_v14  ;;  %v4364_v58 = vadd.f32 %v4315_v4, %v10395_v6  ;;  %v4316_v45 = vmul.f32 %v8390_v31, %v4282_v24  ;;  %v8394_v27 = vpop.eup %8393 }
 0x629   : > { %v4284_v47 = vpop.xlane.xlu1 %4283 }
 0x62a   : > { %4381 = vst.msk [vmem:[%s10240_s20 + $0x60] sm:$0xff] %vm4368_vm7, %v4364_v58  ;;  %v4365_v19 = vadd.f32 %v4316_v45, %v10400_v0  ;;  %v4317_v1 = vmul.f32 %v8392_v39, %v4284_v47  ;;  %7518 = vmatpush3.bf16.msra.mxu1 %v4406_v42  ;;  %7618 = vmatpush3.bf16.msra.mxu0 %v4406_v42 }
 0x62b   : > { %v4286_v41 = vpop.xlane.xlu0 %4285 }
 0x62c   : > { %4382 = vst.msk [vmem:[%s10240_s20 + $0x68] sm:$0xff] %vm4368_vm7, %v4365_v19  ;;  %v4366_v6 = vadd.f32 %v4317_v1, %v10386_v48  ;;  %v4318_v52 = vmul.f32 %v8394_v27, %v4286_v41 }
 0x62e   : > { %4383 = vst.msk [vmem:[%s10240_s20 + $0x70] sm:$0xff] %vm4368_vm7, %v4366_v6  ;;  %v4367_v61 = vadd.f32 %v4318_v52, %v10390_v7  ;;  %v11422_v7 = vld [vmem:[#allocation40_spill] sm:$0xff] }
 0x630   : > { %4384 = vst.msk [vmem:[%s10240_s20 + $0x78] sm:$0xff] %vm4368_vm7, %v4367_v61 }
 0x631   : > { %v4397_v0 = vld [vmem:[%s10240_s20 + $0x60] sm:$0xff] }
 0x633   : > { %v4398_v21 = vld [vmem:[%s10240_s20 + $0x68] sm:$0xff] }
 0x634   : > { %v4407_v3 = vpack.c.bf16 %v4398_v21, %v4397_v0 }
 0x635   : > { %v4399_v34 = vld [vmem:[%s10240_s20 + $0x70] sm:$0xff] }
 0x636   : > { %7519 = vmatprep.subr.bf16.mxu1 %v4407_v3  ;;  %7619 = vmatprep.subr.bf16.mxu0 %v4407_v3 }
 0x637   : > { %7520 = vmatpush3.bf16.msra.mxu1 %v4407_v3  ;;  %7620 = vmatpush3.bf16.msra.mxu0 %v4407_v3  ;;  %v4400_v50 = vld [vmem:[%s10240_s20 + $0x78] sm:$0xff]  ;;  %s11444_s20 = sld [smem:[#allocation29_spill]] }
 0x638   : > { %v4408_v48 = vpack.c.bf16 %v4400_v50, %v4399_v34 }
 0x63a   : > { %7521 = vmatprep.subr.bf16.mxu1 %v4408_v48  ;;  %7621 = vmatprep.subr.bf16.mxu0 %v4408_v48 }
 0x63b   : > { %7522 = vmatpush3.bf16.msra.mxu1 %v4408_v48  ;;  %7622 = vmatpush3.bf16.msra.mxu0 %v4408_v48 }
 0x63c   : > { %7639 = vmatprep.subr.bf16.mxu0 %v11422_v7  ;;  %7949 = vmatprep.subr.msk.bf16.mxu1 %vm1461_vm2, %v4698_v44 }
 0x63e   : > { %7524 = vmatmul.mubr.bf16.vlgmr.msra.gmra.mrb[64].mxu1 %v10440_v26  ;;  %7624 = vmatmul.mubr.bf16.vlgmr.msra.gmra.mrb[120].mxu0 %v8092_v28  ;;  %v11424_v26 = vld [vmem:[#allocation42_spill] sm:$0xff] }
 0x63f   : > { %7640 = vmatpush3.bf16.msra.mxu0 %v11422_v7  ;;  %7527 = vmatprep.mubr.bf16.mxu1 %v10476_v53  ;;  %v11425_v53 = vld [vmem:[#allocation43_spill] sm:$0xff] }
 0x640   : > { %7641 = vmatprep.subr.bf16.mxu0 %v11423_v49  ;;  %7627 = vmatprep.mubr.bf16.mxu0 %v8093_v36 }
 0x641   : > { %7572 = vmatpush3.bf16.msra.mxu1 %v4724_v60 }
 0x642   : > { %7950 = vmatprep.subr.msk.bf16.mxu1 %vm1325_vm0, %v4697_v18  ;;  %v6749_v18 = vld [vmem:[%s11439_s11] ss:$0 sm:$0xff]  ;;  %s11462_s11 = sld [smem:[#allocation37_spill]] }
 0x643   : > { %7642 = vmatpush3.bf16.msra.mxu0 %v11423_v49 }
 0x644   : > { %7643 = vmatprep.subr.bf16.mxu0 %v11424_v26 }
 0x646   : > { %7528 = vmatmul.mubr.bf16.gmra.mrb[68].mxu1 %v10482_v8  ;;  %7628 = vmatmul.mubr.bf16.gmra.mrb[124].mxu0 %v8094_v59  ;;  %v11428_v8 = vld [vmem:[#allocation45_spill] sm:$0xff] }
 0x647   : > { %7644 = vmatpush3.bf16.msra.mxu0 %v11424_v26  ;;  %7531 = vmatprep.mubr.bf16.mxu1 %v10489_v63  ;;  %v8098_v63 = vld [vmem:[%s11419_s9 + $0x38] sm:$0xff]  }
 0x648   : > { %7645 = vmatprep.subr.bf16.mxu0 %v11425_v53  ;;  %7631 = vmatprep.mubr.bf16.mxu0 %v8095_v17 }
 0x64b   : > { %7646 = vmatpush3.bf16.msra.mxu0 %v11425_v53 }
 0x64c   : > { %7647 = vmatprep.subr.bf16.mxu0 %v11426_v38 }
 0x64e   : > { %7532 = vmatmul.mubr.bf16.gmra.mrb[72].mxu1 %v10492_v40  ;;  %7632 = vmatmul.mubr.bf16.gmra.mrb[128].mxu0 %v8096_v23  ;;  %v11430_v40 = vld [vmem:[#allocation47_spill] sm:$0xff] }
 0x64f   : > { %7648 = vmatpush3.bf16.msra.mxu0 %v11426_v38  ;;  %7535 = vmatprep.mubr.bf16.mxu1 %v10498_v32  ;;  %v7557_v32 = vpop.f32.mrb[104].mxu0 }
 0x650   : > { %7649 = vmatprep.subr.bf16.mxu0 %v11428_v8  ;;  %7635 = vmatprep.mubr.bf16.mxu0 %v8097_v37  ;;  %v4635_v33 = vadd.f32 %v7557_v32, %v10676_v43  ;;  %v4626_v16 = vpop.f32.mrb[105].mxu0 }
 0x651   : > { %v4627_v10 = vadd.f32 %v10676_v43, %v4626_v16 }
 0x653   : > { %7650 = vmatpush3.bf16.msra.mxu0 %v11428_v8 }
 0x654   : > { %7651 = vmatprep.subr.bf16.mxu0 %v11429_v20 }
 0x656   : > { %7536 = vmatmul.mubr.bf16.gmra.mrb[76].mxu1 %v10501_v54  ;;  %7636 = vmatmul.mubr.bf16.gmra.mrb[132].mxu0 %v8098_v63  ;;  %v7558_v54 = vpop.f32.mrb[106].mxu0 }
 0x657   : > { %7652 = vmatpush3.bf16.msra.mxu0 %v11429_v20  ;;  %7655 = vmatprep.mubr.bf16.mxu0 %v10521_v25  ;;  %v4638_v30 = vadd.f32 %v7558_v54, %v10676_v43  ;;  %v4629_v22 = vpop.f32.mrb[107].mxu0 }
 0x658   : > { %7653 = vmatprep.subr.bf16.mxu0 %v11430_v40  ;;  %v4630_v25 = vadd.f32 %v10676_v43, %v4629_v22 }
 0x659   : > { %v4690_v2 = vpack.c.bf16 %v4638_v30, %v4635_v33 }
 0x65a   : > { %v4689_v29 = vpack.c.bf16 %v4630_v25, %v4627_v10 }
 0x65b   : > { %7654 = vmatpush3.bf16.msra.mxu0 %v11430_v40 }
 0x65c   : > { %7707 = vmatprep.subr.bf16.mxu0 %v11431_v51  ;;  %7573 = vmatprep.mubr.msk.bf16.mxu1 %vm1436_vm3, %v4689_v29 }
 0x65e   : > { %7656 = vmatmul.mubr.bf16.vlgmr.msra.gmra.mrb[136].mxu0 %v8092_v28  ;;  %7574 = vmatmul.mubr.msk.bf16.vlgmr.msra.gmra.mrb[80].mxu1 %vm1436_vm3, %v4690_v2 }
 0x65f   : > { %7708 = vmatpush3.bf16.msra.mxu0 %v11431_v51  ;;  %7659 = vmatprep.mubr.bf16.mxu0 %v8093_v36 }
 0x660   : > { %7709 = vmatprep.subr.bf16.mxu0 %v11432_v11  ;;  %7590 = vmatpush3.bf16.msra.mxu1 %v4848_v57 }
 0x663   : > { %7710 = vmatpush3.bf16.msra.mxu0 %v11432_v11  ;;  %v7561_v35 = vpop.f32.mrb[108].mxu0 }
 0x664   : > { %7711 = vmatprep.subr.bf16.mxu0 %v11433_v13  ;;  %v4651_v62 = vadd.f32 %v7561_v35, %v10676_v43  ;;  %v4642_v56 = vpop.f32.mrb[109].mxu0 }
 0x665   : > { %v4643_v55 = vadd.f32 %v10676_v43, %v4642_v56  ;;  %v7562_v42 = vpop.f32.mrb[110].mxu0 }
 0x666   : > { %7660 = vmatmul.mubr.bf16.gmra.mrb[140].mxu0 %v8094_v59  ;;  %v4654_v31 = vadd.f32 %v7562_v42, %v10676_v43  ;;  %v4645_v14 = vpop.f32.mrb[111].mxu0 }
 0x667   : > { %7712 = vmatpush3.bf16.msra.mxu0 %v11433_v13  ;;  %7663 = vmatprep.mubr.bf16.mxu0 %v8095_v17  ;;  %v4646_v4 = vadd.f32 %v10676_v43, %v4645_v14 }
 0x668   : > { %7713 = vmatprep.subr.bf16.mxu0 %v11434_v46  ;;  %v4692_v24 = vpack.c.bf16 %v4654_v31, %v4651_v62 }
 0x669   : > { %v4691_v58 = vpack.c.bf16 %v4646_v4, %v4643_v55  ;;  %v8099_v4 = vld [vmem:[%s11440_s10] sm:$0xff]  }
 0x66b   : > { %7714 = vmatpush3.bf16.msra.mxu0 %v11434_v46  ;;  %v7565_v45 = vpop.f32.mrb[112].mxu0  ;;  %7577 = vmatprep.mubr.msk.bf16.mxu1 %vm1436_vm3, %v4691_v58  ;;  %v10735_v58 = vld [vmem:[%s11440_s10 + $0x10] sm:$0xff]  }
 0x66c   : > { %7715 = vmatprep.subr.bf16.mxu0 %v11435_v12  ;;  %v4667_v39 = vadd.f32 %v7565_v45, %v10676_v43  ;;  %v4658_v47 = vpop.f32.mrb[113].mxu0  ;;  %7578 = vmatmul.mubr.msk.bf16.gmra.mrb[84].mxu1 %vm1436_vm3, %v4692_v24  ;;  %v10731_v24 = vld [vmem:[%s11440_s10 + $0x8] sm:$0xff]   ;;  %v10738_v45 = vld [vmem:[%s11440_s10 + $0x18] sm:$0xff]  }
 0x66d   : > { %v4659_v19 = vadd.f32 %v10676_v43, %v4658_v47  ;;  %v7566_v1 = vpop.f32.mrb[114].mxu0  ;;  %v10747_v47 = vld [vmem:[%s11440_s10 + $0x28] sm:$0xff]  }
 0x66e   : > { %7664 = vmatmul.mubr.bf16.gmra.mrb[144].mxu0 %v8096_v23  ;;  %v4670_v27 = vadd.f32 %v7566_v1, %v10676_v43  ;;  %v4661_v41 = vpop.f32.mrb[115].mxu0  ;;  %v10754_v1 = vld [vmem:[%s11440_s10 + $0x38] sm:$0xff]  }
 0x66f   : > { %7716 = vmatpush3.bf16.msra.mxu0 %v11435_v12  ;;  %7667 = vmatprep.mubr.bf16.mxu0 %v8097_v37  ;;  %v4662_v6 = vadd.f32 %v10676_v43, %v4661_v41  ;;  %v6792_v41 = vld [vmem:[%s11441_s6] ss:$0 sm:$0xff]  ;;  %s11128_s6 = scalar_lea.vmem %s11462_s11, %s9189_s21 }
 0x670   : > { %7717 = vmatprep.subr.bf16.mxu0 %v11436_v15  ;;  %v4694_v52 = vpack.c.bf16 %v4670_v27, %v4667_v39  ;;  %v10743_v39 = vld [vmem:[%s11440_s10 + $0x20] sm:$0xff]  }
 0x671   : > { %v4693_v61 = vpack.c.bf16 %v4662_v6, %v4659_v19  ;;  %v10751_v19 = vld [vmem:[%s11440_s10 + $0x30] sm:$0xff]  }
 0x673   : > { %7718 = vmatpush3.bf16.msra.mxu0 %v11436_v15  ;;  %v7569_v0 = vpop.f32.mrb[116].mxu0  ;;  %7581 = vmatprep.mubr.msk.bf16.mxu1 %vm1436_vm3, %v4693_v61  ;;  %v5355_v61 = vld [vmem:[%s11442_s28] sm:$0xf] }
 0x674   : > { %7719 = vmatprep.subr.bf16.mxu0 %v11437_v5  ;;  %v4683_v21 = vadd.f32 %v7569_v0, %v10676_v43  ;;  %v4674_v3 = vpop.f32.mrb[117].mxu0  ;;  %7582 = vmatmul.mubr.msk.bf16.gmra.mrb[88].mxu1 %vm1436_vm3, %v4694_v52  ;;  %v5354_v0 = vld [vmem:[%s11443_s7] sm:$0x3] }
 0x675   : > { %v4675_v34 = vadd.f32 %v10676_v43, %v4674_v3  ;;  %v7570_v50 = vpop.f32.mrb[118].mxu0  ;;  %7951 = vmatprep.subr.msk.bf16.mxu1 %vm1461_vm2, %v5355_v61 }
 0x676   : > { %7668 = vmatmul.mubr.bf16.gmra.mrb[148].mxu0 %v8098_v63  ;;  %v4686_v48 = vadd.f32 %v7570_v50, %v10676_v43  ;;  %v4677_v44 = vpop.f32.mrb[119].mxu0 }
 0x677   : > { %7720 = vmatpush3.bf16.msra.mxu0 %v11437_v5  ;;  %v4678_v28 = vadd.f32 %v10676_v43, %v4677_v44  ;;  %7723 = vmatprep.mubr.bf16.mxu0 %v8099_v4 }
 0x678   : > { %7721 = vmatprep.subr.bf16.mxu0 %v11438_v9  ;;  %v4696_v7 = vpack.c.bf16 %v4686_v48, %v4683_v21 }
 0x679   : > { %v4695_v36 = vpack.c.bf16 %v4678_v28, %v4675_v34  ;;  %v5381_v34 = vsel %vm1461_vm2, %v5355_v61, 0 }
 0x67b   : > { %7722 = vmatpush3.bf16.msra.mxu0 %v11438_v9  ;;  %7585 = vmatprep.mubr.msk.bf16.mxu1 %vm1436_vm3, %v4695_v36 }
 0x67c   : > { %7586 = vmatmul.mubr.msk.bf16.gmra.mrb[92].mxu1 %vm1436_vm3, %v4696_v7 }
 0x67e   : > { %7724 = vmatmul.mubr.bf16.vlgmr.msra.gmra.mrb[152].mxu0 %v10731_v24 }
 0x67f   : > { %7727 = vmatprep.mubr.bf16.mxu0 %v10735_v58 }
 0x686   : > { %7728 = vmatmul.mubr.bf16.gmra.mrb[156].mxu0 %v10738_v45 }
 0x687   : > { %7731 = vmatprep.mubr.bf16.mxu0 %v10743_v39 }
 0x68e   : > { %7732 = vmatmul.mubr.bf16.gmra.mrb[160].mxu0 %v10747_v47 }
 0x68f   : > { %7735 = vmatprep.mubr.bf16.mxu0 %v10751_v19 }
 0x696   : > { %7736 = vmatmul.mubr.bf16.gmra.mrb[164].mxu0 %v10754_v1 }
 0x697   : > { %7755 = vmatprep.mubr.bf16.mxu0 %v8099_v4 }
 0x711   : > { %v7525_v60 = vpop.f32.mrb[64].mxu1  ;;  %v7625_v27 = vpop.f32.mrb[120].mxu0 }
 0x712   : > { %v4514_v49 = vpop.f32.mrb[65].mxu1  ;;  %v4523_v26 = vadd.f32 %v7525_v60, %v6749_v18  ;;  %v10759_v6 = vadd.f32 %v7625_v27, %v6792_v41  ;;  %v5171_v52 = vpop.f32.mrb[121].mxu0 }
 0x713   : > { %v7526_v59 = vpop.f32.mrb[66].mxu1  ;;  %v4515_v23 = vadd.f32 %v6749_v18, %v4514_v49  ;;  %v10763_v21 = vadd.f32 %v6792_v41, %v5171_v52  ;;  %v7626_v3 = vpop.f32.mrb[122].mxu0 }
 0x714   : > { %v4526_v17 = vadd.f32 %v7526_v59, %v6749_v18  ;;  %v4517_v53 = vpop.f32.mrb[67].mxu1  ;;  %v10767_v50 = vadd.f32 %v7626_v3, %v6792_v41  ;;  %v5174_v48 = vpop.f32.mrb[123].mxu0 }
 0x715   : > { %v4518_v38 = vadd.f32 %v6749_v18, %v4517_v53  ;;  %v10769_v44 = vadd.f32 %v6792_v41, %v5174_v48 }
 0x716   : > { %v4578_v37 = vpack.c.bf16 %v4526_v17, %v4523_v26  ;;  %v5235_v7 = vpack.c.bf16 %v10767_v50, %v10759_v6 }
 0x717   : > { %v4577_v8 = vpack.c.bf16 %v4518_v38, %v4515_v23 }
 0x719   : > { %v7529_v63 = vpop.f32.mrb[68].mxu1  ;;  %7591 = vmatprep.mubr.msk.bf16.mxu1 %vm1300_vm1, %v4577_v8  ;;  %v7629_v28 = vpop.f32.mrb[124].mxu0 }
 0x71a   : > { %v4530_v20 = vpop.f32.mrb[69].mxu1  ;;  %7592 = vmatmul.mubr.msk.bf16.vlgmr.msra.gmra.mrb[80].mxu1 %vm1300_vm1, %v4578_v37  ;;  %v4539_v43 = vadd.f32 %v7529_v63, %v6749_v18  ;;  %v10774_v36 = vadd.f32 %v7629_v28, %v6792_v41  ;;  %v5187_v60 = vpop.f32.mrb[125].mxu0 }
 0x71b   : > { %v7530_v40 = vpop.f32.mrb[70].mxu1  ;;  %v4531_v16 = vadd.f32 %v6749_v18, %v4530_v20  ;;  %7672 = vmatpush3.bf16.msra.mxu1 %v5381_v34  ;;  %v10778_v49 = vadd.f32 %v6792_v41, %v5187_v60  ;;  %v7630_v59 = vpop.f32.mrb[126].mxu0  ;;  %v5505_v34 = vsel %vm1325_vm0, %v5354_v0, 0 }
 0x71c   : > { %v4542_v32 = vadd.f32 %v7530_v40, %v6749_v18  ;;  %v4533_v33 = vpop.f32.mrb[71].mxu1  ;;  %7952 = vmatprep.subr.msk.bf16.mxu1 %vm1325_vm0, %v5354_v0  ;;  %v10780_v26 = vadd.f32 %v7630_v59, %v6792_v41  ;;  %v5190_v17 = vpop.f32.mrb[127].mxu0 }
 0x71d   : > { %v4534_v51 = vadd.f32 %v6749_v18, %v4533_v33  ;;  %v10782_v53 = vadd.f32 %v6792_v41, %v5190_v17 }
 0x71e   : > { %v4580_v10 = vpack.c.bf16 %v4542_v32, %v4539_v43  ;;  %v5237_v38 = vpack.c.bf16 %v10780_v26, %v10774_v36  ;;  %v10873_v36 = vld [vmem:[%s9205_s0] sm:$0xff] }
 0x71f   : > { %v4579_v54 = vpack.c.bf16 %v4534_v51, %v4531_v16  ;;  %v5236_v63 = vpack.c.bf16 %v10782_v53, %v10778_v49 }
 0x721   : > { %v7533_v30 = vpop.f32.mrb[72].mxu1  ;;  %7595 = vmatprep.mubr.msk.bf16.mxu1 %vm1300_vm1, %v4579_v54  ;;  %v7633_v23 = vpop.f32.mrb[128].mxu0 }
 0x722   : > { %v4546_v22 = vpop.f32.mrb[73].mxu1  ;;  %7596 = vmatmul.mubr.msk.bf16.gmra.mrb[84].mxu1 %vm1300_vm1, %v4580_v10  ;;  %v4555_v2 = vadd.f32 %v7533_v30, %v6749_v18  ;;  %v10786_v37 = vadd.f32 %v7633_v23, %v6792_v41  ;;  %v5203_v8 = vpop.f32.mrb[129].mxu0 }
 0x723   : > { %v7534_v25 = vpop.f32.mrb[74].mxu1  ;;  %v4547_v57 = vadd.f32 %v6749_v18, %v4546_v22  ;;  %v10790_v20 = vadd.f32 %v6792_v41, %v5203_v8  ;;  %v7634_v40 = vpop.f32.mrb[130].mxu0 }
 0x724   : > { %v4558_v11 = vadd.f32 %v7534_v25, %v6749_v18  ;;  %v4549_v29 = vpop.f32.mrb[75].mxu1  ;;  %v10792_v43 = vadd.f32 %v7634_v40, %v6792_v41  ;;  %v5206_v32 = vpop.f32.mrb[131].mxu0 }
 0x725   : > { %v4550_v13 = vadd.f32 %v6749_v18, %v4549_v29  ;;  %v10794_v33 = vadd.f32 %v6792_v41, %v5206_v32 }
 0x726   : > { %v4582_v46 = vpack.c.bf16 %v4558_v11, %v4555_v2  ;;  %v5239_v51 = vpack.c.bf16 %v10792_v43, %v10786_v37  ;;  %v6801_v2 = vld [vmem:[%s11444_s20] ss:$0 sm:$0xff]  ;;  %v10901_v43 = vld [vmem:[%s9205_s0 + $0x28] sm:$0xff] }
 0x727   : > { %v4581_v12 = vpack.c.bf16 %v4550_v13, %v4547_v57  ;;  %v5238_v30 = vpack.c.bf16 %v10794_v33, %v10790_v20 }
 0x729   : > { %v7537_v15 = vpop.f32.mrb[76].mxu1  ;;  %7599 = vmatprep.mubr.msk.bf16.mxu1 %vm1300_vm1, %v4581_v12  ;;  %v7637_v16 = vpop.f32.mrb[132].mxu0 }
 0x72a   : > { %v4562_v5 = vpop.f32.mrb[77].mxu1  ;;  %7600 = vmatmul.mubr.msk.bf16.gmra.mrb[88].mxu1 %vm1300_vm1, %v4582_v46  ;;  %v4571_v62 = vadd.f32 %v7537_v15, %v6749_v18  ;;  %v10798_v10 = vadd.f32 %v7637_v16, %v6792_v41  ;;  %v5219_v54 = vpop.f32.mrb[133].mxu0 }
 0x72b   : > { %v7538_v35 = vpop.f32.mrb[78].mxu1  ;;  %v4563_v55 = vadd.f32 %v6749_v18, %v4562_v5  ;;  %v10802_v22 = vadd.f32 %v6792_v41, %v5219_v54  ;;  %v7638_v25 = vpop.f32.mrb[134].mxu0 }
 0x72c   : > { %v4574_v56 = vadd.f32 %v7538_v35, %v6749_v18  ;;  %v4565_v9 = vpop.f32.mrb[79].mxu1  ;;  %v10805_v11 = vadd.f32 %v7638_v25, %v6792_v41  ;;  %v5222_v29 = vpop.f32.mrb[135].mxu0 }
 0x72d   : > { %v4566_v42 = vadd.f32 %v6749_v18, %v4565_v9  ;;  %v5234_v18 = vpack.c.bf16 %v10769_v44, %v10763_v21  ;;  %v10807_v57 = vadd.f32 %v6792_v41, %v5222_v29 }
 0x72e   : > { %v4584_v31 = vpack.c.bf16 %v4574_v56, %v4571_v62  ;;  %v5241_v46 = vpack.c.bf16 %v10805_v11, %v10798_v10  ;;  %v10921_v10 = vld [vmem:[%s9205_s0 + $0x48] sm:$0xff] }
 0x72f   : > { %v4583_v14 = vpack.c.bf16 %v4566_v42, %v4563_v55  ;;  %v5240_v5 = vpack.c.bf16 %v10807_v57, %v10802_v22 }
 0x731   : > { %7603 = vmatprep.mubr.msk.bf16.mxu1 %vm1300_vm1, %v4583_v14  ;;  %v7657_v13 = vpop.f32.mrb[136].mxu0 }
 0x732   : > { %7604 = vmatmul.mubr.msk.bf16.gmra.mrb[92].mxu1 %vm1300_vm1, %v4584_v31  ;;  %v5292_v12 = vadd.f32 %v7657_v13, %v6801_v2  ;;  %v5283_v15 = vpop.f32.mrb[137].mxu0 }
 0x733   : > { %v5284_v35 = vadd.f32 %v6801_v2, %v5283_v15  ;;  %v7658_v62 = vpop.f32.mrb[138].mxu0 }
 0x734   : > { %v5295_v56 = vadd.f32 %v7658_v62, %v6801_v2  ;;  %v5286_v9 = vpop.f32.mrb[139].mxu0 }
 0x735   : > { %v5287_v55 = vadd.f32 %v6801_v2, %v5286_v9 }
 0x736   : > { %v5347_v31 = vpack.c.bf16 %v5295_v56, %v5292_v12 }
 0x737   : > { %v5346_v27 = vpack.c.bf16 %v5287_v55, %v5284_v35  ;;  %v10818_v55 = vld [vmem:[%s11445_s2] ss:$0 sm:$0xff] }
 0x739   : > { %v7661_v42 = vpop.f32.mrb[140].mxu0  ;;  %7673 = vmatprep.mubr.msk.bf16.mxu1 %vm1436_vm3, %v5346_v27 }
 0x73a   : > { %v5308_v14 = vadd.f32 %v7661_v42, %v6801_v2  ;;  %v5299_v4 = vpop.f32.mrb[141].mxu0  ;;  %7674 = vmatmul.mubr.msk.bf16.vlgmr.msra.gmra.mrb[96].mxu1 %vm1436_vm3, %v5347_v31 }
 0x73b   : > { %v5300_v41 = vadd.f32 %v6801_v2, %v5299_v4  ;;  %v7662_v52 = vpop.f32.mrb[142].mxu0  ;;  %7690 = vmatpush3.bf16.msra.mxu1 %v5505_v34 }
 0x73c   : > { %v5311_v61 = vadd.f32 %v7662_v52, %v6801_v2  ;;  %v5302_v3 = vpop.f32.mrb[143].mxu0 }
 0x73d   : > { %v5303_v48 = vadd.f32 %v6801_v2, %v5302_v3 }
 0x73e   : > { %v5349_v60 = vpack.c.bf16 %v5311_v61, %v5308_v14 }
 0x73f   : > { %v5348_v23 = vpack.c.bf16 %v5303_v48, %v5300_v41 }
 0x741   : > { %v7665_v28 = vpop.f32.mrb[144].mxu0  ;;  %7677 = vmatprep.mubr.msk.bf16.mxu1 %vm1436_vm3, %v5348_v23 }
 0x742   : > { %v5324_v59 = vadd.f32 %v7665_v28, %v6801_v2  ;;  %v5315_v17 = vpop.f32.mrb[145].mxu0  ;;  %7678 = vmatmul.mubr.msk.bf16.gmra.mrb[100].mxu1 %vm1436_vm3, %v5349_v60 }
 0x743   : > { %v5316_v8 = vadd.f32 %v6801_v2, %v5315_v17  ;;  %v7666_v40 = vpop.f32.mrb[146].mxu0 }
 0x744   : > { %v5327_v32 = vadd.f32 %v7666_v40, %v6801_v2  ;;  %v5318_v16 = vpop.f32.mrb[147].mxu0 }
 0x745   : > { %v5319_v54 = vadd.f32 %v6801_v2, %v5318_v16 }
 0x746   : > { %v5351_v25 = vpack.c.bf16 %v5327_v32, %v5324_v59 }
 0x747   : > { %v5350_v12 = vpack.c.bf16 %v5319_v54, %v5316_v8 }
 0x749   : > { %v7669_v0 = vpop.f32.mrb[148].mxu0  ;;  %7681 = vmatprep.mubr.msk.bf16.mxu1 %vm1436_vm3, %v5350_v12 }
 0x74a   : > { %v5340_v29 = vadd.f32 %v7669_v0, %v6801_v2  ;;  %v5331_v13 = vpop.f32.mrb[149].mxu0  ;;  %7682 = vmatmul.mubr.msk.bf16.gmra.mrb[104].mxu1 %vm1436_vm3, %v5351_v25 }
 0x74b   : > { %v5332_v15 = vadd.f32 %v6801_v2, %v5331_v13  ;;  %v7670_v35 = vpop.f32.mrb[150].mxu0 }
 0x74c   : > { %v5343_v62 = vadd.f32 %v7670_v35, %v6801_v2  ;;  %v5334_v56 = vpop.f32.mrb[151].mxu0 }
 0x74d   : > { %v5335_v9 = vadd.f32 %v6801_v2, %v5334_v56  ;;  %v6036_v2 = vld [vmem:[%s8980_s4] sm:$0xf] }
 0x74e   : > { %v5353_v42 = vpack.c.bf16 %v5343_v62, %v5340_v29  ;;  %7953 = vmatprep.subr.msk.bf16.mxu1 %vm1461_vm2, %v6036_v2 }
 0x74f   : > { %v5352_v31 = vpack.c.bf16 %v5335_v9, %v5332_v15 }
 0x751   : > { %7685 = vmatprep.mubr.msk.bf16.mxu1 %vm1436_vm3, %v5352_v31 }
 0x752   : > { %7686 = vmatmul.mubr.msk.bf16.gmra.mrb[108].mxu1 %vm1436_vm3, %v5353_v42 }
 0x753   : > { %7691 = vmatprep.mubr.msk.bf16.mxu1 %vm1300_vm1, %v5234_v18 }
 0x75a   : > { %7692 = vmatmul.mubr.msk.bf16.vlgmr.msra.gmra.mrb[96].mxu1 %vm1300_vm1, %v5235_v7 }
 0x75b   : > { %7695 = vmatprep.mubr.msk.bf16.mxu1 %vm1300_vm1, %v5236_v63 }
 0x762   : > { %7696 = vmatmul.mubr.msk.bf16.gmra.mrb[100].mxu1 %vm1300_vm1, %v5237_v38  ;;  %v10877_v38 = vld [vmem:[%s9205_s0 + $0x8] sm:$0xff] }
 0x763   : > { %7699 = vmatprep.mubr.msk.bf16.mxu1 %vm1300_vm1, %v5238_v30 }
 0x76a   : > { %7700 = vmatmul.mubr.msk.bf16.gmra.mrb[104].mxu1 %vm1300_vm1, %v5239_v51 }
 0x76b   : > { %7703 = vmatprep.mubr.msk.bf16.mxu1 %vm1300_vm1, %v5240_v5 }
 0x772   : > { %7704 = vmatmul.mubr.msk.bf16.gmra.mrb[108].mxu1 %vm1300_vm1, %v5241_v46 }
 0x7ed   : > { %v7593_v14 = vpop.f32.mrb[80].mxu1 }
 0x7ee   : > { %v4956_v4 = vadd.f32 %v7593_v14, %v10818_v55  ;;  %v4884_v27 = vpop.f32.mrb[81].mxu1 }
 0x7ef   : > { %v4954_v41 = vadd.f32 %v10818_v55, %v4884_v27  ;;  %v7594_v52 = vpop.f32.mrb[82].mxu1 }
 0x7f0   : > { %v6778_v61 = vmul.f32 -1.442695, %v4956_v4  ;;  %v4957_v3 = vadd.f32 %v7594_v52, %v10818_v55  ;;  %v4887_v34 = vpop.f32.mrb[83].mxu1 }
 0x7f1   : > { %v6776_v48 = vmul.f32 -1.442695, %v4954_v41  ;;  %v4955_v28 = vadd.f32 %v10818_v55, %v4887_v34 }
 0x7f2   : > { %8395 = vpow2.f32 %v6778_v61  ;;  %v6779_v60 = vmul.f32 -1.442695, %v4957_v3 }
 0x7f3   : > { %8397 = vpow2.f32 %v6776_v48  ;;  %v6777_v59 = vmul.f32 -1.442695, %v4955_v28  ;;  %v6062_v48 = vsel %vm1461_vm2, %v6036_v2, 0 }
 0x7f4   : > { %8399 = vpow2.f32 %v6779_v60  ;;  %7772 = vmatpush3.bf16.msra.mxu1 %v6062_v48 }
 0x7f5   : > { %8401 = vpow2.f32 %v6777_v59  ;;  %v7597_v17 = vpop.f32.mrb[84].mxu1 }
 0x7f6   : > { %v4960_v23 = vadd.f32 %v7597_v17, %v10818_v55  ;;  %v4900_v8 = vpop.f32.mrb[85].mxu1 }
 0x7f7   : > { %v4958_v40 = vadd.f32 %v10818_v55, %v4900_v8  ;;  %v7598_v32 = vpop.f32.mrb[86].mxu1 }
 0x7f8   : > { %v6782_v16 = vmul.f32 -1.442695, %v4960_v23  ;;  %v4961_v54 = vadd.f32 %v7598_v32, %v10818_v55  ;;  %v4903_v0 = vpop.f32.mrb[87].mxu1 }
 0x7f9   : > { %v6780_v29 = vmul.f32 -1.442695, %v4958_v40  ;;  %v4959_v13 = vadd.f32 %v10818_v55, %v4903_v0 }
 0x7fa   : > { %8403 = vpow2.f32 %v6782_v16  ;;  %v6783_v25 = vmul.f32 -1.442695, %v4961_v54 }
 0x7fb   : > { %8405 = vpow2.f32 %v6780_v29  ;;  %v6781_v12 = vmul.f32 -1.442695, %v4959_v13 }
 0x7fc   : > { %v8396_v15 = vpop.eup %8395  ;;  %8407 = vpow2.f32 %v6783_v25 }
 0x7fd   : > { %v8398_v35 = vpop.eup %8397  ;;  %v5020_v62 = vadd.f32 1.0, %v8396_v15  ;;  %8409 = vpow2.f32 %v6781_v12  ;;  %v7601_v56 = vpop.f32.mrb[88].mxu1 }
 0x7fe   : > { %v8400_v9 = vpop.eup %8399  ;;  %v5018_v31 = vadd.f32 1.0, %v8398_v35  ;;  %v4964_v14 = vadd.f32 %v7601_v56, %v10818_v55  ;;  %v4916_v4 = vpop.f32.mrb[89].mxu1 }
 0x7ff   : > { %v8402_v27 = vpop.eup %8401  ;;  %8411 = vrcp.f32 %v5020_v62  ;;  %v5021_v41 = vadd.f32 1.0, %v8400_v9  ;;  %v4962_v42 = vadd.f32 %v10818_v55, %v4916_v4  ;;  %v7602_v52 = vpop.f32.mrb[90].mxu1  ;;  %v10861_v9 = vld [vmem:[%s9205_s0 + $0x10] sm:$0xff] }
 0x800   : > { %8413 = vrcp.f32 %v5018_v31  ;;  %v5019_v61 = vadd.f32 1.0, %v8402_v27  ;;  %v6786_v21 = vmul.f32 -1.442695, %v4964_v14  ;;  %v4965_v44 = vadd.f32 %v7602_v52, %v10818_v55  ;;  %v4919_v18 = vpop.f32.mrb[91].mxu1 }
 0x801   : > { %8415 = vrcp.f32 %v5021_v41  ;;  %v6784_v3 = vmul.f32 -1.442695, %v4962_v42  ;;  %v4963_v34 = vadd.f32 %v10818_v55, %v4919_v18 }
 0x802   : > { %8417 = vrcp.f32 %v5019_v61  ;;  %v6787_v28 = vmul.f32 -1.442695, %v4965_v44 }
 0x803   : > { %8419 = vpow2.f32 %v6786_v21  ;;  %v6785_v60 = vmul.f32 -1.442695, %v4963_v34 }
 0x804   : > { %v8404_v59 = vpop.eup %8403  ;;  %8421 = vpow2.f32 %v6784_v3 }
 0x805   : > { %v8406_v17 = vpop.eup %8405  ;;  %v5024_v23 = vadd.f32 1.0, %v8404_v59  ;;  %8423 = vpow2.f32 %v6787_v28  ;;  %v7605_v2 = vpop.f32.mrb[92].mxu1  ;;  %v10885_v28 = vld [vmem:[%s9205_s0 + $0x30] sm:$0xff]  ;;  %v10889_v59 = vld [vmem:[%s9205_s0 + $0x38] sm:$0xff] }
 0x806   : > { %v8408_v8 = vpop.eup %8407  ;;  %v5022_v40 = vadd.f32 1.0, %v8406_v17  ;;  %8425 = vpow2.f32 %v6785_v60  ;;  %v4968_v32 = vadd.f32 %v7605_v2, %v10818_v55  ;;  %v4932_v6 = vpop.f32.mrb[93].mxu1  ;;  %v10897_v2 = vld [vmem:[%s9205_s0 + $0x20] sm:$0xff] }
 0x807   : > { %v8410_v50 = vpop.eup %8409  ;;  %8427 = vrcp.f32 %v5024_v23  ;;  %v5025_v7 = vadd.f32 1.0, %v8408_v8  ;;  %v4966_v16 = vadd.f32 %v10818_v55, %v4932_v6  ;;  %v7606_v54 = vpop.f32.mrb[94].mxu1 }
 0x808   : > { %8429 = vrcp.f32 %v5022_v40  ;;  %v5023_v49 = vadd.f32 1.0, %v8410_v50  ;;  %v6790_v53 = vmul.f32 -1.442695, %v4968_v32  ;;  %v4969_v63 = vadd.f32 %v7606_v54, %v10818_v55  ;;  %v4935_v0 = vpop.f32.mrb[95].mxu1 }
 0x809   : > { %v8412_v29 = vpop.eup %8411  ;;  %8431 = vrcp.f32 %v5025_v7  ;;  %v6788_v13 = vmul.f32 -1.442695, %v4966_v16  ;;  %v4967_v25 = vadd.f32 %v10818_v55, %v4935_v0  ;;  %v10865_v55 = vld [vmem:[%s9205_s0 + $0x18] sm:$0xff] }
 0x80a   : > { %v8414_v12 = vpop.eup %8413  ;;  %8433 = vrcp.f32 %v5023_v49  ;;  %v6791_v15 = vmul.f32 -1.442695, %v4969_v63  ;;  %v5741_v31 = vmul.f32 %v10861_v9, %v8412_v29  ;;  %v10909_v63 = vld [vmem:[%s9205_s0 + $0x50] sm:$0xff]  ;;  %v10913_v29 = vld [vmem:[%s9205_s0 + $0x58] sm:$0xff] }
 0x80b   : > { %v8416_v35 = vpop.eup %8415  ;;  %8435 = vpow2.f32 %v6790_v53  ;;  %v6789_v62 = vmul.f32 -1.442695, %v4967_v25  ;;  %v5739_v26 = vmul.f32 %v10873_v36, %v8414_v12  ;;  %v10917_v25 = vld [vmem:[%s9205_s0 + $0x40] sm:$0xff] }
 0x80c   : > { %v8418_v56 = vpop.eup %8417  ;;  %8437 = vpow2.f32 %v6788_v13  ;;  %v5742_v14 = vmul.f32 %v10865_v55, %v8416_v35 }
 0x80d   : > { %v8420_v4 = vpop.eup %8419  ;;  %8439 = vpow2.f32 %v6791_v15  ;;  %v5740_v27 = vmul.f32 %v10877_v38, %v8418_v56 }
 0x80e   : > { %v8422_v41 = vpop.eup %8421  ;;  %v5028_v42 = vadd.f32 1.0, %v8420_v4  ;;  %8441 = vpow2.f32 %v6789_v62  ;;  %v5756_v52 = vpack.c.bf16 %v5742_v14, %v5741_v31  ;;  %v10925_v14 = vld [vmem:[%s9205_s0 + $0x70] sm:$0xff] }
 0x80f   : > { %v8424_v61 = vpop.eup %8423  ;;  %v5026_v21 = vadd.f32 1.0, %v8422_v41  ;;  %v5755_v44 = vpack.c.bf16 %v5740_v27, %v5739_v26  ;;  %11446 = vst [vmem:[#allocation73_spill] sm:$0xff] %v10925_v14  ;;  %v10929_v26 = vld [vmem:[%s9205_s0 + $0x78] sm:$0xff]  ;;  %v10933_v41 = vld [vmem:[%s9205_s0 + $0x60] sm:$0xff] }
 0x810   : > { %v8426_v20 = vpop.eup %8425  ;;  %8443 = vrcp.f32 %v5028_v42  ;;  %v5029_v33 = vadd.f32 1.0, %v8424_v61  ;;  %11447 = vst [vmem:[#allocation76_spill] sm:$0xff] %v10929_v26  ;;  %11448 = vst [vmem:[#allocation75_spill] sm:$0xff] %v10933_v41 }
 0x811   : > { %v8428_v30 = vpop.eup %8427  ;;  %8445 = vrcp.f32 %v5026_v21  ;;  %v5027_v18 = vadd.f32 1.0, %v8426_v20  ;;  %7739 = vmatprep.subr.bf16.mxu0 %v5755_v44  ;;  %v6835_v20 = vld [vmem:[%s11450_s18] ss:$0 sm:$0xff] }
 0x812   : > { %v8430_v3 = vpop.eup %8429  ;;  %8447 = vrcp.f32 %v5029_v33  ;;  %7740 = vmatpush3.bf16.msra.mxu0 %v5755_v44  ;;  %v5745_v60 = vmul.f32 %v10885_v28, %v8428_v30  ;;  %v7725_v33 = vpop.f32.mrb[152].mxu0 }
 0x813   : > { %v8432_v34 = vpop.eup %8431  ;;  %8449 = vrcp.f32 %v5027_v18  ;;  %7741 = vmatprep.subr.bf16.mxu0 %v5756_v52  ;;  %v5743_v37 = vmul.f32 %v10897_v2, %v8430_v3  ;;  %v10948_v30 = vadd.f32 %v7725_v33, %v6835_v20  ;;  %v5852_v18 = vpop.f32.mrb[153].mxu0 }
 0x814   : > { %v8434_v48 = vpop.eup %8433  ;;  %v5746_v17 = vmul.f32 %v10889_v59, %v8432_v34  ;;  %v10950_v3 = vadd.f32 %v6835_v20, %v5852_v18 }
 0x815   : > { %v8436_v23 = vpop.eup %8435  ;;  %v5744_v51 = vmul.f32 %v10901_v43, %v8434_v48 }
 0x816   : > { %v8438_v8 = vpop.eup %8437  ;;  %v5032_v40 = vadd.f32 1.0, %v8436_v23  ;;  %7742 = vmatpush3.bf16.msra.mxu0 %v5756_v52  ;;  %v5758_v32 = vpack.c.bf16 %v5746_v17, %v5745_v60  ;;  %v10937_v52 = vld [vmem:[%s9205_s0 + $0x68] sm:$0xff]  ;;  %s11451_s0 = sld [smem:[#allocation36_spill]] }
 0x817   : > { %v8440_v6 = vpop.eup %8439  ;;  %v5030_v50 = vadd.f32 1.0, %v8438_v8  ;;  %v5757_v7 = vpack.c.bf16 %v5744_v51, %v5743_v37  ;;  %11449 = vst [vmem:[#allocation78_spill] sm:$0xff] %v10937_v52 }
 0x818   : > { %v8442_v22 = vpop.eup %8441  ;;  %8451 = vrcp.f32 %v5032_v40  ;;  %v5033_v57 = vadd.f32 1.0, %v8440_v6 }
 0x819   : > { %8453 = vrcp.f32 %v5030_v50  ;;  %v5031_v5 = vadd.f32 1.0, %v8442_v22  ;;  %7743 = vmatprep.subr.bf16.mxu0 %v5757_v7 }
 0x81a   : > { %v8444_v16 = vpop.eup %8443  ;;  %8455 = vrcp.f32 %v5033_v57  ;;  %7744 = vmatpush3.bf16.msra.mxu0 %v5757_v7 }
 0x81b   : > { %v8446_v54 = vpop.eup %8445  ;;  %8457 = vrcp.f32 %v5031_v5  ;;  %7745 = vmatprep.subr.bf16.mxu0 %v5758_v32  ;;  %v5749_v0 = vmul.f32 %v10909_v63, %v8444_v16 }
 0x81c   : > { %v8448_v49 = vpop.eup %8447  ;;  %v5747_v12 = vmul.f32 %v10917_v25, %v8446_v54 }
 0x81d   : > { %v8450_v53 = vpop.eup %8449  ;;  %v5750_v13 = vmul.f32 %v10913_v29, %v8448_v49 }
 0x81e   : > { %7746 = vmatpush3.bf16.msra.mxu0 %v5758_v32  ;;  %v5748_v11 = vmul.f32 %v10921_v10, %v8450_v53 }
 0x81f   : > { %v5760_v46 = vpack.c.bf16 %v5750_v13, %v5749_v0 }
 0x820   : > { %v5759_v15 = vpack.c.bf16 %v5748_v11, %v5747_v12 }
 0x822   : > { %v8452_v35 = vpop.eup %8451  ;;  %7747 = vmatprep.subr.bf16.mxu0 %v5759_v15 }
 0x823   : > { %v8454_v62 = vpop.eup %8453  ;;  %7748 = vmatpush3.bf16.msra.mxu0 %v5759_v15  ;;  %v5753_v4 = vmul.f32 %v10925_v14, %v8452_v35 }
 0x824   : > { %v8456_v56 = vpop.eup %8455  ;;  %7749 = vmatprep.subr.bf16.mxu0 %v5760_v46  ;;  %v5751_v42 = vmul.f32 %v10933_v41, %v8454_v62 }
 0x825   : > { %v8458_v31 = vpop.eup %8457  ;;  %v5754_v27 = vmul.f32 %v10929_v26, %v8456_v56 }
 0x826   : > { %v5752_v61 = vmul.f32 %v10937_v52, %v8458_v31  ;;  %v6035_v31 = vld [vmem:[%s11451_s0] sm:$0xf] }
 0x827   : > { %7750 = vmatpush3.bf16.msra.mxu0 %v5760_v46  ;;  %v5762_v21 = vpack.c.bf16 %v5754_v27, %v5753_v4  ;;  %7954 = vmatprep.subr.msk.bf16.mxu1 %vm1461_vm2, %v6035_v31  ;;  %v6186_v8 = vsel %vm1461_vm2, %v6035_v31, 0 }
 0x828   : > { %v5761_v44 = vpack.c.bf16 %v5752_v61, %v5751_v42 }
 0x82a   : > { %7751 = vmatprep.subr.bf16.mxu0 %v5761_v44 }
 0x82b   : > { %7752 = vmatpush3.bf16.msra.mxu0 %v5761_v44 }
 0x82c   : > { %7753 = vmatprep.subr.bf16.mxu0 %v5762_v21 }
 0x82d   : > { %v10998_v4 = vpop.f32.mrb[96].mxu1 }
 0x82e   : > { %v11000_v27 = vpop.f32.mrb[97].mxu1 }
 0x82f   : > { %7754 = vmatpush3.bf16.msra.mxu0 %v5762_v21  ;;  %v11002_v42 = vpop.f32.mrb[98].mxu1 }
 0x830   : > { %v11004_v61 = vpop.f32.mrb[99].mxu1 }
 0x832   : > { %7756 = vmatmul.mubr.bf16.vlgmr.msra.gmra.mrb[168].mxu0 %v10731_v24  ;;  %v7726_v24 = vpop.f32.mrb[154].mxu0 }
 0x833   : > { %7759 = vmatprep.mubr.bf16.mxu0 %v10735_v58  ;;  %v10952_v34 = vadd.f32 %v7726_v24, %v6835_v20  ;;  %v5855_v58 = vpop.f32.mrb[155].mxu0 }
 0x835   : > { %v11006_v21 = vpop.f32.mrb[100].mxu1 }
 0x836   : > { %v11008_v44 = vpop.f32.mrb[101].mxu1 }
 0x83a   : > { %7760 = vmatmul.mubr.bf16.gmra.mrb[172].mxu0 %v10738_v45  ;;  %v10954_v45 = vadd.f32 %v6835_v20, %v5855_v58 }
 0x83b   : > { %7763 = vmatprep.mubr.bf16.mxu0 %v10743_v39 }
 0x842   : > { %7764 = vmatmul.mubr.bf16.gmra.mrb[176].mxu0 %v10747_v47 }
 0x843   : > { %7767 = vmatprep.mubr.bf16.mxu0 %v10751_v19  ;;  %v7729_v19 = vpop.f32.mrb[156].mxu0 }
 0x844   : > { %v5868_v48 = vpop.f32.mrb[157].mxu0 }
 0x845   : > { %v10962_v60 = vadd.f32 %v6835_v20, %v5868_v48  ;;  %v7730_v17 = vpop.f32.mrb[158].mxu0 }
 0x846   : > { %v10964_v23 = vadd.f32 %v7730_v17, %v6835_v20  ;;  %v5871_v37 = vpop.f32.mrb[159].mxu0 }
 0x847   : > { %v10966_v51 = vadd.f32 %v6835_v20, %v5871_v37  ;;  %v7733_v32 = vpop.f32.mrb[160].mxu0 }
 0x848   : > { %v10972_v6 = vadd.f32 %v7733_v32, %v6835_v20  ;;  %v5884_v50 = vpop.f32.mrb[161].mxu0 }
 0x849   : > { %v10974_v7 = vadd.f32 %v6835_v20, %v5884_v50  ;;  %v7734_v22 = vpop.f32.mrb[162].mxu0 }
 0x84a   : > { %7768 = vmatmul.mubr.bf16.gmra.mrb[180].mxu0 %v10754_v1  ;;  %v10960_v1 = vadd.f32 %v7729_v19, %v6835_v20  ;;  %v10976_v57 = vadd.f32 %v7734_v22, %v6835_v20  ;;  %v5887_v5 = vpop.f32.mrb[163].mxu0  ;;  %v6844_v22 = vld [vmem:[%s11452_s8] ss:$0 sm:$0xff] }
 0x84b   : > { %v10978_v16 = vadd.f32 %v6835_v20, %v5887_v5  ;;  %v7737_v53 = vpop.f32.mrb[164].mxu0 }
 0x84c   : > { %v10984_v0 = vadd.f32 %v7737_v53, %v6835_v20  ;;  %v5900_v13 = vpop.f32.mrb[165].mxu0 }
 0x84d   : > { %v10986_v12 = vadd.f32 %v6835_v20, %v5900_v13  ;;  %v7738_v11 = vpop.f32.mrb[166].mxu0 }
 0x84e   : > { %v10988_v46 = vadd.f32 %v7738_v11, %v6835_v20  ;;  %v5903_v15 = vpop.f32.mrb[167].mxu0 }
 0x84f   : > { %v10990_v35 = vadd.f32 %v6835_v20, %v5903_v15  ;;  %v11010_v20 = vpop.f32.mrb[102].mxu1 }
 0x850   : > { %v11012_v33 = vpop.f32.mrb[103].mxu1 }
 0x851   : > { %v11014_v18 = vpop.f32.mrb[104].mxu1 }
 0x852   : > { %v11016_v24 = vpop.f32.mrb[105].mxu1 }
 0x853   : > { %v11018_v58 = vpop.f32.mrb[106].mxu1 }
 0x854   : > { %v11020_v19 = vpop.f32.mrb[107].mxu1 }
 0x855   : > { %v11022_v48 = vpop.f32.mrb[108].mxu1 }
 0x856   : > { %v11024_v17 = vpop.f32.mrb[109].mxu1 }
 0x857   : > { %v11026_v37 = vpop.f32.mrb[110].mxu1 }
 0x858   : > { %v11028_v32 = vpop.f32.mrb[111].mxu1 }
 0x905   : > { %v7757_v50 = vpop.f32.mrb[168].mxu0 }
 0x906   : > { %v5964_v5 = vpop.f32.mrb[169].mxu0  ;;  %v5973_v13 = vadd.f32 %v7757_v50, %v6844_v22 }
 0x907   : > { %v7758_v53 = vpop.f32.mrb[170].mxu0  ;;  %v5965_v62 = vadd.f32 %v6844_v22, %v5964_v5 }
 0x908   : > { %v5976_v11 = vadd.f32 %v7758_v53, %v6844_v22  ;;  %v5967_v15 = vpop.f32.mrb[171].mxu0 }
 0x909   : > { %v5968_v56 = vadd.f32 %v6844_v22, %v5967_v15 }
 0x90a   : > { %v6028_v54 = vpack.c.bf16 %v5976_v11, %v5973_v13 }
 0x90b   : > { %v6027_v49 = vpack.c.bf16 %v5968_v56, %v5965_v62 }
 0x90d   : > { %v7761_v40 = vpop.f32.mrb[172].mxu0  ;;  %7773 = vmatprep.mubr.msk.bf16.mxu1 %vm1436_vm3, %v6027_v49 }
 0x90e   : > { %v5980_v39 = vpop.f32.mrb[173].mxu0  ;;  %7774 = vmatmul.mubr.msk.bf16.vlgmr.msra.gmra.mrb[112].mxu1 %vm1436_vm3, %v6028_v54  ;;  %v5989_v52 = vadd.f32 %v7761_v40, %v6844_v22 }
 0x90f   : > { %v7762_v47 = vpop.f32.mrb[174].mxu0  ;;  %7790 = vmatpush3.bf16.msra.mxu1 %v6186_v8  ;;  %v5981_v50 = vadd.f32 %v6844_v22, %v5980_v39 }
 0x910   : > { %v5992_v26 = vadd.f32 %v7762_v47, %v6844_v22  ;;  %v5983_v41 = vpop.f32.mrb[175].mxu0 }
 0x911   : > { %v5984_v53 = vadd.f32 %v6844_v22, %v5983_v41 }
 0x912   : > { %v6030_v14 = vpack.c.bf16 %v5992_v26, %v5989_v52 }
 0x913   : > { %v6029_v5 = vpack.c.bf16 %v5984_v53, %v5981_v50 }
 0x915   : > { %v7765_v15 = vpop.f32.mrb[176].mxu0  ;;  %7777 = vmatprep.mubr.msk.bf16.mxu1 %vm1436_vm3, %v6029_v5 }
 0x916   : > { %v5996_v62 = vpop.f32.mrb[177].mxu0  ;;  %7778 = vmatmul.mubr.msk.bf16.gmra.mrb[116].mxu1 %vm1436_vm3, %v6030_v14  ;;  %v6005_v49 = vadd.f32 %v7765_v15, %v6844_v22 }
 0x917   : > { %v7766_v56 = vpop.f32.mrb[178].mxu0  ;;  %v5997_v54 = vadd.f32 %v6844_v22, %v5996_v62  ;;  %v11454_v62 = vpack.c.bf16 %v10954_v45, %v10950_v3  ;;  %v11458_v3 = vpack.c.bf16 %v10978_v16, %v10974_v7  ;;  %v11461_v45 = vpack.c.bf16 %v10988_v46, %v10984_v0 }
 0x918   : > { %v6008_v31 = vadd.f32 %v7766_v56, %v6844_v22  ;;  %v5999_v13 = vpop.f32.mrb[179].mxu0  ;;  %v11455_v56 = vpack.c.bf16 %v10952_v34, %v10948_v30  ;;  %v11459_v30 = vpack.c.bf16 %v10976_v57, %v10972_v6  ;;  %v11460_v34 = vpack.c.bf16 %v10990_v35, %v10986_v12 }
 0x919   : > { %v6000_v11 = vadd.f32 %v6844_v22, %v5999_v13 }
 0x91a   : > { %v6032_v8 = vpack.c.bf16 %v6008_v31, %v6005_v49  ;;  %v11456_v49 = vpack.c.bf16 %v10966_v51, %v10962_v60 }
 0x91b   : > { %v6031_v40 = vpack.c.bf16 %v6000_v11, %v5997_v54 }
 0x91d   : > { %v7769_v47 = vpop.f32.mrb[180].mxu0  ;;  %7781 = vmatprep.mubr.msk.bf16.mxu1 %vm1436_vm3, %v6031_v40 }
 0x91e   : > { %v6012_v41 = vpop.f32.mrb[181].mxu0  ;;  %7782 = vmatmul.mubr.msk.bf16.gmra.mrb[120].mxu1 %vm1436_vm3, %v6032_v8  ;;  %v6021_v52 = vadd.f32 %v7769_v47, %v6844_v22 }
 0x91f   : > { %v7770_v26 = vpop.f32.mrb[182].mxu0  ;;  %v6013_v14 = vadd.f32 %v6844_v22, %v6012_v41 }
 0x920   : > { %v6024_v39 = vadd.f32 %v7770_v26, %v6844_v22  ;;  %v6015_v50 = vpop.f32.mrb[183].mxu0 }
 0x921   : > { %v6016_v53 = vadd.f32 %v6844_v22, %v6015_v50  ;;  %v11457_v22 = vpack.c.bf16 %v10964_v23, %v10960_v1  ;;  %v11073_v1 = vld [vmem:[%s11453_s23] ss:$0 sm:$0xff] }
 0x922   : > { %v6034_v5 = vpack.c.bf16 %v6024_v39, %v6021_v52  ;;  %v5613_v60 = vadd.f32 %v10998_v4, %v11073_v1  ;;  %v5611_v23 = vadd.f32 %v11073_v1, %v11000_v27  ;;  %v5614_v51 = vadd.f32 %v11002_v42, %v11073_v1 }
 0x923   : > { %v6033_v15 = vpack.c.bf16 %v6016_v53, %v6013_v14  ;;  %v5612_v6 = vadd.f32 %v11073_v1, %v11004_v61  ;;  %v5617_v12 = vadd.f32 %v11006_v21, %v11073_v1  ;;  %v5615_v46 = vadd.f32 %v11073_v1, %v11008_v44 }
 0x924   : > { %v6821_v7 = vmul.f32 -1.442695, %v5613_v60  ;;  %v6819_v57 = vmul.f32 -1.442695, %v5611_v23  ;;  %v6822_v16 = vmul.f32 -1.442695, %v5614_v51  ;;  %v5618_v35 = vadd.f32 %v11010_v20, %v11073_v1 }
 0x925   : > { %7785 = vmatprep.mubr.msk.bf16.mxu1 %vm1436_vm3, %v6033_v15  ;;  %v6820_v0 = vmul.f32 -1.442695, %v5612_v6  ;;  %v6825_v4 = vmul.f32 -1.442695, %v5617_v12  ;;  %v6823_v27 = vmul.f32 -1.442695, %v5615_v46  ;;  %v5616_v61 = vadd.f32 %v11073_v1, %v11012_v33 }
 0x926   : > { %7786 = vmatmul.mubr.msk.bf16.gmra.mrb[124].mxu1 %vm1436_vm3, %v6034_v5  ;;  %8459 = vpow2.f32 %v6821_v7  ;;  %v6826_v42 = vmul.f32 -1.442695, %v5618_v35  ;;  %v5621_v8 = vadd.f32 %v11014_v18, %v11073_v1  ;;  %v5619_v40 = vadd.f32 %v11073_v1, %v11016_v24 }
 0x927   : > { %7791 = vmatprep.mubr.msk.bf16.mxu1 %vm1436_vm3, %v11454_v62  ;;  %8461 = vpow2.f32 %v6819_v57  ;;  %v6824_v54 = vmul.f32 -1.442695, %v5616_v61  ;;  %v5622_v41 = vadd.f32 %v11018_v58, %v11073_v1  ;;  %v5620_v26 = vadd.f32 %v11073_v1, %v11020_v19 }
 0x928   : > { %8463 = vpow2.f32 %v6822_v16  ;;  %v6829_v52 = vmul.f32 -1.442695, %v5621_v8  ;;  %v6827_v50 = vmul.f32 -1.442695, %v5619_v40  ;;  %v5625_v58 = vadd.f32 %v11022_v48, %v11073_v1 }
 0x929   : > { %8465 = vpow2.f32 %v6820_v0  ;;  %v6830_v14 = vmul.f32 -1.442695, %v5622_v41  ;;  %v6828_v24 = vmul.f32 -1.442695, %v5620_v26 }
 0x92a   : > { %8467 = vpow2.f32 %v6825_v4  ;;  %v6833_v62 = vmul.f32 -1.442695, %v5625_v58 }
 0x92b   : > { %8469 = vpow2.f32 %v6823_v27 }
 0x92c   : > { %8471 = vpow2.f32 %v6826_v42 }
 0x92d   : > { %8473 = vpow2.f32 %v6824_v54 }
 0x92e   : > { %7792 = vmatmul.mubr.msk.bf16.vlgmr.msra.gmra.mrb[112].mxu1 %vm1436_vm3, %v11455_v56  ;;  %v11102_v56 = vld [vmem:[%s8985_s30] ss:$0 sm:$0xff] }
 0x92f   : > { %7795 = vmatprep.mubr.msk.bf16.mxu1 %vm1436_vm3, %v11456_v49  ;;  %v5623_v49 = vadd.f32 %v11073_v1, %v11024_v17 }
 0x930   : > { %v8460_v31 = vpop.eup %8459 }
 0x931   : > { %v8462_v21 = vpop.eup %8461  ;;  %v5677_v44 = vadd.f32 1.0, %v8460_v31  ;;  %v6831_v7 = vmul.f32 -1.442695, %v5623_v49 }
 0x932   : > { %v8464_v13 = vpop.eup %8463  ;;  %v5675_v20 = vadd.f32 1.0, %v8462_v21 }
 0x933   : > { %v8466_v11 = vpop.eup %8465  ;;  %v5678_v47 = vadd.f32 1.0, %v8464_v13  ;;  %8475 = vrcp.f32 %v5677_v44 }
 0x934   : > { %v5676_v33 = vadd.f32 1.0, %v8466_v11  ;;  %v8468_v39 = vpop.eup %8467  ;;  %8477 = vrcp.f32 %v5675_v20 }
 0x935   : > { %v8470_v18 = vpop.eup %8469  ;;  %8479 = vrcp.f32 %v5678_v47  ;;  %v5681_v5 = vadd.f32 1.0, %v8468_v39 }
 0x936   : > { %7796 = vmatmul.mubr.msk.bf16.gmra.mrb[116].mxu1 %vm1436_vm3, %v11457_v22  ;;  %v8472_v53 = vpop.eup %8471  ;;  %8481 = vrcp.f32 %v5676_v33  ;;  %v5679_v15 = vadd.f32 1.0, %v8470_v18 }
 0x937   : > { %7799 = vmatprep.mubr.msk.bf16.mxu1 %vm1436_vm3, %v11458_v3  ;;  %8483 = vpow2.f32 %v6829_v52  ;;  %v5682_v19 = vadd.f32 1.0, %v8472_v53  ;;  %v8474_v22 = vpop.eup %8473  ;;  %v5626_v3 = vadd.f32 %v11026_v37, %v11073_v1 }
 0x938   : > { %8485 = vpow2.f32 %v6827_v50  ;;  %v5680_v35 = vadd.f32 1.0, %v8474_v22 }
 0x939   : > { %8487 = vpow2.f32 %v6830_v14  ;;  %v6834_v0 = vmul.f32 -1.442695, %v5626_v3 }
 0x93a   : > { %8489 = vpow2.f32 %v6828_v24 }
 0x93b   : > { %8491 = vrcp.f32 %v5681_v5 }
 0x93c   : > { %8493 = vrcp.f32 %v5679_v15 }
 0x93d   : > { %8495 = vrcp.f32 %v5682_v19 }
 0x93e   : > { %7800 = vmatmul.mubr.msk.bf16.gmra.mrb[120].mxu1 %vm1436_vm3, %v11459_v30  ;;  %v8476_v30 = vpop.eup %8475  ;;  %8497 = vpow2.f32 %v6833_v62 }
 0x93f   : > { %7803 = vmatprep.mubr.msk.bf16.mxu1 %vm1436_vm3, %v11460_v34  ;;  %v5624_v34 = vadd.f32 %v11073_v1, %v11028_v32  ;;  %v8478_v23 = vpop.eup %8477  ;;  %v6326_v8 = vmul.f32 %v10861_v9, %v8476_v30  ;;  %v6342_v26 = vsub.f32 1.0, %v8476_v30 }
 0x940   : > { %v8480_v17 = vpop.eup %8479  ;;  %v6324_v50 = vmul.f32 %v10873_v36, %v8478_v23  ;;  %v6340_v14 = vsub.f32 1.0, %v8478_v23 }
 0x941   : > { %v8482_v16 = vpop.eup %8481  ;;  %v6832_v1 = vmul.f32 -1.442695, %v5624_v34  ;;  %v6343_v58 = vsub.f32 1.0, %v8480_v17  ;;  %v6327_v15 = vmul.f32 %v10865_v55, %v8480_v17 }
 0x942   : > { %v8484_v32 = vpop.eup %8483  ;;  %v6341_v62 = vsub.f32 1.0, %v8482_v16  ;;  %v6325_v36 = vmul.f32 %v10877_v38, %v8482_v16 }
 0x943   : > { %v8486_v46 = vpop.eup %8485  ;;  %v5685_v20 = vadd.f32 1.0, %v8484_v32 }
 0x944   : > { %v8488_v4 = vpop.eup %8487  ;;  %v5683_v33 = vadd.f32 1.0, %v8486_v46 }
 0x945   : > { %v8490_v27 = vpop.eup %8489  ;;  %v5686_v18 = vadd.f32 1.0, %v8488_v4 }
 0x946   : > { %7804 = vmatmul.mubr.msk.bf16.gmra.mrb[124].mxu1 %vm1436_vm3, %v11461_v45  ;;  %v11114_v61 = vpop.eup %8491  ;;  %v5684_v53 = vadd.f32 1.0, %v8490_v27 }
 0x947   : > { %v11117_v13 = vpop.eup %8493 }
 0x948   : > { %v11120_v44 = vpop.eup %8495  ;;  %v6344_v27 = vsub.f32 1.0, %v11117_v13 }
 0x949   : > { %v8498_v41 = vpop.eup %8497 }
 0xa01   : > { %v7793_v48 = vpop.f32.mrb[112].mxu1 }
 0xa02   : > { %v6294_v45 = vadd.f32 %v7793_v48, %v11102_v56  ;;  %v6222_v60 = vpop.f32.mrb[113].mxu1 }
 0xa03   : > { %v6292_v51 = vadd.f32 %v11102_v56, %v6222_v60  ;;  %v7794_v6 = vpop.f32.mrb[114].mxu1 }
 0xa04   : > { %8499 = vtanh.f32 %v6294_v45  ;;  %v6295_v57 = vadd.f32 %v7794_v6, %v11102_v56  ;;  %v6225_v37 = vpop.f32.mrb[115].mxu1 }
 0xa05   : > { %8501 = vtanh.f32 %v6292_v51  ;;  %v6293_v12 = vadd.f32 %v11102_v56, %v6225_v37  ;;  %v6330_v51 = vmul.f32 %v10885_v28, %v11114_v61  ;;  %v6346_v28 = vsub.f32 1.0, %v11114_v61 }
 0xa06   : > { %8503 = vtanh.f32 %v6295_v57  ;;  %v5689_v57 = vadd.f32 1.0, %v8498_v41 }
 0xa07   : > { %8505 = vtanh.f32 %v6293_v12 }
 0xa08   : > { %8507 = vpow2.f32 %v6831_v7 }
 0xa09   : > { %8509 = vpow2.f32 %v6834_v0  ;;  %v7797_v42 = vpop.f32.mrb[116].mxu1 }
 0xa0a   : > { %8511 = vpow2.f32 %v6832_v1  ;;  %v6298_v31 = vadd.f32 %v7797_v42, %v11102_v56  ;;  %v6238_v21 = vpop.f32.mrb[117].mxu1 }
 0xa0b   : > { %8513 = vrcp.f32 %v5680_v35  ;;  %v6296_v54 = vadd.f32 %v11102_v56, %v6238_v21  ;;  %v7798_v11 = vpop.f32.mrb[118].mxu1  ;;  %v6328_v35 = vmul.f32 %v10897_v2, %v11117_v13 }
 0xa0c   : > { %8515 = vtanh.f32 %v6298_v31  ;;  %v6299_v40 = vadd.f32 %v7798_v11, %v11102_v56  ;;  %v6241_v47 = vpop.f32.mrb[119].mxu1  ;;  %v6331_v11 = vmul.f32 %v10889_v59, %v11120_v44 }
 0xa0d   : > { %8517 = vtanh.f32 %v6296_v54  ;;  %v6297_v52 = vadd.f32 %v11102_v56, %v6241_v47  ;;  %v6347_v54 = vsub.f32 1.0, %v11120_v44 }
 0xa0e   : > { %v8500_v39 = vpop.eup %8499  ;;  %8519 = vtanh.f32 %v6299_v40 }
 0xa0f   : > { %v8502_v9 = vpop.eup %8501  ;;  %v6358_v24 = vmul.f32 %v8500_v39, %v6342_v26  ;;  %8521 = vtanh.f32 %v6297_v52 }
 0xa10   : > { %v8504_v5 = vpop.eup %8503  ;;  %8523 = vrcp.f32 %v5685_v20  ;;  %v6356_v19 = vmul.f32 %v8502_v9, %v6340_v14 }
 0xa11   : > { %v8506_v49 = vpop.eup %8505  ;;  %8525 = vrcp.f32 %v5683_v33  ;;  %v6374_v22 = vadd.f32 %v6358_v24, %v6326_v8  ;;  %v6359_v3 = vmul.f32 %v8504_v5, %v6343_v58  ;;  %v7801_v48 = vpop.f32.mrb[120].mxu1 }
 0xa12   : > { %v8508_v30 = vpop.eup %8507  ;;  %8527 = vrcp.f32 %v5686_v18  ;;  %v6372_v34 = vadd.f32 %v6356_v19, %v6324_v50  ;;  %v6357_v45 = vmul.f32 %v8506_v49, %v6341_v62  ;;  %v6302_v60 = vadd.f32 %v7801_v48, %v11102_v56  ;;  %v6254_v23 = vpop.f32.mrb[121].mxu1 }
 0xa13   : > { %v8510_v55 = vpop.eup %8509  ;;  %8529 = vrcp.f32 %v5684_v53  ;;  %6390 = vst.msk [vmem:[%s11128_s6 + $0x10] sm:$0xff] %vm1436_vm3, %v6374_v22  ;;  %v6375_v38 = vadd.f32 %v6359_v3, %v6327_v15  ;;  %v6300_v6 = vadd.f32 %v11102_v56, %v6254_v23  ;;  %v7802_v17 = vpop.f32.mrb[122].mxu1  ;;  %v5687_v32 = vadd.f32 1.0, %v8508_v30 }
 0xa14   : > { %v8512_v7 = vpop.eup %8511  ;;  %6388 = vst.msk [vmem:[%s11128_s6] sm:$0xff] %vm1436_vm3, %v6372_v34  ;;  %v6373_v37 = vadd.f32 %v6357_v45, %v6325_v36  ;;  %8531 = vtanh.f32 %v6302_v60  ;;  %v6303_v16 = vadd.f32 %v7802_v17, %v11102_v56  ;;  %v6257_v0 = vpop.f32.mrb[123].mxu1  ;;  %v5690_v4 = vadd.f32 1.0, %v8510_v55 }
 0xa15   : > { %v8514_v12 = vpop.eup %8513  ;;  %6391 = vst.msk [vmem:[%s11128_s6 + $0x18] sm:$0xff] %vm1436_vm3, %v6375_v38  ;;  %8533 = vtanh.f32 %v6300_v6  ;;  %v6301_v1 = vadd.f32 %v11102_v56, %v6257_v0  ;;  %v5688_v31 = vadd.f32 1.0, %v8512_v7 }
 0xa16   : > { %v8516_v46 = vpop.eup %8515  ;;  %6389 = vst.msk [vmem:[%s11128_s6 + $0x8] sm:$0xff] %vm1436_vm3, %v6373_v37  ;;  %8535 = vtanh.f32 %v6303_v16  ;;  %v6345_v2 = vsub.f32 1.0, %v8514_v12  ;;  %v6329_v40 = vmul.f32 %v10901_v43, %v8514_v12  ;;  %v11463_v12 = vld [vmem:[#allocation73_spill] sm:$0xff] }
 0xa17   : > { %v8518_v42 = vpop.eup %8517  ;;  %v6362_v21 = vmul.f32 %v8516_v46, %v6346_v28  ;;  %8537 = vtanh.f32 %v6301_v1 }
 0xa18   : > { %v8520_v61 = vpop.eup %8519  ;;  %8539 = vrcp.f32 %v5689_v57  ;;  %v6360_v8 = vmul.f32 %v8518_v42, %v6344_v27 }
 0xa19   : > { %v8522_v20 = vpop.eup %8521  ;;  %8541 = vrcp.f32 %v5687_v32  ;;  %v6378_v13 = vadd.f32 %v6362_v21, %v6330_v51  ;;  %v6363_v47 = vmul.f32 %v8520_v61, %v6347_v54  ;;  %v7805_v41 = vpop.f32.mrb[124].mxu1  ;;  %v11465_v21 = vld [vmem:[#allocation76_spill] sm:$0xff] }
 0xa1a   : > { %v8524_v33 = vpop.eup %8523  ;;  %8543 = vrcp.f32 %v5690_v4  ;;  %v6376_v26 = vadd.f32 %v6360_v8, %v6328_v35  ;;  %v6361_v52 = vmul.f32 %v8522_v20, %v6345_v2  ;;  %v6306_v39 = vadd.f32 %v7805_v41, %v11102_v56  ;;  %v6270_v59 = vpop.f32.mrb[125].mxu1  ;;  %v11464_v35 = vld [vmem:[#allocation75_spill] sm:$0xff]  ;;  %v11466_v8 = vld [vmem:[#allocation78_spill] sm:$0xff] }
 0xa1b   : > { %v8526_v44 = vpop.eup %8525  ;;  %8545 = vrcp.f32 %v5688_v31  ;;  %6394 = vst.msk [vmem:[%s11128_s6 + $0x30] sm:$0xff] %vm1436_vm3, %v6378_v13  ;;  %v6379_v50 = vadd.f32 %v6363_v47, %v6331_v11  ;;  %v6304_v43 = vadd.f32 %v11102_v56, %v6270_v59  ;;  %v7806_v18 = vpop.f32.mrb[126].mxu1  ;;  %v6350_v5 = vsub.f32 1.0, %v8524_v33 }
 0xa1c   : > { %v8528_v14 = vpop.eup %8527  ;;  %6392 = vst.msk [vmem:[%s11128_s6 + $0x20] sm:$0xff] %vm1436_vm3, %v6376_v26  ;;  %v6377_v9 = vadd.f32 %v6361_v52, %v6329_v40  ;;  %8547 = vtanh.f32 %v6306_v39  ;;  %v6307_v53 = vadd.f32 %v7806_v18, %v11102_v56  ;;  %v6273_v24 = vpop.f32.mrb[127].mxu1  ;;  %v6348_v62 = vsub.f32 1.0, %v8526_v44 }
 0xa1d   : > { %v8530_v58 = vpop.eup %8529  ;;  %6395 = vst.msk [vmem:[%s11128_s6 + $0x38] sm:$0xff] %vm1436_vm3, %v6379_v50  ;;  %8549 = vtanh.f32 %v6304_v43  ;;  %v6305_v15 = vadd.f32 %v11102_v56, %v6273_v24  ;;  %v6334_v36 = vmul.f32 %v10909_v63, %v8524_v33  ;;  %v6351_v3 = vsub.f32 1.0, %v8528_v14 }
 0xa1e   : > { %v8532_v19 = vpop.eup %8531  ;;  %6393 = vst.msk [vmem:[%s11128_s6 + $0x28] sm:$0xff] %vm1436_vm3, %v6377_v9  ;;  %8551 = vtanh.f32 %v6307_v53  ;;  %v6332_v30 = vmul.f32 %v10917_v25, %v8526_v44  ;;  %v6349_v45 = vsub.f32 1.0, %v8530_v58  ;;  %v6335_v60 = vmul.f32 %v10913_v29, %v8528_v14 }
 0xa1f   : > { %v8534_v49 = vpop.eup %8533  ;;  %v6366_v22 = vmul.f32 %v8532_v19, %v6350_v5  ;;  %8553 = vtanh.f32 %v6305_v15  ;;  %v6333_v63 = vmul.f32 %v10921_v10, %v8530_v58 }
 0xa20   : > { %v8536_v48 = vpop.eup %8535  ;;  %v6364_v34 = vmul.f32 %v8534_v49, %v6348_v62 }
 0xa21   : > { %v8538_v56 = vpop.eup %8537  ;;  %v6382_v23 = vadd.f32 %v6366_v22, %v6334_v36  ;;  %v6367_v55 = vmul.f32 %v8536_v48, %v6351_v3 }
 0xa22   : > { %v8540_v51 = vpop.eup %8539  ;;  %v6380_v38 = vadd.f32 %v6364_v34, %v6332_v30  ;;  %v6365_v6 = vmul.f32 %v8538_v56, %v6349_v45 }
 0xa23   : > { %v8542_v17 = vpop.eup %8541  ;;  %6398 = vst.msk [vmem:[%s11128_s6 + $0x50] sm:$0xff] %vm1436_vm3, %v6382_v23  ;;  %v6383_v7 = vadd.f32 %v6367_v55, %v6335_v60  ;;  %v6354_v29 = vsub.f32 1.0, %v8540_v51  ;;  %v6338_v32 = vmul.f32 %v11463_v12, %v8540_v51 }
 0xa24   : > { %v8544_v57 = vpop.eup %8543  ;;  %6396 = vst.msk [vmem:[%s11128_s6 + $0x40] sm:$0xff] %vm1436_vm3, %v6380_v38  ;;  %v6381_v25 = vadd.f32 %v6365_v6, %v6333_v63  ;;  %v6352_v0 = vsub.f32 1.0, %v8542_v17  ;;  %v6336_v4 = vmul.f32 %v11464_v35, %v8542_v17 }
 0xa25   : > { %v8546_v37 = vpop.eup %8545  ;;  %6399 = vst.msk [vmem:[%s11128_s6 + $0x58] sm:$0xff] %vm1436_vm3, %v6383_v7  ;;  %v6355_v1 = vsub.f32 1.0, %v8544_v57  ;;  %v6339_v54 = vmul.f32 %v11465_v21, %v8544_v57 }
 0xa26   : > { %v8548_v16 = vpop.eup %8547  ;;  %6397 = vst.msk [vmem:[%s11128_s6 + $0x48] sm:$0xff] %vm1436_vm3, %v6381_v25  ;;  %v6353_v42 = vsub.f32 1.0, %v8546_v37  ;;  %v6337_v2 = vmul.f32 %v11466_v8, %v8546_v37 }
 0xa27   : > { %v8550_v10 = vpop.eup %8549  ;;  %v6370_v28 = vmul.f32 %v8548_v16, %v6354_v29 }
 0xa28   : > { %v8552_v46 = vpop.eup %8551  ;;  %v6368_v27 = vmul.f32 %v8550_v10, %v6352_v0 }
 0xa29   : > { %v8554_v31 = vpop.eup %8553  ;;  %v6386_v61 = vadd.f32 %v6370_v28, %v6338_v32  ;;  %v6371_v11 = vmul.f32 %v8552_v46, %v6355_v1 }
 0xa2a   : > { %v6384_v20 = vadd.f32 %v6368_v27, %v6336_v4  ;;  %v6369_v40 = vmul.f32 %v8554_v31, %v6353_v42 }
 0xa2b   : > { %6402 = vst.msk [vmem:[%s11128_s6 + $0x70] sm:$0xff] %vm1436_vm3, %v6386_v61  ;;  %v6387_v13 = vadd.f32 %v6371_v11, %v6339_v54 }
 0xa2c   : > { %6400 = vst.msk [vmem:[%s11128_s6 + $0x60] sm:$0xff] %vm1436_vm3, %v6384_v20  ;;  %v6385_v47 = vadd.f32 %v6369_v40, %v6337_v2 }
 0xa2d   : > { %6403 = vst.msk [vmem:[%s11128_s6 + $0x78] sm:$0xff] %vm1436_vm3, %v6387_v13 }
 0xa2e   : > { %6401 = vst.msk [vmem:[%s11128_s6 + $0x68] sm:$0xff] %vm1436_vm3, %v6385_v47 }
 0xa2f PF: > { %s11467_s21 = sld [smem:[#allocation38_spill]]  ;;  %s11468_s2 = sld [smem:[#allocation39_spill]] }
 0xa30   : > { %p88_p4 = scmp.ge.s32.totalorder %s9092_s22, 4   ;;  %s11469_s28 = smov %s8755_s1 }
 0xa31   : > { %s11471_s7 = smov %s9092_s22 }
 0xa32   :  { %90 = sbr.rel (!%p88_p4) target bundleno = 77 (0x4d), region = 279 }
 0xa35   : > { %s11470_s1 = smov %s11467_s21 }
 0xa39   :  { %6441 = vsyncpa [#allocation3], 1 }
 0xa3a   :  { %6443 = vsyncpa [#allocation3 + $0x1], 1 }
 0xa3b   :  { %6444 = vsyncpa [#allocation5], 1 }
 0xa3c   :  { %6446 = vsyncpa [#allocation5 + $0x1], 1 }
 0xa3d   :  { %6447 = vsyncpa [#allocation8], 1 }

</bundles_post_ra>
